<compile_context>
chip_gen: v7x
topology: tpu7x:2x2x1
jax: 0.10.0
libtpu: 0.0.40
codegen_flags: <defaults>
</compile_context>

<pallas_src>
import functools

import jax
import jax.numpy as jnp
from jax import lax
from jax.experimental import pallas as pl
from jax.experimental.pallas import tpu as pltpu


def _pick_tile(n, cap):
    """Largest multiple-of-8 divisor of n that is <= cap; falls back to n."""
    if n <= cap:
        return n
    t = (cap // 8) * 8
    while t >= 8:
        if n % t == 0:
            return t
        t -= 8
    return n


# ----------------------------- conv 3x3 + ReLU ------------------------------
def _conv3x3_relu_kernel(x_ref, top_ref, bot_ref, w_ref, b_ref, o_ref):
    # x_ref:   [TH, W, Cin]   current row tile (no padding)
    # top_ref: [HR, W, Cin]   block containing the row just above the tile (row HR-1)
    # bot_ref: [HR, W, Cin]   block containing the row just below the tile (row 0)
    # w_ref:   [9*Cin, Cout]  (bf16, im2col layout: dy-major, dx, cin)
    # b_ref:   [1, Cout]      (f32)
    # o_ref:   [TH, W, Cout]  (f32)
    TH, W, Cout = o_ref.shape
    Cin = x_ref.shape[-1]
    HR = top_ref.shape[0]
    r = pl.program_id(1)
    nr = pl.num_programs(1)
    bf = jnp.bfloat16

    # Boundary masks: first tile has a zero top halo, last tile a zero bottom halo.
    tmask = (r > 0).astype(jnp.float32)
    bmask = (r < nr - 1).astype(jnp.float32)

    xt = x_ref[...].astype(bf)                                   # (TH, W, Cin)
    top = (top_ref[HR - 1:HR, :, :] * tmask).astype(bf)          # (1, W, Cin)
    bot = (bot_ref[0:1, :, :] * bmask).astype(bf)                # (1, W, Cin)

    rows = jnp.concatenate([top, xt, bot], axis=0)               # (TH+2, W, Cin)
    zc = jnp.zeros((TH + 2, 1, Cin), bf)
    xp = jnp.concatenate([zc, rows, zc], axis=1)                 # (TH+2, W+2, Cin)

    # im2col built once per tile -> a single MXU matmul with K = 9*Cin.
    taps = [xp[dy:dy + TH, dx:dx + W, :] for dy in range(3) for dx in range(3)]
    patch = jnp.concatenate(taps, axis=-1).reshape(TH * W, 9 * Cin)   # bf16

    acc = jnp.dot(patch, w_ref[...], preferred_element_type=jnp.float32)
    acc = acc + b_ref[...]                                       # f32 bias
    o_ref[...] = jnp.maximum(acc, 0.0).reshape(TH, W, Cout)


def conv3x3_relu(x, w, b, row_cap=64):
    # x: [B, H, W, Cin] (f32), w: [9*Cin, Cout] (bf16), b: [1, Cout] (f32)
    B, H, W, Cin = x.shape
    Cout = w.shape[-1]
    TH = _pick_tile(H, row_cap)          # row tile (multiple of 8 when H allows)
    nr = H // TH

    if H % 8 == 0:
        HR = 8                           # small 8-row halo blocks
        th8 = TH // 8
        hb = H // 8
        top_map = lambda bi, r: (bi, jnp.maximum(r * th8 - 1, 0), 0, 0)
        bot_map = lambda bi, r: (bi, jnp.minimum((r + 1) * th8, hb - 1), 0, 0)
    else:
        # H not a multiple of 8 -> single tile; halo content is masked anyway.
        HR = H
        top_map = lambda bi, r: (bi, 0, 0, 0)
        bot_map = lambda bi, r: (bi, 0, 0, 0)

    return pl.pallas_call(
        _conv3x3_relu_kernel,
        out_shape=jax.ShapeDtypeStruct((B, H, W, Cout), jnp.float32),
        grid=(B, nr),
        in_specs=[
            pl.BlockSpec((None, TH, W, Cin), lambda bi, r: (bi, r, 0, 0)),
            pl.BlockSpec((None, HR, W, Cin), top_map),
            pl.BlockSpec((None, HR, W, Cin), bot_map),
            pl.BlockSpec((9 * Cin, Cout), lambda bi, r: (0, 0)),
            pl.BlockSpec((1, Cout), lambda bi, r: (0, 0)),
        ],
        out_specs=pl.BlockSpec((None, TH, W, Cout), lambda bi, r: (bi, r, 0, 0)),
        compiler_params=pltpu.CompilerParams(
            dimension_semantics=("parallel", "parallel")),
    )(x, x, x, w, b)


# ------------------------------- Gram matrix --------------------------------
def _gram_kernel(f_ref, o_ref, acc_ref, *, inv_norm):
    # f_ref: [TK, C] slab of the (H*W, C) feature; accumulate f^T f over H*W.
    k = pl.program_id(1)

    @pl.when(k == 0)
    def _():
        acc_ref[...] = jnp.zeros_like(acc_ref)

    f = f_ref[...]
    acc_ref[...] += lax.dot_general(f, f, (((0,), (0,)), ((), ())),
                                    preferred_element_type=jnp.float32)

    @pl.when(k == pl.num_programs(1) - 1)
    def _():
        o_ref[...] = acc_ref[...] * inv_norm


def gram_matrix(feat_nhwc, k_cap=1024):
    # matches torch: x.view(b, c, h*w) @ transpose(1,2) / (c*h*w)  (x in NCHW);
    # here we contract the leading H*W axis of the (B, H*W, C) view instead of
    # transposing -> identical [C, C] result, no extra HBM pass.
    B, H, W, C = feat_nhwc.shape
    HW = H * W
    f = feat_nhwc.reshape(B, HW, C)          # free reshape, no transpose glue
    TK = _pick_tile(HW, k_cap)
    inv_norm = 1.0 / float(C * HW)
    return pl.pallas_call(
        functools.partial(_gram_kernel, inv_norm=inv_norm),
        out_shape=jax.ShapeDtypeStruct((B, C, C), jnp.float32),
        grid=(B, HW // TK),
        in_specs=[pl.BlockSpec((None, TK, C), lambda b, k: (b, k, 0))],
        out_specs=pl.BlockSpec((None, C, C), lambda b, k: (b, 0, 0)),
        scratch_shapes=[pltpu.VMEM((C, C), jnp.float32)],
        compiler_params=pltpu.CompilerParams(
            dimension_semantics=("parallel", "arbitrary")),
    )(f)


# ------------------------------ MSE reduction -------------------------------
def _mse_kernel(a_ref, b_ref, o_ref, acc_ref, *, inv_n):
    i = pl.program_id(0)

    @pl.when(i == 0)
    def _():
        acc_ref[...] = jnp.zeros_like(acc_ref)

    d = a_ref[...] - b_ref[...]                      # f32 elementwise
    acc_ref[...] += jnp.sum(d * d).reshape(1, 1)

    @pl.when(i == pl.num_programs(0) - 1)
    def _():
        o_ref[...] = acc_ref[...] * inv_n


def mse(a, b, row_cap=512):
    a2 = a.reshape(-1, a.shape[-1]).astype(jnp.float32)
    b2 = b.reshape(-1, b.shape[-1]).astype(jnp.float32)
    N, C = a2.shape
    TN = _pick_tile(N, row_cap)
    inv_n = 1.0 / float(a2.size)
    out = pl.pallas_call(
        functools.partial(_mse_kernel, inv_n=inv_n),
        out_shape=jax.ShapeDtypeStruct((1, 1), jnp.float32),
        grid=(N // TN,),
        in_specs=[pl.BlockSpec((TN, C), lambda i: (i, 0)),
                  pl.BlockSpec((TN, C), lambda i: (i, 0))],
        out_specs=pl.BlockSpec((1, 1), lambda i: (0, 0)),
        scratch_shapes=[pltpu.VMEM((1, 1), jnp.float32)],
        compiler_params=pltpu.CompilerParams(dimension_semantics=("arbitrary",)),
    )(a2, b2)
    return out[0, 0]


# --------------------------------- glue -------------------------------------
def maxpool2x2(x):
    # TODO(synk): 2x2 max-pool kept in plain-JAX glue (tiny reduction); could be
    # fused into the following conv kernel's input pipeline.
    B, H, W, C = x.shape
    return jnp.max(x.reshape(B, H // 2, 2, W // 2, 2, C), axis=(2, 4))


def init_vgg_params(key):
    # conv shapes from VGG19.features[:9]: (3->64), (64->64), (64->128), (128->128)
    specs = [(3, 64), (64, 64), (64, 128), (128, 128)]
    params = []
    for i, (cin, cout) in enumerate(specs):
        kw, kb = jax.random.split(jax.random.fold_in(key, i))
        std = (2.0 / (9.0 * cin)) ** 0.5
        w = jax.random.normal(kw, (3, 3, cin, cout), jnp.float32) * std
        b = jax.random.normal(kb, (1, cout), jnp.float32) * 0.01
        # im2col weight layout (dy-major, dx, cin) -> (9*Cin, Cout), bf16 MXU operand.
        params.append((w.reshape(9 * cin, cout).astype(jnp.bfloat16), b))
    return params


def vgg_features(x_nchw, params, row_cap=64):
    # TODO(synk): the reference forward calls slice2(input) on the raw 3-channel
    # image, which is shape-inconsistent with VGG19 (slice2's first conv expects
    # 64 channels); we use the standard chained semantics slice2(slice1(input)).
    x = jnp.transpose(x_nchw, (0, 2, 3, 1))  # NCHW -> NHWC (done once on 3-ch input)
    h = conv3x3_relu(x, *params[0], row_cap=row_cap)
    h = conv3x3_relu(h, *params[1], row_cap=row_cap)
    feat1 = h                                # slice1 output: [B, H, W, 64]
    h = maxpool2x2(h)
    h = conv3x3_relu(h, *params[2], row_cap=row_cap)
    h = conv3x3_relu(h, *params[3], row_cap=row_cap)
    feat2 = h                                # slice2 output: [B, H/2, W/2, 128]
    return feat1, feat2


def vgg_loss(inp, tgt, params, row_cap=64):
    # Stack input+target along batch -> every feature / Gram pallas_call runs once.
    B = inp.shape[0]
    x = jnp.concatenate([inp, tgt], axis=0)              # (2B, 3, H, W)
    f1, f2 = vgg_features(x, params, row_cap=row_cap)
    g1 = gram_matrix(f1)
    g2 = gram_matrix(f2)

    fi1, ft1 = f1[:B], f1[B:]
    gi1, gt1 = g1[:B], g1[B:]
    gi2, gt2 = g2[:B], g2[B:]

    content_loss = mse(fi1, ft1)
    style_loss = mse(gi1, gt1) + mse(gi2, gt2)
    return content_loss, style_loss


if __name__ == "__main__":
    key = jax.random.PRNGKey(0)
    kx, ky, kp = jax.random.split(key, 3)
    x = jax.random.normal(kx, (2, 3, 16, 16), jnp.float32)   # NCHW, like PyTorch
    y = jax.random.normal(ky, (2, 3, 16, 16), jnp.float32)
    params = init_vgg_params(kp)

    # row_cap=8 so the 16x16 test actually exercises the multi-row-tile + halo
    # path; use 32-64 (v7x) or larger (v6e/v5e) for realistic image sizes.
    loss_fn = jax.jit(functools.partial(vgg_loss, row_cap=8))
    content, style = loss_fn(x, y, params)
    jax.block_until_ready((content, style))
    print("KERNEL_OK")
</pallas_src>

<mosaic_0001>
module attributes {stable_mosaic.version = 11 : i64} {
  func.func @_conv3x3_relu_kernel(%arg0: i32, %arg1: i32, %arg2: memref<1x8x16x3xf32, #tpu.memory_space<vmem>>, %arg3: memref<1x8x16x3xf32, #tpu.memory_space<vmem>>, %arg4: memref<1x8x16x3xf32, #tpu.memory_space<vmem>>, %arg5: memref<27x64xbf16, #tpu.memory_space<vmem>>, %arg6: memref<1x64xf32, #tpu.memory_space<vmem>>, %arg7: memref<1x8x16x64xf32, #tpu.memory_space<vmem>>) attributes {dimension_semantics = [#tpu.dimension_semantics<parallel>, #tpu.dimension_semantics<parallel>], iteration_bounds = array<i64: 4, 2>, scalar_prefetch = 0 : i64, scratch_operands = 0 : i64, tpu.core_type = #tpu.core_type<tc>, window_params = [{transform_indices = @transform_0, window_bounds = array<i64: 1, 8, 16, 3>}, {transform_indices = @transform_1, window_bounds = array<i64: 1, 8, 16, 3>}, {transform_indices = @transform_2, window_bounds = array<i64: 1, 8, 16, 3>}, {pipeline_mode = #tpu.pipeline_mode<synchronous>, transform_indices = @transform_3, window_bounds = array<i64: 27, 64>}, {pipeline_mode = #tpu.pipeline_mode<synchronous>, transform_indices = @transform_4, window_bounds = array<i64: 1, 64>}, {transform_indices = @transform_5, window_bounds = array<i64: 1, 8, 16, 64>}]} {
    %c0_i32 = arith.constant 0 : i32
    %0 = arith.cmpi sgt, %arg1, %c0_i32 : i32
    %1 = arith.extui %0 : i1 to i32
    %2 = arith.sitofp %1 : i32 to f32
    %c1_i32 = arith.constant 1 : i32
    %3 = arith.cmpi slt, %arg1, %c1_i32 : i32
    %4 = arith.extui %3 : i1 to i32
    %5 = arith.sitofp %4 : i32 to f32
    %c0 = arith.constant 0 : index
    %c0_0 = arith.constant 0 : index
    %c0_1 = arith.constant 0 : index
    %c0_2 = arith.constant 0 : index
    %6 = vector.load %arg2[%c0, %c0_0, %c0_1, %c0_2] : memref<1x8x16x3xf32, #tpu.memory_space<vmem>>, vector<1x8x16x3xf32>
    %7 = vector.shape_cast %6 : vector<1x8x16x3xf32> to vector<8x16x3xf32>
    %8 = arith.truncf %7 : vector<8x16x3xf32> to vector<8x16x3xbf16>
    %c0_3 = arith.constant 0 : index
    %c7 = arith.constant 7 : index
    %c0_4 = arith.constant 0 : index
    %c0_5 = arith.constant 0 : index
    %9 = vector.load %arg3[%c0_3, %c7, %c0_4, %c0_5] : memref<1x8x16x3xf32, #tpu.memory_space<vmem>>, vector<1x1x16x3xf32>
    %10 = vector.shape_cast %9 : vector<1x1x16x3xf32> to vector<1x16x3xf32>
    %11 = vector.broadcast %2 : f32 to vector<1x16x3xf32>
    %12 = arith.mulf %10, %11 : vector<1x16x3xf32>
    %13 = arith.truncf %12 : vector<1x16x3xf32> to vector<1x16x3xbf16>
    %c0_6 = arith.constant 0 : index
    %c0_7 = arith.constant 0 : index
    %c0_8 = arith.constant 0 : index
    %c0_9 = arith.constant 0 : index
    %14 = vector.load %arg4[%c0_6, %c0_7, %c0_8, %c0_9] : memref<1x8x16x3xf32, #tpu.memory_space<vmem>>, vector<1x1x16x3xf32>
    %15 = vector.shape_cast %14 : vector<1x1x16x3xf32> to vector<1x16x3xf32>
    %16 = vector.broadcast %5 : f32 to vector<1x16x3xf32>
    %17 = arith.mulf %15, %16 : vector<1x16x3xf32>
    %18 = arith.truncf %17 : vector<1x16x3xf32> to vector<1x16x3xbf16>
    %19 = tpu.concatenate %13, %8, %18 in 0 : vector<1x16x3xbf16>, vector<8x16x3xbf16>, vector<1x16x3xbf16> -> vector<10x16x3xbf16>
    %cst = arith.constant 0.000000e+00 : bf16
    %20 = vector.broadcast %cst : bf16 to vector<10x1x3xbf16>
    %21 = tpu.concatenate %20, %19, %20 in 1 : vector<10x1x3xbf16>, vector<10x16x3xbf16>, vector<10x1x3xbf16> -> vector<10x18x3xbf16>
    %22 = vector.extract_strided_slice %21 {offsets = [0, 0, 0], sizes = [8, 16, 3], strides = [1, 1, 1]} : vector<10x18x3xbf16> to vector<8x16x3xbf16>
    %23 = vector.extract_strided_slice %21 {offsets = [0, 1, 0], sizes = [8, 16, 3], strides = [1, 1, 1]} : vector<10x18x3xbf16> to vector<8x16x3xbf16>
    %24 = vector.extract_strided_slice %21 {offsets = [0, 2, 0], sizes = [8, 16, 3], strides = [1, 1, 1]} : vector<10x18x3xbf16> to vector<8x16x3xbf16>
    %25 = vector.extract_strided_slice %21 {offsets = [1, 0, 0], sizes = [8, 16, 3], strides = [1, 1, 1]} : vector<10x18x3xbf16> to vector<8x16x3xbf16>
    %26 = vector.extract_strided_slice %21 {offsets = [1, 1, 0], sizes = [8, 16, 3], strides = [1, 1, 1]} : vector<10x18x3xbf16> to vector<8x16x3xbf16>
    %27 = vector.extract_strided_slice %21 {offsets = [1, 2, 0], sizes = [8, 16, 3], strides = [1, 1, 1]} : vector<10x18x3xbf16> to vector<8x16x3xbf16>
    %28 = vector.extract_strided_slice %21 {offsets = [2, 0, 0], sizes = [8, 16, 3], strides = [1, 1, 1]} : vector<10x18x3xbf16> to vector<8x16x3xbf16>
    %29 = vector.extract_strided_slice %21 {offsets = [2, 1, 0], sizes = [8, 16, 3], strides = [1, 1, 1]} : vector<10x18x3xbf16> to vector<8x16x3xbf16>
    %30 = vector.extract_strided_slice %21 {offsets = [2, 2, 0], sizes = [8, 16, 3], strides = [1, 1, 1]} : vector<10x18x3xbf16> to vector<8x16x3xbf16>
    %31 = tpu.concatenate %22, %23, %24, %25, %26, %27, %28, %29, %30 in 2 : vector<8x16x3xbf16>, vector<8x16x3xbf16>, vector<8x16x3xbf16>, vector<8x16x3xbf16>, vector<8x16x3xbf16>, vector<8x16x3xbf16>, vector<8x16x3xbf16>, vector<8x16x3xbf16>, vector<8x16x3xbf16> -> vector<8x16x27xbf16>
    %32 = vector.shape_cast %31 : vector<8x16x27xbf16> to vector<128x27xbf16>
    %c0_10 = arith.constant 0 : index
    %c0_11 = arith.constant 0 : index
    %33 = vector.load %arg5[%c0_10, %c0_11] : memref<27x64xbf16, #tpu.memory_space<vmem>>, vector<27x64xbf16>
    %cst_12 = arith.constant dense<0.000000e+00> : vector<128x64xf32>
    %34 = tpu.matmul %32, %33, %cst_12 {dimension_numbers = #tpu.dot_dimension_numbers<[1], [0], [0], [1], [0, 0, 1, 1], [], []>} : vector<128x27xbf16>, vector<27x64xbf16>, vector<128x64xf32> -> vector<128x64xf32>
    %c0_13 = arith.constant 0 : index
    %c0_14 = arith.constant 0 : index
    %35 = vector.load %arg6[%c0_13, %c0_14] : memref<1x64xf32, #tpu.memory_space<vmem>>, vector<1x64xf32>
    %36 = vector.broadcast %35 : vector<1x64xf32> to vector<128x64xf32>
    %37 = arith.addf %34, %36 : vector<128x64xf32>
    %cst_15 = arith.constant 0.000000e+00 : f32
    %38 = vector.broadcast %cst_15 : f32 to vector<128x64xf32>
    %39 = arith.maximumf %37, %38 : vector<128x64xf32>
    %40 = vector.shape_cast %39 : vector<128x64xf32> to vector<8x16x64xf32>
    %c0_16 = arith.constant 0 : index
    %c0_17 = arith.constant 0 : index
    %c0_18 = arith.constant 0 : index
    %c0_19 = arith.constant 0 : index
    %41 = vector.load %arg7[%c0_16, %c0_17, %c0_18, %c0_19] : memref<1x8x16x64xf32, #tpu.memory_space<vmem>>, vector<1x8x16x64xf32>
    %42 = vector.shape_cast %41 : vector<1x8x16x64xf32> to vector<8x16x64xf32>
    %43 = vector.shape_cast %40 : vector<8x16x64xf32> to vector<1x8x16x64xf32>
    tpu.vector_store %arg7[%c0_16, %c0_17, %c0_18, %c0_19], %43 {strides = array<i32>} : memref<1x8x16x64xf32, #tpu.memory_space<vmem>>, vector<1x8x16x64xf32>,
    return
  }
  func.func @transform_0(%arg0: i32, %arg1: i32) -> (i32, i32, i32, i32) {
    %c0_i32 = arith.constant 0 : i32
    %c0_i32_0 = arith.constant 0 : i32
    %c0_i32_1 = arith.constant 0 : i32
    return %arg0, %arg1, %c0_i32, %c0_i32_0 : i32, i32, i32, i32
  }
  func.func @transform_1(%arg0: i32, %arg1: i32) -> (i32, i32, i32, i32) {
    %c1_i32 = arith.constant 1 : i32
    %0 = arith.muli %arg1, %c1_i32 : i32
    %c1_i32_0 = arith.constant 1 : i32
    %1 = arith.subi %0, %c1_i32_0 : i32
    %c0_i32 = arith.constant 0 : i32
    %2 = arith.maxsi %1, %c0_i32 : i32
    %c0_i32_1 = arith.constant 0 : i32
    %c0_i32_2 = arith.constant 0 : i32
    %c0_i32_3 = arith.constant 0 : i32
    return %arg0, %2, %c0_i32_1, %c0_i32_2 : i32, i32, i32, i32
  }
  func.func @transform_2(%arg0: i32, %arg1: i32) -> (i32, i32, i32, i32) {
    %c1_i32 = arith.constant 1 : i32
    %0 = arith.addi %arg1, %c1_i32 : i32
    %c1_i32_0 = arith.constant 1 : i32
    %1 = arith.muli %0, %c1_i32_0 : i32
    %c1_i32_1 = arith.constant 1 : i32
    %2 = arith.minsi %1, %c1_i32_1 : i32
    %c0_i32 = arith.constant 0 : i32
    %c0_i32_2 = arith.constant 0 : i32
    %c0_i32_3 = arith.constant 0 : i32
    return %arg0, %2, %c0_i32, %c0_i32_2 : i32, i32, i32, i32
  }
  func.func @transform_3(%arg0: i32, %arg1: i32) -> (i32, i32) {
    %c0_i32 = arith.constant 0 : i32
    %c0_i32_0 = arith.constant 0 : i32
    %c0_i32_1 = arith.constant 0 : i32
    return %c0_i32, %c0_i32_0 : i32, i32
  }
  func.func @transform_4(%arg0: i32, %arg1: i32) -> (i32, i32) {
    %c0_i32 = arith.constant 0 : i32
    %c0_i32_0 = arith.constant 0 : i32
    %c0_i32_1 = arith.constant 0 : i32
    return %c0_i32, %c0_i32_0 : i32, i32
  }
  func.func @transform_5(%arg0: i32, %arg1: i32) -> (i32, i32, i32, i32) {
    %c0_i32 = arith.constant 0 : i32
    %c0_i32_0 = arith.constant 0 : i32
    %c0_i32_1 = arith.constant 0 : i32
    return %arg0, %arg1, %c0_i32, %c0_i32_0 : i32, i32, i32, i32
  }
}

module attributes {stable_mosaic.version = 11 : i64} {
  func.func @_conv3x3_relu_kernel(%arg0: i32, %arg1: i32, %arg2: memref<1x8x16x64xf32, #tpu.memory_space<vmem>>, %arg3: memref<1x8x16x64xf32, #tpu.memory_space<vmem>>, %arg4: memref<1x8x16x64xf32, #tpu.memory_space<vmem>>, %arg5: memref<576x64xbf16, #tpu.memory_space<vmem>>, %arg6: memref<1x64xf32, #tpu.memory_space<vmem>>, %arg7: memref<1x8x16x64xf32, #tpu.memory_space<vmem>>) attributes {dimension_semantics = [#tpu.dimension_semantics<parallel>, #tpu.dimension_semantics<parallel>], iteration_bounds = array<i64: 4, 2>, scalar_prefetch = 0 : i64, scratch_operands = 0 : i64, tpu.core_type = #tpu.core_type<tc>, window_params = [{transform_indices = @transform_0, window_bounds = array<i64: 1, 8, 16, 64>}, {transform_indices = @transform_1, window_bounds = array<i64: 1, 8, 16, 64>}, {transform_indices = @transform_2, window_bounds = array<i64: 1, 8, 16, 64>}, {pipeline_mode = #tpu.pipeline_mode<synchronous>, transform_indices = @transform_3, window_bounds = array<i64: 576, 64>}, {pipeline_mode = #tpu.pipeline_mode<synchronous>, transform_indices = @transform_4, window_bounds = array<i64: 1, 64>}, {transform_indices = @transform_5, window_bounds = array<i64: 1, 8, 16, 64>}]} {
    %c0_i32 = arith.constant 0 : i32
    %0 = arith.cmpi sgt, %arg1, %c0_i32 : i32
    %1 = arith.extui %0 : i1 to i32
    %2 = arith.sitofp %1 : i32 to f32
    %c1_i32 = arith.constant 1 : i32
    %3 = arith.cmpi slt, %arg1, %c1_i32 : i32
    %4 = arith.extui %3 : i1 to i32
    %5 = arith.sitofp %4 : i32 to f32
    %c0 = arith.constant 0 : index
    %c0_0 = arith.constant 0 : index
    %c0_1 = arith.constant 0 : index
    %c0_2 = arith.constant 0 : index
    %6 = vector.load %arg2[%c0, %c0_0, %c0_1, %c0_2] : memref<1x8x16x64xf32, #tpu.memory_space<vmem>>, vector<1x8x16x64xf32>
    %7 = vector.shape_cast %6 : vector<1x8x16x64xf32> to vector<8x16x64xf32>
    %8 = arith.truncf %7 : vector<8x16x64xf32> to vector<8x16x64xbf16>
    %c0_3 = arith.constant 0 : index
    %c7 = arith.constant 7 : index
    %c0_4 = arith.constant 0 : index
    %c0_5 = arith.constant 0 : index
    %9 = vector.load %arg3[%c0_3, %c7, %c0_4, %c0_5] : memref<1x8x16x64xf32, #tpu.memory_space<vmem>>, vector<1x1x16x64xf32>
    %10 = vector.shape_cast %9 : vector<1x1x16x64xf32> to vector<1x16x64xf32>
    %11 = vector.broadcast %2 : f32 to vector<1x16x64xf32>
    %12 = arith.mulf %10, %11 : vector<1x16x64xf32>
    %13 = arith.truncf %12 : vector<1x16x64xf32> to vector<1x16x64xbf16>
    %c0_6 = arith.constant 0 : index
    %c0_7 = arith.constant 0 : index
    %c0_8 = arith.constant 0 : index
    %c0_9 = arith.constant 0 : index
    %14 = vector.load %arg4[%c0_6, %c0_7, %c0_8, %c0_9] : memref<1x8x16x64xf32, #tpu.memory_space<vmem>>, vector<1x1x16x64xf32>
    %15 = vector.shape_cast %14 : vector<1x1x16x64xf32> to vector<1x16x64xf32>
    %16 = vector.broadcast %5 : f32 to vector<1x16x64xf32>
    %17 = arith.mulf %15, %16 : vector<1x16x64xf32>
    %18 = arith.truncf %17 : vector<1x16x64xf32> to vector<1x16x64xbf16>
    %19 = tpu.concatenate %13, %8, %18 in 0 : vector<1x16x64xbf16>, vector<8x16x64xbf16>, vector<1x16x64xbf16> -> vector<10x16x64xbf16>
    %cst = arith.constant 0.000000e+00 : bf16
    %20 = vector.broadcast %cst : bf16 to vector<10x1x64xbf16>
    %21 = tpu.concatenate %20, %19, %20 in 1 : vector<10x1x64xbf16>, vector<10x16x64xbf16>, vector<10x1x64xbf16> -> vector<10x18x64xbf16>
    %22 = vector.extract_strided_slice %21 {offsets = [0, 0, 0], sizes = [8, 16, 64], strides = [1, 1, 1]} : vector<10x18x64xbf16> to vector<8x16x64xbf16>
    %23 = vector.extract_strided_slice %21 {offsets = [0, 1, 0], sizes = [8, 16, 64], strides = [1, 1, 1]} : vector<10x18x64xbf16> to vector<8x16x64xbf16>
    %24 = vector.extract_strided_slice %21 {offsets = [0, 2, 0], sizes = [8, 16, 64], strides = [1, 1, 1]} : vector<10x18x64xbf16> to vector<8x16x64xbf16>
    %25 = vector.extract_strided_slice %21 {offsets = [1, 0, 0], sizes = [8, 16, 64], strides = [1, 1, 1]} : vector<10x18x64xbf16> to vector<8x16x64xbf16>
    %26 = vector.extract_strided_slice %21 {offsets = [1, 1, 0], sizes = [8, 16, 64], strides = [1, 1, 1]} : vector<10x18x64xbf16> to vector<8x16x64xbf16>
    %27 = vector.extract_strided_slice %21 {offsets = [1, 2, 0], sizes = [8, 16, 64], strides = [1, 1, 1]} : vector<10x18x64xbf16> to vector<8x16x64xbf16>
    %28 = vector.extract_strided_slice %21 {offsets = [2, 0, 0], sizes = [8, 16, 64], strides = [1, 1, 1]} : vector<10x18x64xbf16> to vector<8x16x64xbf16>
    %29 = vector.extract_strided_slice %21 {offsets = [2, 1, 0], sizes = [8, 16, 64], strides = [1, 1, 1]} : vector<10x18x64xbf16> to vector<8x16x64xbf16>
    %30 = vector.extract_strided_slice %21 {offsets = [2, 2, 0], sizes = [8, 16, 64], strides = [1, 1, 1]} : vector<10x18x64xbf16> to vector<8x16x64xbf16>
    %31 = tpu.concatenate %22, %23, %24, %25, %26, %27, %28, %29, %30 in 2 : vector<8x16x64xbf16>, vector<8x16x64xbf16>, vector<8x16x64xbf16>, vector<8x16x64xbf16>, vector<8x16x64xbf16>, vector<8x16x64xbf16>, vector<8x16x64xbf16>, vector<8x16x64xbf16>, vector<8x16x64xbf16> -> vector<8x16x576xbf16>
    %32 = vector.shape_cast %31 : vector<8x16x576xbf16> to vector<128x576xbf16>
    %c0_10 = arith.constant 0 : index
    %c0_11 = arith.constant 0 : index
    %33 = vector.load %arg5[%c0_10, %c0_11] : memref<576x64xbf16, #tpu.memory_space<vmem>>, vector<576x64xbf16>
    %cst_12 = arith.constant dense<0.000000e+00> : vector<128x64xf32>
    %34 = tpu.matmul %32, %33, %cst_12 {dimension_numbers = #tpu.dot_dimension_numbers<[1], [0], [0], [1], [0, 0, 1, 1], [], []>} : vector<128x576xbf16>, vector<576x64xbf16>, vector<128x64xf32> -> vector<128x64xf32>
    %c0_13 = arith.constant 0 : index
    %c0_14 = arith.constant 0 : index
    %35 = vector.load %arg6[%c0_13, %c0_14] : memref<1x64xf32, #tpu.memory_space<vmem>>, vector<1x64xf32>
    %36 = vector.broadcast %35 : vector<1x64xf32> to vector<128x64xf32>
    %37 = arith.addf %34, %36 : vector<128x64xf32>
    %cst_15 = arith.constant 0.000000e+00 : f32
    %38 = vector.broadcast %cst_15 : f32 to vector<128x64xf32>
    %39 = arith.maximumf %37, %38 : vector<128x64xf32>
    %40 = vector.shape_cast %39 : vector<128x64xf32> to vector<8x16x64xf32>
    %c0_16 = arith.constant 0 : index
    %c0_17 = arith.constant 0 : index
    %c0_18 = arith.constant 0 : index
    %c0_19 = arith.constant 0 : index
    %41 = vector.load %arg7[%c0_16, %c0_17, %c0_18, %c0_19] : memref<1x8x16x64xf32, #tpu.memory_space<vmem>>, vector<1x8x16x64xf32>
    %42 = vector.shape_cast %41 : vector<1x8x16x64xf32> to vector<8x16x64xf32>
    %43 = vector.shape_cast %40 : vector<8x16x64xf32> to vector<1x8x16x64xf32>
    tpu.vector_store %arg7[%c0_16, %c0_17, %c0_18, %c0_19], %43 {strides = array<i32>} : memref<1x8x16x64xf32, #tpu.memory_space<vmem>>, vector<1x8x16x64xf32>,
    return
  }
  func.func @transform_0(%arg0: i32, %arg1: i32) -> (i32, i32, i32, i32) {
    %c0_i32 = arith.constant 0 : i32
    %c0_i32_0 = arith.constant 0 : i32
    %c0_i32_1 = arith.constant 0 : i32
    return %arg0, %arg1, %c0_i32, %c0_i32_0 : i32, i32, i32, i32
  }
  func.func @transform_1(%arg0: i32, %arg1: i32) -> (i32, i32, i32, i32) {
    %c1_i32 = arith.constant 1 : i32
    %0 = arith.muli %arg1, %c1_i32 : i32
    %c1_i32_0 = arith.constant 1 : i32
    %1 = arith.subi %0, %c1_i32_0 : i32
    %c0_i32 = arith.constant 0 : i32
    %2 = arith.maxsi %1, %c0_i32 : i32
    %c0_i32_1 = arith.constant 0 : i32
    %c0_i32_2 = arith.constant 0 : i32
    %c0_i32_3 = arith.constant 0 : i32
    return %arg0, %2, %c0_i32_1, %c0_i32_2 : i32, i32, i32, i32
  }
  func.func @transform_2(%arg0: i32, %arg1: i32) -> (i32, i32, i32, i32) {
    %c1_i32 = arith.constant 1 : i32
    %0 = arith.addi %arg1, %c1_i32 : i32
    %c1_i32_0 = arith.constant 1 : i32
    %1 = arith.muli %0, %c1_i32_0 : i32
    %c1_i32_1 = arith.constant 1 : i32
    %2 = arith.minsi %1, %c1_i32_1 : i32
    %c0_i32 = arith.constant 0 : i32
    %c0_i32_2 = arith.constant 0 : i32
    %c0_i32_3 = arith.constant 0 : i32
    return %arg0, %2, %c0_i32, %c0_i32_2 : i32, i32, i32, i32
  }
  func.func @transform_3(%arg0: i32, %arg1: i32) -> (i32, i32) {
    %c0_i32 = arith.constant 0 : i32
    %c0_i32_0 = arith.constant 0 : i32
    %c0_i32_1 = arith.constant 0 : i32
    return %c0_i32, %c0_i32_0 : i32, i32
  }
  func.func @transform_4(%arg0: i32, %arg1: i32) -> (i32, i32) {
    %c0_i32 = arith.constant 0 : i32
    %c0_i32_0 = arith.constant 0 : i32
    %c0_i32_1 = arith.constant 0 : i32
    return %c0_i32, %c0_i32_0 : i32, i32
  }
  func.func @transform_5(%arg0: i32, %arg1: i32) -> (i32, i32, i32, i32) {
    %c0_i32 = arith.constant 0 : i32
    %c0_i32_0 = arith.constant 0 : i32
    %c0_i32_1 = arith.constant 0 : i32
    return %arg0, %arg1, %c0_i32, %c0_i32_0 : i32, i32, i32, i32
  }
}

module attributes {stable_mosaic.version = 11 : i64} {
  func.func @_conv3x3_relu_kernel(%arg0: i32, %arg1: i32, %arg2: memref<1x8x8x64xf32, #tpu.memory_space<vmem>>, %arg3: memref<1x8x8x64xf32, #tpu.memory_space<vmem>>, %arg4: memref<1x8x8x64xf32, #tpu.memory_space<vmem>>, %arg5: memref<576x128xbf16, #tpu.memory_space<vmem>>, %arg6: memref<1x128xf32, #tpu.memory_space<vmem>>, %arg7: memref<1x8x8x128xf32, #tpu.memory_space<vmem>>) attributes {dimension_semantics = [#tpu.dimension_semantics<parallel>, #tpu.dimension_semantics<parallel>], iteration_bounds = array<i64: 4, 1>, scalar_prefetch = 0 : i64, scratch_operands = 0 : i64, tpu.core_type = #tpu.core_type<tc>, window_params = [{transform_indices = @transform_0, window_bounds = array<i64: 1, 8, 8, 64>}, {transform_indices = @transform_1, window_bounds = array<i64: 1, 8, 8, 64>}, {transform_indices = @transform_2, window_bounds = array<i64: 1, 8, 8, 64>}, {pipeline_mode = #tpu.pipeline_mode<synchronous>, transform_indices = @transform_3, window_bounds = array<i64: 576, 128>}, {pipeline_mode = #tpu.pipeline_mode<synchronous>, transform_indices = @transform_4, window_bounds = array<i64: 1, 128>}, {transform_indices = @transform_5, window_bounds = array<i64: 1, 8, 8, 128>}]} {
    %c0_i32 = arith.constant 0 : i32
    %0 = arith.cmpi sgt, %arg1, %c0_i32 : i32
    %1 = arith.extui %0 : i1 to i32
    %2 = arith.sitofp %1 : i32 to f32
    %c0_i32_0 = arith.constant 0 : i32
    %3 = arith.cmpi slt, %arg1, %c0_i32_0 : i32
    %4 = arith.extui %3 : i1 to i32
    %5 = arith.sitofp %4 : i32 to f32
    %c0 = arith.constant 0 : index
    %c0_1 = arith.constant 0 : index
    %c0_2 = arith.constant 0 : index
    %c0_3 = arith.constant 0 : index
    %6 = vector.load %arg2[%c0, %c0_1, %c0_2, %c0_3] : memref<1x8x8x64xf32, #tpu.memory_space<vmem>>, vector<1x8x8x64xf32>
    %7 = vector.shape_cast %6 : vector<1x8x8x64xf32> to vector<8x8x64xf32>
    %8 = arith.truncf %7 : vector<8x8x64xf32> to vector<8x8x64xbf16>
    %c0_4 = arith.constant 0 : index
    %c7 = arith.constant 7 : index
    %c0_5 = arith.constant 0 : index
    %c0_6 = arith.constant 0 : index
    %9 = vector.load %arg3[%c0_4, %c7, %c0_5, %c0_6] : memref<1x8x8x64xf32, #tpu.memory_space<vmem>>, vector<1x1x8x64xf32>
    %10 = vector.shape_cast %9 : vector<1x1x8x64xf32> to vector<1x8x64xf32>
    %11 = vector.broadcast %2 : f32 to vector<1x8x64xf32>
    %12 = arith.mulf %10, %11 : vector<1x8x64xf32>
    %13 = arith.truncf %12 : vector<1x8x64xf32> to vector<1x8x64xbf16>
    %c0_7 = arith.constant 0 : index
    %c0_8 = arith.constant 0 : index
    %c0_9 = arith.constant 0 : index
    %c0_10 = arith.constant 0 : index
    %14 = vector.load %arg4[%c0_7, %c0_8, %c0_9, %c0_10] : memref<1x8x8x64xf32, #tpu.memory_space<vmem>>, vector<1x1x8x64xf32>
    %15 = vector.shape_cast %14 : vector<1x1x8x64xf32> to vector<1x8x64xf32>
    %16 = vector.broadcast %5 : f32 to vector<1x8x64xf32>
    %17 = arith.mulf %15, %16 : vector<1x8x64xf32>
    %18 = arith.truncf %17 : vector<1x8x64xf32> to vector<1x8x64xbf16>
    %19 = tpu.concatenate %13, %8, %18 in 0 : vector<1x8x64xbf16>, vector<8x8x64xbf16>, vector<1x8x64xbf16> -> vector<10x8x64xbf16>
    %cst = arith.constant 0.000000e+00 : bf16
    %20 = vector.broadcast %cst : bf16 to vector<10x1x64xbf16>
    %21 = tpu.concatenate %20, %19, %20 in 1 : vector<10x1x64xbf16>, vector<10x8x64xbf16>, vector<10x1x64xbf16> -> vector<10x10x64xbf16>
    %22 = vector.extract_strided_slice %21 {offsets = [0, 0, 0], sizes = [8, 8, 64], strides = [1, 1, 1]} : vector<10x10x64xbf16> to vector<8x8x64xbf16>
    %23 = vector.extract_strided_slice %21 {offsets = [0, 1, 0], sizes = [8, 8, 64], strides = [1, 1, 1]} : vector<10x10x64xbf16> to vector<8x8x64xbf16>
    %24 = vector.extract_strided_slice %21 {offsets = [0, 2, 0], sizes = [8, 8, 64], strides = [1, 1, 1]} : vector<10x10x64xbf16> to vector<8x8x64xbf16>
    %25 = vector.extract_strided_slice %21 {offsets = [1, 0, 0], sizes = [8, 8, 64], strides = [1, 1, 1]} : vector<10x10x64xbf16> to vector<8x8x64xbf16>
    %26 = vector.extract_strided_slice %21 {offsets = [1, 1, 0], sizes = [8, 8, 64], strides = [1, 1, 1]} : vector<10x10x64xbf16> to vector<8x8x64xbf16>
    %27 = vector.extract_strided_slice %21 {offsets = [1, 2, 0], sizes = [8, 8, 64], strides = [1, 1, 1]} : vector<10x10x64xbf16> to vector<8x8x64xbf16>
    %28 = vector.extract_strided_slice %21 {offsets = [2, 0, 0], sizes = [8, 8, 64], strides = [1, 1, 1]} : vector<10x10x64xbf16> to vector<8x8x64xbf16>
    %29 = vector.extract_strided_slice %21 {offsets = [2, 1, 0], sizes = [8, 8, 64], strides = [1, 1, 1]} : vector<10x10x64xbf16> to vector<8x8x64xbf16>
    %30 = vector.extract_strided_slice %21 {offsets = [2, 2, 0], sizes = [8, 8, 64], strides = [1, 1, 1]} : vector<10x10x64xbf16> to vector<8x8x64xbf16>
    %31 = tpu.concatenate %22, %23, %24, %25, %26, %27, %28, %29, %30 in 2 : vector<8x8x64xbf16>, vector<8x8x64xbf16>, vector<8x8x64xbf16>, vector<8x8x64xbf16>, vector<8x8x64xbf16>, vector<8x8x64xbf16>, vector<8x8x64xbf16>, vector<8x8x64xbf16>, vector<8x8x64xbf16> -> vector<8x8x576xbf16>
    %32 = vector.shape_cast %31 : vector<8x8x576xbf16> to vector<64x576xbf16>
    %c0_11 = arith.constant 0 : index
    %c0_12 = arith.constant 0 : index
    %33 = vector.load %arg5[%c0_11, %c0_12] : memref<576x128xbf16, #tpu.memory_space<vmem>>, vector<576x128xbf16>
    %cst_13 = arith.constant dense<0.000000e+00> : vector<64x128xf32>
    %34 = tpu.matmul %32, %33, %cst_13 {dimension_numbers = #tpu.dot_dimension_numbers<[1], [0], [0], [1], [0, 0, 1, 1], [], []>} : vector<64x576xbf16>, vector<576x128xbf16>, vector<64x128xf32> -> vector<64x128xf32>
    %c0_14 = arith.constant 0 : index
    %c0_15 = arith.constant 0 : index
    %35 = vector.load %arg6[%c0_14, %c0_15] : memref<1x128xf32, #tpu.memory_space<vmem>>, vector<1x128xf32>
    %36 = vector.broadcast %35 : vector<1x128xf32> to vector<64x128xf32>
    %37 = arith.addf %34, %36 : vector<64x128xf32>
    %cst_16 = arith.constant 0.000000e+00 : f32
    %38 = vector.broadcast %cst_16 : f32 to vector<64x128xf32>
    %39 = arith.maximumf %37, %38 : vector<64x128xf32>
    %40 = vector.shape_cast %39 : vector<64x128xf32> to vector<8x8x128xf32>
    %c0_17 = arith.constant 0 : index
    %c0_18 = arith.constant 0 : index
    %c0_19 = arith.constant 0 : index
    %c0_20 = arith.constant 0 : index
    %41 = vector.load %arg7[%c0_17, %c0_18, %c0_19, %c0_20] : memref<1x8x8x128xf32, #tpu.memory_space<vmem>>, vector<1x8x8x128xf32>
    %42 = vector.shape_cast %41 : vector<1x8x8x128xf32> to vector<8x8x128xf32>
    %43 = vector.shape_cast %40 : vector<8x8x128xf32> to vector<1x8x8x128xf32>
    tpu.vector_store %arg7[%c0_17, %c0_18, %c0_19, %c0_20], %43 {strides = array<i32>} : memref<1x8x8x128xf32, #tpu.memory_space<vmem>>, vector<1x8x8x128xf32>,
    return
  }
  func.func @transform_0(%arg0: i32, %arg1: i32) -> (i32, i32, i32, i32) {
    %c0_i32 = arith.constant 0 : i32
    %c0_i32_0 = arith.constant 0 : i32
    %c0_i32_1 = arith.constant 0 : i32
    return %arg0, %arg1, %c0_i32, %c0_i32_0 : i32, i32, i32, i32
  }
  func.func @transform_1(%arg0: i32, %arg1: i32) -> (i32, i32, i32, i32) {
    %c1_i32 = arith.constant 1 : i32
    %0 = arith.muli %arg1, %c1_i32 : i32
    %c1_i32_0 = arith.constant 1 : i32
    %1 = arith.subi %0, %c1_i32_0 : i32
    %c0_i32 = arith.constant 0 : i32
    %2 = arith.maxsi %1, %c0_i32 : i32
    %c0_i32_1 = arith.constant 0 : i32
    %c0_i32_2 = arith.constant 0 : i32
    %c0_i32_3 = arith.constant 0 : i32
    return %arg0, %2, %c0_i32_1, %c0_i32_2 : i32, i32, i32, i32
  }
  func.func @transform_2(%arg0: i32, %arg1: i32) -> (i32, i32, i32, i32) {
    %c1_i32 = arith.constant 1 : i32
    %0 = arith.addi %arg1, %c1_i32 : i32
    %c1_i32_0 = arith.constant 1 : i32
    %1 = arith.muli %0, %c1_i32_0 : i32
    %c0_i32 = arith.constant 0 : i32
    %2 = arith.minsi %1, %c0_i32 : i32
    %c0_i32_1 = arith.constant 0 : i32
    %c0_i32_2 = arith.constant 0 : i32
    %c0_i32_3 = arith.constant 0 : i32
    return %arg0, %2, %c0_i32_1, %c0_i32_2 : i32, i32, i32, i32
  }
  func.func @transform_3(%arg0: i32, %arg1: i32) -> (i32, i32) {
    %c0_i32 = arith.constant 0 : i32
    %c0_i32_0 = arith.constant 0 : i32
    %c0_i32_1 = arith.constant 0 : i32
    return %c0_i32, %c0_i32_0 : i32, i32
  }
  func.func @transform_4(%arg0: i32, %arg1: i32) -> (i32, i32) {
    %c0_i32 = arith.constant 0 : i32
    %c0_i32_0 = arith.constant 0 : i32
    %c0_i32_1 = arith.constant 0 : i32
    return %c0_i32, %c0_i32_0 : i32, i32
  }
  func.func @transform_5(%arg0: i32, %arg1: i32) -> (i32, i32, i32, i32) {
    %c0_i32 = arith.constant 0 : i32
    %c0_i32_0 = arith.constant 0 : i32
    %c0_i32_1 = arith.constant 0 : i32
    return %arg0, %arg1, %c0_i32, %c0_i32_0 : i32, i32, i32, i32
  }
}

module attributes {stable_mosaic.version = 11 : i64} {
  func.func @_conv3x3_relu_kernel(%arg0: i32, %arg1: i32, %arg2: memref<1x8x8x128xf32, #tpu.memory_space<vmem>>, %arg3: memref<1x8x8x128xf32, #tpu.memory_space<vmem>>, %arg4: memref<1x8x8x128xf32, #tpu.memory_space<vmem>>, %arg5: memref<1152x128xbf16, #tpu.memory_space<vmem>>, %arg6: memref<1x128xf32, #tpu.memory_space<vmem>>, %arg7: memref<1x8x8x128xf32, #tpu.memory_space<vmem>>) attributes {dimension_semantics = [#tpu.dimension_semantics<parallel>, #tpu.dimension_semantics<parallel>], iteration_bounds = array<i64: 4, 1>, scalar_prefetch = 0 : i64, scratch_operands = 0 : i64, tpu.core_type = #tpu.core_type<tc>, window_params = [{transform_indices = @transform_0, window_bounds = array<i64: 1, 8, 8, 128>}, {transform_indices = @transform_1, window_bounds = array<i64: 1, 8, 8, 128>}, {transform_indices = @transform_2, window_bounds = array<i64: 1, 8, 8, 128>}, {pipeline_mode = #tpu.pipeline_mode<synchronous>, transform_indices = @transform_3, window_bounds = array<i64: 1152, 128>}, {pipeline_mode = #tpu.pipeline_mode<synchronous>, transform_indices = @transform_4, window_bounds = array<i64: 1, 128>}, {transform_indices = @transform_5, window_bounds = array<i64: 1, 8, 8, 128>}]} {
    %c0_i32 = arith.constant 0 : i32
    %0 = arith.cmpi sgt, %arg1, %c0_i32 : i32
    %1 = arith.extui %0 : i1 to i32
    %2 = arith.sitofp %1 : i32 to f32
    %c0_i32_0 = arith.constant 0 : i32
    %3 = arith.cmpi slt, %arg1, %c0_i32_0 : i32
    %4 = arith.extui %3 : i1 to i32
    %5 = arith.sitofp %4 : i32 to f32
    %c0 = arith.constant 0 : index
    %c0_1 = arith.constant 0 : index
    %c0_2 = arith.constant 0 : index
    %c0_3 = arith.constant 0 : index
    %6 = vector.load %arg2[%c0, %c0_1, %c0_2, %c0_3] : memref<1x8x8x128xf32, #tpu.memory_space<vmem>>, vector<1x8x8x128xf32>
    %7 = vector.shape_cast %6 : vector<1x8x8x128xf32> to vector<8x8x128xf32>
    %8 = arith.truncf %7 : vector<8x8x128xf32> to vector<8x8x128xbf16>
    %c0_4 = arith.constant 0 : index
    %c7 = arith.constant 7 : index
    %c0_5 = arith.constant 0 : index
    %c0_6 = arith.constant 0 : index
    %9 = vector.load %arg3[%c0_4, %c7, %c0_5, %c0_6] : memref<1x8x8x128xf32, #tpu.memory_space<vmem>>, vector<1x1x8x128xf32>
    %10 = vector.shape_cast %9 : vector<1x1x8x128xf32> to vector<1x8x128xf32>
    %11 = vector.broadcast %2 : f32 to vector<1x8x128xf32>
    %12 = arith.mulf %10, %11 : vector<1x8x128xf32>
    %13 = arith.truncf %12 : vector<1x8x128xf32> to vector<1x8x128xbf16>
    %c0_7 = arith.constant 0 : index
    %c0_8 = arith.constant 0 : index
    %c0_9 = arith.constant 0 : index
    %c0_10 = arith.constant 0 : index
    %14 = vector.load %arg4[%c0_7, %c0_8, %c0_9, %c0_10] : memref<1x8x8x128xf32, #tpu.memory_space<vmem>>, vector<1x1x8x128xf32>
    %15 = vector.shape_cast %14 : vector<1x1x8x128xf32> to vector<1x8x128xf32>
    %16 = vector.broadcast %5 : f32 to vector<1x8x128xf32>
    %17 = arith.mulf %15, %16 : vector<1x8x128xf32>
    %18 = arith.truncf %17 : vector<1x8x128xf32> to vector<1x8x128xbf16>
    %19 = tpu.concatenate %13, %8, %18 in 0 : vector<1x8x128xbf16>, vector<8x8x128xbf16>, vector<1x8x128xbf16> -> vector<10x8x128xbf16>
    %cst = arith.constant 0.000000e+00 : bf16
    %20 = vector.broadcast %cst : bf16 to vector<10x1x128xbf16>
    %21 = tpu.concatenate %20, %19, %20 in 1 : vector<10x1x128xbf16>, vector<10x8x128xbf16>, vector<10x1x128xbf16> -> vector<10x10x128xbf16>
    %22 = vector.extract_strided_slice %21 {offsets = [0, 0, 0], sizes = [8, 8, 128], strides = [1, 1, 1]} : vector<10x10x128xbf16> to vector<8x8x128xbf16>
    %23 = vector.extract_strided_slice %21 {offsets = [0, 1, 0], sizes = [8, 8, 128], strides = [1, 1, 1]} : vector<10x10x128xbf16> to vector<8x8x128xbf16>
    %24 = vector.extract_strided_slice %21 {offsets = [0, 2, 0], sizes = [8, 8, 128], strides = [1, 1, 1]} : vector<10x10x128xbf16> to vector<8x8x128xbf16>
    %25 = vector.extract_strided_slice %21 {offsets = [1, 0, 0], sizes = [8, 8, 128], strides = [1, 1, 1]} : vector<10x10x128xbf16> to vector<8x8x128xbf16>
    %26 = vector.extract_strided_slice %21 {offsets = [1, 1, 0], sizes = [8, 8, 128], strides = [1, 1, 1]} : vector<10x10x128xbf16> to vector<8x8x128xbf16>
    %27 = vector.extract_strided_slice %21 {offsets = [1, 2, 0], sizes = [8, 8, 128], strides = [1, 1, 1]} : vector<10x10x128xbf16> to vector<8x8x128xbf16>
    %28 = vector.extract_strided_slice %21 {offsets = [2, 0, 0], sizes = [8, 8, 128], strides = [1, 1, 1]} : vector<10x10x128xbf16> to vector<8x8x128xbf16>
    %29 = vector.extract_strided_slice %21 {offsets = [2, 1, 0], sizes = [8, 8, 128], strides = [1, 1, 1]} : vector<10x10x128xbf16> to vector<8x8x128xbf16>
    %30 = vector.extract_strided_slice %21 {offsets = [2, 2, 0], sizes = [8, 8, 128], strides = [1, 1, 1]} : vector<10x10x128xbf16> to vector<8x8x128xbf16>
    %31 = tpu.concatenate %22, %23, %24, %25, %26, %27, %28, %29, %30 in 2 : vector<8x8x128xbf16>, vector<8x8x128xbf16>, vector<8x8x128xbf16>, vector<8x8x128xbf16>, vector<8x8x128xbf16>, vector<8x8x128xbf16>, vector<8x8x128xbf16>, vector<8x8x128xbf16>, vector<8x8x128xbf16> -> vector<8x8x1152xbf16>
    %32 = vector.shape_cast %31 : vector<8x8x1152xbf16> to vector<64x1152xbf16>
    %c0_11 = arith.constant 0 : index
    %c0_12 = arith.constant 0 : index
    %33 = vector.load %arg5[%c0_11, %c0_12] : memref<1152x128xbf16, #tpu.memory_space<vmem>>, vector<1152x128xbf16>
    %cst_13 = arith.constant dense<0.000000e+00> : vector<64x128xf32>
    %34 = tpu.matmul %32, %33, %cst_13 {dimension_numbers = #tpu.dot_dimension_numbers<[1], [0], [0], [1], [0, 0, 1, 1], [], []>} : vector<64x1152xbf16>, vector<1152x128xbf16>, vector<64x128xf32> -> vector<64x128xf32>
    %c0_14 = arith.constant 0 : index
    %c0_15 = arith.constant 0 : index
    %35 = vector.load %arg6[%c0_14, %c0_15] : memref<1x128xf32, #tpu.memory_space<vmem>>, vector<1x128xf32>
    %36 = vector.broadcast %35 : vector<1x128xf32> to vector<64x128xf32>
    %37 = arith.addf %34, %36 : vector<64x128xf32>
    %cst_16 = arith.constant 0.000000e+00 : f32
    %38 = vector.broadcast %cst_16 : f32 to vector<64x128xf32>
    %39 = arith.maximumf %37, %38 : vector<64x128xf32>
    %40 = vector.shape_cast %39 : vector<64x128xf32> to vector<8x8x128xf32>
    %c0_17 = arith.constant 0 : index
    %c0_18 = arith.constant 0 : index
    %c0_19 = arith.constant 0 : index
    %c0_20 = arith.constant 0 : index
    %41 = vector.load %arg7[%c0_17, %c0_18, %c0_19, %c0_20] : memref<1x8x8x128xf32, #tpu.memory_space<vmem>>, vector<1x8x8x128xf32>
    %42 = vector.shape_cast %41 : vector<1x8x8x128xf32> to vector<8x8x128xf32>
    %43 = vector.shape_cast %40 : vector<8x8x128xf32> to vector<1x8x8x128xf32>
    tpu.vector_store %arg7[%c0_17, %c0_18, %c0_19, %c0_20], %43 {strides = array<i32>} : memref<1x8x8x128xf32, #tpu.memory_space<vmem>>, vector<1x8x8x128xf32>,
    return
  }
  func.func @transform_0(%arg0: i32, %arg1: i32) -> (i32, i32, i32, i32) {
    %c0_i32 = arith.constant 0 : i32
    %c0_i32_0 = arith.constant 0 : i32
    %c0_i32_1 = arith.constant 0 : i32
    return %arg0, %arg1, %c0_i32, %c0_i32_0 : i32, i32, i32, i32
  }
  func.func @transform_1(%arg0: i32, %arg1: i32) -> (i32, i32, i32, i32) {
    %c1_i32 = arith.constant 1 : i32
    %0 = arith.muli %arg1, %c1_i32 : i32
    %c1_i32_0 = arith.constant 1 : i32
    %1 = arith.subi %0, %c1_i32_0 : i32
    %c0_i32 = arith.constant 0 : i32
    %2 = arith.maxsi %1, %c0_i32 : i32
    %c0_i32_1 = arith.constant 0 : i32
    %c0_i32_2 = arith.constant 0 : i32
    %c0_i32_3 = arith.constant 0 : i32
    return %arg0, %2, %c0_i32_1, %c0_i32_2 : i32, i32, i32, i32
  }
  func.func @transform_2(%arg0: i32, %arg1: i32) -> (i32, i32, i32, i32) {
    %c1_i32 = arith.constant 1 : i32
    %0 = arith.addi %arg1, %c1_i32 : i32
    %c1_i32_0 = arith.constant 1 : i32
    %1 = arith.muli %0, %c1_i32_0 : i32
    %c0_i32 = arith.constant 0 : i32
    %2 = arith.minsi %1, %c0_i32 : i32
    %c0_i32_1 = arith.constant 0 : i32
    %c0_i32_2 = arith.constant 0 : i32
    %c0_i32_3 = arith.constant 0 : i32
    return %arg0, %2, %c0_i32_1, %c0_i32_2 : i32, i32, i32, i32
  }
  func.func @transform_3(%arg0: i32, %arg1: i32) -> (i32, i32) {
    %c0_i32 = arith.constant 0 : i32
    %c0_i32_0 = arith.constant 0 : i32
    %c0_i32_1 = arith.constant 0 : i32
    return %c0_i32, %c0_i32_0 : i32, i32
  }
  func.func @transform_4(%arg0: i32, %arg1: i32) -> (i32, i32) {
    %c0_i32 = arith.constant 0 : i32
    %c0_i32_0 = arith.constant 0 : i32
    %c0_i32_1 = arith.constant 0 : i32
    return %c0_i32, %c0_i32_0 : i32, i32
  }
  func.func @transform_5(%arg0: i32, %arg1: i32) -> (i32, i32, i32, i32) {
    %c0_i32 = arith.constant 0 : i32
    %c0_i32_0 = arith.constant 0 : i32
    %c0_i32_1 = arith.constant 0 : i32
    return %arg0, %arg1, %c0_i32, %c0_i32_0 : i32, i32, i32, i32
  }
}

module attributes {stable_mosaic.version = 11 : i64} {
  func.func @_mse_kernel(%arg0: i32, %arg1: memref<256x128xf32, #tpu.memory_space<vmem>>, %arg2: memref<256x128xf32, #tpu.memory_space<vmem>>, %arg3: memref<1x1xf32, #tpu.memory_space<vmem>>, %arg4: memref<1x1xf32, #tpu.memory_space<vmem>>) attributes {dimension_semantics = [#tpu.dimension_semantics<arbitrary>], iteration_bounds = array<i64: 1>, scalar_prefetch = 0 : i64, scratch_operands = 1 : i64, tpu.core_type = #tpu.core_type<tc>, window_params = [{transform_indices = @transform_0, window_bounds = array<i64: 256, 128>}, {transform_indices = @transform_1, window_bounds = array<i64: 256, 128>}, {pipeline_mode = #tpu.pipeline_mode<synchronous>, transform_indices = @transform_2, window_bounds = array<i64: 1, 1>}]} {
    %c0_i32 = arith.constant 0 : i32
    %0 = arith.cmpi eq, %arg0, %c0_i32 : i32
    %1 = arith.extui %0 : i1 to i32
    %c0_i32_0 = arith.constant 0 : i32
    %2 = arith.cmpi ne, %1, %c0_i32_0 : i32
    scf.if %2 {
      %cst_10 = arith.constant 0.000000e+00 : f32
      %18 = vector.broadcast %cst_10 : f32 to vector<1x1xf32>
      %c0_11 = arith.constant 0 : index
      %c0_12 = arith.constant 0 : index
      %19 = vector.load %arg4[%c0_11, %c0_12] : memref<1x1xf32, #tpu.memory_space<vmem>>, vector<1x1xf32>
      tpu.vector_store %arg4[%c0_11, %c0_12], %18 {strides = array<i32>} : memref<1x1xf32, #tpu.memory_space<vmem>>, vector<1x1xf32>,
    } else {
    }
    %c0 = arith.constant 0 : index
    %c0_1 = arith.constant 0 : index
    %3 = vector.load %arg1[%c0, %c0_1] : memref<256x128xf32, #tpu.memory_space<vmem>>, vector<256x128xf32>
    %c0_2 = arith.constant 0 : index
    %c0_3 = arith.constant 0 : index
    %4 = vector.load %arg2[%c0_2, %c0_3] : memref<256x128xf32, #tpu.memory_space<vmem>>, vector<256x128xf32>
    %5 = arith.subf %3, %4 : vector<256x128xf32>
    %c0_4 = arith.constant 0 : index
    %c0_5 = arith.constant 0 : index
    %6 = vector.load %arg4[%c0_4, %c0_5] : memref<1x1xf32, #tpu.memory_space<vmem>>, vector<1x1xf32>
    %7 = arith.mulf %5, %5 : vector<256x128xf32>
    %8 = vector.shape_cast %7 : vector<256x128xf32> to vector<1x256x128xf32>
    %cst = arith.constant dense<0.000000e+00> : vector<1xf32>
    %9 = vector.multi_reduction <add>, %8, %cst [1, 2] : vector<1x256x128xf32> to vector<1xf32>
    %10 = vector.shape_cast %9 : vector<1xf32> to vector<1x1x1xf32>
    %11 = vector.extract %10[0, 0, 0] : f32 from vector<1x1x1xf32>
    %12 = vector.broadcast %11 : f32 to vector<1x1xf32>
    %13 = arith.addf %6, %12 : vector<1x1xf32>
    %c0_6 = arith.constant 0 : index
    %c0_7 = arith.constant 0 : index
    %14 = vector.load %arg4[%c0_6, %c0_7] : memref<1x1xf32, #tpu.memory_space<vmem>>, vector<1x1xf32>
    tpu.vector_store %arg4[%c0_6, %c0_7], %13 {strides = array<i32>} : memref<1x1xf32, #tpu.memory_space<vmem>>, vector<1x1xf32>,
    %c0_i32_8 = arith.constant 0 : i32
    %15 = arith.cmpi eq, %arg0, %c0_i32_8 : i32
    %16 = arith.extui %15 : i1 to i32
    %c0_i32_9 = arith.constant 0 : i32
    %17 = arith.cmpi ne, %16, %c0_i32_9 : i32
    scf.if %17 {
      %c0_10 = arith.constant 0 : index
      %c0_11 = arith.constant 0 : index
      %18 = vector.load %arg4[%c0_10, %c0_11] : memref<1x1xf32, #tpu.memory_space<vmem>>, vector<1x1xf32>
      %cst_12 = arith.constant 3.05175781E-5 : f32
      %19 = vector.broadcast %cst_12 : f32 to vector<1x1xf32>
      %20 = arith.mulf %18, %19 : vector<1x1xf32>
      %c0_13 = arith.constant 0 : index
      %c0_14 = arith.constant 0 : index
      %21 = vector.load %arg3[%c0_13, %c0_14] : memref<1x1xf32, #tpu.memory_space<vmem>>, vector<1x1xf32>
      tpu.vector_store %arg3[%c0_13, %c0_14], %20 {strides = array<i32>} : memref<1x1xf32, #tpu.memory_space<vmem>>, vector<1x1xf32>,
    } else {
    }
    return
  }
  func.func @transform_0(%arg0: i32) -> (i32, i32) {
    %c0_i32 = arith.constant 0 : i32
    %c0_i32_0 = arith.constant 0 : i32
    return %arg0, %c0_i32 : i32, i32
  }
  func.func @transform_1(%arg0: i32) -> (i32, i32) {
    %c0_i32 = arith.constant 0 : i32
    %c0_i32_0 = arith.constant 0 : i32
    return %arg0, %c0_i32 : i32, i32
  }
  func.func @transform_2(%arg0: i32) -> (i32, i32) {
    %c0_i32 = arith.constant 0 : i32
    %c0_i32_0 = arith.constant 0 : i32
    %c0_i32_1 = arith.constant 0 : i32
    return %c0_i32, %c0_i32_0 : i32, i32
  }
}

module attributes {stable_mosaic.version = 11 : i64} {
  func.func @_gram_kernel(%arg0: i32, %arg1: i32, %arg2: memref<1x64x128xf32, #tpu.memory_space<vmem>>, %arg3: memref<1x128x128xf32, #tpu.memory_space<vmem>>, %arg4: memref<128x128xf32, #tpu.memory_space<vmem>>) attributes {dimension_semantics = [#tpu.dimension_semantics<parallel>, #tpu.dimension_semantics<arbitrary>], iteration_bounds = array<i64: 4, 1>, scalar_prefetch = 0 : i64, scratch_operands = 1 : i64, tpu.core_type = #tpu.core_type<tc>, window_params = [{transform_indices = @transform_0, window_bounds = array<i64: 1, 64, 128>}, {transform_indices = @transform_1, window_bounds = array<i64: 1, 128, 128>}]} {
    %c0_i32 = arith.constant 0 : i32
    %0 = arith.cmpi eq, %arg1, %c0_i32 : i32
    %1 = arith.extui %0 : i1 to i32
    %c0_i32_0 = arith.constant 0 : i32
    %2 = arith.cmpi ne, %1, %c0_i32_0 : i32
    scf.if %2 {
      %cst_9 = arith.constant 0.000000e+00 : f32
      %12 = vector.broadcast %cst_9 : f32 to vector<128x128xf32>
      %c0_10 = arith.constant 0 : index
      %c0_11 = arith.constant 0 : index
      %13 = vector.load %arg4[%c0_10, %c0_11] : memref<128x128xf32, #tpu.memory_space<vmem>>, vector<128x128xf32>
      tpu.vector_store %arg4[%c0_10, %c0_11], %12 {strides = array<i32>} : memref<128x128xf32, #tpu.memory_space<vmem>>, vector<128x128xf32>,
    } else {
    }
    %c0 = arith.constant 0 : index
    %c0_1 = arith.constant 0 : index
    %c0_2 = arith.constant 0 : index
    %3 = vector.load %arg2[%c0, %c0_1, %c0_2] : memref<1x64x128xf32, #tpu.memory_space<vmem>>, vector<1x64x128xf32>
    %4 = vector.shape_cast %3 : vector<1x64x128xf32> to vector<64x128xf32>
    %c0_3 = arith.constant 0 : index
    %c0_4 = arith.constant 0 : index
    %5 = vector.load %arg4[%c0_3, %c0_4] : memref<128x128xf32, #tpu.memory_space<vmem>>, vector<128x128xf32>
    %cst = arith.constant dense<0.000000e+00> : vector<128x128xf32>
    %6 = tpu.matmul %4, %4, %cst {dimension_numbers = #tpu.dot_dimension_numbers<[0], [0], [1], [1], [0, 1, 1, 1], [], []>} : vector<64x128xf32>, vector<64x128xf32>, vector<128x128xf32> -> vector<128x128xf32>
    %7 = arith.addf %5, %6 : vector<128x128xf32>
    %c0_5 = arith.constant 0 : index
    %c0_6 = arith.constant 0 : index
    %8 = vector.load %arg4[%c0_5, %c0_6] : memref<128x128xf32, #tpu.memory_space<vmem>>, vector<128x128xf32>
    tpu.vector_store %arg4[%c0_5, %c0_6], %7 {strides = array<i32>} : memref<128x128xf32, #tpu.memory_space<vmem>>, vector<128x128xf32>,
    %c0_i32_7 = arith.constant 0 : i32
    %9 = arith.cmpi eq, %arg1, %c0_i32_7 : i32
    %10 = arith.extui %9 : i1 to i32
    %c0_i32_8 = arith.constant 0 : i32
    %11 = arith.cmpi ne, %10, %c0_i32_8 : i32
    scf.if %11 {
      %c0_9 = arith.constant 0 : index
      %c0_10 = arith.constant 0 : index
      %12 = vector.load %arg4[%c0_9, %c0_10] : memref<128x128xf32, #tpu.memory_space<vmem>>, vector<128x128xf32>
      %cst_11 = arith.constant 1.22070313E-4 : f32
      %13 = vector.broadcast %cst_11 : f32 to vector<128x128xf32>
      %14 = arith.mulf %12, %13 : vector<128x128xf32>
      %c0_12 = arith.constant 0 : index
      %c0_13 = arith.constant 0 : index
      %c0_14 = arith.constant 0 : index
      %15 = vector.load %arg3[%c0_12, %c0_13, %c0_14] : memref<1x128x128xf32, #tpu.memory_space<vmem>>, vector<1x128x128xf32>
      %16 = vector.shape_cast %15 : vector<1x128x128xf32> to vector<128x128xf32>
      %17 = vector.shape_cast %14 : vector<128x128xf32> to vector<1x128x128xf32>
      tpu.vector_store %arg3[%c0_12, %c0_13, %c0_14], %17 {strides = array<i32>} : memref<1x128x128xf32, #tpu.memory_space<vmem>>, vector<1x128x128xf32>,
    } else {
    }
    return
  }
  func.func @transform_0(%arg0: i32, %arg1: i32) -> (i32, i32, i32) {
    %c0_i32 = arith.constant 0 : i32
    %c0_i32_0 = arith.constant 0 : i32
    return %arg0, %arg1, %c0_i32 : i32, i32, i32
  }
  func.func @transform_1(%arg0: i32, %arg1: i32) -> (i32, i32, i32) {
    %c0_i32 = arith.constant 0 : i32
    %c0_i32_0 = arith.constant 0 : i32
    %c0_i32_1 = arith.constant 0 : i32
    return %arg0, %c0_i32, %c0_i32_0 : i32, i32, i32
  }
}

module attributes {stable_mosaic.version = 11 : i64} {
  func.func @_gram_kernel(%arg0: i32, %arg1: i32, %arg2: memref<1x256x64xf32, #tpu.memory_space<vmem>>, %arg3: memref<1x64x64xf32, #tpu.memory_space<vmem>>, %arg4: memref<64x64xf32, #tpu.memory_space<vmem>>) attributes {dimension_semantics = [#tpu.dimension_semantics<parallel>, #tpu.dimension_semantics<arbitrary>], iteration_bounds = array<i64: 4, 1>, scalar_prefetch = 0 : i64, scratch_operands = 1 : i64, tpu.core_type = #tpu.core_type<tc>, window_params = [{transform_indices = @transform_0, window_bounds = array<i64: 1, 256, 64>}, {transform_indices = @transform_1, window_bounds = array<i64: 1, 64, 64>}]} {
    %c0_i32 = arith.constant 0 : i32
    %0 = arith.cmpi eq, %arg1, %c0_i32 : i32
    %1 = arith.extui %0 : i1 to i32
    %c0_i32_0 = arith.constant 0 : i32
    %2 = arith.cmpi ne, %1, %c0_i32_0 : i32
    scf.if %2 {
      %cst_9 = arith.constant 0.000000e+00 : f32
      %12 = vector.broadcast %cst_9 : f32 to vector<64x64xf32>
      %c0_10 = arith.constant 0 : index
      %c0_11 = arith.constant 0 : index
      %13 = vector.load %arg4[%c0_10, %c0_11] : memref<64x64xf32, #tpu.memory_space<vmem>>, vector<64x64xf32>
      tpu.vector_store %arg4[%c0_10, %c0_11], %12 {strides = array<i32>} : memref<64x64xf32, #tpu.memory_space<vmem>>, vector<64x64xf32>,
    } else {
    }
    %c0 = arith.constant 0 : index
    %c0_1 = arith.constant 0 : index
    %c0_2 = arith.constant 0 : index
    %3 = vector.load %arg2[%c0, %c0_1, %c0_2] : memref<1x256x64xf32, #tpu.memory_space<vmem>>, vector<1x256x64xf32>
    %4 = vector.shape_cast %3 : vector<1x256x64xf32> to vector<256x64xf32>
    %c0_3 = arith.constant 0 : index
    %c0_4 = arith.constant 0 : index
    %5 = vector.load %arg4[%c0_3, %c0_4] : memref<64x64xf32, #tpu.memory_space<vmem>>, vector<64x64xf32>
    %cst = arith.constant dense<0.000000e+00> : vector<64x64xf32>
    %6 = tpu.matmul %4, %4, %cst {dimension_numbers = #tpu.dot_dimension_numbers<[0], [0], [1], [1], [0, 1, 1, 1], [], []>} : vector<256x64xf32>, vector<256x64xf32>, vector<64x64xf32> -> vector<64x64xf32>
    %7 = arith.addf %5, %6 : vector<64x64xf32>
    %c0_5 = arith.constant 0 : index
    %c0_6 = arith.constant 0 : index
    %8 = vector.load %arg4[%c0_5, %c0_6] : memref<64x64xf32, #tpu.memory_space<vmem>>, vector<64x64xf32>
    tpu.vector_store %arg4[%c0_5, %c0_6], %7 {strides = array<i32>} : memref<64x64xf32, #tpu.memory_space<vmem>>, vector<64x64xf32>,
    %c0_i32_7 = arith.constant 0 : i32
    %9 = arith.cmpi eq, %arg1, %c0_i32_7 : i32
    %10 = arith.extui %9 : i1 to i32
    %c0_i32_8 = arith.constant 0 : i32
    %11 = arith.cmpi ne, %10, %c0_i32_8 : i32
    scf.if %11 {
      %c0_9 = arith.constant 0 : index
      %c0_10 = arith.constant 0 : index
      %12 = vector.load %arg4[%c0_9, %c0_10] : memref<64x64xf32, #tpu.memory_space<vmem>>, vector<64x64xf32>
      %cst_11 = arith.constant 6.10351563E-5 : f32
      %13 = vector.broadcast %cst_11 : f32 to vector<64x64xf32>
      %14 = arith.mulf %12, %13 : vector<64x64xf32>
      %c0_12 = arith.constant 0 : index
      %c0_13 = arith.constant 0 : index
      %c0_14 = arith.constant 0 : index
      %15 = vector.load %arg3[%c0_12, %c0_13, %c0_14] : memref<1x64x64xf32, #tpu.memory_space<vmem>>, vector<1x64x64xf32>
      %16 = vector.shape_cast %15 : vector<1x64x64xf32> to vector<64x64xf32>
      %17 = vector.shape_cast %14 : vector<64x64xf32> to vector<1x64x64xf32>
      tpu.vector_store %arg3[%c0_12, %c0_13, %c0_14], %17 {strides = array<i32>} : memref<1x64x64xf32, #tpu.memory_space<vmem>>, vector<1x64x64xf32>,
    } else {
    }
    return
  }
  func.func @transform_0(%arg0: i32, %arg1: i32) -> (i32, i32, i32) {
    %c0_i32 = arith.constant 0 : i32
    %c0_i32_0 = arith.constant 0 : i32
    return %arg0, %arg1, %c0_i32 : i32, i32, i32
  }
  func.func @transform_1(%arg0: i32, %arg1: i32) -> (i32, i32, i32) {
    %c0_i32 = arith.constant 0 : i32
    %c0_i32_0 = arith.constant 0 : i32
    %c0_i32_1 = arith.constant 0 : i32
    return %arg0, %c0_i32, %c0_i32_0 : i32, i32, i32
  }
}

module attributes {stable_mosaic.version = 11 : i64} {
  func.func @_mse_kernel(%arg0: i32, %arg1: memref<128x64xf32, #tpu.memory_space<vmem>>, %arg2: memref<128x64xf32, #tpu.memory_space<vmem>>, %arg3: memref<1x1xf32, #tpu.memory_space<vmem>>, %arg4: memref<1x1xf32, #tpu.memory_space<vmem>>) attributes {dimension_semantics = [#tpu.dimension_semantics<arbitrary>], iteration_bounds = array<i64: 1>, scalar_prefetch = 0 : i64, scratch_operands = 1 : i64, tpu.core_type = #tpu.core_type<tc>, window_params = [{transform_indices = @transform_0, window_bounds = array<i64: 128, 64>}, {transform_indices = @transform_1, window_bounds = array<i64: 128, 64>}, {pipeline_mode = #tpu.pipeline_mode<synchronous>, transform_indices = @transform_2, window_bounds = array<i64: 1, 1>}]} {
    %c0_i32 = arith.constant 0 : i32
    %0 = arith.cmpi eq, %arg0, %c0_i32 : i32
    %1 = arith.extui %0 : i1 to i32
    %c0_i32_0 = arith.constant 0 : i32
    %2 = arith.cmpi ne, %1, %c0_i32_0 : i32
    scf.if %2 {
      %cst_10 = arith.constant 0.000000e+00 : f32
      %18 = vector.broadcast %cst_10 : f32 to vector<1x1xf32>
      %c0_11 = arith.constant 0 : index
      %c0_12 = arith.constant 0 : index
      %19 = vector.load %arg4[%c0_11, %c0_12] : memref<1x1xf32, #tpu.memory_space<vmem>>, vector<1x1xf32>
      tpu.vector_store %arg4[%c0_11, %c0_12], %18 {strides = array<i32>} : memref<1x1xf32, #tpu.memory_space<vmem>>, vector<1x1xf32>,
    } else {
    }
    %c0 = arith.constant 0 : index
    %c0_1 = arith.constant 0 : index
    %3 = vector.load %arg1[%c0, %c0_1] : memref<128x64xf32, #tpu.memory_space<vmem>>, vector<128x64xf32>
    %c0_2 = arith.constant 0 : index
    %c0_3 = arith.constant 0 : index
    %4 = vector.load %arg2[%c0_2, %c0_3] : memref<128x64xf32, #tpu.memory_space<vmem>>, vector<128x64xf32>
    %5 = arith.subf %3, %4 : vector<128x64xf32>
    %c0_4 = arith.constant 0 : index
    %c0_5 = arith.constant 0 : index
    %6 = vector.load %arg4[%c0_4, %c0_5] : memref<1x1xf32, #tpu.memory_space<vmem>>, vector<1x1xf32>
    %7 = arith.mulf %5, %5 : vector<128x64xf32>
    %8 = vector.shape_cast %7 : vector<128x64xf32> to vector<1x128x64xf32>
    %cst = arith.constant dense<0.000000e+00> : vector<1xf32>
    %9 = vector.multi_reduction <add>, %8, %cst [1, 2] : vector<1x128x64xf32> to vector<1xf32>
    %10 = vector.shape_cast %9 : vector<1xf32> to vector<1x1x1xf32>
    %11 = vector.extract %10[0, 0, 0] : f32 from vector<1x1x1xf32>
    %12 = vector.broadcast %11 : f32 to vector<1x1xf32>
    %13 = arith.addf %6, %12 : vector<1x1xf32>
    %c0_6 = arith.constant 0 : index
    %c0_7 = arith.constant 0 : index
    %14 = vector.load %arg4[%c0_6, %c0_7] : memref<1x1xf32, #tpu.memory_space<vmem>>, vector<1x1xf32>
    tpu.vector_store %arg4[%c0_6, %c0_7], %13 {strides = array<i32>} : memref<1x1xf32, #tpu.memory_space<vmem>>, vector<1x1xf32>,
    %c0_i32_8 = arith.constant 0 : i32
    %15 = arith.cmpi eq, %arg0, %c0_i32_8 : i32
    %16 = arith.extui %15 : i1 to i32
    %c0_i32_9 = arith.constant 0 : i32
    %17 = arith.cmpi ne, %16, %c0_i32_9 : i32
    scf.if %17 {
      %c0_10 = arith.constant 0 : index
      %c0_11 = arith.constant 0 : index
      %18 = vector.load %arg4[%c0_10, %c0_11] : memref<1x1xf32, #tpu.memory_space<vmem>>, vector<1x1xf32>
      %cst_12 = arith.constant 1.22070313E-4 : f32
      %19 = vector.broadcast %cst_12 : f32 to vector<1x1xf32>
      %20 = arith.mulf %18, %19 : vector<1x1xf32>
      %c0_13 = arith.constant 0 : index
      %c0_14 = arith.constant 0 : index
      %21 = vector.load %arg3[%c0_13, %c0_14] : memref<1x1xf32, #tpu.memory_space<vmem>>, vector<1x1xf32>
      tpu.vector_store %arg3[%c0_13, %c0_14], %20 {strides = array<i32>} : memref<1x1xf32, #tpu.memory_space<vmem>>, vector<1x1xf32>,
    } else {
    }
    return
  }
  func.func @transform_0(%arg0: i32) -> (i32, i32) {
    %c0_i32 = arith.constant 0 : i32
    %c0_i32_0 = arith.constant 0 : i32
    return %arg0, %c0_i32 : i32, i32
  }
  func.func @transform_1(%arg0: i32) -> (i32, i32) {
    %c0_i32 = arith.constant 0 : i32
    %c0_i32_0 = arith.constant 0 : i32
    return %arg0, %c0_i32 : i32, i32
  }
  func.func @transform_2(%arg0: i32) -> (i32, i32) {
    %c0_i32 = arith.constant 0 : i32
    %c0_i32_0 = arith.constant 0 : i32
    %c0_i32_1 = arith.constant 0 : i32
    return %c0_i32, %c0_i32_0 : i32, i32
  }
}

module attributes {stable_mosaic.version = 11 : i64} {
  func.func @_mse_kernel(%arg0: i32, %arg1: memref<512x64xf32, #tpu.memory_space<vmem>>, %arg2: memref<512x64xf32, #tpu.memory_space<vmem>>, %arg3: memref<1x1xf32, #tpu.memory_space<vmem>>, %arg4: memref<1x1xf32, #tpu.memory_space<vmem>>) attributes {dimension_semantics = [#tpu.dimension_semantics<arbitrary>], iteration_bounds = array<i64: 1>, scalar_prefetch = 0 : i64, scratch_operands = 1 : i64, tpu.core_type = #tpu.core_type<tc>, window_params = [{transform_indices = @transform_0, window_bounds = array<i64: 512, 64>}, {transform_indices = @transform_1, window_bounds = array<i64: 512, 64>}, {pipeline_mode = #tpu.pipeline_mode<synchronous>, transform_indices = @transform_2, window_bounds = array<i64: 1, 1>}]} {
    %c0_i32 = arith.constant 0 : i32
    %0 = arith.cmpi eq, %arg0, %c0_i32 : i32
    %1 = arith.extui %0 : i1 to i32
    %c0_i32_0 = arith.constant 0 : i32
    %2 = arith.cmpi ne, %1, %c0_i32_0 : i32
    scf.if %2 {
      %cst_10 = arith.constant 0.000000e+00 : f32
      %18 = vector.broadcast %cst_10 : f32 to vector<1x1xf32>
      %c0_11 = arith.constant 0 : index
      %c0_12 = arith.constant 0 : index
      %19 = vector.load %arg4[%c0_11, %c0_12] : memref<1x1xf32, #tpu.memory_space<vmem>>, vector<1x1xf32>
      tpu.vector_store %arg4[%c0_11, %c0_12], %18 {strides = array<i32>} : memref<1x1xf32, #tpu.memory_space<vmem>>, vector<1x1xf32>,
    } else {
    }
    %c0 = arith.constant 0 : index
    %c0_1 = arith.constant 0 : index
    %3 = vector.load %arg1[%c0, %c0_1] : memref<512x64xf32, #tpu.memory_space<vmem>>, vector<512x64xf32>
    %c0_2 = arith.constant 0 : index
    %c0_3 = arith.constant 0 : index
    %4 = vector.load %arg2[%c0_2, %c0_3] : memref<512x64xf32, #tpu.memory_space<vmem>>, vector<512x64xf32>
    %5 = arith.subf %3, %4 : vector<512x64xf32>
    %c0_4 = arith.constant 0 : index
    %c0_5 = arith.constant 0 : index
    %6 = vector.load %arg4[%c0_4, %c0_5] : memref<1x1xf32, #tpu.memory_space<vmem>>, vector<1x1xf32>
    %7 = arith.mulf %5, %5 : vector<512x64xf32>
    %8 = vector.shape_cast %7 : vector<512x64xf32> to vector<1x512x64xf32>
    %cst = arith.constant dense<0.000000e+00> : vector<1xf32>
    %9 = vector.multi_reduction <add>, %8, %cst [1, 2] : vector<1x512x64xf32> to vector<1xf32>
    %10 = vector.shape_cast %9 : vector<1xf32> to vector<1x1x1xf32>
    %11 = vector.extract %10[0, 0, 0] : f32 from vector<1x1x1xf32>
    %12 = vector.broadcast %11 : f32 to vector<1x1xf32>
    %13 = arith.addf %6, %12 : vector<1x1xf32>
    %c0_6 = arith.constant 0 : index
    %c0_7 = arith.constant 0 : index
    %14 = vector.load %arg4[%c0_6, %c0_7] : memref<1x1xf32, #tpu.memory_space<vmem>>, vector<1x1xf32>
    tpu.vector_store %arg4[%c0_6, %c0_7], %13 {strides = array<i32>} : memref<1x1xf32, #tpu.memory_space<vmem>>, vector<1x1xf32>,
    %c0_i32_8 = arith.constant 0 : i32
    %15 = arith.cmpi eq, %arg0, %c0_i32_8 : i32
    %16 = arith.extui %15 : i1 to i32
    %c0_i32_9 = arith.constant 0 : i32
    %17 = arith.cmpi ne, %16, %c0_i32_9 : i32
    scf.if %17 {
      %c0_10 = arith.constant 0 : index
      %c0_11 = arith.constant 0 : index
      %18 = vector.load %arg4[%c0_10, %c0_11] : memref<1x1xf32, #tpu.memory_space<vmem>>, vector<1x1xf32>
      %cst_12 = arith.constant 3.05175781E-5 : f32
      %19 = vector.broadcast %cst_12 : f32 to vector<1x1xf32>
      %20 = arith.mulf %18, %19 : vector<1x1xf32>
      %c0_13 = arith.constant 0 : index
      %c0_14 = arith.constant 0 : index
      %21 = vector.load %arg3[%c0_13, %c0_14] : memref<1x1xf32, #tpu.memory_space<vmem>>, vector<1x1xf32>
      tpu.vector_store %arg3[%c0_13, %c0_14], %20 {strides = array<i32>} : memref<1x1xf32, #tpu.memory_space<vmem>>, vector<1x1xf32>,
    } else {
    }
    return
  }
  func.func @transform_0(%arg0: i32) -> (i32, i32) {
    %c0_i32 = arith.constant 0 : i32
    %c0_i32_0 = arith.constant 0 : i32
    return %arg0, %c0_i32 : i32, i32
  }
  func.func @transform_1(%arg0: i32) -> (i32, i32) {
    %c0_i32 = arith.constant 0 : i32
    %c0_i32_0 = arith.constant 0 : i32
    return %arg0, %c0_i32 : i32, i32
  }
  func.func @transform_2(%arg0: i32) -> (i32, i32) {
    %c0_i32 = arith.constant 0 : i32
    %c0_i32_0 = arith.constant 0 : i32
    %c0_i32_1 = arith.constant 0 : i32
    return %c0_i32, %c0_i32_0 : i32, i32
  }
}

</mosaic_0001>

<bundles_post_ra>
// kernel: vgg_loss.9
= control target key start
LH: loop header
LB: loop body
LE: loop exit
PB: predicated region body
PF: predicated region fallthrough
CT: control target
= control target key end

     0   :  { %s1502_s18 = smov 0   ;;  %s1504_s19 = smov 0   ;;  %s2019_s0 = inlined_call_operand.vmem [shape: f32[4,16,16,3], index: 0, kind: input, shape index: {}, may-alias: {0,1,2}]   ;;  %s2020_s1 = inlined_call_operand.vmem [shape: f32[4,16,16,3], index: 1, kind: input, shape index: {}, may-alias: {0,1,2}]   ;;  %s2021_s2 = inlined_call_operand.vmem [shape: f32[4,16,16,3], index: 2, kind: input, shape index: {}, may-alias: {0,1,2}]   ;;  %s2022_s3 = inlined_call_operand.vmem [shape: bf16[27,64], index: 3, kind: input, shape index: {}]   ;;  %s2023_s4 = inlined_call_operand.vmem [shape: f32[1,64], index: 4, kind: input, shape index: {}]   ;;  %s2024_s5 = inlined_call_operand.vmem [shape: f32[4,16,16,64], index: 5, kind: output, shape index: {}]  }
   0x1   :  { %s1506_s20 = smov 0   ;;  %s1508_s21 = smov 0  }
   0x2   :  { %s1510_s22 = smov 0  }
   0x3 LB: > { %s24_s23 = sadd.s32 1, %s1453_s20  ;;  %s27_s24 = sadd.s32 1, %s1457_s21  ;;  %s1461_s22 = sphi %s1510_s22, %s15_s22   ;;  %s1457_s21 = sphi %s1508_s21, %s2032_s21   ;;  %s1453_s20 = sphi %s1506_s20, %s2031_s20   ;;  %s1449_s19 = sphi %s1504_s19, %s2030_s19   ;;  %s1445_s18 = sphi %s1502_s18, %s2029_s18  }
   0x4   : > { %p25_p0 = scmp.ge.s32.totalorder %s24_s23, 2  ;;  %p1305_p1 = scmp.ge.s32.totalorder %s1461_s22, 1 }
   0x5   : > { %p269_p2 = scmp.lt.s32.totalorder %s1461_s22, 9 }
   0x6   : > { %s2034_s23 = smov (%p25_p0, %s24_s23), 0  ;;  %s2036_s24 = smov (!%p25_p0, %s27_s24), %s1457_s21 }
   0x7   : > { %p270_p3 = pnand %p1305_p1, %p269_p2  ;;  %p29_p4 = scmp.ge.s32.totalorder %s2036_s24, 4 }
   0x8   : > { %s1306_s25 = sshll.u32 (!%p270_p3), %s1445_s18, 3  ;;  %p334_p5 = scmp.lt.s32.totalorder (!%p270_p3), %s1449_s19, 3  ;;  %vm523_vm0 = vcmask (!%p270_p3), 1040384   ;;  %vm524_vm1 = vsmask.f32 (!%p270_p3), 256  ;;  %vm675_vm3 = vcmask (!%p270_p3), 1046528  }
   0x9   : > { %s2038_s24 = smov (%p29_p4, %s2036_s24), 0  ;;  %273 = sbr.rel (%p270_p3) target bundleno = 492 (0x1ec), region = 40 }
   0xa   : > { %p336_p6 = scmp.lt.s32.totalorder (!%p270_p3), %s1306_s25, 15  ;;  %s1310_s30 = sadd.s32 (!%p270_p3), 4294967295, %s1445_s18  ;;  %vm1565_vm2 = vmand (!%p270_p3), %vm523_vm0, %vm524_vm1  ;;  %vm546_vm4 = vsmask.f32 (!%p270_p3), 7424  ;;  %vm1021_vm5 = vcmask (!%p270_p3), 1044480   ;;  %vm1022_vm6 = vcmask (!%p270_p3), 1045504  }
   0xb   : > { %p345_p7 = scmp.gt.s32.totalorder (!%p270_p3), %s1310_s30, 0  ;;  %p390_p8 = scmp.gt.s32.totalorder (!%p270_p3), %s1445_s18, 0  ;;  %vm846_vm7 = vcmask (!%p270_p3), 23552   ;;  %vm863_vm8 = vcmask (!%p270_p3), 48128   ;;  %vm880_vm9 = vcmask (!%p270_p3), 72704   ;;  %vm897_vm10 = vcmask (!%p270_p3), 97280  }
   0xc   : > { %s361_s11 = sadd.s32 (!%p270_p3), 1, %s1445_s18  ;;  %s1463_s15 = smov (!%p270_p3), 9   ;;  %vm914_vm11 = vcmask (!%p270_p3), 121856   ;;  %vm931_vm12 = vcmask (!%p270_p3), 146432   ;;  %vm948_vm13 = vcmask (!%p270_p3), 171008   ;;  %vm965_vm14 = vcmask (!%p270_p3), 195584  }
   0xd   : > { %p1575_p10 = scmp.lt.s32.totalorder (!%p270_p3), %s361_s11, 1  ;;  %s1464_s7 = smov (!%p270_p3), 6   ;;  %vm1004_vm15 = vcmask (!%p270_p3), 220160   ;;  %vm1141_vm0 = vcmask (!%p270_p3), 523264  }
   0xe   : > { %p393_p12 = scmp.lt.s32.totalorder (!%p270_p3), %s1445_s18, 1  ;;  %s1466_s13 = smov (!%p270_p3), 12  }
  0x10   : > { %s2040_s19 = smov (!%p334_p5, %s1449_s19), 3  ;;  %s2042_s25 = smov (!%p336_p6, %s1306_s25), 15 }
  0x11   : > { %s1535_s26 = sshll.u32 %s2040_s19, 5  ;;  %s1307_s27 = sshll.u32 %s2042_s25, 1 }
  0x12   : > { %s1538_s28 = sadd.s32 %s1535_s26, %s1307_s27  ;;  %s2044_s30 = smov (!%p345_p7, %s1310_s30), 0 }
  0x13   : > { %s1309_s29 = sshll.u32 %s1538_s28, 3  ;;  %s1311_s9 = sshll.u32 %s2044_s30, 3 }
  0x14   : > { %s1547_s8 = scalar_lea.vmem %s2019_s0, %s1309_s29  ;;  %p350_p9 = scmp.lt.s32.totalorder %s1311_s9, 15 }
  0x15   : > { %v404_v0 = vld [vmem:[%s1547_s8 + $0x40] sm:$0xff]  ;;  %v405_v1 = vld [vmem:[%s1547_s8 + $0x48] sm:$0xff]  ;;  %v406_v5 = vld [vmem:[%s1547_s8 + $0x50] sm:$0xff]  ;;  %s1562_s10 = scalar_select %p390_p8, 1, 0 }
  0x16   : > { %v396_v2 = vld [vmem:[%s1547_s8] sm:$0xff]  ;;  %v416_v3 = vpack.c.bf16 %v405_v1, %v404_v0  ;;  %v397_v4 = vld [vmem:[%s1547_s8 + $0x8] sm:$0xff]  ;;  %v407_v6 = vld [vmem:[%s1547_s8 + $0x58] sm:$0xff]  ;;  %s2046_s9 = smov (!%p350_p9, %s1311_s9), 15  ;;  %s2048_s11 = smov (!%p1575_p10, %s361_s11), 1 }
  0x17   : > { %v412_v7 = vpack.c.bf16 %v397_v4, %v396_v2  ;;  %v417_v8 = vpack.c.bf16 %v407_v6, %v406_v5  ;;  %v398_v9 = vld [vmem:[%s1547_s8 + $0x10] sm:$0xff]  ;;  %v399_v10 = vld [vmem:[%s1547_s8 + $0x18] sm:$0xff]  ;;  %s1312_s12 = sshll.u32 %s2046_s9, 1  ;;  %s392_s17 = scvt.s32.f32 %s1562_s10 }
  0x18   : > { %v402_v11 = vld [vmem:[%s1547_s8 + $0x30] sm:$0xff]  ;;  %v469_v12 = vshrl.u32 %v416_v3, 16  ;;  %v472_v13 = vshll.u32 %v416_v3, 16  ;;  %v413_v14 = vpack.c.bf16 %v399_v10, %v398_v9  ;;  %v403_v15 = vld [vmem:[%s1547_s8 + $0x38] sm:$0xff]  ;;  %s354_s14 = sadd.s32 %s1312_s12, %s1535_s26  ;;  %s1315_s30 = sshll.u32 %s2048_s11, 3 }
  0x19   : > { %v441_v16 = vshrl.u32 %v412_v7, 16  ;;  %v444_v17 = vshll.u32 %v412_v7, 16  ;;  %v476_v18 = vshrl.u32 %v417_v8, 16  ;;  %v479_v19 = vshll.u32 %v417_v8, 16  ;;  %s1314_s16 = sshll.u32 %s354_s14, 3  ;;  %p1631_p11 = scmp.lt.s32.totalorder %s1315_s30, 15 }
  0x1a   : > { %v471_v20 = vrot.slane %v469_v12, 7  ;;  %v448_v21 = vshrl.u32 %v413_v14, 16  ;;  %v451_v22 = vshll.u32 %v413_v14, 16  ;;  %v415_v23 = vpack.c.bf16 %v403_v15, %v402_v11  ;;  %s356_s27 = scalar_lea.vmem %s2020_s1, %s1314_s16  ;;  %s1465_s10 = smov 3  }
  0x1b   : > { %v443_v25 = vrot.slane %v441_v16, 7  ;;  %v1569_v26 = vrot.slane %v476_v18, 7  ;;  %v423_v54 = vstv %s392_s17  ;;  %v1323_v59 = vld [vmem:[%s356_s27 + $0x70] sm:$0xff]  ;;  %v1324_v0 = vld [vmem:[%s356_s27 + $0x78] sm:$0xff]  ;;  %s2050_s30 = smov (!%p1631_p11, %s1315_s30), 15  ;;  %s1467_s17 = smov 15  }
  0x1c   : > { %v474_v27 = vor.u32 %v472_v13, %v471_v20  ;;  %v450_v28 = vrot.slane %v448_v21, 7  ;;  %v462_v29 = vshrl.u32 %v415_v23, 16  ;;  %v465_v30 = vshll.u32 %v415_v23, 16  ;;  %s1316_s9 = sshll.u32 %s2050_s30, 1  ;;  %s1468_s19 = smov 18  }
  0x1d   : > { %v446_v31 = vor.u32 %v444_v17, %v443_v25  ;;  %v481_v32 = vor.u32 %v479_v19, %v1569_v26  ;;  %v537_v33 = vsel %vm1565_vm2, %v443_v25, 0  ;;  %v541_v45 = vsel %vm1565_vm2, %v471_v20, 0  ;;  %s1679_s11 = sadd.s32 %s1316_s9, %s1535_s26  ;;  %s1470_s9 = smov 21  }
  0x1e   : > { %v1581_v34 = vsel %vm1565_vm2, 0, %v474_v27  ;;  %v453_v35 = vor.u32 %v451_v22, %v450_v28  ;;  %v464_v36 = vrot.slane %v462_v29, 7  ;;  %v680_v38 = vrot.slane %v537_v33, 1  ;;  %v409_v29 = vld [vmem:[%s1547_s8 + $0x68] sm:$0xff]  ;;  %s1691_s12 = scalar_select %p393_p12, 1, 0 }
  0x1f   : > { %725 = vrot.lane.b32.xlu1 %v1581_v34, %s1463_s15  ;;  %v1588_v37 = vsel %vm1565_vm2, 0, %v446_v31  ;;  %v1595_v39 = vsel %vm1565_vm2, 0, %v481_v32  ;;  %v567_v50 = vshll.u32 %v537_v33, 16  ;;  %v691_v56 = vrot.slane %v1581_v34, 1  ;;  %v410_v31 = vld [vmem:[%s1547_s8 + $0x70] sm:$0xff]  ;;  %v411_v32 = vld [vmem:[%s1547_s8 + $0x78] sm:$0xff] }
  0x20   : > { %717 = vrot.lane.b32.xlu0 %v1588_v37, %s1463_s15  ;;  %v467_v40 = vor.u32 %v465_v30, %v464_v36  ;;  %v540_v41 = vsel %vm1565_vm2, %v464_v36, 0  ;;  %v679_v42 = vrot.slane %v1588_v37, 1  ;;  %v1605_v43 = vsel %vm1565_vm2, 0, %v453_v35  ;;  %v400_v36 = vld [vmem:[%s1547_s8 + $0x20] sm:$0xff]  ;;  %s1318_s26 = sshll.u32 %s1679_s11, 3  ;;  %s395_s18 = scvt.s32.f32 %s1691_s12 }
  0x21   : > { %v689_v44 = vrot.slane %v540_v41, 1  ;;  %v603_v46 = vshll.u32 %v540_v41, 16  ;;  %v560_v48 = vshrl.u32 %v1588_v37, 16  ;;  %v562_v49 = vshll.u32 %v1588_v37, 16  ;;  %s373_s16 = scalar_lea.vmem %s2021_s2, %s1318_s26  ;;  %s1471_s11 = smov 24  }
  0x22   : > { %v1615_v47 = vsel %vm1565_vm2, 0, %v467_v40  ;;  %v1628_v55 = vsel %vm675_vm3, %v679_v42, %v680_v38  ;;  %v692_v57 = vrot.slane %v541_v45, 1  ;;  %v574_v63 = vshll.u32 %v1605_v43, 16  ;;  %v401_v38 = vld [vmem:[%s1547_s8 + $0x28] sm:$0xff] }
  0x23   : > { %727 = vrot.lane.b32.xlu1 %v1595_v39, %s1463_s15  ;;  %v688_v51 = vrot.slane %v1615_v47, 1  ;;  %v596_v52 = vshrl.u32 %v1615_v47, 16  ;;  %v598_v53 = vshll.u32 %v1615_v47, 16  ;;  %v564_v58 = vrot.slane %v562_v49, 1 }
  0x24   : > { %719 = vrot.lane.b32.xlu0 %v1605_v43, %s1463_s15  ;;  %v605_v62 = vrot.slane %v603_v46, 1  ;;  %v569_v2 = vrot.slane %v567_v50, 1  ;;  %v1641_v3 = vsel %vm1565_vm2, %v450_v28, 0  ;;  %v610_v4 = vshll.u32 %v1581_v34, 16  ;;  %v408_v28 = vld [vmem:[%s1547_s8 + $0x60] sm:$0xff] }
  0x25   : > { %v1636_v60 = vsel %vm675_vm3, %v688_v51, %v689_v44  ;;  %v600_v61 = vrot.slane %v598_v53, 1  ;;  %v565_v1 = vor.u32 %v564_v58, %v560_v48  ;;  %v608_v6 = vshrl.u32 %v1581_v34, 16 }
  0x26   : > { %v615_v7 = vshll.u32 %v541_v45, 16  ;;  %v424_v8 = vmul.f32 %v1323_v59, %v423_v54  ;;  %v1654_v9 = vsel %vm675_vm3, %v691_v56, %v692_v57  ;;  %v612_v10 = vrot.slane %v610_v4, 1 }
  0x27   : > { %708 = vrot.lane.b32.xlu1 %v1636_v60, %s1464_s7  ;;  %v601_v5 = vor.u32 %v600_v61, %v596_v52  ;;  %v425_v11 = vmul.f32 %v1324_v0, %v423_v54  ;;  %v572_v13 = vshrl.u32 %v1605_v43, 16  ;;  %v576_v14 = vrot.slane %v574_v63, 1  ;;  %v427_v0 = vld [vmem:[%s373_s16] sm:$0xff] }
  0x28   : > { %702 = vrot.lane.b32.xlu0 %v1628_v55, %s1464_s7  ;;  %v579_v15 = vshll.u32 %v1641_v3, 16  ;;  %v570_v17 = vsel %vm546_vm4, %v565_v1, %v569_v2  ;;  %v613_v18 = vor.u32 %v612_v10, %v608_v6  ;;  %v617_v19 = vrot.slane %v615_v7, 1  ;;  %v428_v6 = vld [vmem:[%s373_s16 + $0x8] sm:$0xff] }
  0x29   : > { %v1657_v12 = vsel %vm546_vm4, %v601_v5, %v605_v62  ;;  %v426_v16 = vpack.c.bf16 %v425_v11, %v424_v8  ;;  %v1671_v22 = vsel %vm1565_vm2, %v1569_v26, 0  ;;  %v622_v23 = vshll.u32 %v1595_v39, 16 }
  0x2a   : > { %v577_v25 = vor.u32 %v576_v14, %v572_v13  ;;  %v581_v27 = vrot.slane %v579_v15, 1  ;;  %v1683_v33 = vsel %vm546_vm4, %v613_v18, %v617_v19  ;;  %v620_v26 = vshrl.u32 %v1595_v39, 16 }
  0x2b   : > { %710 = vrot.lane.b32.xlu1 %v1654_v9, %s1464_s7  ;;  %v434_v20 = vshrl.u32 %v426_v16, 16  ;;  %v437_v21 = vshll.u32 %v426_v16, 16  ;;  %v627_v35 = vshll.u32 %v1671_v22, 16  ;;  %v624_v42 = vrot.slane %v622_v23, 1 }
  0x2c   : > { %651 = vrot.lane.b32.xlu0 %v1657_v12, %s1465_s10  ;;  %v418_v44 = vpack.c.bf16 %v409_v29, %v408_v28  ;;  %v1697_v45 = vsel %vm546_vm4, %v577_v25, %v581_v27  ;;  %v419_v48 = vpack.c.bf16 %v411_v32, %v410_v31  ;;  %v414_v50 = vpack.c.bf16 %v401_v38, %v400_v36 }
  0x2d   : > { %v436_v30 = vrot.slane %v434_v20, 7  ;;  %v625_v53 = vor.u32 %v624_v42, %v620_v26  ;;  %v629_v54 = vrot.slane %v627_v35, 1  ;;  %v429_v1 = vstv %s395_s18 }
  0x2e   : > { %v483_v57 = vshrl.u32 %v418_v44, 16  ;;  %v490_v62 = vshrl.u32 %v419_v48, 16  ;;  %v455_v63 = vshrl.u32 %v414_v50, 16  ;;  %v486_v5 = vshll.u32 %v418_v44, 16 }
  0x2f   : > { %645 = vrot.lane.b32.xlu1 %v570_v17, %s1465_s10  ;;  %v439_v40 = vor.u32 %v437_v21, %v436_v30  ;;  %v536_v41 = vsel %vm1565_vm2, %v436_v30, 0  ;;  %v1720_v2 = vsel %vm546_vm4, %v625_v53, %v629_v54  ;;  %v458_v13 = vshll.u32 %v414_v50, 16 }
  0x30   : > { %745 = vrot.lane.b32.xlu0 %v570_v17, %s1466_s13  ;;  %v677_v46 = vrot.slane %v536_v41, 1  ;;  %v555_v56 = vshll.u32 %v536_v41, 16  ;;  %v485_v4 = vrot.slane %v483_v57, 7  ;;  %v492_v10 = vrot.slane %v490_v62, 7 }
  0x31   : > { %v1702_v49 = vsel %vm1565_vm2, 0, %v439_v40  ;;  %v457_v11 = vrot.slane %v455_v63, 7  ;;  %v493_v14 = vshll.u32 %v419_v48, 16  ;;  %v430_v15 = vmul.f32 %v429_v1, %v427_v0 }
  0x32   : > { %v676_v51 = vrot.slane %v1702_v49, 1  ;;  %v550_v52 = vshll.u32 %v1702_v49, 16  ;;  %v548_v59 = vshrl.u32 %v1702_v49, 16  ;;  %v557_v8 = vrot.slane %v555_v56, 1 }
  0x33   : > { %653 = vrot.lane.b32.xlu1 %v1683_v33, %s1465_s10  ;;  %v682_v16 = vrot.slane %v1605_v43, 1  ;;  %v683_v17 = vrot.slane %v1641_v3, 1  ;;  %v544_v18 = vsel %vm1565_vm2, %v492_v10, 0  ;;  %v431_v19 = vmul.f32 %v429_v1, %v428_v6 }
  0x34   : > { %747 = vrot.lane.b32.xlu0 %v1697_v45, %s1466_s13  ;;  %v678_v58 = vsel %vm675_vm3, %v676_v51, %v677_v46  ;;  %v552_v61 = vrot.slane %v550_v52, 1  ;;  %v694_v20 = vrot.slane %v1595_v39, 1  ;;  %v695_v21 = vrot.slane %v1671_v22, 1 }
  0x35   : > { %v488_v23 = vor.u32 %v486_v5, %v485_v4  ;;  %v495_v25 = vor.u32 %v493_v14, %v492_v10  ;;  %v741_v28 = vshll.u32 %v544_v18, 16  ;;  %v763_v29 = vrot.slane %v544_v18, 1 }
  0x36   : > { %v553_v7 = vor.u32 %v552_v61, %v548_v59  ;;  %v432_v30 = vpack.c.bf16 %v431_v19, %v430_v15  ;;  %v460_v3 = vor.u32 %v458_v13, %v457_v11  ;;  %v1744_v35 = vsel %vm675_vm3, %v682_v16, %v683_v17  ;;  %v1421_v15 = vld [vmem:[%s2022_s3] sm:$0xff]   ;;  %v1422_v19 = vld [vmem:[%s2022_s3 + $0x8] sm:$0x3f]  }
  0x37   : > { %753 = vrot.lane.b32.xlu1 %v1683_v33, %s1466_s13  ;;  %v1735_v31 = vsel %vm1565_vm2, 0, %v495_v25  ;;  %v1747_v36 = vsel %vm675_vm3, %v694_v20, %v695_v21  ;;  %v1751_v38 = vsel %vm1565_vm2, 0, %v488_v23  ;;  %v743_v42 = vrot.slane %v741_v28, 1  ;;  %1348 = vmatprep.subr.bf16.mxu0 %v1421_v15 }
  0x38   : > { %700 = vrot.lane.b32.xlu0 %v678_v58, %s1464_s7  ;;  %v558_v27 = vsel %vm546_vm4, %v553_v7, %v557_v8  ;;  %v736_v32 = vshll.u32 %v1735_v31, 16  ;;  %v762_v22 = vrot.slane %v1735_v31, 1  ;;  %v497_v26 = vshrl.u32 %v432_v30, 16  ;;  %1368 = vmatprep.subr.bf16.mxu1 %v1421_v15 }
  0x39   : > { %v500_v40 = vshll.u32 %v432_v30, 16  ;;  %v1758_v48 = vsel %vm1565_vm2, 0, %v460_v3  ;;  %v1768_v53 = vsel %vm1565_vm2, %v485_v4, 0  ;;  %v634_v54 = vshll.u32 %v1751_v38, 16  ;;  %1349 = vmatpush3.bf16.msra.mxu0 %v1421_v15  ;;  %1370 = vmatpush3.bf16.msra.mxu1 %v1421_v15 }
  0x3a   : > { %v738_v41 = vrot.slane %v736_v32, 1  ;;  %v1754_v44 = vsel %vm675_vm3, %v762_v22, %v763_v29  ;;  %v499_v46 = vrot.slane %v497_v26, 7  ;;  %v586_v58 = vshll.u32 %v1758_v48, 16 }
  0x3b   : > { %755 = vrot.lane.b32.xlu1 %v1720_v2, %s1466_s13  ;;  %v539_v62 = vsel %vm1565_vm2, %v457_v11, 0  ;;  %v632_v4 = vshrl.u32 %v1751_v38, 16  ;;  %v639_v5 = vshll.u32 %v1768_v53, 16  ;;  %v636_v6 = vrot.slane %v634_v54, 1 }
  0x3c   : > { %765 = vrot.lane.b32.xlu0 %v1628_v55, %s1467_s17  ;;  %v734_v55 = vshrl.u32 %v1735_v31, 16  ;;  %v502_v51 = vor.u32 %v500_v40, %v499_v46  ;;  %v545_v52 = vsel %vm1565_vm2, %v499_v46, 0  ;;  %v584_v10 = vshrl.u32 %v1758_v48, 16 }
  0x3d   : > { %v806_v56 = vshll.u32 %v545_v52, 16  ;;  %v828_v57 = vrot.slane %v545_v52, 1  ;;  %v588_v11 = vrot.slane %v586_v58, 1  ;;  %v591_v13 = vshll.u32 %v539_v62, 16 }
  0x3e   : > { %v739_v50 = vor.u32 %v738_v41, %v734_v55  ;;  %v1777_v61 = vsel %vm1565_vm2, 0, %v502_v51  ;;  %v641_v16 = vrot.slane %v639_v5, 1  ;;  %v637_v17 = vor.u32 %v636_v6, %v632_v4 }
  0x3f   : > { %773 = vrot.lane.b32.xlu1 %v1654_v9, %s1467_s17  ;;  %v799_v63 = vshrl.u32 %v1777_v61, 16  ;;  %v801_v0 = vshll.u32 %v1777_v61, 16  ;;  %v827_v1 = vrot.slane %v1777_v61, 1  ;;  %v808_v7 = vrot.slane %v806_v56, 1 }
  0x40   : > { %643 = vrot.lane.b32.xlu0 %v558_v27, %s1465_s10  ;;  %v1773_v59 = vsel %vm546_vm4, %v739_v50, %v743_v42  ;;  %v1469_v20 = vmov 65535   ;;  %v589_v23 = vor.u32 %v588_v11, %v584_v10  ;;  %v593_v25 = vrot.slane %v591_v13, 1 }
  0x41   : > { %v803_v24 = vrot.slane %v801_v0, 1  ;;  %v1791_v8 = vsel %vm675_vm3, %v827_v1, %v828_v57  ;;  %v1023_v21 = vsel %vm1021_vm5, 4294967295, %v1469_v20  ;;  %v642_v29 = vsel %vm546_vm4, %v637_v17, %v641_v16 }
  0x42   : > { %v1024_v27 = vsel %vm1022_vm6, %v1023_v21, 0  ;;  %v594_v30 = vsel %vm546_vm4, %v589_v23, %v593_v25  ;;  %v697_v3 = vrot.slane %v1751_v38, 1  ;;  %v698_v55 = vrot.slane %v1768_v53, 1 }
  0x43   : > { %775 = vrot.lane.b32.xlu1 %v1747_v36, %s1467_s17  ;;  %v804_v14 = vor.u32 %v803_v24, %v799_v63  ;;  %v1026_v28 = vand.u32 %v1422_v19, %v1024_v27  ;;  %v685_v32 = vrot.slane %v1758_v48, 1  ;;  %v686_v22 = vrot.slane %v539_v62, 1 }
  0x44   : > { %767 = vrot.lane.b32.xlu0 %v1744_v35, %s1467_s17  ;;  %v699_v26 = vsel %vm675_vm3, %v697_v3, %v698_v55 }
  0x45   : > { %v809_v18 = vsel %vm546_vm4, %v804_v14, %v808_v7  ;;  %1350 = vmatprep.subr.bf16.mxu0 %v1026_v28  ;;  %1369 = vmatprep.subr.bf16.mxu1 %v1026_v28  ;;  %v687_v40 = vsel %vm675_vm3, %v685_v32, %v686_v22 }
  0x46   : > { %1351 = vmatpush3.bf16.msra.mxu0 %v1026_v28  ;;  %1371 = vmatpush3.bf16.msra.mxu1 %v1026_v28 }
  0x47   : > { %790 = vrot.lane.b32.xlu1 %v1595_v39, %s1468_s19 }
  0x48   : > { %782 = vrot.lane.b32.xlu0 %v1605_v43, %s1468_s19 }
  0x4b   : > { %792 = vrot.lane.b32.xlu1 %v1751_v38, %s1468_s19 }
  0x4c   : > { %784 = vrot.lane.b32.xlu0 %v1758_v48, %s1468_s19 }
  0x4f   : > { %818 = vrot.lane.b32.xlu1 %v1720_v2, %s1470_s9 }
  0x50   : > { %810 = vrot.lane.b32.xlu0 %v1697_v45, %s1470_s9 }
  0x53   : > { %820 = vrot.lane.b32.xlu1 %v642_v29, %s1470_s9 }
  0x54   : > { %812 = vrot.lane.b32.xlu0 %v594_v30, %s1470_s9 }
  0x57   : > { %838 = vrot.lane.b32.xlu1 %v1747_v36, %s1471_s11 }
  0x58   : > { %830 = vrot.lane.b32.xlu0 %v1744_v35, %s1471_s11 }
  0x5b   : > { %655 = vrot.lane.b32.xlu1 %v1720_v2, %s1465_s10 }
  0x5c   : > { %647 = vrot.lane.b32.xlu0 %v1697_v45, %s1465_s10 }
  0x5f   : > { %840 = vrot.lane.b32.xlu1 %v699_v26, %s1471_s11 }
  0x60   : > { %832 = vrot.lane.b32.xlu0 %v687_v40, %s1471_s11 }
  0x63   : > { %657 = vrot.lane.b32.xlu1 %v642_v29, %s1465_s10 }
  0x64   : > { %649 = vrot.lane.b32.xlu0 %v594_v30, %s1465_s10 }
  0x67   : > { %712 = vrot.lane.b32.xlu1 %v1747_v36, %s1464_s7 }
  0x68   : > { %704 = vrot.lane.b32.xlu0 %v1744_v35, %s1464_s7 }
  0x6b   : > { %714 = vrot.lane.b32.xlu1 %v699_v26, %s1464_s7 }
  0x6c   : > { %706 = vrot.lane.b32.xlu0 %v687_v40, %s1464_s7 }
  0x6f   : > { %729 = vrot.lane.b32.xlu1 %v1751_v38, %s1463_s15 }
  0x70   : > { %721 = vrot.lane.b32.xlu0 %v1758_v48, %s1463_s15 }
  0x73   : > { %731 = vrot.lane.b32.xlu1 %v1735_v31, %s1463_s15 }
  0x74   : > { %723 = vrot.lane.b32.xlu0 %v1615_v47, %s1463_s15 }
  0x77   : > { %757 = vrot.lane.b32.xlu1 %v642_v29, %s1466_s13 }
  0x78   : > { %749 = vrot.lane.b32.xlu0 %v594_v30, %s1466_s13 }
  0x7b   : > { %759 = vrot.lane.b32.xlu1 %v1773_v59, %s1466_s13 }
  0x7c   : > { %751 = vrot.lane.b32.xlu0 %v1657_v12, %s1466_s13  ;;  %s1970_s13 = scalar_lea.vmem %s2024_s5, %s1309_s29 }
  0x7f   : > { %777 = vrot.lane.b32.xlu1 %v699_v26, %s1467_s17 }
  0x80   : > { %769 = vrot.lane.b32.xlu0 %v687_v40, %s1467_s17 }
  0x83   : > { %779 = vrot.lane.b32.xlu1 %v1754_v44, %s1467_s17 }
  0x84   : > { %771 = vrot.lane.b32.xlu0 %v1636_v60, %s1467_s17 }
  0x87   : > { %794 = vrot.lane.b32.xlu1 %v1735_v31, %s1468_s19 }
  0x88   : > { %786 = vrot.lane.b32.xlu0 %v1615_v47, %s1468_s19 }
  0x8b   : > { %796 = vrot.lane.b32.xlu1 %v1777_v61, %s1468_s19 }
  0x8c   : > { %788 = vrot.lane.b32.xlu0 %v1581_v34, %s1468_s19 }
  0x8f   : > { %822 = vrot.lane.b32.xlu1 %v1773_v59, %s1470_s9 }
  0x90   : > { %814 = vrot.lane.b32.xlu0 %v1657_v12, %s1470_s9 }
  0x91   : > { %v726_v45 = vpop.permute.xlu1 %725 }
  0x92   : > { %v718_v2 = vpop.permute.xlu0 %717 }
  0x93   : > { %824 = vrot.lane.b32.xlu1 %v809_v18, %s1470_s9 }
  0x94   : > { %816 = vrot.lane.b32.xlu0 %v1683_v33, %s1470_s9 }
  0x95   : > { %v1871_v31 = vpop.permute.xlu1 %727 }
  0x96   : > { %v720_v35 = vpop.permute.xlu0 %719 }
  0x97   : > { %842 = vrot.lane.b32.xlu1 %v1754_v44, %s1471_s11 }
  0x98   : > { %834 = vrot.lane.b32.xlu0 %v1636_v60, %s1471_s11 }
  0x99   : > { %v709_v36 = vpop.permute.xlu1 %708 }
  0x9a   : > { %v703_v41 = vpop.permute.xlu0 %702 }
  0x9b   : > { %844 = vrot.lane.b32.xlu1 %v1791_v8, %s1471_s11 }
  0x9c   : > { %836 = vrot.lane.b32.xlu0 %v1654_v9, %s1471_s11 }
  0x9d   : > { %v711_v12 = vpop.permute.xlu1 %710 }
  0x9e   : > { %v652_v42 = vpop.permute.xlu0 %651 }
  0x9f   : > { %v856_v0 = vsel %vm846_vm7, %v1615_v47, %v652_v42 }
  0xa0   : > { %v873_v5 = vsel %vm863_vm8, %v856_v0, %v709_v36 }
  0xa1   : > { %v646_v33 = vpop.permute.xlu1 %645  ;;  %v890_v7 = vsel %vm880_vm9, %v873_v5, %v726_v45 }
  0xa2   : > { %v746_v46 = vpop.permute.xlu0 %745  ;;  %v850_v47 = vsel %vm846_vm7, %v1588_v37, %v646_v33 }
  0xa3   : > { %v867_v17 = vsel %vm863_vm8, %v850_v47, %v703_v41 }
  0xa4   : > { %v884_v27 = vsel %vm880_vm9, %v867_v17, %v720_v35 }
  0xa5   : > { %v654_v50 = vpop.permute.xlu1 %653 }
  0xa6   : > { %v748_v51 = vpop.permute.xlu0 %747  ;;  %v858_v13 = vsel %vm846_vm7, %v1581_v34, %v654_v50 }
  0xa7   : > { %v875_v20 = vsel %vm863_vm8, %v858_v13, %v711_v12  ;;  %v901_v55 = vsel %vm897_vm10, %v884_v27, %v748_v51 }
  0xa8   : > { %v892_v28 = vsel %vm880_vm9, %v875_v20, %v1871_v31 }
  0xa9   : > { %v754_v52 = vpop.permute.xlu1 %753 }
  0xaa   : > { %v701_v53 = vpop.permute.xlu0 %700  ;;  %v907_v10 = vsel %vm897_vm10, %v890_v7, %v754_v52 }
  0xad   : > { %v756_v44 = vpop.permute.xlu1 %755 }
  0xae   : > { %v766_v54 = vpop.permute.xlu0 %765  ;;  %v909_v30 = vsel %vm897_vm10, %v892_v28, %v756_v44 }
  0xb1   : > { %v774_v56 = vpop.permute.xlu1 %773 }
  0xb2   : > { %v644_v60 = vpop.permute.xlu0 %643  ;;  %v924_v14 = vsel %vm914_vm11, %v907_v10, %v774_v56 }
  0xb3   : > { %v848_v9 = vsel %vm846_vm7, %v1702_v49, %v644_v60 }
  0xb4   : > { %v865_v1 = vsel %vm863_vm8, %v848_v9, %v701_v53 }
  0xb5   : > { %v776_v57 = vpop.permute.xlu1 %775  ;;  %v882_v6 = vsel %vm880_vm9, %v865_v1, %v718_v2 }
  0xb6   : > { %v768_v58 = vpop.permute.xlu0 %767  ;;  %v899_v49 = vsel %vm897_vm10, %v882_v6, %v746_v46  ;;  %v926_v32 = vsel %vm914_vm11, %v909_v30, %v776_v57 }
  0xb7   : > { %v916_v15 = vsel %vm914_vm11, %v899_v49, %v766_v54  ;;  %v918_v22 = vsel %vm914_vm11, %v901_v55, %v768_v58 }
  0xb9   : > { %v791_v59 = vpop.permute.xlu1 %790 }
  0xba   : > { %v783_v61 = vpop.permute.xlu0 %782  ;;  %v941_v16 = vsel %vm931_vm12, %v924_v14, %v791_v59 }
  0xbb   : > { %v933_v18 = vsel %vm931_vm12, %v916_v15, %v783_v61 }
  0xbd   : > { %v793_v62 = vpop.permute.xlu1 %792 }
  0xbe   : > { %v785_v63 = vpop.permute.xlu0 %784  ;;  %v943_v26 = vsel %vm931_vm12, %v926_v32, %v793_v62 }
  0xbf   : > { %v935_v40 = vsel %vm931_vm12, %v918_v22, %v785_v63 }
  0xc1   : > { %v819_v4 = vpop.permute.xlu1 %818 }
  0xc2   : > { %v811_v24 = vpop.permute.xlu0 %810  ;;  %v958_v37 = vsel %vm948_vm13, %v941_v16, %v819_v4 }
  0xc3   : > { %v950_v21 = vsel %vm948_vm13, %v933_v18, %v811_v24 }
  0xc5   : > { %v821_v8 = vpop.permute.xlu1 %820 }
  0xc6   : > { %v813_v11 = vpop.permute.xlu0 %812  ;;  %v960_v45 = vsel %vm948_vm13, %v943_v26, %v821_v8 }
  0xc7   : > { %v952_v35 = vsel %vm948_vm13, %v935_v40, %v813_v11 }
  0xc9   : > { %v839_v19 = vpop.permute.xlu1 %838 }
  0xca   : > { %v831_v34 = vpop.permute.xlu0 %830  ;;  %v975_v23 = vsel %vm965_vm14, %v958_v37, %v839_v19 }
  0xcb   : > { %v967_v25 = vsel %vm965_vm14, %v950_v21, %v831_v34  ;;  %1360 = vmatprep.mubr.msk.bf16.mxu1 %vm1004_vm15, %v975_v23 }
  0xcc   : > { %1352 = vmatprep.mubr.msk.bf16.mxu0 %vm1004_vm15, %v967_v25 }
  0xcd   : > { %v656_v29 = vpop.permute.xlu1 %655 }
  0xce   : > { %v648_v3 = vpop.permute.xlu0 %647  ;;  %v860_v33 = vsel %vm846_vm7, %v1595_v39, %v656_v29 }
  0xcf   : > { %v852_v50 = vsel %vm846_vm7, %v1605_v43, %v648_v3 }
  0xd1   : > { %v841_v2 = vpop.permute.xlu1 %840 }
  0xd2   : > { %v833_v31 = vpop.permute.xlu0 %832  ;;  %v977_v36 = vsel %vm965_vm14, %v960_v45, %v841_v2 }
  0xd3   : > { %v969_v41 = vsel %vm965_vm14, %v952_v35, %v833_v31  ;;  %1361 = vmatmul.mubr.msk.bf16.vlgmr.msra.gmra.mrb[0].mxu1 %vm1004_vm15, %v977_v36  ;;  %v1325_v36 = vld [vmem:[%s2023_s4] ss:$0 sm:$0xff] }
  0xd4   : > { %1353 = vmatmul.mubr.msk.bf16.vlgmr.msra.gmra.mrb[0].mxu0 %vm1004_vm15, %v969_v41 }
  0xd5   : > { %v658_v12 = vpop.permute.xlu1 %657 }
  0xd6   : > { %v650_v42 = vpop.permute.xlu0 %649  ;;  %v862_v44 = vsel %vm846_vm7, %v1751_v38, %v658_v12 }
  0xd7   : > { %v854_v56 = vsel %vm846_vm7, %v1758_v48, %v650_v42 }
  0xd9   : > { %v713_v46 = vpop.permute.xlu1 %712 }
  0xda   : > { %v705_v51 = vpop.permute.xlu0 %704  ;;  %v877_v52 = vsel %vm863_vm8, %v860_v33, %v713_v46 }
  0xdb   : > { %v869_v53 = vsel %vm863_vm8, %v852_v50, %v705_v51 }
  0xdd   : > { %v715_v54 = vpop.permute.xlu1 %714 }
  0xde   : > { %v707_v60 = vpop.permute.xlu0 %706  ;;  %v879_v57 = vsel %vm863_vm8, %v862_v44, %v715_v54 }
  0xdf   : > { %v871_v39 = vsel %vm863_vm8, %v854_v56, %v707_v60 }
  0xe1   : > { %v730_v58 = vpop.permute.xlu1 %729 }
  0xe2   : > { %v722_v59 = vpop.permute.xlu0 %721  ;;  %v894_v47 = vsel %vm880_vm9, %v877_v52, %v730_v58 }
  0xe3   : > { %v886_v11 = vsel %vm880_vm9, %v869_v53, %v722_v59 }
  0xe5   : > { %v732_v43 = vpop.permute.xlu1 %731 }
  0xe6   : > { %v724_v61 = vpop.permute.xlu0 %723  ;;  %v896_v37 = vsel %vm880_vm9, %v879_v57, %v732_v43 }
  0xe7   : > { %v888_v34 = vsel %vm880_vm9, %v871_v39, %v724_v61 }
  0xe9   : > { %v758_v9 = vpop.permute.xlu1 %757 }
  0xea   : > { %v750_v62 = vpop.permute.xlu0 %749  ;;  %v911_v13 = vsel %vm897_vm10, %v894_v47, %v758_v9 }
  0xeb   : > { %v903_v15 = vsel %vm897_vm10, %v886_v11, %v750_v62 }
  0xed   : > { %v760_v63 = vpop.permute.xlu1 %759 }
  0xee   : > { %v752_v0 = vpop.permute.xlu0 %751  ;;  %v913_v23 = vsel %vm897_vm10, %v896_v37, %v760_v63 }
  0xef   : > { %v905_v29 = vsel %vm897_vm10, %v888_v34, %v752_v0 }
  0xf1   : > { %v778_v1 = vpop.permute.xlu1 %777 }
  0xf2   : > { %v770_v4 = vpop.permute.xlu0 %769  ;;  %v928_v16 = vsel %vm914_vm11, %v911_v13, %v778_v1 }
  0xf3   : > { %v920_v17 = vsel %vm914_vm11, %v903_v15, %v770_v4 }
  0xf5   : > { %v780_v38 = vpop.permute.xlu1 %779 }
  0xf6   : > { %v772_v5 = vpop.permute.xlu0 %771  ;;  %v930_v30 = vsel %vm914_vm11, %v913_v23, %v780_v38 }
  0xf7   : > { %v922_v55 = vsel %vm914_vm11, %v905_v29, %v772_v5 }
  0xf9   : > { %v795_v6 = vpop.permute.xlu1 %794 }
  0xfa   : > { %v787_v24 = vpop.permute.xlu0 %786  ;;  %v945_v18 = vsel %vm931_vm12, %v928_v16, %v795_v6 }
  0xfb   : > { %v937_v19 = vsel %vm931_vm12, %v920_v17, %v787_v24 }
  0xfd   : > { %v797_v48 = vpop.permute.xlu1 %796 }
  0xfe   : > { %v789_v7 = vpop.permute.xlu0 %788  ;;  %v947_v32 = vsel %vm931_vm12, %v930_v30, %v797_v48 }
  0xff   : > { %v939_v22 = vsel %vm931_vm12, %v922_v55, %v789_v7 }
 0x101   : > { %v823_v49 = vpop.permute.xlu1 %822 }
 0x102   : > { %v815_v8 = vpop.permute.xlu0 %814  ;;  %v962_v20 = vsel %vm948_vm13, %v945_v18, %v823_v49 }
 0x103   : > { %v954_v25 = vsel %vm948_vm13, %v937_v19, %v815_v8 }
 0x105   : > { %v825_v10 = vpop.permute.xlu1 %824 }
 0x106   : > { %v817_v14 = vpop.permute.xlu0 %816  ;;  %v964_v26 = vsel %vm948_vm13, %v947_v32, %v825_v10 }
 0x107   : > { %v956_v45 = vsel %vm948_vm13, %v939_v22, %v817_v14 }
 0x109   : > { %v843_v21 = vpop.permute.xlu1 %842 }
 0x10a   : > { %v835_v27 = vpop.permute.xlu0 %834  ;;  %v979_v28 = vsel %vm965_vm14, %v962_v20, %v843_v21 }
 0x10b   : > { %v971_v3 = vsel %vm965_vm14, %v954_v25, %v835_v27  ;;  %1364 = vmatprep.mubr.msk.bf16.mxu1 %vm1004_vm15, %v979_v28 }
 0x10c   : > { %1356 = vmatprep.mubr.msk.bf16.mxu0 %vm1004_vm15, %v971_v3 }
 0x10d   : > { %v845_v40 = vpop.permute.xlu1 %844 }
 0x10e   : > { %v837_v2 = vpop.permute.xlu0 %836  ;;  %v981_v35 = vsel %vm965_vm14, %v964_v26, %v845_v40 }
 0x10f   : > { %v973_v31 = vsel %vm965_vm14, %v956_v45, %v837_v2  ;;  %1365 = vmatmul.mubr.msk.bf16.gmra.mrb[4].mxu1 %vm1004_vm15, %v981_v35 }
 0x110   : > { %1357 = vmatmul.mubr.msk.bf16.gmra.mrb[4].mxu0 %vm1004_vm15, %v973_v31 }
 0x1a6   : > { %v1362_v41 = vpop.f32.mrb[0].mxu1 }
 0x1a7   : > { %v1354_v12 = vpop.f32.mrb[0].mxu0  ;;  %v1103_v42 = vadd.f32 %v1362_v41, %v1325_v36  ;;  %v1094_v33 = vpop.f32.mrb[1].mxu1 }
 0x1a8   : > { %v1071_v46 = vadd.f32 %v1354_v12, %v1325_v36  ;;  %v1062_v50 = vpop.f32.mrb[1].mxu0  ;;  %v1095_v51 = vadd.f32 %v1325_v36, %v1094_v33  ;;  %v1363_v52 = vpop.f32.mrb[2].mxu1 }
 0x1a9   : > { %v1135_v53 = vmax.f32 %v1103_v42, 0.0  ;;  %v1063_v44 = vadd.f32 %v1325_v36, %v1062_v50  ;;  %v1355_v54 = vpop.f32.mrb[2].mxu0  ;;  %v1106_v56 = vadd.f32 %v1363_v52, %v1325_v36  ;;  %v1097_v60 = vpop.f32.mrb[3].mxu1 }
 0x1aa   : > { %v1127_v57 = vmax.f32 %v1071_v46, 0.0  ;;  %v1133_v39 = vmax.f32 %v1095_v51, 0.0  ;;  %v1074_v58 = vadd.f32 %v1355_v54, %v1325_v36  ;;  %v1065_v59 = vpop.f32.mrb[3].mxu0  ;;  %v1098_v43 = vadd.f32 %v1325_v36, %v1097_v60 }
 0x1ab   : > { %1152 = vst.msk [vmem:[%s1970_s13 + $0x50] sm:$0xff] %vm1141_vm0, %v1135_v53  ;;  %v1125_v61 = vmax.f32 %v1063_v44, 0.0  ;;  %v1136_v9 = vmax.f32 %v1106_v56, 0.0  ;;  %v1066_v62 = vadd.f32 %v1325_v36, %v1065_v59 }
 0x1ac   : > { %1144 = vst.msk [vmem:[%s1970_s13 + $0x10] sm:$0xff] %vm1141_vm0, %v1127_v57  ;;  %1150 = vst.msk [vmem:[%s1970_s13 + $0x40] sm:$0xff] %vm1141_vm0, %v1133_v39  ;;  %v1128_v63 = vmax.f32 %v1074_v58, 0.0  ;;  %v1134_v0 = vmax.f32 %v1098_v43, 0.0 }
 0x1ad   : > { %1142 = vst.msk [vmem:[%s1970_s13] sm:$0xff] %vm1141_vm0, %v1125_v61  ;;  %1153 = vst.msk [vmem:[%s1970_s13 + $0x58] sm:$0xff] %vm1141_vm0, %v1136_v9  ;;  %v1126_v1 = vmax.f32 %v1066_v62, 0.0 }
 0x1ae   : > { %1145 = vst.msk [vmem:[%s1970_s13 + $0x18] sm:$0xff] %vm1141_vm0, %v1128_v63  ;;  %1151 = vst.msk [vmem:[%s1970_s13 + $0x48] sm:$0xff] %vm1141_vm0, %v1134_v0 }
 0x1af   : > { %1143 = vst.msk [vmem:[%s1970_s13 + $0x8] sm:$0xff] %vm1141_vm0, %v1126_v1 }
 0x1e2   : > { %v1366_v4 = vpop.f32.mrb[4].mxu1 }
 0x1e3   : > { %v1358_v38 = vpop.f32.mrb[4].mxu0  ;;  %v1119_v5 = vadd.f32 %v1366_v4, %v1325_v36  ;;  %v1110_v6 = vpop.f32.mrb[5].mxu1 }
 0x1e4   : > { %v1087_v24 = vadd.f32 %v1358_v38, %v1325_v36  ;;  %v1078_v48 = vpop.f32.mrb[5].mxu0  ;;  %v1111_v7 = vadd.f32 %v1325_v36, %v1110_v6  ;;  %v1367_v49 = vpop.f32.mrb[6].mxu1 }
 0x1e5   : > { %v1139_v8 = vmax.f32 %v1119_v5, 0.0  ;;  %v1079_v47 = vadd.f32 %v1325_v36, %v1078_v48  ;;  %v1359_v10 = vpop.f32.mrb[6].mxu0  ;;  %v1122_v11 = vadd.f32 %v1367_v49, %v1325_v36  ;;  %v1113_v13 = vpop.f32.mrb[7].mxu1 }
 0x1e6   : > { %v1131_v14 = vmax.f32 %v1087_v24, 0.0  ;;  %v1137_v15 = vmax.f32 %v1111_v7, 0.0  ;;  %v1090_v16 = vadd.f32 %v1359_v10, %v1325_v36  ;;  %v1081_v17 = vpop.f32.mrb[7].mxu0  ;;  %v1114_v18 = vadd.f32 %v1325_v36, %v1113_v13 }
 0x1e7   : > { %1156 = vst.msk [vmem:[%s1970_s13 + $0x70] sm:$0xff] %vm1141_vm0, %v1139_v8  ;;  %v1129_v37 = vmax.f32 %v1079_v47, 0.0  ;;  %v1140_v19 = vmax.f32 %v1122_v11, 0.0  ;;  %v1082_v20 = vadd.f32 %v1325_v36, %v1081_v17 }
 0x1e8   : > { %1148 = vst.msk [vmem:[%s1970_s13 + $0x30] sm:$0xff] %vm1141_vm0, %v1131_v14  ;;  %1154 = vst.msk [vmem:[%s1970_s13 + $0x60] sm:$0xff] %vm1141_vm0, %v1137_v15  ;;  %v1132_v21 = vmax.f32 %v1090_v16, 0.0  ;;  %v1138_v34 = vmax.f32 %v1114_v18, 0.0 }
 0x1e9   : > { %1146 = vst.msk [vmem:[%s1970_s13 + $0x20] sm:$0xff] %vm1141_vm0, %v1129_v37  ;;  %1157 = vst.msk [vmem:[%s1970_s13 + $0x78] sm:$0xff] %vm1141_vm0, %v1140_v19  ;;  %v1130_v23 = vmax.f32 %v1082_v20, 0.0 }
 0x1ea   : > { %1149 = vst.msk [vmem:[%s1970_s13 + $0x38] sm:$0xff] %vm1141_vm0, %v1132_v21  ;;  %1155 = vst.msk [vmem:[%s1970_s13 + $0x68] sm:$0xff] %vm1141_vm0, %v1138_v34 }
 0x1eb   : > { %1147 = vst.msk [vmem:[%s1970_s13 + $0x28] sm:$0xff] %vm1141_vm0, %v1130_v23 }
 0x1ec PF: > { %s15_s22 = sadd.s32 1, %s1461_s22   ;;  %s2029_s18 = smov %s1453_s20 }
 0x1ed   : > { %p12_p13 = scmp.ge.s32.totalorder %s15_s22, 10   ;;  %s2030_s19 = smov %s1457_s21 }
 0x1ee   : > { %s2031_s20 = smov %s2034_s23  ;;  %s2032_s21 = smov %s2038_s24 }
 0x1ef   :  { %14 = sbr.rel (!%p12_p13) target bundleno = 3 (0x3), region = 77 }

// kernel: vgg_loss.10
= control target key start
LH: loop header
LB: loop body
LE: loop exit
PB: predicated region body
PF: predicated region fallthrough
CT: control target
= control target key end

     0   :  { %s2035_s18 = smov 0   ;;  %s2037_s19 = smov 0   ;;  %s2678_s0 = inlined_call_operand.vmem [shape: f32[4,16,16,64], index: 0, kind: input, shape index: {}, may-alias: {0,1,2}]   ;;  %s2679_s1 = inlined_call_operand.vmem [shape: f32[4,16,16,64], index: 1, kind: input, shape index: {}, may-alias: {0,1,2}]   ;;  %s2680_s2 = inlined_call_operand.vmem [shape: f32[4,16,16,64], index: 2, kind: input, shape index: {}, may-alias: {0,1,2}]   ;;  %s2681_s3 = inlined_call_operand.vmem [shape: bf16[576,64], index: 3, kind: input, shape index: {}]   ;;  %s2682_s4 = inlined_call_operand.vmem [shape: f32[1,64], index: 4, kind: input, shape index: {}]   ;;  %s2683_s5 = inlined_call_operand.vmem [shape: f32[4,16,16,64], index: 5, kind: output, shape index: {}]  }
   0x1   :  { %s2039_s20 = smov 0   ;;  %s2041_s21 = smov 0  }
   0x2   :  { %s2043_s22 = smov 0  }
   0x3 LB: > { %s24_s23 = sadd.s32 1, %s1994_s20  ;;  %s27_s24 = sadd.s32 1, %s1998_s21  ;;  %s2002_s22 = sphi %s2043_s22, %s15_s22   ;;  %s1998_s21 = sphi %s2041_s21, %s2692_s21   ;;  %s1994_s20 = sphi %s2039_s20, %s2691_s20   ;;  %s1990_s19 = sphi %s2037_s19, %s2690_s19   ;;  %s1986_s18 = sphi %s2035_s18, %s2689_s18  }
   0x4   : > { %p25_p0 = scmp.ge.s32.totalorder %s24_s23, 2  ;;  %p1648_p1 = scmp.ge.s32.totalorder %s2002_s22, 1 }
   0x5   : > { %p269_p2 = scmp.lt.s32.totalorder %s2002_s22, 9 }
   0x6   : > { %s2694_s23 = smov (%p25_p0, %s24_s23), 0  ;;  %s2696_s24 = smov (!%p25_p0, %s27_s24), %s1998_s21 }
   0x7   : > { %p270_p3 = pnand %p1648_p1, %p269_p2  ;;  %p29_p4 = scmp.ge.s32.totalorder %s2696_s24, 4 }
   0x8   : > { %s1649_s25 = sshll.u32 (!%p270_p3), %s1986_s18, 3  ;;  %p334_p5 = scmp.lt.s32.totalorder (!%p270_p3), %s1990_s19, 3  ;;  %v1928_v0 = vld [vmem:[%s2681_s3 + $0xc0] sm:$0xff] (!%p270_p3)   ;;  %v1930_v2 = vld [vmem:[%s2681_s3 + $0xc8] sm:$0xff] (!%p270_p3)   ;;  %vm523_vm0 = vcmask (!%p270_p3), 1040384   ;;  %vm675_vm3 = vcmask (!%p270_p3), 1046528  }
   0x9   : > { %s2698_s24 = smov (%p29_p4, %s2696_s24), 0  ;;  %273 = sbr.rel (%p270_p3) target bundleno = 458 (0x1ca), region = 40 }
   0xa   : > { %p336_p6 = scmp.lt.s32.totalorder (!%p270_p3), %s1649_s25, 15  ;;  %v1929_v1 = vld [vmem:[%s2681_s3 + $0x80] sm:$0xff] (!%p270_p3)   ;;  %s1653_s6 = sadd.s32 (!%p270_p3), 4294967295, %s1986_s18  ;;  %1779 = vmatprep.subr.bf16.mxu1 (!%p270_p3), %v1928_v0  ;;  %v1932_v4 = vld [vmem:[%s2681_s3 + $0x88] sm:$0xff] (!%p270_p3)   ;;  %vm524_vm1 = vsmask.f32 (!%p270_p3), 256 }
   0xb   : > { %v1931_v3 = vld [vmem:[%s2681_s3 + $0x40] sm:$0xff] (!%p270_p3)   ;;  %p2083_p7 = scmp.gt.s32.totalorder (!%p270_p3), %s1653_s6, 0  ;;  %1780 = vmatpush3.bf16.msra.mxu1 (!%p270_p3), %v1929_v1  ;;  %p390_p8 = scmp.gt.s32.totalorder (!%p270_p3), %s1986_s18, 0  ;;  %vm546_vm2 = vsmask.f32 (!%p270_p3), 7424  ;;  %vm2130_vm4 = vmand (!%p270_p3), %vm523_vm0, %vm524_vm1  ;;  %v1934_v28 = vld [vmem:[%s2681_s3 + $0xd0] sm:$0xff] (!%p270_p3)  }
   0xc   : > { %1781 = vmatprep.subr.bf16.mxu1 (!%p270_p3), %v1930_v2  ;;  %1715 = vmatprep.subr.bf16.mxu0 (!%p270_p3), %v1931_v3  ;;  %s361_s26 = sadd.s32 (!%p270_p3), 1, %s1986_s18  ;;  %v1933_v5 = vld [vmem:[%s2681_s3] sm:$0xff] (!%p270_p3)   ;;  %v1935_v32 = vld [vmem:[%s2681_s3 + $0x48] sm:$0xff] (!%p270_p3)   ;;  %v1936_v37 = vld [vmem:[%s2681_s3 + $0x90] sm:$0xff] (!%p270_p3)   ;;  %p393_p12 = scmp.lt.s32.totalorder (!%p270_p3), %s1986_s18, 1  ;;  %vm770_vm5 = vcmask (!%p270_p3), 523264  }
   0xd   : > { %1716 = vmatpush3.bf16.msra.mxu0 (!%p270_p3), %v1933_v5  ;;  %p2122_p9 = scmp.lt.s32.totalorder (!%p270_p3), %s361_s26, 1  ;;  %v1937_v55 = vld [vmem:[%s2681_s3 + $0x8] sm:$0xff] (!%p270_p3)   ;;  %v1938_v3 = vld [vmem:[%s2681_s3 + $0xd8] sm:$0xff] (!%p270_p3)  }
   0xe   : > { %1717 = vmatprep.subr.bf16.mxu0 (!%p270_p3), %v1935_v32 }
   0xf   : > { %1782 = vmatpush3.bf16.msra.mxu1 (!%p270_p3), %v1932_v4 }
  0x10   : > { %s2700_s19 = smov (!%p334_p5, %s1990_s19), 3  ;;  %s2702_s25 = smov (!%p336_p6, %s1649_s25), 15  ;;  %1783 = vmatprep.subr.bf16.mxu1 %v1934_v28 }
  0x11   : > { %s2074_s30 = sshll.u32 %s2700_s19, 5  ;;  %s1650_s11 = sshll.u32 %s2702_s25, 1  ;;  %1718 = vmatpush3.bf16.msra.mxu0 %v1937_v55 }
  0x12   : > { %s2088_s13 = sadd.s32 %s2074_s30, %s1650_s11  ;;  %s2704_s6 = smov (!%p2083_p7, %s1653_s6), 0 }
  0x13   : > { %s1652_s16 = sshll.u32 %s2088_s13, 3  ;;  %s1654_s7 = sshll.u32 %s2704_s6, 3  ;;  %1784 = vmatpush3.bf16.msra.mxu1 %v1936_v37  ;;  %v1943_v37 = vld [vmem:[%s2681_s3 + $0x58] sm:$0xff]  }
  0x14   : > { %s2100_s25 = scalar_lea.vmem %s2678_s0, %s1652_s16  ;;  %p350_p10 = scmp.lt.s32.totalorder %s1654_s7, 15  ;;  %1785 = vmatprep.subr.bf16.mxu1 %v1938_v3 }
  0x15   : > { %v398_v6 = vld [vmem:[%s2100_s25 + $0x10] sm:$0xff]  ;;  %v399_v7 = vld [vmem:[%s2100_s25 + $0x18] sm:$0xff]  ;;  %v396_v8 = vld [vmem:[%s2100_s25] sm:$0xff]  ;;  %s2114_s29 = scalar_select %p390_p8, 1, 0 }
  0x16   : > { %v413_v9 = vpack.c.bf16 %v399_v7, %v398_v6  ;;  %v397_v10 = vld [vmem:[%s2100_s25 + $0x8] sm:$0xff]  ;;  %v400_v11 = vld [vmem:[%s2100_s25 + $0x20] sm:$0xff]  ;;  %v402_v15 = vld [vmem:[%s2100_s25 + $0x30] sm:$0xff]  ;;  %s2706_s7 = smov (!%p350_p10, %s1654_s7), 15  ;;  %s2708_s26 = smov (!%p2122_p9, %s361_s26), 1 }
  0x17   : > { %v401_v12 = vld [vmem:[%s2100_s25 + $0x28] sm:$0xff]  ;;  %v412_v13 = vpack.c.bf16 %v397_v10, %v396_v8  ;;  %v403_v16 = vld [vmem:[%s2100_s25 + $0x38] sm:$0xff]  ;;  %s392_s9 = scvt.s32.f32 %s2114_s29  ;;  %s1655_s11 = sshll.u32 %s2706_s7, 1  ;;  %v404_v59 = vld [vmem:[%s2100_s25 + $0x40] sm:$0xff] }
  0x18   : > { %v414_v14 = vpack.c.bf16 %v401_v12, %v400_v11  ;;  %v448_v17 = vshrl.u32 %v413_v9, 16  ;;  %v451_v18 = vshll.u32 %v413_v9, 16  ;;  %v2126_v19 = vpack.c.bf16 %v403_v16, %v402_v15  ;;  %s354_s15 = sadd.s32 %s1655_s11, %s2074_s30  ;;  %s1658_s17 = sshll.u32 %s2708_s26, 3  ;;  %v405_v60 = vld [vmem:[%s2100_s25 + $0x48] sm:$0xff]  ;;  %v406_v1 = vld [vmem:[%s2100_s25 + $0x50] sm:$0xff]  ;;  %v407_v2 = vld [vmem:[%s2100_s25 + $0x58] sm:$0xff] }
  0x19   : > { %v441_v20 = vshrl.u32 %v412_v13, 16  ;;  %v444_v21 = vshll.u32 %v412_v13, 16  ;;  %s1657_s28 = sshll.u32 %s354_s15, 3  ;;  %v423_v40 = vstv %s392_s9  ;;  %p2187_p11 = scmp.lt.s32.totalorder %s1658_s17, 15  ;;  %v408_v7 = vld [vmem:[%s2100_s25 + $0x60] sm:$0xff]  ;;  %v1939_v8 = vld [vmem:[%s2681_s3 + $0x50] sm:$0xff]  }
  0x1a   : > { %v455_v22 = vshrl.u32 %v414_v14, 16  ;;  %v458_v23 = vshll.u32 %v414_v14, 16  ;;  %v450_v24 = vrot.slane %v448_v17, 7  ;;  %v462_v31 = vshrl.u32 %v2126_v19, 16  ;;  %s356_s8 = scalar_lea.vmem %s2679_s1, %s1657_s28  ;;  %s2004_s11 = smov 64   ;;  %v409_v13 = vld [vmem:[%s2100_s25 + $0x68] sm:$0xff]  ;;  %1719 = vmatprep.subr.bf16.mxu0 %v1939_v8 }
  0x1b   : > { %v443_v26 = vrot.slane %v441_v20, 7  ;;  %v465_v41 = vshll.u32 %v2126_v19, 16  ;;  %v1666_v47 = vld [vmem:[%s356_s8 + $0x70] sm:$0xff]  ;;  %v1667_v48 = vld [vmem:[%s356_s8 + $0x78] sm:$0xff]  ;;  %s2710_s17 = smov (!%p2187_p11, %s1658_s17), 15  ;;  %v416_v17 = vpack.c.bf16 %v405_v60, %v404_v59  ;;  %v2253_v32 = vpack.c.bf16 %v409_v13, %v408_v7  ;;  %s2620_s6 = scalar_lea.vmem %s2683_s5, %s1652_s16 }
  0x1c   : > { %v457_v27 = vrot.slane %v455_v22, 7  ;;  %v453_v29 = vor.u32 %v451_v18, %v450_v24  ;;  %v2145_v30 = vsel %vm2130_vm4, %v450_v24, 0  ;;  %v464_v50 = vrot.slane %v462_v31, 7  ;;  %v1940_v18 = vld [vmem:[%s2681_s3 + $0x98] sm:$0xff]   ;;  %s1659_s7 = sshll.u32 %s2710_s17, 1 }
  0x1d   : > { %v579_v33 = vshll.u32 %v2145_v30, 16  ;;  %v446_v34 = vor.u32 %v444_v21, %v443_v26  ;;  %v2154_v35 = vsel %vm2130_vm4, %v443_v26, 0  ;;  %v424_v53 = vmul.f32 %v1666_v47, %v423_v40  ;;  %1786 = vmatpush3.bf16.msra.mxu1 %v1940_v18  ;;  %s2275_s14 = sadd.s32 %s1659_s7, %s2074_s30  ;;  %v1947_v18 = vld [vmem:[%s2681_s3 + $0x60] sm:$0xff]  }
  0x1e   : > { %v460_v36 = vor.u32 %v458_v23, %v457_v27  ;;  %v2163_v38 = vsel %vm2130_vm4, 0, %v453_v29  ;;  %v680_v39 = vrot.slane %v2154_v35, 1  ;;  %v2178_v45 = vsel %vm2130_vm4, %v457_v27, 0  ;;  %v1941_v23 = vld [vmem:[%s2681_s3 + $0x10] sm:$0xff]   ;;  %v1942_v27 = vld [vmem:[%s2681_s3 + $0xe0] sm:$0xff]   ;;  %s1661_s26 = sshll.u32 %s2275_s14, 3 }
  0x1f   : > { %v572_v42 = vshrl.u32 %v2163_v38, 16  ;;  %v574_v43 = vshll.u32 %v2163_v38, 16  ;;  %v2171_v44 = vsel %vm2130_vm4, 0, %v446_v34  ;;  %v581_v52 = vrot.slane %v579_v33, 1  ;;  %1720 = vmatpush3.bf16.msra.mxu0 %v1941_v23  ;;  %1787 = vmatprep.subr.bf16.mxu1 %v1942_v27  ;;  %s2288_s30 = scalar_select %p393_p12, 1, 0 }
  0x20   : > { %v679_v46 = vrot.slane %v2171_v44, 1  ;;  %v2183_v49 = vsel %vm2130_vm4, 0, %v460_v36  ;;  %v425_v54 = vmul.f32 %v1667_v48, %v423_v40  ;;  %v591_v58 = vshll.u32 %v2178_v45, 16  ;;  %1721 = vmatprep.subr.bf16.mxu0 %v1943_v37  ;;  %s373_s29 = scalar_lea.vmem %s2680_s2, %s1661_s26 }
  0x21   : > { %v576_v51 = vrot.slane %v574_v43, 1  ;;  %v586_v57 = vshll.u32 %v2183_v49, 16  ;;  %v584_v63 = vshrl.u32 %v2183_v49, 16  ;;  %v562_v0 = vshll.u32 %v2171_v44, 16  ;;  %v1944_v43 = vld [vmem:[%s2681_s3 + $0xa0] sm:$0xff]   ;;  %s395_s9 = scvt.s32.f32 %s2288_s30 }
  0x22   : > { %v2195_v56 = vsel %vm675_vm3, %v679_v46, %v680_v39  ;;  %v426_v62 = vpack.c.bf16 %v425_v54, %v424_v53  ;;  %v567_v5 = vshll.u32 %v2154_v35, 16  ;;  %v467_v6 = vor.u32 %v465_v41, %v464_v50  ;;  %1788 = vmatpush3.bf16.msra.mxu1 %v1944_v43  ;;  %v427_v23 = vld [vmem:[%s373_s29] sm:$0xff]  ;;  %v1950_v43 = vld [vmem:[%s2681_s3 + $0xf0] sm:$0xff]  }
  0x23   : > { %v577_v61 = vor.u32 %v576_v51, %v572_v42  ;;  %733 = vrot.lane.b32.xlu1 %v2195_v56, %s2004_s11  ;;  %v588_v4 = vrot.slane %v586_v57, 1  ;;  %v560_v12 = vshrl.u32 %v2171_v44, 16  ;;  %v564_v14 = vrot.slane %v562_v0, 1  ;;  %v1945_v57 = vld [vmem:[%s2681_s3 + $0x18] sm:$0xff]   ;;  %v410_v0 = vld [vmem:[%s2100_s25 + $0x70] sm:$0xff] }
  0x24   : > { %v434_v10 = vshrl.u32 %v426_v62, 16  ;;  %v437_v11 = vshll.u32 %v426_v62, 16  ;;  %v2230_v15 = vsel %vm2130_vm4, 0, %v467_v6  ;;  %v2234_v16 = vsel %vm2130_vm4, %v464_v50, 0  ;;  %1722 = vmatpush3.bf16.msra.mxu0 %v1945_v57  ;;  %v1946_v6 = vld [vmem:[%s2681_s3 + $0xe8] sm:$0xff]  }
  0x25   : > { %v2222_v9 = vsel %vm546_vm2, %v577_v61, %v581_v52  ;;  %v589_v20 = vor.u32 %v588_v4, %v584_v63  ;;  %v593_v21 = vrot.slane %v591_v58, 1  ;;  %v598_v22 = vshll.u32 %v2230_v15, 16  ;;  %1789 = vmatprep.subr.bf16.mxu1 %v1946_v6  ;;  %1723 = vmatprep.subr.bf16.mxu0 %v1947_v18 }
  0x26   : > { %647 = vrot.lane.b32.xlu0 %v2222_v9, %s2004_s11  ;;  %v436_v19 = vrot.slane %v434_v10, 7  ;;  %v569_v24 = vrot.slane %v567_v5, 1  ;;  %v417_v26 = vpack.c.bf16 %v407_v2, %v406_v1  ;;  %v603_v31 = vshll.u32 %v2234_v16, 16  ;;  %v411_v1 = vld [vmem:[%s2100_s25 + $0x78] sm:$0xff] }
  0x27   : > { %v565_v34 = vor.u32 %v564_v14, %v560_v12  ;;  %v469_v35 = vshrl.u32 %v416_v17, 16  ;;  %v472_v36 = vshll.u32 %v416_v17, 16  ;;  %v2266_v40 = vsel %vm546_vm2, %v589_v20, %v593_v21  ;;  %v1948_v21 = vld [vmem:[%s2681_s3 + $0xa8] sm:$0xff]  }
  0x28   : > { %v439_v28 = vor.u32 %v437_v11, %v436_v19  ;;  %v2250_v29 = vsel %vm2130_vm4, %v436_v19, 0  ;;  %v596_v41 = vshrl.u32 %v2230_v15, 16  ;;  %v600_v42 = vrot.slane %v598_v22, 1  ;;  %1790 = vmatpush3.bf16.msra.mxu1 %v1948_v21  ;;  %v1959_v21 = vld [vmem:[%s2681_s3 + $0x38] sm:$0xff]  }
  0x29   : > { %v555_v33 = vshll.u32 %v2250_v29, 16  ;;  %v471_v48 = vrot.slane %v469_v35, 7  ;;  %v476_v50 = vshrl.u32 %v417_v26, 16  ;;  %v479_v51 = vshll.u32 %v417_v26, 16  ;;  %1791 = vmatprep.subr.bf16.mxu1 %v1950_v43 }
  0x2a   : > { %701 = vrot.lane.b32.xlu0 %v2171_v44, %s2004_s11  ;;  %v2263_v39 = vsel %vm2130_vm4, 0, %v439_v28  ;;  %v605_v54 = vrot.slane %v603_v31, 1  ;;  %v2283_v58 = vsel %vm546_vm2, %v565_v34, %v569_v24  ;;  %v601_v59 = vor.u32 %v600_v42, %v596_v41  ;;  %v428_v24 = vld [vmem:[%s373_s29 + $0x8] sm:$0xff] }
  0x2b   : > { %v548_v46 = vshrl.u32 %v2263_v39, 16  ;;  %v550_v47 = vshll.u32 %v2263_v39, 16  ;;  %v557_v53 = vrot.slane %v555_v33, 1  ;;  %v474_v55 = vor.u32 %v472_v36, %v471_v48 }
  0x2c   : > { %v478_v60 = vrot.slane %v476_v50, 7  ;;  %v483_v61 = vshrl.u32 %v2253_v32, 16  ;;  %v683_v63 = vrot.slane %v2145_v30, 1  ;;  %v682_v2 = vrot.slane %v2163_v38, 1 }
  0x2d   : > { %v552_v52 = vrot.slane %v550_v47, 1  ;;  %v685_v3 = vrot.slane %v2183_v49, 1  ;;  %v2298_v4 = vsel %vm2130_vm4, 0, %v474_v55  ;;  %v686_v30 = vrot.slane %v2178_v45, 1 }
  0x2e   : > { %649 = vrot.lane.b32.xlu0 %v2266_v40, %s2004_s11  ;;  %v481_v5 = vor.u32 %v479_v51, %v478_v60  ;;  %v2309_v8 = vsel %vm2130_vm4, %v471_v48, 0  ;;  %v2313_v10 = vsel %vm546_vm2, %v601_v59, %v605_v54  ;;  %v485_v12 = vrot.slane %v483_v61, 7  ;;  %v1953_v59 = vld [vmem:[%s2681_s3 + $0x28] sm:$0xff]  }
  0x2f   : > { %v553_v62 = vor.u32 %v552_v52, %v548_v46  ;;  %v486_v13 = vshll.u32 %v2253_v32, 16  ;;  %v610_v45 = vshll.u32 %v2298_v4, 16  ;;  %v2326_v14 = vsel %vm2130_vm4, %v478_v60, 0  ;;  %v1949_v32 = vld [vmem:[%s2681_s3 + $0x20] sm:$0xff]   ;;  %v1951_v46 = vld [vmem:[%s2681_s3 + $0x68] sm:$0xff]   ;;  %v1952_v52 = vld [vmem:[%s2681_s3 + $0xb0] sm:$0xff]  }
  0x30   : > { %v2317_v11 = vsel %vm2130_vm4, 0, %v481_v5  ;;  %v615_v19 = vshll.u32 %v2309_v8, 16  ;;  %v419_v20 = vpack.c.bf16 %v411_v1, %v410_v0  ;;  %v688_v22 = vrot.slane %v2230_v15, 1  ;;  %1724 = vmatpush3.bf16.msra.mxu0 %v1949_v32  ;;  %v1954_v60 = vld [vmem:[%s2681_s3 + $0xf8] sm:$0xff]   ;;  %1792 = vmatpush3.bf16.msra.mxu1 %v1952_v52 }
  0x31   : > { %v558_v7 = vsel %vm546_vm2, %v553_v62, %v557_v53  ;;  %v622_v17 = vshll.u32 %v2317_v11, 16  ;;  %v2343_v26 = vsel %vm675_vm3, %v685_v3, %v686_v30  ;;  %v620_v27 = vshrl.u32 %v2317_v11, 16  ;;  %1725 = vmatprep.subr.bf16.mxu0 %v1951_v46  ;;  %v1955_v62 = vld [vmem:[%s2681_s3 + $0x70] sm:$0xff]   ;;  %1793 = vmatprep.subr.bf16.mxu1 %v1954_v60 }
  0x32   : > { %645 = vrot.lane.b32.xlu0 %v2283_v58, %s2004_s11  ;;  %643 = vrot.lane.b32.xlu1 %v558_v7, %s2004_s11  ;;  %v627_v31 = vshll.u32 %v2326_v14, 16  ;;  %v2351_v33 = vsel %vm675_vm3, %v682_v2, %v683_v63  ;;  %v608_v34 = vshrl.u32 %v2298_v4, 16  ;;  %v612_v35 = vrot.slane %v610_v45, 1 }
  0x33   : > { %v624_v28 = vrot.slane %v622_v17, 1  ;;  %v488_v36 = vor.u32 %v486_v13, %v485_v12  ;;  %v617_v37 = vrot.slane %v615_v19, 1  ;;  %v490_v41 = vshrl.u32 %v419_v20, 16  ;;  %v1957_v13 = vld [vmem:[%s2681_s3 + $0x30] sm:$0xff]  }
  0x34   : > { %v429_v42 = vstv %s395_s9  ;;  %v629_v51 = vrot.slane %v627_v31, 1  ;;  %v613_v53 = vor.u32 %v612_v35, %v608_v34  ;;  %v493_v55 = vshll.u32 %v419_v20, 16  ;;  %1726 = vmatpush3.bf16.msra.mxu0 %v1953_v59 }
  0x35   : > { %v430_v47 = vmul.f32 %v429_v42, %v427_v23  ;;  %v431_v48 = vmul.f32 %v429_v42, %v428_v24  ;;  %v625_v50 = vor.u32 %v624_v28, %v620_v27  ;;  %v2369_v54 = vsel %vm2130_vm4, 0, %v488_v36  ;;  %1727 = vmatprep.subr.bf16.mxu0 %v1955_v62  ;;  %v2419_v23 = vld [vmem:[%s2681_s3 + $0x100] sm:$0xff]  }
  0x36   : > { %651 = vrot.lane.b32.xlu0 %v2313_v10, %s2004_s11  ;;  %703 = vrot.lane.b32.xlu1 %v2163_v38, %s2004_s11  ;;  %v492_v61 = vrot.slane %v490_v41, 7  ;;  %v689_v63 = vrot.slane %v2234_v16, 1  ;;  %v691_v0 = vrot.slane %v2298_v4, 1  ;;  %v692_v1 = vrot.slane %v2309_v8, 1  ;;  %v1956_v8 = vld [vmem:[%s2681_s3 + $0xb8] sm:$0xff]  }
  0x37   : > { %v432_v57 = vpack.c.bf16 %v431_v48, %v430_v47  ;;  %v2388_v3 = vsel %vm546_vm2, %v625_v50, %v629_v51  ;;  %v543_v5 = vsel %vm2130_vm4, %v485_v12, 0  ;;  %v2393_v7 = vsel %vm546_vm2, %v613_v53, %v617_v37  ;;  %v1958_v12 = vld [vmem:[%s2681_s3 + $0x78] sm:$0xff]   ;;  %1794 = vmatpush3.bf16.msra.mxu1 %v1956_v8 }
  0x38   : > { %v634_v16 = vshll.u32 %v2369_v54, 16  ;;  %v495_v45 = vor.u32 %v493_v55, %v492_v61  ;;  %v2410_v18 = vsel %vm675_vm3, %v691_v0, %v692_v1  ;;  %v632_v19 = vshrl.u32 %v2369_v54, 16  ;;  %1728 = vmatpush3.bf16.msra.mxu0 %v1957_v13  ;;  %1879 = vmatprep.subr.bf16.mxu1 %v2419_v23 }
  0x39   : > { %v497_v2 = vshrl.u32 %v432_v57, 16  ;;  %v500_v6 = vshll.u32 %v432_v57, 16  ;;  %v639_v20 = vshll.u32 %v543_v5, 16  ;;  %v2424_v24 = vsel %vm675_vm3, %v688_v22, %v689_v63  ;;  %1729 = vmatprep.subr.bf16.mxu0 %v1958_v12 }
  0x3a   : > { %737 = vrot.lane.b32.xlu0 %v2343_v26, %s2004_s11  ;;  %735 = vrot.lane.b32.xlu1 %v2351_v33, %s2004_s11  ;;  %v636_v27 = vrot.slane %v634_v16, 1  ;;  %v2432_v31 = vsel %vm2130_vm4, 0, %v495_v45  ;;  %v544_v37 = vsel %vm2130_vm4, %v492_v61, 0  ;;  %v694_v41 = vrot.slane %v2317_v11, 1  ;;  %v1961_v45 = vld [vmem:[%s2681_s3 + $0x108] sm:$0xff]  }
  0x3b   : > { %v499_v30 = vrot.slane %v497_v2, 7  ;;  %v641_v34 = vrot.slane %v639_v20, 1  ;;  %v720_v35 = vshll.u32 %v2432_v31, 16  ;;  %v695_v42 = vrot.slane %v2326_v14, 1  ;;  %v1963_v20 = vld [vmem:[%s2681_s3 + $0x118] sm:$0xff]  }
  0x3c   : > { %1730 = vmatpush3.bf16.msra.mxu0 %v1959_v21  ;;  %v637_v32 = vor.u32 %v636_v27, %v632_v19  ;;  %v697_v43 = vrot.slane %v2369_v54, 1  ;;  %v698_v46 = vrot.slane %v543_v5, 1  ;;  %v718_v51 = vshrl.u32 %v2432_v31, 16 }
  0x3d   : > { %v502_v17 = vor.u32 %v500_v6, %v499_v30  ;;  %v2443_v36 = vsel %vm2130_vm4, %v499_v30, 0  ;;  %1855 = vmatprep.subr.bf16.mxu0 %v2419_v23  ;;  %v722_v52 = vrot.slane %v720_v35, 1  ;;  %v725_v53 = vshll.u32 %v544_v37, 16 }
  0x3e   : > { %707 = vrot.lane.b32.xlu0 %v2230_v15, %s2004_s11  ;;  %705 = vrot.lane.b32.xlu1 %v2183_v49, %s2004_s11  ;;  %v757_v50 = vshll.u32 %v2443_v36, 16  ;;  %v2458_v25 = vsel %vm546_vm2, %v637_v32, %v641_v34  ;;  %v2466_v14 = vsel %vm675_vm3, %v697_v43, %v698_v46  ;;  %v2469_v59 = vsel %vm675_vm3, %v694_v41, %v695_v42 }
  0x3f   : > { %v2428_v28 = vsel %vm2130_vm4, 0, %v502_v17  ;;  %v723_v60 = vor.u32 %v722_v52, %v718_v51  ;;  %v727_v61 = vrot.slane %v725_v53, 1  ;;  %v730_v0 = vrot.slane %v2432_v31, 1 }
  0x40   : > { %v752_v22 = vshll.u32 %v2428_v28, 16  ;;  %v750_v47 = vshrl.u32 %v2428_v28, 16  ;;  %v759_v57 = vrot.slane %v757_v50, 1  ;;  %v731_v1 = vrot.slane %v544_v37, 1 }
  0x41   : > { %v2477_v63 = vsel %vm546_vm2, %v723_v60, %v727_v61  ;;  %v676_v6 = vrot.slane %v2263_v39, 1  ;;  %v677_v16 = vrot.slane %v2250_v29, 1 }
  0x42   : > { %655 = vrot.lane.b32.xlu0 %v2388_v3, %s2004_s11  ;;  %653 = vrot.lane.b32.xlu1 %v2393_v7, %s2004_s11  ;;  %v754_v48 = vrot.slane %v752_v22, 1  ;;  %v2486_v2 = vsel %vm675_vm3, %v730_v0, %v731_v1 }
  0x43   : > { %v678_v12 = vsel %vm675_vm3, %v676_v6, %v677_v16 }
  0x44   : > { %v755_v55 = vor.u32 %v754_v48, %v750_v47 }
  0x46   : > { %741 = vrot.lane.b32.xlu0 %v2410_v18, %s2004_s11  ;;  %739 = vrot.lane.b32.xlu1 %v2424_v24, %s2004_s11  ;;  %v760_v62 = vsel %vm546_vm2, %v755_v55, %v759_v57 }
  0x4a   : > { %711 = vrot.lane.b32.xlu0 %v2317_v11, %s2004_s11  ;;  %709 = vrot.lane.b32.xlu1 %v2298_v4, %s2004_s11 }
  0x4e   : > { %713 = vrot.lane.b32.xlu0 %v2369_v54, %s2004_s11  ;;  %657 = vrot.lane.b32.xlu1 %v2458_v25, %s2004_s11 }
  0x52   : > { %745 = vrot.lane.b32.xlu0 %v2466_v14, %s2004_s11  ;;  %743 = vrot.lane.b32.xlu1 %v2469_v59, %s2004_s11 }
  0x56   : > { %763 = vrot.lane.b32.xlu0 %v760_v62, %s2004_s11  ;;  %761 = vrot.lane.b32.xlu1 %v2477_v63, %s2004_s11 }
  0x5a   : > { %715 = vrot.lane.b32.xlu1 %v2432_v31, %s2004_s11 }
  0x5e   : > { %747 = vrot.lane.b32.xlu1 %v2486_v2, %s2004_s11 }
  0x95   : > { %v734_v5 = vpop.permute.xlu1 %733 }
  0x96   : > { %v829_v8 = vsel %vm770_vm5, %v2283_v58, %v734_v5  ;;  %v1962_v58 = vld [vmem:[%s2681_s3 + $0x110] sm:$0xff]  }
  0x98   : > { %v648_v30 = vpop.permute.xlu0 %647 }
  0x99   : > { %v778_v13 = vsel %vm770_vm5, %v2163_v38, %v648_v30 }
  0x9a   : > { %1307 = vmatprep.mubr.bf16.mxu1 %v778_v13 }
  0x9b   : > { %1308 = vmatmul.mubr.bf16.vlgmr.msra.gmra.mrb[0].mxu1 %v829_v8 }
  0x9c   : > { %v702_v17 = vpop.permute.xlu0 %701  ;;  %1883 = vmatpush3.bf16.msra.mxu1 %v2419_v23 }
  0x9d   : > { %v797_v29 = vsel %vm770_vm5, %v678_v12, %v702_v17  ;;  %1880 = vmatprep.subr.bf16.mxu1 %v1961_v45 }
  0x9e   : > { %1210 = vmatprep.mubr.bf16.mxu0 %v797_v29 }
  0xa0   : > { %v650_v38 = vpop.permute.xlu0 %649  ;;  %1884 = vmatpush3.bf16.msra.mxu1 %v1961_v45 }
  0xa1   : > { %v781_v19 = vsel %vm770_vm5, %v2183_v49, %v650_v38  ;;  %1881 = vmatprep.subr.bf16.mxu1 %v1962_v58 }
  0xa2   : > { %1315 = vmatprep.mubr.bf16.mxu1 %v781_v19 }
  0xa4   : > { %v646_v21 = vpop.permute.xlu0 %645  ;;  %1885 = vmatpush3.bf16.msra.mxu1 %v1962_v58  ;;  %v644_v27 = vpop.permute.xlu1 %643 }
  0xa5   : > { %1882 = vmatprep.subr.bf16.mxu1 %v1963_v20  ;;  %v772_v22 = vsel %vm770_vm5, %v2263_v39, %v644_v27  ;;  %v775_v35 = vsel %vm770_vm5, %v2171_v44, %v646_v21 }
  0xa6   : > { %1211 = vmatmul.mubr.bf16.vlgmr.msra.gmra.mrb[0].mxu0 %v772_v22 }
  0xa7   : > { %1856 = vmatpush3.bf16.msra.mxu0 %v2419_v23 }
  0xa8   : > { %v652_v32 = vpop.permute.xlu0 %651  ;;  %1886 = vmatpush3.bf16.msra.mxu1 %v1963_v20  ;;  %v704_v34 = vpop.permute.xlu1 %703  ;;  %1857 = vmatprep.subr.bf16.mxu0 %v1961_v45 }
  0xa9   : > { %v801_v49 = vsel %vm770_vm5, %v2195_v56, %v704_v34  ;;  %v784_v41 = vsel %vm770_vm5, %v2230_v15, %v652_v32 }
  0xaa   : > { %1218 = vmatprep.mubr.bf16.mxu0 %v801_v49 }
  0xab   : > { %1858 = vmatpush3.bf16.msra.mxu0 %v1961_v45 }
  0xac   : > { %v736_v37 = vpop.permute.xlu1 %735  ;;  %1859 = vmatprep.subr.bf16.mxu0 %v1962_v58  ;;  %v738_v23 = vpop.permute.xlu0 %737 }
  0xad   : > { %v833_v39 = vsel %vm770_vm5, %v2222_v9, %v736_v37  ;;  %v837_v43 = vsel %vm770_vm5, %v2266_v40, %v738_v23 }
  0xae   : > { %1219 = vmatmul.mubr.bf16.gmra.mrb[4].mxu0 %v775_v35  ;;  %1316 = vmatmul.mubr.bf16.gmra.mrb[4].mxu1 %v833_v39 }
  0xaf   : > { %1323 = vmatprep.mubr.bf16.mxu1 %v784_v41  ;;  %1860 = vmatpush3.bf16.msra.mxu0 %v1962_v58 }
  0xb0   : > { %v706_v42 = vpop.permute.xlu1 %705  ;;  %1861 = vmatprep.subr.bf16.mxu0 %v1963_v20  ;;  %v708_v44 = vpop.permute.xlu0 %707 }
  0xb1   : > { %v805_v56 = vsel %vm770_vm5, %v2351_v33, %v706_v42  ;;  %v809_v9 = vsel %vm770_vm5, %v2343_v26, %v708_v44 }
  0xb2   : > { %1226 = vmatprep.mubr.bf16.mxu0 %v805_v56 }
  0xb3   : > { %1862 = vmatpush3.bf16.msra.mxu0 %v1963_v20 }
  0xb4   : > { %v654_v15 = vpop.permute.xlu1 %653  ;;  %v656_v47 = vpop.permute.xlu0 %655 }
  0xb5   : > { %v787_v46 = vsel %vm770_vm5, %v2298_v4, %v654_v15  ;;  %v790_v40 = vsel %vm770_vm5, %v2317_v11, %v656_v47 }
  0xb6   : > { %1227 = vmatmul.mubr.bf16.gmra.mrb[8].mxu0 %v778_v13  ;;  %1324 = vmatmul.mubr.bf16.gmra.mrb[8].mxu1 %v837_v43 }
  0xb7   : > { %1331 = vmatprep.mubr.bf16.mxu1 %v787_v46  ;;  %1234 = vmatprep.mubr.bf16.mxu0 %v809_v9 }
  0xb8   : > { %v740_v48 = vpop.permute.xlu1 %739  ;;  %v742_v52 = vpop.permute.xlu0 %741 }
  0xb9   : > { %v841_v50 = vsel %vm770_vm5, %v2313_v10, %v740_v48  ;;  %v845_v57 = vsel %vm770_vm5, %v2393_v7, %v742_v52 }
  0xbc   : > { %v710_v51 = vpop.permute.xlu1 %709  ;;  %v712_v55 = vpop.permute.xlu0 %711 }
  0xbd   : > { %v813_v53 = vsel %vm770_vm5, %v2424_v24, %v710_v51  ;;  %v817_v11 = vsel %vm770_vm5, %v2410_v18, %v712_v55 }
  0xbe   : > { %1235 = vmatmul.mubr.bf16.gmra.mrb[12].mxu0 %v781_v19  ;;  %1332 = vmatmul.mubr.bf16.gmra.mrb[12].mxu1 %v841_v50 }
  0xbf   : > { %1339 = vmatprep.mubr.bf16.mxu1 %v790_v40  ;;  %1242 = vmatprep.mubr.bf16.mxu0 %v813_v53 }
  0xc0   : > { %v658_v4 = vpop.permute.xlu1 %657  ;;  %v714_v61 = vpop.permute.xlu0 %713 }
  0xc1   : > { %v793_v10 = vsel %vm770_vm5, %v2369_v54, %v658_v4  ;;  %v821_v1 = vsel %vm770_vm5, %v2469_v59, %v714_v61 }
  0xc4   : > { %v744_v60 = vpop.permute.xlu1 %743  ;;  %v746_v54 = vpop.permute.xlu0 %745 }
  0xc5   : > { %v849_v0 = vsel %vm770_vm5, %v2388_v3, %v744_v60  ;;  %v853_v16 = vsel %vm770_vm5, %v2458_v25, %v746_v54  ;;  %v767_v25 = vrot.slane %v2428_v28, 1 }
  0xc6   : > { %1243 = vmatmul.mubr.bf16.gmra.mrb[16].mxu0 %v784_v41  ;;  %1340 = vmatmul.mubr.bf16.gmra.mrb[16].mxu1 %v845_v57 }
  0xc7   : > { %1347 = vmatprep.mubr.bf16.mxu1 %v793_v10  ;;  %1250 = vmatprep.mubr.bf16.mxu0 %v817_v11 }
  0xc8   : > { %v762_v62 = vpop.permute.xlu1 %761  ;;  %v764_v6 = vpop.permute.xlu0 %763 }
  0xc9   : > { %v860_v7 = vsel %vm770_vm5, %v2432_v31, %v762_v62  ;;  %v863_v3 = vsel %vm770_vm5, %v2428_v28, %v764_v6  ;;  %v2576_v28 = vld [vmem:[%s2682_s4] ss:$0 sm:$0xff] }
  0xcc   : > { %v716_v5 = vpop.permute.xlu1 %715 }
  0xcd   : > { %v825_v30 = vsel %vm770_vm5, %v2466_v14, %v716_v5 }
  0xce   : > { %1251 = vmatmul.mubr.bf16.gmra.mrb[20].mxu0 %v787_v46  ;;  %1348 = vmatmul.mubr.bf16.gmra.mrb[20].mxu1 %v849_v0 }
  0xcf   : > { %1258 = vmatprep.mubr.bf16.mxu0 %v821_v1  ;;  %1355 = vmatprep.mubr.bf16.mxu1 %v860_v7 }
  0xd0   : > { %v748_v31 = vpop.permute.xlu1 %747 }
  0xd1   : > { %v857_v8 = vsel %vm770_vm5, %v2477_v63, %v748_v31  ;;  %v768_v63 = vrot.slane %v2443_v36, 1 }
  0xd6   : > { %1259 = vmatmul.mubr.bf16.gmra.mrb[24].mxu0 %v790_v40  ;;  %1356 = vmatmul.mubr.bf16.gmra.mrb[24].mxu1 %v853_v16 }
  0xd7   : > { %1266 = vmatprep.mubr.bf16.mxu0 %v825_v30  ;;  %1363 = vmatprep.mubr.bf16.mxu1 %v863_v3 }
  0xde   : > { %1267 = vmatmul.mubr.bf16.gmra.mrb[28].mxu0 %v793_v10  ;;  %1364 = vmatmul.mubr.bf16.gmra.mrb[28].mxu1 %v857_v8 }
  0xdf   : > { %1863 = vmatprep.mubr.msk.bf16.mxu0 %vm770_vm5, %v2351_v33  ;;  %1871 = vmatprep.mubr.msk.bf16.mxu1 %vm770_vm5, %v2469_v59  ;;  %v769_v33 = vsel %vm675_vm3, %v767_v25, %v768_v63 }
  0xe6   : > { %1864 = vmatmul.mubr.msk.bf16.vlgmr.msra.gmra.mrb[32].mxu0 %vm770_vm5, %v2343_v26  ;;  %1872 = vmatmul.mubr.msk.bf16.vlgmr.msra.gmra.mrb[32].mxu1 %vm770_vm5, %v2466_v14 }
  0xe7   : > { %1867 = vmatprep.mubr.msk.bf16.mxu0 %vm770_vm5, %v2424_v24  ;;  %1875 = vmatprep.mubr.msk.bf16.mxu1 %vm770_vm5, %v2486_v2 }
  0xee   : > { %1868 = vmatmul.mubr.msk.bf16.gmra.mrb[36].mxu0 %vm770_vm5, %v2410_v18  ;;  %1876 = vmatmul.mubr.msk.bf16.gmra.mrb[36].mxu1 %vm770_vm5, %v769_v33 }
 0x16e   : > { %v1795_v26 = vpop.f32.mrb[0].mxu1 }
 0x16f   : > { %v1796_v59 = vpop.f32.mrb[1].mxu1 }
 0x170   : > { %v1797_v14 = vadd.f32 %v1796_v59, %v1795_v26  ;;  %v1798_v13 = vpop.f32.mrb[2].mxu1 }
 0x171   : > { %v1799_v45 = vpop.f32.mrb[3].mxu1 }
 0x172   : > { %v1800_v24 = vadd.f32 %v1799_v45, %v1798_v13 }
 0x179   : > { %v1731_v12 = vpop.f32.mrb[0].mxu0 }
 0x17a   : > { %v1732_v36 = vpop.f32.mrb[1].mxu0 }
 0x17b   : > { %v1733_v2 = vadd.f32 %v1732_v36, %v1731_v12  ;;  %v1734_v17 = vpop.f32.mrb[2].mxu0 }
 0x17c   : > { %v1735_v29 = vpop.f32.mrb[3].mxu0 }
 0x17d   : > { %v1213_v18 = vadd.f32 %v1733_v2, %v2576_v28  ;;  %v1736_v58 = vadd.f32 %v1735_v29, %v1734_v17 }
 0x17f   : > { %v1216_v38 = vadd.f32 %v1736_v58, %v2576_v28  ;;  %v2580_v19 = vadd.f32 %v1797_v14, %v1213_v18 }
 0x181   : > { %v1737_v20 = vpop.f32.mrb[4].mxu0  ;;  %v1801_v21 = vpop.f32.mrb[4].mxu1  ;;  %v2582_v27 = vadd.f32 %v1800_v24, %v1216_v38 }
 0x182   : > { %v1738_v22 = vpop.f32.mrb[5].mxu0  ;;  %v1802_v32 = vpop.f32.mrb[5].mxu1 }
 0x183   : > { %v1739_v34 = vadd.f32 %v1738_v22, %v1737_v20  ;;  %v1803_v49 = vadd.f32 %v1802_v32, %v1801_v21  ;;  %v1740_v35 = vpop.f32.mrb[6].mxu0  ;;  %v1804_v37 = vpop.f32.mrb[6].mxu1 }
 0x184   : > { %v1741_v41 = vpop.f32.mrb[7].mxu0  ;;  %v1805_v39 = vpop.f32.mrb[7].mxu1 }
 0x185   : > { %v1221_v23 = vadd.f32 %v1739_v34, %v2576_v28  ;;  %v1742_v42 = vadd.f32 %v1741_v41, %v1740_v35  ;;  %v1806_v56 = vadd.f32 %v1805_v39, %v1804_v37 }
 0x187   : > { %v1224_v44 = vadd.f32 %v1742_v42, %v2576_v28  ;;  %v2586_v43 = vadd.f32 %v1803_v49, %v1221_v23 }
 0x189   : > { %v1743_v15 = vpop.f32.mrb[8].mxu0  ;;  %v1807_v9 = vpop.f32.mrb[8].mxu1  ;;  %v2588_v46 = vadd.f32 %v1806_v56, %v1224_v44 }
 0x18a   : > { %v1744_v47 = vpop.f32.mrb[9].mxu0  ;;  %v1808_v48 = vpop.f32.mrb[9].mxu1 }
 0x18b   : > { %v1745_v50 = vadd.f32 %v1744_v47, %v1743_v15  ;;  %v1809_v40 = vadd.f32 %v1808_v48, %v1807_v9  ;;  %v1746_v51 = vpop.f32.mrb[10].mxu0  ;;  %v1810_v52 = vpop.f32.mrb[10].mxu1 }
 0x18c   : > { %v1747_v53 = vpop.f32.mrb[11].mxu0  ;;  %v1811_v4 = vpop.f32.mrb[11].mxu1 }
 0x18d   : > { %v1229_v55 = vadd.f32 %v1745_v50, %v2576_v28  ;;  %v1748_v57 = vadd.f32 %v1747_v53, %v1746_v51  ;;  %v1812_v10 = vadd.f32 %v1811_v4, %v1810_v52 }
 0x18f   : > { %v1232_v11 = vadd.f32 %v1748_v57, %v2576_v28  ;;  %v2592_v60 = vadd.f32 %v1809_v40, %v1229_v55 }
 0x191   : > { %v1749_v61 = vpop.f32.mrb[12].mxu0  ;;  %v1813_v62 = vpop.f32.mrb[12].mxu1  ;;  %v2594_v0 = vadd.f32 %v1812_v10, %v1232_v11 }
 0x192   : > { %v1750_v1 = vpop.f32.mrb[13].mxu0  ;;  %v1814_v7 = vpop.f32.mrb[13].mxu1 }
 0x193   : > { %v1751_v54 = vadd.f32 %v1750_v1, %v1749_v61  ;;  %v1815_v5 = vadd.f32 %v1814_v7, %v1813_v62  ;;  %v1752_v6 = vpop.f32.mrb[14].mxu0  ;;  %v1816_v16 = vpop.f32.mrb[14].mxu1 }
 0x194   : > { %v1753_v30 = vpop.f32.mrb[15].mxu0  ;;  %v1817_v3 = vpop.f32.mrb[15].mxu1 }
 0x195   : > { %v1237_v31 = vadd.f32 %v1751_v54, %v2576_v28  ;;  %v1754_v8 = vadd.f32 %v1753_v30, %v1752_v6  ;;  %v1818_v25 = vadd.f32 %v1817_v3, %v1816_v16 }
 0x197   : > { %v1240_v63 = vadd.f32 %v1754_v8, %v2576_v28  ;;  %v2598_v33 = vadd.f32 %v1815_v5, %v1237_v31 }
 0x199   : > { %v1755_v26 = vpop.f32.mrb[16].mxu0  ;;  %v1819_v59 = vpop.f32.mrb[16].mxu1  ;;  %v2600_v14 = vadd.f32 %v1818_v25, %v1240_v63 }
 0x19a   : > { %v1756_v13 = vpop.f32.mrb[17].mxu0  ;;  %v1820_v45 = vpop.f32.mrb[17].mxu1 }
 0x19b   : > { %v1757_v24 = vadd.f32 %v1756_v13, %v1755_v26  ;;  %v1821_v12 = vadd.f32 %v1820_v45, %v1819_v59  ;;  %v1758_v36 = vpop.f32.mrb[18].mxu0  ;;  %v1822_v2 = vpop.f32.mrb[18].mxu1 }
 0x19c   : > { %v1759_v17 = vpop.f32.mrb[19].mxu0  ;;  %v1823_v29 = vpop.f32.mrb[19].mxu1 }
 0x19d   : > { %v1245_v18 = vadd.f32 %v1757_v24, %v2576_v28  ;;  %v1760_v58 = vadd.f32 %v1759_v17, %v1758_v36  ;;  %v1824_v38 = vadd.f32 %v1823_v29, %v1822_v2 }
 0x19f   : > { %v1248_v20 = vadd.f32 %v1760_v58, %v2576_v28  ;;  %v1342_v21 = vadd.f32 %v1821_v12, %v1245_v18 }
 0x1a1   : > { %v1761_v22 = vpop.f32.mrb[20].mxu0  ;;  %v1825_v32 = vpop.f32.mrb[20].mxu1  ;;  %v2604_v34 = vadd.f32 %v1824_v38, %v1248_v20 }
 0x1a2   : > { %v1762_v49 = vpop.f32.mrb[21].mxu0  ;;  %v1826_v35 = vpop.f32.mrb[21].mxu1 }
 0x1a3   : > { %v1763_v37 = vadd.f32 %v1762_v49, %v1761_v22  ;;  %v1827_v41 = vadd.f32 %v1826_v35, %v1825_v32  ;;  %v1764_v39 = vpop.f32.mrb[22].mxu0  ;;  %v1828_v23 = vpop.f32.mrb[22].mxu1 }
 0x1a4   : > { %v1765_v42 = vpop.f32.mrb[23].mxu0  ;;  %v1829_v56 = vpop.f32.mrb[23].mxu1 }
 0x1a5   : > { %v1253_v44 = vadd.f32 %v1763_v37, %v2576_v28  ;;  %v1766_v15 = vadd.f32 %v1765_v42, %v1764_v39  ;;  %v1830_v9 = vadd.f32 %v1829_v56, %v1828_v23 }
 0x1a7   : > { %v1256_v47 = vadd.f32 %v1766_v15, %v2576_v28  ;;  %v1350_v48 = vadd.f32 %v1827_v41, %v1253_v44 }
 0x1a9   : > { %v1767_v50 = vpop.f32.mrb[24].mxu0  ;;  %v1831_v40 = vpop.f32.mrb[24].mxu1  ;;  %v1353_v51 = vadd.f32 %v1830_v9, %v1256_v47 }
 0x1aa   : > { %v1768_v52 = vpop.f32.mrb[25].mxu0  ;;  %v1832_v53 = vpop.f32.mrb[25].mxu1 }
 0x1ab   : > { %v1769_v4 = vadd.f32 %v1768_v52, %v1767_v50  ;;  %v1833_v55 = vadd.f32 %v1832_v53, %v1831_v40  ;;  %v1770_v57 = vpop.f32.mrb[26].mxu0  ;;  %v1834_v10 = vpop.f32.mrb[26].mxu1 }
 0x1ac   : > { %v1771_v11 = vpop.f32.mrb[27].mxu0  ;;  %v1835_v61 = vpop.f32.mrb[27].mxu1 }
 0x1ad   : > { %v1261_v62 = vadd.f32 %v1769_v4, %v2576_v28  ;;  %v1772_v1 = vadd.f32 %v1771_v11, %v1770_v57  ;;  %v1836_v7 = vadd.f32 %v1835_v61, %v1834_v10 }
 0x1af   : > { %v1264_v54 = vadd.f32 %v1772_v1, %v2576_v28  ;;  %v1358_v5 = vadd.f32 %v1833_v55, %v1261_v62 }
 0x1b1   : > { %v1773_v6 = vpop.f32.mrb[28].mxu0  ;;  %v1837_v16 = vpop.f32.mrb[28].mxu1  ;;  %v2610_v30 = vadd.f32 %v1836_v7, %v1264_v54 }
 0x1b2   : > { %v1774_v3 = vpop.f32.mrb[29].mxu0  ;;  %v1838_v31 = vpop.f32.mrb[29].mxu1 }
 0x1b3   : > { %v1775_v8 = vadd.f32 %v1774_v3, %v1773_v6  ;;  %v1839_v25 = vadd.f32 %v1838_v31, %v1837_v16  ;;  %v1776_v63 = vpop.f32.mrb[30].mxu0  ;;  %v1840_v26 = vpop.f32.mrb[30].mxu1 }
 0x1b4   : > { %v1777_v59 = vpop.f32.mrb[31].mxu0  ;;  %v1841_v13 = vpop.f32.mrb[31].mxu1 }
 0x1b5   : > { %v1269_v45 = vadd.f32 %v1775_v8, %v2576_v28  ;;  %v1778_v24 = vadd.f32 %v1777_v59, %v1776_v63  ;;  %v1842_v12 = vadd.f32 %v1841_v13, %v1840_v26 }
 0x1b7   : > { %v1272_v36 = vadd.f32 %v1778_v24, %v2576_v28  ;;  %v1366_v2 = vadd.f32 %v1839_v25, %v1269_v45 }
 0x1b9   : > { %v1865_v17 = vpop.f32.mrb[32].mxu0  ;;  %v1873_v29 = vpop.f32.mrb[32].mxu1  ;;  %v1369_v18 = vadd.f32 %v1842_v12, %v1272_v36 }
 0x1ba   : > { %v1415_v58 = vadd.f32 %v1865_v17, %v2586_v43  ;;  %v1447_v38 = vadd.f32 %v1873_v29, %v1350_v48  ;;  %v1406_v20 = vpop.f32.mrb[33].mxu0  ;;  %v1438_v22 = vpop.f32.mrb[33].mxu1 }
 0x1bb   : > { %v1407_v32 = vadd.f32 %v1406_v20, %v2580_v19  ;;  %v1439_v28 = vadd.f32 %v1438_v22, %v1342_v21  ;;  %v1866_v49 = vpop.f32.mrb[34].mxu0  ;;  %v1874_v35 = vpop.f32.mrb[34].mxu1 }
 0x1bc   : > { %v1471_v37 = vmax.f32 %v1415_v58, 0.0  ;;  %v1479_v43 = vmax.f32 %v1447_v38, 0.0  ;;  %v1418_v41 = vadd.f32 %v1866_v49, %v2588_v46  ;;  %v1450_v39 = vadd.f32 %v1874_v35, %v1353_v51  ;;  %v1409_v23 = vpop.f32.mrb[35].mxu0  ;;  %v1441_v42 = vpop.f32.mrb[35].mxu1 }
 0x1bd   : > { %v1469_v56 = vmax.f32 %v1407_v32, 0.0  ;;  %v1477_v44 = vmax.f32 %v1439_v28, 0.0  ;;  %v1410_v19 = vadd.f32 %v1409_v23, %v2582_v27  ;;  %v1442_v21 = vadd.f32 %v1441_v42, %v2604_v34 }
 0x1be   : > { %1487 = vst.msk [vmem:[%s2620_s6 + $0x10] sm:$0xff] %vm770_vm5, %v1471_v37  ;;  %1495 = vst.msk [vmem:[%s2620_s6 + $0x50] sm:$0xff] %vm770_vm5, %v1479_v43  ;;  %v1472_v15 = vmax.f32 %v1418_v41, 0.0  ;;  %v1480_v9 = vmax.f32 %v1450_v39, 0.0 }
 0x1bf   : > { %1485 = vst.msk [vmem:[%s2620_s6] sm:$0xff] %vm770_vm5, %v1469_v56  ;;  %1493 = vst.msk [vmem:[%s2620_s6 + $0x40] sm:$0xff] %vm770_vm5, %v1477_v44  ;;  %v1470_v46 = vmax.f32 %v1410_v19, 0.0  ;;  %v1478_v47 = vmax.f32 %v1442_v21, 0.0 }
 0x1c0   : > { %1488 = vst.msk [vmem:[%s2620_s6 + $0x18] sm:$0xff] %vm770_vm5, %v1472_v15  ;;  %1496 = vst.msk [vmem:[%s2620_s6 + $0x58] sm:$0xff] %vm770_vm5, %v1480_v9 }
 0x1c1   : > { %1486 = vst.msk [vmem:[%s2620_s6 + $0x8] sm:$0xff] %vm770_vm5, %v1470_v46  ;;  %1494 = vst.msk [vmem:[%s2620_s6 + $0x48] sm:$0xff] %vm770_vm5, %v1478_v47  ;;  %v1869_v27 = vpop.f32.mrb[36].mxu0  ;;  %v1877_v34 = vpop.f32.mrb[36].mxu1 }
 0x1c2   : > { %v1431_v48 = vadd.f32 %v1869_v27, %v2598_v33  ;;  %v1463_v50 = vadd.f32 %v1877_v34, %v1366_v2  ;;  %v1422_v40 = vpop.f32.mrb[37].mxu0  ;;  %v1454_v51 = vpop.f32.mrb[37].mxu1 }
 0x1c3   : > { %v1423_v52 = vadd.f32 %v1422_v40, %v2592_v60  ;;  %v1455_v53 = vadd.f32 %v1454_v51, %v1358_v5  ;;  %v1870_v4 = vpop.f32.mrb[38].mxu0  ;;  %v1878_v55 = vpop.f32.mrb[38].mxu1 }
 0x1c4   : > { %v1475_v57 = vmax.f32 %v1431_v48, 0.0  ;;  %v1483_v10 = vmax.f32 %v1463_v50, 0.0  ;;  %v1434_v11 = vadd.f32 %v1870_v4, %v2600_v14  ;;  %v1466_v61 = vadd.f32 %v1878_v55, %v1369_v18  ;;  %v1425_v33 = vpop.f32.mrb[39].mxu0  ;;  %v1457_v62 = vpop.f32.mrb[39].mxu1 }
 0x1c5   : > { %v1473_v1 = vmax.f32 %v1423_v52, 0.0  ;;  %v1481_v7 = vmax.f32 %v1455_v53, 0.0  ;;  %v1426_v60 = vadd.f32 %v1425_v33, %v2594_v0  ;;  %v1458_v54 = vadd.f32 %v1457_v62, %v2610_v30 }
 0x1c6   : > { %1491 = vst.msk [vmem:[%s2620_s6 + $0x30] sm:$0xff] %vm770_vm5, %v1475_v57  ;;  %1499 = vst.msk [vmem:[%s2620_s6 + $0x70] sm:$0xff] %vm770_vm5, %v1483_v10  ;;  %v1476_v5 = vmax.f32 %v1434_v11, 0.0  ;;  %v1484_v6 = vmax.f32 %v1466_v61, 0.0 }
 0x1c7   : > { %1489 = vst.msk [vmem:[%s2620_s6 + $0x20] sm:$0xff] %vm770_vm5, %v1473_v1  ;;  %1497 = vst.msk [vmem:[%s2620_s6 + $0x60] sm:$0xff] %vm770_vm5, %v1481_v7  ;;  %v1474_v14 = vmax.f32 %v1426_v60, 0.0  ;;  %v1482_v16 = vmax.f32 %v1458_v54, 0.0 }
 0x1c8   : > { %1492 = vst.msk [vmem:[%s2620_s6 + $0x38] sm:$0xff] %vm770_vm5, %v1476_v5  ;;  %1500 = vst.msk [vmem:[%s2620_s6 + $0x78] sm:$0xff] %vm770_vm5, %v1484_v6 }
 0x1c9   : > { %1490 = vst.msk [vmem:[%s2620_s6 + $0x28] sm:$0xff] %vm770_vm5, %v1474_v14  ;;  %1498 = vst.msk [vmem:[%s2620_s6 + $0x68] sm:$0xff] %vm770_vm5, %v1482_v16 }
 0x1ca PF: > { %s15_s22 = sadd.s32 1, %s2002_s22   ;;  %s2689_s18 = smov %s1994_s20 }
 0x1cb   : > { %p12_p13 = scmp.ge.s32.totalorder %s15_s22, 10   ;;  %s2690_s19 = smov %s1998_s21 }
 0x1cc   : > { %s2691_s20 = smov %s2694_s23  ;;  %s2692_s21 = smov %s2698_s24 }
 0x1cd   :  { %14 = sbr.rel (!%p12_p13) target bundleno = 3 (0x3), region = 77 }

// kernel: vgg_loss.11
= control target key start
LH: loop header
LB: loop body
LE: loop exit
PB: predicated region body
PF: predicated region fallthrough
CT: control target
= control target key end

     0   :  { %s1764_s18 = smov 0   ;;  %s1766_s19 = smov 0   ;;  %s2186_s0 = inlined_call_operand.vmem [shape: f32[4,8,8,64], index: 0, kind: input, shape index: {}, may-alias: {0,1,2}]   ;;  %s2187_s1 = inlined_call_operand.vmem [shape: f32[4,8,8,64], index: 1, kind: input, shape index: {}, may-alias: {0,1,2}]   ;;  %s2188_s2 = inlined_call_operand.vmem [shape: f32[4,8,8,64], index: 2, kind: input, shape index: {}, may-alias: {0,1,2}]   ;;  %s2189_s3 = inlined_call_operand.vmem [shape: bf16[576,128], index: 3, kind: input, shape index: {}]   ;;  %s2190_s4 = inlined_call_operand.vmem [shape: f32[1,128], index: 4, kind: input, shape index: {}]   ;;  %s2191_s5 = inlined_call_operand.vmem [shape: f32[4,8,8,128], index: 5, kind: output, shape index: {}]  }
   0x1   :  { %s1768_s20 = smov 0  }
   0x2 LB: > { %s27_s21 = sadd.s32 1, %s1727_s19  ;;  %p1462_p0 = scmp.ge.s32.totalorder %s1731_s20, 1  ;;  %s1731_s20 = sphi %s1768_s20, %s15_s20   ;;  %s1727_s19 = sphi %s1766_s19, %s2197_s19   ;;  %s1723_s18 = sphi %s1764_s18, %s2196_s18  }
   0x3   : > { %p29_p1 = scmp.ge.s32.totalorder %s27_s21, 4  ;;  %p266_p2 = scmp.lt.s32.totalorder %s1731_s20, 5 }
   0x5   : > { %s2199_s21 = smov (%p29_p1, %s27_s21), 0  ;;  %p267_p3 = pnand %p1462_p0, %p266_p2 }
   0x6   : > { %p327_p4 = scmp.lt.s32.totalorder (!%p267_p3), %s1723_s18, 3  ;;  %v1673_v0 = vld [vmem:[%s2189_s3 + $0xc0] sm:$0xff] (!%p267_p3)   ;;  %v1675_v2 = vld [vmem:[%s2189_s3 + $0xc8] sm:$0xff] (!%p267_p3)   ;;  %vm490_vm0 = vcmask (!%p267_p3), 1040384   ;;  %vm491_vm1 = vsmask.f32 (!%p267_p3), 256 }
   0x7   : > { %270 = sbr.rel (%p267_p3) target bundleno = 422 (0x1a6), region = 40  ;;  %v1674_v1 = vld [vmem:[%s2189_s3 + $0x80] sm:$0xff] (!%p267_p3)   ;;  %1576 = vmatprep.subr.bf16.mxu1 (!%p267_p3), %v1673_v0  ;;  %v1676_v3 = vld [vmem:[%s2189_s3 + $0x88] sm:$0xff] (!%p267_p3)   ;;  %vm503_vm2 = vcmask (!%p267_p3), 1044480   ;;  %vm504_vm3 = vsmask.f32 (!%p267_p3), 4352  ;;  %vm1817_vm4 = vmand (!%p267_p3), %vm490_vm0, %vm491_vm1 }
   0x8   : > { %1577 = vmatpush3.bf16.msra.mxu1 (!%p267_p3), %v1674_v1  ;;  %v1677_v21 = vld [vmem:[%s2189_s3 + $0x40] sm:$0xff] (!%p267_p3)   ;;  %vm1823_vm5 = vmand (!%p267_p3), %vm503_vm2, %vm504_vm3  ;;  %v1679_v36 = vld [vmem:[%s2189_s3 + $0xd0] sm:$0xff] (!%p267_p3)   ;;  %s1733_s25 = smov (!%p267_p3), 64   ;;  %vm658_vm6 = vcmask (!%p267_p3), 523264  }
   0x9   : > { %1578 = vmatprep.subr.bf16.mxu1 (!%p267_p3), %v1675_v2  ;;  %1536 = vmatprep.subr.bf16.mxu0 (!%p267_p3), %v1677_v21  ;;  %v1678_v35 = vld [vmem:[%s2189_s3] sm:$0xff] (!%p267_p3)   ;;  %v1680_v40 = vld [vmem:[%s2189_s3 + $0x90] sm:$0xff] (!%p267_p3)   ;;  %v1681_v49 = vld [vmem:[%s2189_s3 + $0x48] sm:$0xff] (!%p267_p3)  }
   0xa   : > { %1537 = vmatpush3.bf16.msra.mxu0 (!%p267_p3), %v1678_v35  ;;  %v1682_v63 = vld [vmem:[%s2189_s3 + $0x8] sm:$0xff] (!%p267_p3)   ;;  %v1683_v0 = vld [vmem:[%s2189_s3 + $0xd8] sm:$0xff] (!%p267_p3)   ;;  %v1686_v21 = vld [vmem:[%s2189_s3 + $0x10] sm:$0xff] (!%p267_p3)  }
   0xb   : > { %1538 = vmatprep.subr.bf16.mxu0 (!%p267_p3), %v1681_v49  ;;  %v1703_v28 = vld [vmem:[%s2189_s3 + $0x78] sm:$0xff] (!%p267_p3)  }
   0xc   : > { %1579 = vmatpush3.bf16.msra.mxu1 (!%p267_p3), %v1676_v3 }
   0xd   : > { %1580 = vmatprep.subr.bf16.mxu1 (!%p267_p3), %v1679_v36  ;;  %v1688_v36 = vld [vmem:[%s2189_s3 + $0xa0] sm:$0xff] (!%p267_p3)  }
   0xe   : > { %s2201_s18 = smov (!%p327_p4, %s1723_s18), 3  ;;  %1539 = vmatpush3.bf16.msra.mxu0 %v1682_v63 }
   0xf   : > { %s1788_s26 = sshll.u32 %s2201_s18, 6 }
  0x10   : > { %s1797_s6 = scalar_lea.vmem %s2186_s0, %s1788_s26  ;;  %s347_s9 = scalar_lea.vmem %s2187_s1, %s1788_s26  ;;  %1581 = vmatpush3.bf16.msra.mxu1 %v1680_v40 }
  0x11   : > { %v387_v4 = vld [vmem:[%s1797_s6 + $0x10] sm:$0xff]  ;;  %v385_v5 = vld [vmem:[%s1797_s6] sm:$0xff]  ;;  %v386_v6 = vld [vmem:[%s1797_s6 + $0x8] sm:$0xff]  ;;  %1582 = vmatprep.subr.bf16.mxu1 %v1683_v0  ;;  %s376_s27 = scalar_lea.vmem %s2191_s5, %s1788_s26 }
  0x12   : > { %v395_v7 = vpack.c.bf16 %v387_v4, %v387_v4  ;;  %v393_v8 = vpack.c.bf16 %v385_v5, %v385_v5  ;;  %v394_v9 = vpack.c.bf16 %v386_v6, %v386_v6  ;;  %v388_v10 = vld [vmem:[%s1797_s6 + $0x18] sm:$0xff]  ;;  %v389_v11 = vld [vmem:[%s1797_s6 + $0x20] sm:$0xff]  ;;  %v390_v20 = vld [vmem:[%s1797_s6 + $0x28] sm:$0xff] }
  0x13   : > { %v1471_v12 = vld [vmem:[%s347_s9 + $0x38] sm:$0xff]  ;;  %v396_v13 = vpack.c.bf16 %v388_v10, %v388_v10  ;;  %v397_v14 = vpack.c.bf16 %v389_v11, %v389_v11  ;;  %v1836_v43 = vpack.c.bf16 %v390_v20, %v390_v20  ;;  %v391_v44 = vld [vmem:[%s1797_s6 + $0x30] sm:$0xff]  ;;  %s363_s9 = scalar_lea.vmem %s2188_s2, %s1788_s26 }
  0x14   : > { %v404_v15 = vmul.f32 0.0, %v1471_v12  ;;  %v432_v16 = vshrl.u32 %v395_v7, 16  ;;  %v435_v17 = vshll.u32 %v395_v7, 16  ;;  %v418_v18 = vshrl.u32 %v393_v8, 16 }
  0x15   : > { %v421_v19 = vshll.u32 %v393_v8, 16  ;;  %v425_v23 = vshrl.u32 %v394_v9, 16  ;;  %v428_v24 = vshll.u32 %v394_v9, 16  ;;  %v439_v25 = vshrl.u32 %v396_v13, 16  ;;  %v392_v9 = vld [vmem:[%s1797_s6 + $0x38] sm:$0xff] }
  0x16   : > { %v442_v26 = vshll.u32 %v396_v13, 16  ;;  %v434_v27 = vrot.slane %v432_v16, 7  ;;  %v420_v29 = vrot.slane %v418_v18, 7  ;;  %v446_v30 = vshrl.u32 %v397_v14, 16  ;;  %v1684_v13 = vld [vmem:[%s2189_s3 + $0x98] sm:$0xff]   ;;  %v406_v16 = vld [vmem:[%s363_s9] sm:$0xff] }
  0x17   : > { %v449_v31 = vshll.u32 %v397_v14, 16  ;;  %v427_v32 = vrot.slane %v425_v23, 7  ;;  %v441_v33 = vrot.slane %v439_v25, 7  ;;  %v405_v34 = vpack.c.bf16 %v404_v15, %v404_v15  ;;  %1583 = vmatpush3.bf16.msra.mxu1 %v1684_v13 }
  0x18   : > { %v437_v37 = vor.u32 %v435_v17, %v434_v27  ;;  %v423_v38 = vor.u32 %v421_v19, %v420_v29  ;;  %v448_v39 = vrot.slane %v446_v30, 7  ;;  %v399_v58 = vpack.c.bf16 %v391_v44, %v391_v44  ;;  %v1685_v17 = vld [vmem:[%s2189_s3 + $0x50] sm:$0xff]   ;;  %v1687_v27 = vld [vmem:[%s2189_s3 + $0xe0] sm:$0xff]  }
  0x19   : > { %v430_v41 = vor.u32 %v428_v24, %v427_v32  ;;  %v444_v42 = vor.u32 %v442_v26, %v441_v33  ;;  %v411_v48 = vshrl.u32 %v405_v34, 16  ;;  %v414_v57 = vshll.u32 %v405_v34, 16  ;;  %1540 = vmatprep.subr.bf16.mxu0 %v1685_v17  ;;  %1584 = vmatprep.subr.bf16.mxu1 %v1687_v27 }
  0x1a   : > { %v496_v45 = vsel %vm1817_vm4, 0, %v437_v37  ;;  %v494_v46 = vsel %vm1817_vm4, 0, %v423_v38  ;;  %v451_v47 = vor.u32 %v449_v31, %v448_v39  ;;  %v453_v62 = vshrl.u32 %v1836_v43, 16  ;;  %1541 = vmatpush3.bf16.msra.mxu0 %v1686_v21 }
  0x1b   : > { %v1848_v50 = vsel %vm1823_vm5, %v496_v45, 0  ;;  %v1852_v51 = vsel %vm1823_vm5, %v494_v46, 0  ;;  %v495_v52 = vsel %vm1817_vm4, 0, %v430_v41  ;;  %v497_v53 = vsel %vm1817_vm4, 0, %v444_v42  ;;  %v1689_v41 = vld [vmem:[%s2189_s3 + $0x58] sm:$0xff]   ;;  %1585 = vmatpush3.bf16.msra.mxu1 %v1688_v36 }
  0x1c   : > { %609 = vrot.lane.b32.xlu0 %v1848_v50, %s1733_s25  ;;  %605 = vrot.lane.b32.xlu1 %v1852_v51, %s1733_s25  ;;  %v1864_v54 = vsel %vm1823_vm5, %v495_v52, 0  ;;  %v597_v55 = vrot.slane %v1852_v51, 1  ;;  %v1870_v59 = vsel %vm1823_vm5, %v497_v53, 0  ;;  %v1873_v60 = vrot.slane %v1848_v50, 1  ;;  %v1690_v45 = vld [vmem:[%s2189_s3 + $0x18] sm:$0xff]   ;;  %v1691_v53 = vld [vmem:[%s2189_s3 + $0xe8] sm:$0xff]  }
  0x1d   : > { %v533_v56 = vshll.u32 %v1864_v54, 16  ;;  %v540_v61 = vshll.u32 %v1848_v50, 16  ;;  %v1884_v1 = vrot.slane %v1864_v54, 1  ;;  %v531_v2 = vshrl.u32 %v1864_v54, 16  ;;  %1542 = vmatprep.subr.bf16.mxu0 %v1689_v41  ;;  %1586 = vmatprep.subr.bf16.mxu1 %v1691_v53 }
  0x1e   : > { %v498_v3 = vsel %vm1817_vm4, 0, %v451_v47  ;;  %v413_v4 = vrot.slane %v411_v48, 7  ;;  %v538_v6 = vshrl.u32 %v1848_v50, 16  ;;  %v526_v7 = vshll.u32 %v1852_v51, 16  ;;  %1543 = vmatpush3.bf16.msra.mxu0 %v1690_v45 }
  0x1f   : > { %v535_v5 = vrot.slane %v533_v56, 1  ;;  %v1902_v8 = vsel %vm1823_vm5, %v498_v3, 0  ;;  %v542_v10 = vrot.slane %v540_v61, 1  ;;  %v524_v11 = vshrl.u32 %v1852_v51, 16 }
  0x20   : > { %607 = vrot.lane.b32.xlu1 %v1864_v54, %s1733_s25  ;;  %629 = vrot.lane.b32.xlu0 %v597_v55, %s1733_s25  ;;  %v547_v12 = vshll.u32 %v1870_v59, 16  ;;  %v416_v14 = vor.u32 %v414_v57, %v413_v4  ;;  %v455_v15 = vrot.slane %v453_v62, 7  ;;  %v554_v18 = vshll.u32 %v1902_v8, 16 }
  0x21   : > { %v456_v19 = vshll.u32 %v1836_v43, 16  ;;  %v460_v20 = vshrl.u32 %v399_v58, 16  ;;  %v1922_v23 = vor.u32 %v535_v5, %v531_v2  ;;  %v528_v24 = vrot.slane %v526_v7, 1 }
  0x22   : > { %v493_v25 = vsel %vm1817_vm4, 0, %v416_v14  ;;  %v463_v26 = vshll.u32 %v399_v58, 16  ;;  %v400_v32 = vpack.c.bf16 %v392_v9, %v392_v9  ;;  %v545_v33 = vshrl.u32 %v1870_v59, 16  ;;  %v1692_v9 = vld [vmem:[%s2189_s3 + $0xa8] sm:$0xff]   ;;  %v1693_v14 = vld [vmem:[%s2189_s3 + $0x60] sm:$0xff]  }
  0x23   : > { %v1931_v29 = vsel %vm1823_vm5, %v493_v25, 0  ;;  %v458_v30 = vor.u32 %v456_v19, %v455_v15  ;;  %v462_v31 = vrot.slane %v460_v20, 7  ;;  %v549_v34 = vrot.slane %v547_v12, 1  ;;  %1587 = vmatpush3.bf16.msra.mxu1 %v1692_v9  ;;  %1544 = vmatprep.subr.bf16.mxu0 %v1693_v14  ;;  %v1696_v19 = vld [vmem:[%s2189_s3 + $0xb0] sm:$0xff]  }
  0x24   : > { %611 = vrot.lane.b32.xlu1 %v1870_v59, %s1733_s25  ;;  %633 = vrot.lane.b32.xlu0 %v1873_v60, %s1733_s25  ;;  %v552_v35 = vshrl.u32 %v1902_v8, 16  ;;  %v556_v37 = vrot.slane %v554_v18, 1  ;;  %v408_v40 = vmul.f32 0.0, %v406_v16  ;;  %v1947_v42 = vor.u32 %v542_v10, %v538_v6  ;;  %v1694_v16 = vld [vmem:[%s2189_s3 + $0x20] sm:$0xff]   ;;  %v1695_v18 = vld [vmem:[%s2189_s3 + $0xf0] sm:$0xff]  }
  0x25   : > { %v499_v38 = vsel %vm1817_vm4, 0, %v458_v30  ;;  %v465_v39 = vor.u32 %v463_v26, %v462_v31  ;;  %v1949_v43 = vor.u32 %v528_v24, %v524_v11  ;;  %v519_v44 = vshll.u32 %v1931_v29, 16  ;;  %1545 = vmatpush3.bf16.msra.mxu0 %v1694_v16  ;;  %v1697_v24 = vld [vmem:[%s2189_s3 + $0x68] sm:$0xff]   ;;  %1588 = vmatprep.subr.bf16.mxu1 %v1695_v18  ;;  %v1699_v30 = vld [vmem:[%s2189_s3 + $0xf8] sm:$0xff]  }
  0x26   : > { %v1957_v46 = vsel %vm1823_vm5, %v499_v38, 0  ;;  %v467_v48 = vshrl.u32 %v400_v32, 16  ;;  %v409_v52 = vpack.c.bf16 %v408_v40, %v408_v40  ;;  %v1968_v56 = vor.u32 %v549_v34, %v545_v33  ;;  %v1698_v26 = vld [vmem:[%s2189_s3 + $0x28] sm:$0xff]   ;;  %1546 = vmatprep.subr.bf16.mxu0 %v1697_v24  ;;  %v1700_v31 = vld [vmem:[%s2189_s3 + $0xb8] sm:$0xff]   ;;  %v1701_v33 = vld [vmem:[%s2189_s3 + $0x70] sm:$0xff]  }
  0x27   : > { %v500_v47 = vsel %vm1817_vm4, 0, %v465_v39  ;;  %v1970_v57 = vor.u32 %v556_v37, %v552_v35  ;;  %v517_v58 = vshrl.u32 %v1931_v29, 16  ;;  %v521_v61 = vrot.slane %v519_v44, 1  ;;  %1589 = vmatpush3.bf16.msra.mxu1 %v1696_v19  ;;  %v1702_v34 = vld [vmem:[%s2189_s3 + $0x30] sm:$0xff]   ;;  %v1704_v39 = vld [vmem:[%s2189_s3 + $0x38] sm:$0xff]   ;;  %v2065_v40 = vld [vmem:[%s2189_s3 + $0x100] sm:$0xff]  }
  0x28   : > { %631 = vrot.lane.b32.xlu1 %v1884_v1, %s1733_s25  ;;  %576 = vrot.lane.b32.xlu0 %v1922_v23, %s1733_s25  ;;  %v1963_v49 = vsel %vm1823_vm5, %v500_v47, 0  ;;  %v561_v62 = vshll.u32 %v1957_v46, 16  ;;  %v474_v0 = vshrl.u32 %v409_v52, 16  ;;  %v469_v2 = vrot.slane %v467_v48, 7  ;;  %v1706_v19 = vld [vmem:[%s2189_s3 + $0x108] sm:$0xff]  }
  0x29   : > { %v568_v63 = vshll.u32 %v1963_v49, 16  ;;  %v470_v3 = vshll.u32 %v400_v32, 16  ;;  %v1980_v4 = vrot.slane %v1870_v59, 1  ;;  %v477_v6 = vshll.u32 %v409_v52, 16  ;;  %1547 = vmatpush3.bf16.msra.mxu0 %v1698_v26  ;;  %1590 = vmatprep.subr.bf16.mxu1 %v1699_v30 }
  0x2a   : > { %v476_v5 = vrot.slane %v474_v0, 7  ;;  %v559_v7 = vshrl.u32 %v1957_v46, 16  ;;  %v522_v10 = vor.u32 %v521_v61, %v517_v58  ;;  %v563_v11 = vrot.slane %v561_v62, 1  ;;  %1548 = vmatprep.subr.bf16.mxu0 %v1701_v33 }
  0x2b   : > { %v566_v12 = vshrl.u32 %v1963_v49, 16  ;;  %v570_v13 = vrot.slane %v568_v63, 1  ;;  %v472_v15 = vor.u32 %v470_v3, %v469_v2  ;;  %1591 = vmatpush3.bf16.msra.mxu1 %v1700_v31  ;;  %v2045_v35 = vrot.slane %v1902_v8, 1 }
  0x2c   : > { %578 = vrot.lane.b32.xlu0 %v1947_v42, %s1733_s25  ;;  %574 = vrot.lane.b32.xlu1 %v1949_v43, %s1733_s25  ;;  %v479_v17 = vor.u32 %v477_v6, %v476_v5  ;;  %v2006_v20 = vor.u32 %v563_v11, %v559_v7  ;;  %v2055_v36 = vrot.slane %v1957_v46, 1  ;;  %v2085_v53 = vrot.slane %v1963_v49, 1 }
  0x2d   : > { %v2008_v21 = vor.u32 %v570_v13, %v566_v12  ;;  %v501_v25 = vsel %vm1817_vm4, 0, %v472_v15  ;;  %1549 = vmatpush3.bf16.msra.mxu0 %v1702_v34  ;;  %1640 = vmatprep.subr.bf16.mxu1 %v2065_v40  ;;  %v596_v63 = vrot.slane %v1931_v29, 1 }
  0x2e   : > { %v502_v27 = vsel %vm1817_vm4, 0, %v479_v17  ;;  %v2032_v22 = vsel %vm1823_vm5, %v501_v25, 0  ;;  %1550 = vmatprep.subr.bf16.mxu0 %v1703_v28 }
  0x2f   : > { %v2036_v32 = vsel %vm1823_vm5, %v502_v27, 0  ;;  %v624_v37 = vshll.u32 %v2032_v22, 16  ;;  %v622_v41 = vshrl.u32 %v2032_v22, 16  ;;  %v628_v58 = vrot.slane %v2032_v22, 1 }
  0x30   : > { %580 = vrot.lane.b32.xlu0 %v1968_v56, %s1733_s25  ;;  %582 = vrot.lane.b32.xlu1 %v1970_v57, %s1733_s25  ;;  %v648_v38 = vshll.u32 %v2036_v32, 16  ;;  %v646_v45 = vshrl.u32 %v2036_v32, 16 }
  0x31   : > { %v626_v44 = vrot.slane %v624_v37, 1  ;;  %1551 = vmatpush3.bf16.msra.mxu0 %v1704_v39 }
  0x32   : > { %v650_v47 = vrot.slane %v648_v38, 1  ;;  %1624 = vmatprep.subr.bf16.mxu0 %v2065_v40 }
  0x33   : > { %v2079_v48 = vor.u32 %v626_v44, %v622_v41 }
  0x34   : > { %572 = vrot.lane.b32.xlu0 %v522_v10, %s1733_s25  ;;  %635 = vrot.lane.b32.xlu1 %v1980_v4, %s1733_s25  ;;  %v651_v52 = vor.u32 %v650_v47, %v646_v45 }
  0x38   : > { %584 = vrot.lane.b32.xlu0 %v2006_v20, %s1733_s25  ;;  %586 = vrot.lane.b32.xlu1 %v2008_v21, %s1733_s25 }
  0x3c   : > { %613 = vrot.lane.b32.xlu0 %v1902_v8, %s1733_s25  ;;  %615 = vrot.lane.b32.xlu1 %v1957_v46, %s1733_s25 }
  0x40   : > { %637 = vrot.lane.b32.xlu0 %v2045_v35, %s1733_s25  ;;  %639 = vrot.lane.b32.xlu1 %v2055_v36, %s1733_s25 }
  0x44   : > { %617 = vrot.lane.b32.xlu0 %v1963_v49, %s1733_s25  ;;  %619 = vrot.lane.b32.xlu1 %v2032_v22, %s1733_s25 }
  0x48   : > { %652 = vrot.lane.b32.xlu0 %v2079_v48, %s1733_s25  ;;  %654 = vrot.lane.b32.xlu1 %v651_v52, %s1733_s25 }
  0x4c   : > { %641 = vrot.lane.b32.xlu0 %v2085_v53, %s1733_s25  ;;  %643 = vrot.lane.b32.xlu1 %v628_v58, %s1733_s25 }
  0x8e   : > { %v610_v61 = vpop.permute.xlu0 %609  ;;  %v606_v62 = vpop.permute.xlu1 %605 }
  0x8f   : > { %v677_v3 = vsel %vm658_vm6, %v596_v63, %v606_v62  ;;  %v683_v34 = vsel %vm658_vm6, %v1884_v1, %v610_v61 }
  0x92   : > { %v608_v0 = vpop.permute.xlu1 %607  ;;  %v630_v2 = vpop.permute.xlu0 %629 }
  0x93   : > { %v680_v5 = vsel %vm658_vm6, %v597_v55, %v608_v0  ;;  %v701_v55 = vsel %vm658_vm6, %v1949_v43, %v630_v2  ;;  %v1707_v43 = vld [vmem:[%s2189_s3 + $0x110] sm:$0xff]  }
  0x94   : > { %v1474_v6 = vcombine.low %v677_v3, %v680_v5 }
  0x96   : > { %v612_v7 = vpop.permute.xlu1 %611  ;;  %v634_v9 = vpop.permute.xlu0 %633  ;;  %1156 = vmatprep.mubr.bf16.mxu0 %v1474_v6 }
  0x97   : > { %v686_v26 = vsel %vm658_vm6, %v1873_v60, %v612_v7 }
  0x98   : > { %v1478_v38 = vcombine.low %v683_v34, %v686_v26 }
  0x9a   : > { %v632_v10 = vpop.permute.xlu1 %631  ;;  %v577_v11 = vpop.permute.xlu0 %576 }
  0x9b   : > { %v704_v12 = vsel %vm658_vm6, %v1922_v23, %v632_v10  ;;  %v664_v15 = vsel %vm658_vm6, %v1864_v54, %v577_v11 }
  0x9c   : > { %v1475_v18 = vcombine.low %v701_v55, %v704_v12 }
  0x9e   : > { %v579_v13 = vpop.permute.xlu0 %578  ;;  %v575_v14 = vpop.permute.xlu1 %574 }
  0x9f   : > { %v666_v16 = vsel %vm658_vm6, %v1848_v50, %v579_v13 }
  0xa0   : > { %v1476_v17 = vcombine.low %v664_v15, %v666_v16  ;;  %v1477_v15 = vcombine.low %v1884_v1, %v1873_v60  ;;  %v1485_v16 = vcombine.low %v2055_v36, %v2085_v53 }
  0xa2   : > { %1221 = vmatprep.mubr.bf16.mxu1 %v1476_v17  ;;  %v581_v24 = vpop.permute.xlu0 %580  ;;  %v583_v23 = vpop.permute.xlu1 %582 }
  0xa3   : > { %v668_v25 = vsel %vm658_vm6, %v1870_v59, %v581_v24  ;;  %v670_v54 = vsel %vm658_vm6, %v1902_v8, %v583_v23  ;;  %1222 = vmatmul.mubr.bf16.vlgmr.msra.gmra.mrb[0].mxu1 %v1475_v18  ;;  %v707_v59 = vsel %vm658_vm6, %v1947_v42, %v634_v9  ;;  %v662_v8 = vsel %vm658_vm6, %v1852_v51, %v575_v14  ;;  %v1708_v51 = vld [vmem:[%s2189_s3 + $0x118] sm:$0xff]   ;;  %v1472_v24 = vld [vmem:[%s2190_s4] ss:$0 sm:$0xff] }
  0xa4   : > { %v1480_v50 = vcombine.low %v668_v25, %v670_v54  ;;  %1644 = vmatpush3.bf16.msra.mxu1 %v2065_v40 }
  0xa5   : > { %1641 = vmatprep.subr.bf16.mxu1 %v1706_v19 }
  0xa6   : > { %v573_v27 = vpop.permute.xlu0 %572  ;;  %v636_v30 = vpop.permute.xlu1 %635  ;;  %1229 = vmatprep.mubr.bf16.mxu1 %v1480_v50 }
  0xa7   : > { %v660_v31 = vsel %vm658_vm6, %v1931_v29, %v573_v27  ;;  %v710_v33 = vsel %vm658_vm6, %v1968_v56, %v636_v30 }
  0xa8   : > { %v1473_v28 = vcombine.low %v660_v31, %v662_v8  ;;  %v1479_v37 = vcombine.low %v707_v59, %v710_v33  ;;  %1645 = vmatpush3.bf16.msra.mxu1 %v1706_v19 }
  0xa9   : > { %1642 = vmatprep.subr.bf16.mxu1 %v1707_v43 }
  0xaa   : > { %v585_v39 = vpop.permute.xlu0 %584  ;;  %1157 = vmatmul.mubr.bf16.vlgmr.msra.gmra.mrb[0].mxu0 %v1473_v28  ;;  %v587_v42 = vpop.permute.xlu1 %586 }
  0xab   : > { %v672_v29 = vsel %vm658_vm6, %v1957_v46, %v585_v39  ;;  %1625 = vmatpush3.bf16.msra.mxu0 %v2065_v40  ;;  %v674_v56 = vsel %vm658_vm6, %v1963_v49, %v587_v42  ;;  %1164 = vmatprep.mubr.bf16.mxu0 %v1478_v38 }
  0xac   : > { %v1484_v41 = vcombine.low %v672_v29, %v674_v56  ;;  %1230 = vmatmul.mubr.bf16.gmra.mrb[4].mxu1 %v1479_v37  ;;  %1626 = vmatprep.subr.bf16.mxu0 %v1706_v19 }
  0xad   : > { %1646 = vmatpush3.bf16.msra.mxu1 %v1707_v43 }
  0xae   : > { %v614_v44 = vpop.permute.xlu0 %613  ;;  %v616_v45 = vpop.permute.xlu1 %615  ;;  %1237 = vmatprep.mubr.bf16.mxu1 %v1484_v41  ;;  %1643 = vmatprep.subr.bf16.mxu1 %v1708_v51 }
  0xaf   : > { %v689_v47 = vsel %vm658_vm6, %v1980_v4, %v614_v44  ;;  %v692_v46 = vsel %vm658_vm6, %v2045_v35, %v616_v45  ;;  %1627 = vmatpush3.bf16.msra.mxu0 %v1706_v19 }
  0xb0   : > { %v1482_v40 = vcombine.low %v689_v47, %v692_v46  ;;  %1628 = vmatprep.subr.bf16.mxu0 %v1707_v43 }
  0xb1   : > { %1647 = vmatpush3.bf16.msra.mxu1 %v1708_v51 }
  0xb2   : > { %v638_v49 = vpop.permute.xlu0 %637  ;;  %1165 = vmatmul.mubr.bf16.gmra.mrb[4].mxu0 %v1476_v17  ;;  %v640_v52 = vpop.permute.xlu1 %639  ;;  %v657_v17 = vrot.slane %v2036_v32, 1 }
  0xb3   : > { %v713_v61 = vsel %vm658_vm6, %v1970_v57, %v638_v49  ;;  %v716_v62 = vsel %vm658_vm6, %v2006_v20, %v640_v52  ;;  %1172 = vmatprep.mubr.bf16.mxu0 %v1482_v40  ;;  %1629 = vmatpush3.bf16.msra.mxu0 %v1707_v43 }
  0xb4   : > { %v1483_v63 = vcombine.low %v713_v61, %v716_v62  ;;  %1630 = vmatprep.subr.bf16.mxu0 %v1708_v51 }
  0xb6   : > { %v618_v0 = vpop.permute.xlu0 %617  ;;  %v620_v2 = vpop.permute.xlu1 %619  ;;  %1238 = vmatmul.mubr.bf16.gmra.mrb[8].mxu1 %v1483_v63 }
  0xb7   : > { %v695_v3 = vsel %vm658_vm6, %v2055_v36, %v618_v0  ;;  %v698_v5 = vsel %vm658_vm6, %v2085_v53, %v620_v2  ;;  %1631 = vmatpush3.bf16.msra.mxu0 %v1708_v51 }
  0xb8   : > { %v1486_v6 = vcombine.low %v695_v3, %v698_v5 }
  0xba   : > { %v653_v7 = vpop.permute.xlu0 %652  ;;  %1173 = vmatmul.mubr.bf16.gmra.mrb[8].mxu0 %v1480_v50  ;;  %v655_v57 = vpop.permute.xlu1 %654 }
  0xbb   : > { %v724_v20 = vsel %vm658_vm6, %v2032_v22, %v653_v7  ;;  %v726_v9 = vsel %vm658_vm6, %v2036_v32, %v655_v57  ;;  %1180 = vmatprep.mubr.bf16.mxu0 %v1486_v6 }
  0xbc   : > { %v1488_v10 = vcombine.low %v724_v20, %v726_v9 }
  0xbe   : > { %v642_v11 = vpop.permute.xlu0 %641  ;;  %v644_v12 = vpop.permute.xlu1 %643  ;;  %1245 = vmatprep.mubr.bf16.mxu1 %v1488_v10 }
  0xbf   : > { %v719_v13 = vsel %vm658_vm6, %v2008_v21, %v642_v11  ;;  %v722_v14 = vsel %vm658_vm6, %v2079_v48, %v644_v12  ;;  %v1481_v21 = vcombine.low %v1980_v4, %v2045_v35  ;;  %v1489_v48 = vcombine.low %v628_v58, %v657_v17 }
  0xc0   : > { %v1487_v55 = vcombine.low %v719_v13, %v722_v14 }
  0xc2   : > { %1181 = vmatmul.mubr.bf16.gmra.mrb[12].mxu0 %v1484_v41  ;;  %1246 = vmatmul.mubr.bf16.gmra.mrb[12].mxu1 %v1487_v55 }
  0xc3   : > { %1632 = vmatprep.mubr.msk.bf16.mxu0 %vm658_vm6, %v1477_v15  ;;  %1636 = vmatprep.mubr.msk.bf16.mxu1 %vm658_vm6, %v1485_v16 }
  0xca   : > { %1633 = vmatmul.mubr.msk.bf16.vlgmr.msra.gmra.mrb[16].mxu0 %vm658_vm6, %v1481_v21  ;;  %1637 = vmatmul.mubr.msk.bf16.vlgmr.msra.gmra.mrb[16].mxu1 %vm658_vm6, %v1489_v48 }
 0x176   : > { %v1592_v60 = vpop.f32.mrb[0].mxu1 }
 0x177   : > { %v1593_v1 = vpop.f32.mrb[1].mxu1 }
 0x178   : > { %v1594_v36 = vadd.f32 %v1593_v1, %v1592_v60  ;;  %v1595_v32 = vpop.f32.mrb[2].mxu1 }
 0x179   : > { %v1596_v53 = vpop.f32.mrb[3].mxu1 }
 0x17a   : > { %v1597_v18 = vadd.f32 %v1596_v53, %v1595_v32 }
 0x17d   : > { %v1552_v19 = vpop.f32.mrb[0].mxu0 }
 0x17e   : > { %v1553_v23 = vpop.f32.mrb[1].mxu0 }
 0x17f   : > { %v1554_v4 = vadd.f32 %v1553_v23, %v1552_v19  ;;  %v1598_v35 = vpop.f32.mrb[4].mxu1  ;;  %v1555_v22 = vpop.f32.mrb[2].mxu0 }
 0x180   : > { %v1599_v58 = vpop.f32.mrb[5].mxu1  ;;  %v1556_v25 = vpop.f32.mrb[3].mxu0 }
 0x181   : > { %v1159_v54 = vadd.f32 %v1554_v4, %v1472_v24  ;;  %v1600_v50 = vadd.f32 %v1599_v58, %v1598_v35  ;;  %v1557_v43 = vadd.f32 %v1556_v25, %v1555_v22  ;;  %v1601_v26 = vpop.f32.mrb[6].mxu1 }
 0x182   : > { %v1602_v27 = vpop.f32.mrb[7].mxu1 }
 0x183   : > { %v1162_v30 = vadd.f32 %v1557_v43, %v1472_v24  ;;  %v1603_v59 = vadd.f32 %v1602_v27, %v1601_v26  ;;  %v1224_v8 = vadd.f32 %v1594_v36, %v1159_v54 }
 0x185   : > { %v1558_v31 = vpop.f32.mrb[4].mxu0  ;;  %v1227_v33 = vadd.f32 %v1597_v18, %v1162_v30 }
 0x186   : > { %v1559_v34 = vpop.f32.mrb[5].mxu0 }
 0x187   : > { %v1560_v28 = vadd.f32 %v1559_v34, %v1558_v31  ;;  %v1561_v37 = vpop.f32.mrb[6].mxu0 }
 0x188   : > { %v1562_v38 = vpop.f32.mrb[7].mxu0 }
 0x189   : > { %v1167_v39 = vadd.f32 %v1560_v28, %v1472_v24  ;;  %v1563_v42 = vadd.f32 %v1562_v38, %v1561_v37  ;;  %v1604_v51 = vpop.f32.mrb[8].mxu1 }
 0x18a   : > { %v1605_v29 = vpop.f32.mrb[9].mxu1 }
 0x18b   : > { %v1170_v56 = vadd.f32 %v1563_v42, %v1472_v24  ;;  %v1606_v41 = vadd.f32 %v1605_v29, %v1604_v51  ;;  %v1607_v44 = vpop.f32.mrb[10].mxu1  ;;  %v1232_v45 = vadd.f32 %v1600_v50, %v1167_v39 }
 0x18c   : > { %v1608_v47 = vpop.f32.mrb[11].mxu1 }
 0x18d   : > { %v1609_v46 = vadd.f32 %v1608_v47, %v1607_v44  ;;  %v1564_v40 = vpop.f32.mrb[8].mxu0  ;;  %v1235_v49 = vadd.f32 %v1603_v59, %v1170_v56 }
 0x18e   : > { %v1565_v52 = vpop.f32.mrb[9].mxu0 }
 0x18f   : > { %v1566_v61 = vadd.f32 %v1565_v52, %v1564_v40  ;;  %v1567_v62 = vpop.f32.mrb[10].mxu0 }
 0x190   : > { %v1568_v63 = vpop.f32.mrb[11].mxu0 }
 0x191   : > { %v1175_v0 = vadd.f32 %v1566_v61, %v1472_v24  ;;  %v1569_v2 = vadd.f32 %v1568_v63, %v1567_v62 }
 0x193   : > { %v1178_v3 = vadd.f32 %v1569_v2, %v1472_v24  ;;  %v1240_v5 = vadd.f32 %v1606_v41, %v1175_v0 }
 0x195   : > { %v1570_v6 = vpop.f32.mrb[12].mxu0  ;;  %v1610_v7 = vpop.f32.mrb[12].mxu1  ;;  %v1243_v57 = vadd.f32 %v1609_v46, %v1178_v3 }
 0x196   : > { %v1571_v20 = vpop.f32.mrb[13].mxu0  ;;  %v1611_v9 = vpop.f32.mrb[13].mxu1 }
 0x197   : > { %v1572_v10 = vadd.f32 %v1571_v20, %v1570_v6  ;;  %v1612_v11 = vadd.f32 %v1611_v9, %v1610_v7  ;;  %v1573_v12 = vpop.f32.mrb[14].mxu0  ;;  %v1613_v13 = vpop.f32.mrb[14].mxu1 }
 0x198   : > { %v1574_v14 = vpop.f32.mrb[15].mxu0  ;;  %v1614_v15 = vpop.f32.mrb[15].mxu1 }
 0x199   : > { %v1183_v16 = vadd.f32 %v1572_v10, %v1472_v24  ;;  %v1575_v55 = vadd.f32 %v1574_v14, %v1573_v12  ;;  %v1615_v17 = vadd.f32 %v1614_v15, %v1613_v13 }
 0x19b   : > { %v1186_v21 = vadd.f32 %v1575_v55, %v1472_v24  ;;  %v1248_v48 = vadd.f32 %v1612_v11, %v1183_v16 }
 0x19d   : > { %v1634_v60 = vpop.f32.mrb[16].mxu0  ;;  %v1638_v1 = vpop.f32.mrb[16].mxu1  ;;  %v1251_v36 = vadd.f32 %v1615_v17, %v1186_v21 }
 0x19e   : > { %v1297_v32 = vadd.f32 %v1634_v60, %v1232_v45  ;;  %v1313_v53 = vadd.f32 %v1638_v1, %v1248_v48  ;;  %v1288_v18 = vpop.f32.mrb[17].mxu0  ;;  %v1304_v19 = vpop.f32.mrb[17].mxu1 }
 0x19f   : > { %v1289_v23 = vadd.f32 %v1288_v18, %v1224_v8  ;;  %v1305_v4 = vadd.f32 %v1304_v19, %v1240_v5  ;;  %v1635_v35 = vpop.f32.mrb[18].mxu0  ;;  %v1639_v22 = vpop.f32.mrb[18].mxu1 }
 0x1a0   : > { %v1321_v58 = vmax.f32 %v1297_v32, 0.0  ;;  %v1325_v25 = vmax.f32 %v1313_v53, 0.0  ;;  %v1300_v54 = vadd.f32 %v1635_v35, %v1235_v49  ;;  %v1316_v24 = vadd.f32 %v1639_v22, %v1251_v36  ;;  %v1291_v50 = vpop.f32.mrb[19].mxu0  ;;  %v1307_v43 = vpop.f32.mrb[19].mxu1 }
 0x1a1   : > { %v1319_v26 = vmax.f32 %v1289_v23, 0.0  ;;  %v1323_v27 = vmax.f32 %v1305_v4, 0.0  ;;  %v1292_v30 = vadd.f32 %v1291_v50, %v1227_v33  ;;  %v1308_v59 = vadd.f32 %v1307_v43, %v1243_v57 }
 0x1a2   : > { %1329 = vst [vmem:[%s376_s27 + $0x10] sm:$0xff] %v1321_v58  ;;  %1333 = vst [vmem:[%s376_s27 + $0x30] sm:$0xff] %v1325_v25  ;;  %v1322_v31 = vmax.f32 %v1300_v54, 0.0  ;;  %v1326_v34 = vmax.f32 %v1316_v24, 0.0 }
 0x1a3   : > { %1327 = vst [vmem:[%s376_s27] sm:$0xff] %v1319_v26  ;;  %1331 = vst [vmem:[%s376_s27 + $0x20] sm:$0xff] %v1323_v27  ;;  %v1320_v8 = vmax.f32 %v1292_v30, 0.0  ;;  %v1324_v28 = vmax.f32 %v1308_v59, 0.0 }
 0x1a4   : > { %1330 = vst [vmem:[%s376_s27 + $0x18] sm:$0xff] %v1322_v31  ;;  %1334 = vst [vmem:[%s376_s27 + $0x38] sm:$0xff] %v1326_v34 }
 0x1a5   : > { %1328 = vst [vmem:[%s376_s27 + $0x8] sm:$0xff] %v1320_v8  ;;  %1332 = vst [vmem:[%s376_s27 + $0x28] sm:$0xff] %v1324_v28 }
 0x1a6 PF: > { %s15_s20 = sadd.s32 1, %s1731_s20   ;;  %s2196_s18 = smov %s1727_s19 }
 0x1a7   : > { %p12_p5 = scmp.ge.s32.totalorder %s15_s20, 6   ;;  %s2197_s19 = smov %s2199_s21 }
 0x1a9   :  { %14 = sbr.rel (!%p12_p5) target bundleno = 2 (0x2), region = 77 }

// kernel: vgg_loss.17
= control target key start
LH: loop header
LB: loop body
LE: loop exit
PB: predicated region body
PF: predicated region fallthrough
CT: control target
= control target key end

     0   :  { %s463_s0 = inlined_call_operand.vmem [shape: f32[256,128], index: 0, kind: input, shape index: {}]   ;;  %s464_s1 = inlined_call_operand.vmem [shape: f32[256,128], index: 1, kind: input, shape index: {}]   ;;  %s465_s2 = inlined_call_operand.hbm [shape: f32[1,1], index: 2, kind: output, shape index: {}]  }
   0x1   :  { %v18_v0 = vld [vmem:[%s463_s0] sm:$0xff]  ;;  %v19_v1 = vld [vmem:[%s463_s0 + $0x8] sm:$0xff]  ;;  %v20_v4 = vld [vmem:[%s463_s0 + $0x10] sm:$0xff] }
   0x2   :  { %v50_v2 = vld [vmem:[%s464_s1] sm:$0xff]  ;;  %v51_v3 = vld [vmem:[%s464_s1 + $0x8] sm:$0xff]  ;;  %v52_v5 = vld [vmem:[%s464_s1 + $0x10] sm:$0xff] }
   0x3   :  { %v82_v6 = vsub.f32 %v18_v0, %v50_v2  ;;  %v83_v7 = vsub.f32 %v19_v1, %v51_v3  ;;  %v21_v8 = vld [vmem:[%s463_s0 + $0x18] sm:$0xff] }
   0x4   :  { %v53_v9 = vld [vmem:[%s464_s1 + $0x18] sm:$0xff] }
   0x5   :  { %7 = vsyncpa [#allocation4], 0  ;;  %v84_v10 = vsub.f32 %v20_v4, %v52_v5  ;;  %v22_v11 = vld [vmem:[%s463_s0 + $0x20] sm:$0xff]  ;;  %v85_v13 = vsub.f32 %v21_v8, %v53_v9  ;;  %v115_v14 = vmul.f32 %v82_v6, %v82_v6  ;;  %v116_v15 = vmul.f32 %v83_v7, %v83_v7  ;;  %v23_v16 = vld [vmem:[%s463_s0 + $0x28] sm:$0xff] }
   0x6   :  { %v54_v12 = vld [vmem:[%s464_s1 + $0x20] sm:$0xff]  ;;  %v55_v17 = vld [vmem:[%s464_s1 + $0x28] sm:$0xff]  ;;  %v24_v20 = vld [vmem:[%s463_s0 + $0x30] sm:$0xff]  ;;  %vm16_vm0 = vcmask 0  }
   0x7   :  { %v86_v18 = vsub.f32 %v22_v11, %v54_v12  ;;  %v117_v19 = vmul.f32 %v84_v10, %v84_v10  ;;  %v56_v21 = vld [vmem:[%s464_s1 + $0x30] sm:$0xff]  ;;  %v87_v22 = vsub.f32 %v23_v16, %v55_v17  ;;  %v118_v23 = vmul.f32 %v85_v13, %v85_v13  ;;  %v25_v25 = vld [vmem:[%s463_s0 + $0x38] sm:$0xff]  ;;  %v26_v30 = vld [vmem:[%s463_s0 + $0x40] sm:$0xff] }
   0x8   :  { %v147_v24 = vadd.f32 %v116_v15, %v115_v14  ;;  %v57_v26 = vld [vmem:[%s464_s1 + $0x38] sm:$0xff]  ;;  %v88_v27 = vsub.f32 %v24_v20, %v56_v21  ;;  %v58_v31 = vld [vmem:[%s464_s1 + $0x40] sm:$0xff]  ;;  %v27_v35 = vld [vmem:[%s463_s0 + $0x48] sm:$0xff] }
   0x9   :  { %v119_v28 = vmul.f32 %v86_v18, %v86_v18  ;;  %v89_v32 = vsub.f32 %v25_v25, %v57_v26  ;;  %v120_v33 = vmul.f32 %v87_v22, %v87_v22  ;;  %v59_v36 = vld [vmem:[%s464_s1 + $0x48] sm:$0xff]  ;;  %v90_v37 = vsub.f32 %v26_v30, %v58_v31  ;;  %v28_v40 = vld [vmem:[%s463_s0 + $0x50] sm:$0xff]  ;;  %v29_v45 = vld [vmem:[%s463_s0 + $0x58] sm:$0xff] }
   0xa   :  { %v148_v29 = vadd.f32 %v147_v24, %v117_v19  ;;  %v121_v38 = vmul.f32 %v88_v27, %v88_v27  ;;  %v60_v41 = vld [vmem:[%s464_s1 + $0x50] sm:$0xff]  ;;  %v91_v42 = vsub.f32 %v27_v35, %v59_v36  ;;  %v61_v46 = vld [vmem:[%s464_s1 + $0x58] sm:$0xff]  ;;  %v30_v50 = vld [vmem:[%s463_s0 + $0x60] sm:$0xff] }
   0xb   :  { %v122_v43 = vmul.f32 %v89_v32, %v89_v32  ;;  %v92_v47 = vsub.f32 %v28_v40, %v60_v41  ;;  %v123_v48 = vmul.f32 %v90_v37, %v90_v37  ;;  %v62_v51 = vld [vmem:[%s464_s1 + $0x60] sm:$0xff]  ;;  %v93_v52 = vsub.f32 %v29_v45, %v61_v46  ;;  %v31_v55 = vld [vmem:[%s463_s0 + $0x68] sm:$0xff]  ;;  %v32_v60 = vld [vmem:[%s463_s0 + $0x70] sm:$0xff] }
   0xc   :  { %v149_v34 = vadd.f32 %v148_v29, %v118_v23  ;;  %v124_v53 = vmul.f32 %v91_v42, %v91_v42  ;;  %v63_v56 = vld [vmem:[%s464_s1 + $0x68] sm:$0xff]  ;;  %v94_v57 = vsub.f32 %v30_v50, %v62_v51  ;;  %v64_v61 = vld [vmem:[%s464_s1 + $0x70] sm:$0xff]  ;;  %v33_v1 = vld [vmem:[%s463_s0 + $0x78] sm:$0xff] }
   0xd   :  { %v125_v58 = vmul.f32 %v92_v47, %v92_v47  ;;  %v95_v62 = vsub.f32 %v31_v55, %v63_v56  ;;  %v126_v63 = vmul.f32 %v93_v52, %v93_v52  ;;  %v65_v2 = vld [vmem:[%s464_s1 + $0x78] sm:$0xff]  ;;  %v96_v3 = vsub.f32 %v32_v60, %v64_v61  ;;  %v34_v6 = vld [vmem:[%s463_s0 + $0x80] sm:$0xff]  ;;  %v35_v11 = vld [vmem:[%s463_s0 + $0x88] sm:$0xff] }
   0xe   :  { %v150_v39 = vadd.f32 %v149_v34, %v119_v28  ;;  %v127_v4 = vmul.f32 %v94_v57, %v94_v57  ;;  %v66_v7 = vld [vmem:[%s464_s1 + $0x80] sm:$0xff]  ;;  %v97_v8 = vsub.f32 %v33_v1, %v65_v2  ;;  %v67_v12 = vld [vmem:[%s464_s1 + $0x88] sm:$0xff]  ;;  %v36_v16 = vld [vmem:[%s463_s0 + $0x90] sm:$0xff] }
   0xf   :  { %v128_v9 = vmul.f32 %v95_v62, %v95_v62  ;;  %v98_v13 = vsub.f32 %v34_v6, %v66_v7  ;;  %v129_v14 = vmul.f32 %v96_v3, %v96_v3  ;;  %v68_v17 = vld [vmem:[%s464_s1 + $0x90] sm:$0xff]  ;;  %v99_v18 = vsub.f32 %v35_v11, %v67_v12  ;;  %v37_v21 = vld [vmem:[%s463_s0 + $0x98] sm:$0xff]  ;;  %v38_v26 = vld [vmem:[%s463_s0 + $0xa0] sm:$0xff] }
  0x10   :  { %v151_v44 = vadd.f32 %v150_v39, %v120_v33  ;;  %v130_v19 = vmul.f32 %v97_v8, %v97_v8  ;;  %v69_v22 = vld [vmem:[%s464_s1 + $0x98] sm:$0xff]  ;;  %v100_v23 = vsub.f32 %v36_v16, %v68_v17  ;;  %v70_v27 = vld [vmem:[%s464_s1 + $0xa0] sm:$0xff]  ;;  %v39_v31 = vld [vmem:[%s463_s0 + $0xa8] sm:$0xff] }
  0x11   :  { %v131_v24 = vmul.f32 %v98_v13, %v98_v13  ;;  %v101_v28 = vsub.f32 %v37_v21, %v69_v22  ;;  %v132_v29 = vmul.f32 %v99_v18, %v99_v18  ;;  %v71_v32 = vld [vmem:[%s464_s1 + $0xa8] sm:$0xff]  ;;  %v102_v33 = vsub.f32 %v38_v26, %v70_v27  ;;  %v40_v36 = vld [vmem:[%s463_s0 + $0xb0] sm:$0xff]  ;;  %v41_v41 = vld [vmem:[%s463_s0 + $0xb8] sm:$0xff] }
  0x12   :  { %v152_v49 = vadd.f32 %v151_v44, %v121_v38  ;;  %v133_v34 = vmul.f32 %v100_v23, %v100_v23  ;;  %v72_v37 = vld [vmem:[%s464_s1 + $0xb0] sm:$0xff]  ;;  %v103_v38 = vsub.f32 %v39_v31, %v71_v32  ;;  %v73_v42 = vld [vmem:[%s464_s1 + $0xb8] sm:$0xff]  ;;  %v42_v46 = vld [vmem:[%s463_s0 + $0xc0] sm:$0xff]  ;;  %v239_v31 = vmov 0.0  }
  0x13   :  { %v134_v39 = vmul.f32 %v101_v28, %v101_v28  ;;  %v135_v44 = vmul.f32 %v102_v33, %v102_v33  ;;  %v74_v47 = vld [vmem:[%s464_s1 + $0xc0] sm:$0xff]  ;;  %v43_v51 = vld [vmem:[%s463_s0 + $0xc8] sm:$0xff]  ;;  %v44_v56 = vld [vmem:[%s463_s0 + $0xd0] sm:$0xff]  ;;  %17 = vst.msk [vmem:[#allocation2] sm:$0x1] %vm16_vm0, %v239_v31 }
  0x14   :  { %v153_v54 = vadd.f32 %v152_v49, %v122_v43  ;;  %v104_v43 = vsub.f32 %v40_v36, %v72_v37  ;;  %v136_v49 = vmul.f32 %v103_v38, %v103_v38  ;;  %v75_v52 = vld [vmem:[%s464_s1 + $0xc8] sm:$0xff]  ;;  %v76_v57 = vld [vmem:[%s464_s1 + $0xd0] sm:$0xff]  ;;  %v45_v61 = vld [vmem:[%s463_s0 + $0xd8] sm:$0xff] }
  0x15   :  { %v77_v62 = vld [vmem:[%s464_s1 + $0xd8] sm:$0xff]  ;;  %v46_v2 = vld [vmem:[%s463_s0 + $0xe0] sm:$0xff]  ;;  %v47_v7 = vld [vmem:[%s463_s0 + $0xe8] sm:$0xff] }
  0x16   :  { %v154_v59 = vadd.f32 %v153_v54, %v123_v48  ;;  %v105_v48 = vsub.f32 %v41_v41, %v73_v42  ;;  %v137_v54 = vmul.f32 %v104_v43, %v104_v43  ;;  %v78_v3 = vld [vmem:[%s464_s1 + $0xe0] sm:$0xff]  ;;  %v79_v8 = vld [vmem:[%s464_s1 + $0xe8] sm:$0xff]  ;;  %v48_v12 = vld [vmem:[%s463_s0 + $0xf0] sm:$0xff] }
  0x17   :  { %v80_v13 = vld [vmem:[%s464_s1 + $0xf0] sm:$0xff]  ;;  %v49_v17 = vld [vmem:[%s463_s0 + $0xf8] sm:$0xff] }
  0x18   :  { %v155_v0 = vadd.f32 %v154_v59, %v124_v53  ;;  %v106_v53 = vsub.f32 %v42_v46, %v74_v47  ;;  %v138_v59 = vmul.f32 %v105_v48, %v105_v48  ;;  %v81_v18 = vld [vmem:[%s464_s1 + $0xf8] sm:$0xff]  ;;  %s240_s1 = smov [#allocation3]  }
  0x19   :  { %v113_v22 = vsub.f32 %v49_v17, %v81_v18  ;;  %s203_s25 = sshll.u32 %s240_s1, 4  ;;  %s204_s25 = int_to_ptr.vmem [resolvable:$true] %s203_s25 }
  0x1a   :  { %v156_v5 = vadd.f32 %v155_v0, %v125_v58  ;;  %v107_v58 = vsub.f32 %v43_v51, %v75_v52  ;;  %v139_v0 = vmul.f32 %v106_v53, %v106_v53  ;;  %s215_s26 = scalar_lea.vmem %s204_s25, 16  ;;  %s219_s27 = scalar_lea.vmem %s204_s25, 32 }
  0x1b   :  { %v146_v27 = vmul.f32 %v113_v22, %v113_v22  ;;  %p216_p0 = scmp.ne.s32.totalorder %s204_s25, %s215_s26  ;;  %p220_p1 = scmp.lt.s32.totalorder %s204_s25, %s204_s25 }
  0x1c   :  { %v157_v10 = vadd.f32 %v156_v5, %v126_v63  ;;  %v108_v63 = vsub.f32 %v44_v56, %v76_v57  ;;  %v140_v5 = vmul.f32 %v107_v58, %v107_v58  ;;  %p221_p2 = scmp.lt.s32.totalorder %s219_s27, %s215_s26 }
  0x1e   :  { %v158_v15 = vadd.f32 %v157_v10, %v127_v4  ;;  %v109_v4 = vsub.f32 %v45_v61, %v77_v62  ;;  %v141_v10 = vmul.f32 %v108_v63, %v108_v63  ;;  %p222_p3 = por %p221_p2, %p220_p1 }
  0x20   :  { %v159_v20 = vadd.f32 %v158_v15, %v128_v9  ;;  %v110_v9 = vsub.f32 %v46_v2, %v78_v3  ;;  %v142_v15 = vmul.f32 %v109_v4, %v109_v4  ;;  %p223_p4 = pnand %p222_p3, %p216_p0 }
  0x22   :  { %v160_v25 = vadd.f32 %v159_v20, %v129_v14  ;;  %v111_v14 = vsub.f32 %v47_v7, %v79_v8  ;;  %v143_v20 = vmul.f32 %v110_v9, %v110_v9 }
  0x24   :  { %v161_v30 = vadd.f32 %v160_v25, %v130_v19  ;;  %v112_v19 = vsub.f32 %v48_v12, %v80_v13  ;;  %v144_v23 = vmul.f32 %v111_v14, %v111_v14 }
  0x26   :  { %v162_v35 = vadd.f32 %v161_v30, %v131_v24  ;;  %v145_v25 = vmul.f32 %v112_v19, %v112_v19 }
  0x28   :  { %v163_v40 = vadd.f32 %v162_v35, %v132_v29 }
  0x2a   :  { %v164_v45 = vadd.f32 %v163_v40, %v133_v34 }
  0x2c   :  { %v165_v50 = vadd.f32 %v164_v45, %v134_v39  ;;  %v114_v39 = vld [vmem:[#allocation2] sm:$0x1] }
  0x2e   :  { %v166_v55 = vadd.f32 %v165_v50, %v135_v44 }
  0x30   :  { %v167_v60 = vadd.f32 %v166_v55, %v136_v49 }
  0x32   :  { %v168_v1 = vadd.f32 %v167_v60, %v137_v54 }
  0x34   :  { %v169_v6 = vadd.f32 %v168_v1, %v138_v59 }
  0x36   :  { %v170_v11 = vadd.f32 %v169_v6, %v139_v0 }
  0x38   :  { %v171_v16 = vadd.f32 %v170_v11, %v140_v5 }
  0x3a   :  { %v172_v21 = vadd.f32 %v171_v16, %v141_v10 }
  0x3c   :  { %v173_v24 = vadd.f32 %v172_v21, %v142_v15 }
  0x3e   :  { %v174_v26 = vadd.f32 %v173_v24, %v143_v20 }
  0x40   :  { %v175_v28 = vadd.f32 %v174_v26, %v144_v23 }
  0x42   :  { %v176_v29 = vadd.f32 %v175_v28, %v145_v25 }
  0x44   :  { %v177_v30 = vadd.f32 %v176_v29, %v146_v27 }
  0x46   :  { %178 = vadd.xlane.f32.xlu0 %v177_v30 }
  0xd3   :  { %v179_v32 = vpop.xlane.xlu0 %178 }
  0xd4   :  { %v180_v33 = vrot.slane %v179_v32, 4 }
  0xd6   :  { %v181_v34 = vadd.f32 %v180_v33, %v179_v32 }
  0xd8   :  { %v182_v35 = vrot.slane %v181_v34, 2 }
  0xda   :  { %v183_v36 = vadd.f32 %v182_v35, %v181_v34 }
  0xdc   :  { %v184_v37 = vrot.slane %v183_v36, 1 }
  0xde   :  { %v185_v38 = vadd.f32 %v184_v37, %v183_v36 }
  0xe0   :  { %211 = vpush %v185_v38 }
 0x111   :  { %s212_s0 = spop %211 }
 0x112   :  { %v187_v40 = vstv %s212_s0 }
 0x113   :  { %v188_v41 = vadd.f32 %v187_v40, %v114_v39 }
 0x115   :  { %190 = vst.msk [vmem:[#allocation2] sm:$0x1] %vm16_vm0, %v188_v41 }
 0x11c   :  { %v194_v42 = vld [vmem:[#allocation2] sm:$0x1] }
 0x11d   :  { %v195_v43 = vmul.f32 3.0517578e-05, %v194_v42 }
 0x11f   :  { %196 = vst.msk [vmem:[#allocation3] sm:$0x1] %vm16_vm0, %v195_v43 }
 0x120   :  { %226 = shalt.err (!%p223_p4)
}
 0x121   :  { %s227_s30 = scalar_lea.hbm %s465_s2, 16 }
 0x122   :  { %p228_p5 = scmp.ne.s32.totalorder %s465_s2, %s227_s30  ;;  %p231_p6 = scmp.lt.u32.totalorder %s227_s30, %s465_s2 }
 0x124   :  { %p233_p7 = pnand %p231_p6, %p228_p5 }
 0x126   :  { %236 = shalt.err (!%p233_p7)
}
 0x127   :  { %206 = dma.vmem_to_hbm [thread:$0]  %s204_s25, 16, %s465_s2, [#allocation4]  }
 0x128   :  { %237 = dma.done.wait [#allocation4], 16  }
 0x129   :  { %238 = vsyncadd [#allocation4], 4294967280 }
 0x12a   :  { %210 = vsyncpa [#allocation4], 1 }

// kernel: vgg_loss.14
= control target key start
LH: loop header
LB: loop body
LE: loop exit
PB: predicated region body
PF: predicated region fallthrough
CT: control target
= control target key end

     0   :  { %s743_s6 = smov 0   ;;  %s745_s7 = smov 0   ;;  %s814_s0 = inlined_call_operand.vmem [shape: f32[4,64,128], index: 0, kind: input, shape index: {}]   ;;  %s815_s1 = inlined_call_operand.vmem [shape: f32[4,128,128], index: 1, kind: output, shape index: {}]  }
   0x1   :  { %s747_s8 = smov 0  }
   0x2 LB: > { %s23_s9 = sadd.s32 1, %s727_s7  ;;  %p571_p0 = scmp.ge.s32.totalorder %s731_s8, 1  ;;  %s731_s8 = sphi %s747_s8, %s11_s8   ;;  %s727_s7 = sphi %s745_s7, %s817_s7   ;;  %s723_s6 = sphi %s743_s6, %s816_s6  }
   0x3   : > { %p25_p1 = scmp.ge.s32.totalorder %s23_s9, 4  ;;  %p106_p2 = scmp.lt.s32.totalorder %s731_s8, 5 }
   0x5   : > { %s819_s9 = smov (%p25_p1, %s23_s9), 0  ;;  %p107_p3 = pnand %p571_p0, %p106_p2 }
   0x6   : > { %p131_p4 = scmp.lt.s32.totalorder (!%p107_p3), %s723_s6, 3  ;;  %vm221_vm0 = vcmask (!%p107_p3), 523264  }
   0x7   : > { %110 = sbr.rel (%p107_p3) target bundleno = 423 (0x1a7), region = 24 }
   0xe   : > { %s821_s6 = smov (!%p131_p4, %s723_s6), 3 }
   0xf   : > { %s594_s10 = sshll.u32 %s821_s6, 6  ;;  %s595_s14 = sshll.u32 %s821_s6, 7 }
  0x10   : > { %s138_s13 = scalar_lea.vmem %s814_s0, %s594_s10  ;;  %s787_s17 = scalar_lea.vmem %s815_s1, %s595_s14 }
  0x11   : > { %v165_v0 = vld [vmem:[%s138_s13] sm:$0xff]  ;;  %v166_v1 = vld [vmem:[%s138_s13 + $0x8] sm:$0xff]  ;;  %v167_v3 = vld [vmem:[%s138_s13 + $0x10] sm:$0xff] }
  0x12   : > { %189 = vxpose.xlu0.b32.start [1/8] (short) %v165_v0, 128  ;;  %v660_v2 = vpack.c.bf16 %v166_v1, %v165_v0  ;;  %v168_v4 = vld [vmem:[%s138_s13 + $0x18] sm:$0xff]  ;;  %v169_v6 = vld [vmem:[%s138_s13 + $0x20] sm:$0xff]  ;;  %v170_v7 = vld [vmem:[%s138_s13 + $0x28] sm:$0xff] }
  0x13   : > { %v664_v5 = vpack.c.bf16 %v168_v4, %v167_v3  ;;  %v668_v8 = vpack.c.bf16 %v170_v7, %v169_v6  ;;  %v171_v9 = vld [vmem:[%s138_s13 + $0x30] sm:$0xff]  ;;  %v172_v10 = vld [vmem:[%s138_s13 + $0x38] sm:$0xff] }
  0x14   : > { %661 = vmatprep.subr.bf16.mxu0 %v660_v2  ;;  %676 = vmatprep.subr.bf16.mxu1 %v660_v2  ;;  %v672_v11 = vpack.c.bf16 %v172_v10, %v171_v9 }
  0x15   : > { %663 = vmatpush3.bf16.msra.mxu0 %v660_v2  ;;  %680 = vmatpush3.bf16.msra.mxu1 %v660_v2 }
  0x16   : > { %190 = vxpose.xlu0.b32.cont [2/8] (short) %v166_v1, 128  ;;  %665 = vmatprep.subr.bf16.mxu0 %v664_v5 }
  0x17   : > { %677 = vmatprep.subr.bf16.mxu1 %v664_v5 }
  0x19   : > { %667 = vmatpush3.bf16.msra.mxu0 %v664_v5  ;;  %681 = vmatpush3.bf16.msra.mxu1 %v664_v5 }
  0x1a   : > { %191 = vxpose.xlu0.b32.cont [3/8] (short) %v167_v3, 128  ;;  %669 = vmatprep.subr.bf16.mxu0 %v668_v8 }
  0x1b   : > { %678 = vmatprep.subr.bf16.mxu1 %v668_v8 }
  0x1d   : > { %671 = vmatpush3.bf16.msra.mxu0 %v668_v8  ;;  %682 = vmatpush3.bf16.msra.mxu1 %v668_v8 }
  0x1e   : > { %192 = vxpose.xlu0.b32.cont [4/8] (short) %v168_v4, 128  ;;  %673 = vmatprep.subr.bf16.mxu0 %v672_v11 }
  0x1f   : > { %679 = vmatprep.subr.bf16.mxu1 %v672_v11 }
  0x21   : > { %675 = vmatpush3.bf16.msra.mxu0 %v672_v11  ;;  %683 = vmatpush3.bf16.msra.mxu1 %v672_v11 }
  0x22   : > { %193 = vxpose.xlu0.b32.cont [5/8] (short) %v169_v6, 128 }
  0x26   : > { %194 = vxpose.xlu0.b32.cont [6/8] (short) %v170_v7, 128 }
  0x2a   : > { %195 = vxpose.xlu0.b32.cont [7/8] (short) %v171_v9, 128 }
  0x2e   : > { %196 = vxpose.xlu0.b32.end [8/8] (short) %v172_v10, 128 }
  0x92   : > { %v205_v12 = vpop.trf.xlu0 }
  0x93   : > { %636 = vmatprep.mubr.msk.f32.mxu0 %vm221_vm0, %v205_v12 }
  0x96   : > { %v206_v13 = vpop.trf.xlu0 }
  0x97   : > { %637 = vmatmul.mubr.msk.f32.vlgmr.msra.gmra.mrb[0].mxu0 %vm221_vm0, %v206_v13 }
  0x9a   : > { %v207_v14 = vpop.trf.xlu0 }
  0x9b   : > { %639 = vmatprep.mubr.msk.f32.mxu0 %vm221_vm0, %v207_v14 }
  0x9e   : > { %v208_v15 = vpop.trf.xlu0 }
  0x9f   : > { %640 = vmatmul.mubr.msk.f32.gmra.mrb[2].mxu0 %vm221_vm0, %v208_v15 }
  0xa2   : > { %v209_v16 = vpop.trf.xlu0 }
  0xa3   : > { %642 = vmatprep.mubr.msk.f32.mxu0 %vm221_vm0, %v209_v16 }
  0xa6   : > { %v210_v17 = vpop.trf.xlu0 }
  0xa7   : > { %643 = vmatmul.mubr.msk.f32.gmra.mrb[4].mxu0 %vm221_vm0, %v210_v17 }
  0xaa   : > { %v211_v18 = vpop.trf.xlu0 }
  0xab   : > { %645 = vmatprep.mubr.msk.f32.mxu0 %vm221_vm0, %v211_v18 }
  0xae   : > { %v212_v19 = vpop.trf.xlu0 }
  0xaf   : > { %646 = vmatmul.mubr.msk.f32.gmra.mrb[6].mxu0 %vm221_vm0, %v212_v19 }
  0xb2   : > { %v213_v20 = vpop.trf.xlu0 }
  0xb3   : > { %648 = vmatprep.mubr.msk.f32.mxu1 %vm221_vm0, %v213_v20 }
  0xb6   : > { %v214_v21 = vpop.trf.xlu0 }
  0xb7   : > { %649 = vmatmul.mubr.msk.f32.vlgmr.msra.gmra.mrb[0].mxu1 %vm221_vm0, %v214_v21 }
  0xba   : > { %v215_v22 = vpop.trf.xlu0 }
  0xbb   : > { %651 = vmatprep.mubr.msk.f32.mxu1 %vm221_vm0, %v215_v22 }
  0xbe   : > { %v216_v23 = vpop.trf.xlu0 }
  0xbf   : > { %652 = vmatmul.mubr.msk.f32.gmra.mrb[2].mxu1 %vm221_vm0, %v216_v23 }
  0xc2   : > { %v217_v24 = vpop.trf.xlu0 }
  0xc3   : > { %654 = vmatprep.mubr.msk.f32.mxu1 %vm221_vm0, %v217_v24 }
  0xc6   : > { %v218_v25 = vpop.trf.xlu0 }
  0xc7   : > { %655 = vmatmul.mubr.msk.f32.gmra.mrb[4].mxu1 %vm221_vm0, %v218_v25 }
  0xca   : > { %v219_v26 = vpop.trf.xlu0 }
  0xcb   : > { %657 = vmatprep.mubr.msk.f32.mxu1 %vm221_vm0, %v219_v26 }
  0xce   : > { %v220_v27 = vpop.trf.xlu0 }
  0xcf   : > { %658 = vmatmul.mubr.msk.f32.gmra.mrb[6].mxu1 %vm221_vm0, %v220_v27 }
 0x16a   : > { %v638_v28 = vpop.f32.mrb[0].mxu0 }
 0x16b   : > { %v467_v29 = vmul.f32 0.00012207031, %v638_v28  ;;  %v336_v30 = vpop.f32.mrb[1].mxu0 }
 0x16c   : > { %v466_v31 = vmul.f32 0.00012207031, %v336_v30 }
 0x16d   : > { %483 = vst [vmem:[%s787_s17 + $0x8] sm:$0xff] %v467_v29 }
 0x16e   : > { %482 = vst [vmem:[%s787_s17] sm:$0xff] %v466_v31 }
 0x172   : > { %v641_v32 = vpop.f32.mrb[2].mxu0 }
 0x173   : > { %v469_v33 = vmul.f32 0.00012207031, %v641_v32  ;;  %v346_v34 = vpop.f32.mrb[3].mxu0 }
 0x174   : > { %v468_v35 = vmul.f32 0.00012207031, %v346_v34 }
 0x175   : > { %485 = vst [vmem:[%s787_s17 + $0x18] sm:$0xff] %v469_v33 }
 0x176   : > { %484 = vst [vmem:[%s787_s17 + $0x10] sm:$0xff] %v468_v35 }
 0x17a   : > { %v644_v36 = vpop.f32.mrb[4].mxu0 }
 0x17b   : > { %v471_v37 = vmul.f32 0.00012207031, %v644_v36  ;;  %v356_v38 = vpop.f32.mrb[5].mxu0 }
 0x17c   : > { %v470_v39 = vmul.f32 0.00012207031, %v356_v38 }
 0x17d   : > { %487 = vst [vmem:[%s787_s17 + $0x28] sm:$0xff] %v471_v37 }
 0x17e   : > { %486 = vst [vmem:[%s787_s17 + $0x20] sm:$0xff] %v470_v39 }
 0x182   : > { %v647_v40 = vpop.f32.mrb[6].mxu0 }
 0x183   : > { %v473_v41 = vmul.f32 0.00012207031, %v647_v40  ;;  %v366_v42 = vpop.f32.mrb[7].mxu0 }
 0x184   : > { %v472_v43 = vmul.f32 0.00012207031, %v366_v42 }
 0x185   : > { %489 = vst [vmem:[%s787_s17 + $0x38] sm:$0xff] %v473_v41 }
 0x186   : > { %488 = vst [vmem:[%s787_s17 + $0x30] sm:$0xff] %v472_v43 }
 0x18a   : > { %v650_v44 = vpop.f32.mrb[0].mxu1 }
 0x18b   : > { %v475_v45 = vmul.f32 0.00012207031, %v650_v44  ;;  %v376_v46 = vpop.f32.mrb[1].mxu1 }
 0x18c   : > { %v474_v47 = vmul.f32 0.00012207031, %v376_v46 }
 0x18d   : > { %491 = vst [vmem:[%s787_s17 + $0x48] sm:$0xff] %v475_v45 }
 0x18e   : > { %490 = vst [vmem:[%s787_s17 + $0x40] sm:$0xff] %v474_v47 }
 0x192   : > { %v653_v48 = vpop.f32.mrb[2].mxu1 }
 0x193   : > { %v477_v49 = vmul.f32 0.00012207031, %v653_v48  ;;  %v386_v50 = vpop.f32.mrb[3].mxu1 }
 0x194   : > { %v476_v51 = vmul.f32 0.00012207031, %v386_v50 }
 0x195   : > { %493 = vst [vmem:[%s787_s17 + $0x58] sm:$0xff] %v477_v49 }
 0x196   : > { %492 = vst [vmem:[%s787_s17 + $0x50] sm:$0xff] %v476_v51 }
 0x19a   : > { %v656_v52 = vpop.f32.mrb[4].mxu1 }
 0x19b   : > { %v479_v53 = vmul.f32 0.00012207031, %v656_v52  ;;  %v396_v54 = vpop.f32.mrb[5].mxu1 }
 0x19c   : > { %v478_v55 = vmul.f32 0.00012207031, %v396_v54 }
 0x19d   : > { %495 = vst [vmem:[%s787_s17 + $0x68] sm:$0xff] %v479_v53 }
 0x19e   : > { %494 = vst [vmem:[%s787_s17 + $0x60] sm:$0xff] %v478_v55 }
 0x1a2   : > { %v659_v56 = vpop.f32.mrb[6].mxu1 }
 0x1a3   : > { %v481_v57 = vmul.f32 0.00012207031, %v659_v56  ;;  %v406_v58 = vpop.f32.mrb[7].mxu1 }
 0x1a4   : > { %v480_v59 = vmul.f32 0.00012207031, %v406_v58 }
 0x1a5   : > { %497 = vst [vmem:[%s787_s17 + $0x78] sm:$0xff] %v481_v57 }
 0x1a6   : > { %496 = vst [vmem:[%s787_s17 + $0x70] sm:$0xff] %v480_v59 }
 0x1a7 PF: > { %s11_s8 = sadd.s32 1, %s731_s8   ;;  %s816_s6 = smov %s727_s7 }
 0x1a8   : > { %p8_p5 = scmp.ge.s32.totalorder %s11_s8, 6   ;;  %s817_s7 = smov %s819_s9 }
 0x1aa   :  { %10 = sbr.rel (!%p8_p5) target bundleno = 2 (0x2), region = 62 }

// kernel: vgg_loss.12
= control target key start
LH: loop header
LB: loop body
LE: loop exit
PB: predicated region body
PF: predicated region fallthrough
CT: control target
= control target key end

     0   :  { %s2219_s18 = smov 0   ;;  %s2221_s19 = smov 0   ;;  %s2701_s0 = inlined_call_operand.vmem [shape: f32[4,8,8,128], index: 0, kind: input, shape index: {}, may-alias: {0,1,2}]   ;;  %s2702_s1 = inlined_call_operand.vmem [shape: f32[4,8,8,128], index: 1, kind: input, shape index: {}, may-alias: {0,1,2}]   ;;  %s2703_s2 = inlined_call_operand.vmem [shape: f32[4,8,8,128], index: 2, kind: input, shape index: {}, may-alias: {0,1,2}]   ;;  %s2704_s3 = inlined_call_operand.vmem [shape: bf16[1152,128], index: 3, kind: input, shape index: {}]   ;;  %s2705_s4 = inlined_call_operand.vmem [shape: f32[1,128], index: 4, kind: input, shape index: {}]   ;;  %s2706_s5 = inlined_call_operand.vmem [shape: f32[4,8,8,128], index: 5, kind: output, shape index: {}]  }
   0x1   :  { %s2223_s20 = smov 0  }
   0x2 LB: > { %s27_s21 = sadd.s32 1, %s2183_s19  ;;  %p1741_p0 = scmp.ge.s32.totalorder %s2187_s20, 1  ;;  %s2187_s20 = sphi %s2223_s20, %s15_s20   ;;  %s2183_s19 = sphi %s2221_s19, %s2712_s19   ;;  %s2179_s18 = sphi %s2219_s18, %s2711_s18  }
   0x3   : > { %p29_p1 = scmp.ge.s32.totalorder %s27_s21, 4  ;;  %p266_p2 = scmp.lt.s32.totalorder %s2187_s20, 5 }
   0x5   : > { %s2714_s21 = smov (%p29_p1, %s27_s21), 0  ;;  %p267_p3 = pnand %p1741_p0, %p266_p2 }
   0x6   : > { %v2093_v0 = vld [vmem:[%s2704_s3 + $0x40] sm:$0xff] (!%p267_p3)   ;;  %v2097_v4 = vld [vmem:[%s2704_s3 + $0x48] sm:$0xff] (!%p267_p3)   ;;  %v2101_v8 = vld [vmem:[%s2704_s3 + $0x50] sm:$0xff] (!%p267_p3)   ;;  %p327_p4 = scmp.lt.s32.totalorder (!%p267_p3), %s2179_s18, 3  ;;  %vm490_vm0 = vcmask (!%p267_p3), 1040384   ;;  %vm503_vm3 = vcmask (!%p267_p3), 1044480  }
   0x7   : > { %270 = sbr.rel (%p267_p3) target bundleno = 328 (0x148), region = 40  ;;  %v2094_v1 = vld [vmem:[%s2704_s3 + $0xc0] sm:$0xff] (!%p267_p3)   ;;  %1857 = vmatprep.subr.bf16.mxu0 (!%p267_p3), %v2093_v0  ;;  %v2098_v5 = vld [vmem:[%s2704_s3 + $0xc8] sm:$0xff] (!%p267_p3)   ;;  %v2102_v9 = vld [vmem:[%s2704_s3 + $0xd0] sm:$0xff] (!%p267_p3)   ;;  %vm491_vm1 = vsmask.f32 (!%p267_p3), 256 }
   0x8   : > { %v2095_v2 = vld [vmem:[%s2704_s3] sm:$0xff] (!%p267_p3)   ;;  %1897 = vmatprep.subr.bf16.mxu1 (!%p267_p3), %v2094_v1  ;;  %v2099_v6 = vld [vmem:[%s2704_s3 + $0x8] sm:$0xff] (!%p267_p3)   ;;  %v2103_v10 = vld [vmem:[%s2704_s3 + $0x10] sm:$0xff] (!%p267_p3)   ;;  %vm504_vm2 = vsmask.f32 (!%p267_p3), 4352 }
   0x9   : > { %v2096_v3 = vld [vmem:[%s2704_s3 + $0x80] sm:$0xff] (!%p267_p3)   ;;  %1858 = vmatpush3.bf16.msra.mxu0 (!%p267_p3), %v2095_v2  ;;  %v2100_v7 = vld [vmem:[%s2704_s3 + $0x88] sm:$0xff] (!%p267_p3)   ;;  %v2104_v11 = vld [vmem:[%s2704_s3 + $0x90] sm:$0xff] (!%p267_p3)  }
   0xa   : > { %1898 = vmatpush3.bf16.msra.mxu1 (!%p267_p3), %v2096_v3  ;;  %1859 = vmatprep.subr.bf16.mxu0 (!%p267_p3), %v2097_v4  ;;  %v2105_v12 = vld [vmem:[%s2704_s3 + $0x58] sm:$0xff] (!%p267_p3)   ;;  %v2109_v16 = vld [vmem:[%s2704_s3 + $0x60] sm:$0xff] (!%p267_p3)   ;;  %v2113_v20 = vld [vmem:[%s2704_s3 + $0x68] sm:$0xff] (!%p267_p3)  }
   0xb   : > { %1899 = vmatprep.subr.bf16.mxu1 (!%p267_p3), %v2098_v5  ;;  %v2106_v13 = vld [vmem:[%s2704_s3 + $0xd8] sm:$0xff] (!%p267_p3)   ;;  %v2110_v17 = vld [vmem:[%s2704_s3 + $0xe0] sm:$0xff] (!%p267_p3)   ;;  %v2114_v21 = vld [vmem:[%s2704_s3 + $0xe8] sm:$0xff] (!%p267_p3)  }
   0xc   : > { %v2107_v14 = vld [vmem:[%s2704_s3 + $0x18] sm:$0xff] (!%p267_p3)   ;;  %v2111_v18 = vld [vmem:[%s2704_s3 + $0x20] sm:$0xff] (!%p267_p3)   ;;  %v2115_v22 = vld [vmem:[%s2704_s3 + $0x28] sm:$0xff] (!%p267_p3)  }
   0xd   : > { %1860 = vmatpush3.bf16.msra.mxu0 (!%p267_p3), %v2099_v6  ;;  %v2108_v15 = vld [vmem:[%s2704_s3 + $0x98] sm:$0xff] (!%p267_p3)   ;;  %v2112_v19 = vld [vmem:[%s2704_s3 + $0xa0] sm:$0xff] (!%p267_p3)   ;;  %v2116_v23 = vld [vmem:[%s2704_s3 + $0xa8] sm:$0xff] (!%p267_p3)  }
   0xe   : > { %1900 = vmatpush3.bf16.msra.mxu1 %v2100_v7  ;;  %1861 = vmatprep.subr.bf16.mxu0 %v2101_v8  ;;  %s2716_s18 = smov (!%p327_p4, %s2179_s18), 3  ;;  %v2117_v24 = vld [vmem:[%s2704_s3 + $0x70] sm:$0xff]   ;;  %v2121_v28 = vld [vmem:[%s2704_s3 + $0x78] sm:$0xff]   ;;  %v2125_v38 = vld [vmem:[%s2704_s3 + $0x140] sm:$0xff]  }
   0xf   : > { %1901 = vmatprep.subr.bf16.mxu1 %v2102_v9  ;;  %v2118_v25 = vld [vmem:[%s2704_s3 + $0xf0] sm:$0xff]   ;;  %s2322_s9 = sshll.u32 %s2716_s18, 6  ;;  %v2122_v29 = vld [vmem:[%s2704_s3 + $0xf8] sm:$0xff]   ;;  %v2126_v43 = vld [vmem:[%s2704_s3 + $0x1c0] sm:$0xff]  }
  0x10   : > { %v2119_v26 = vld [vmem:[%s2704_s3 + $0x30] sm:$0xff]   ;;  %s2337_s17 = scalar_lea.vmem %s2701_s0, %s2322_s9  ;;  %s347_s24 = scalar_lea.vmem %s2702_s1, %s2322_s9  ;;  %v2123_v30 = vld [vmem:[%s2704_s3 + $0x38] sm:$0xff]   ;;  %vm2359_vm4 = vmand %vm490_vm0, %vm491_vm1 }
  0x11   : > { %1862 = vmatpush3.bf16.msra.mxu0 %v2103_v10  ;;  %v2120_v27 = vld [vmem:[%s2704_s3 + $0xb0] sm:$0xff]   ;;  %v2124_v31 = vld [vmem:[%s2704_s3 + $0xb8] sm:$0xff]   ;;  %v385_v32 = vld [vmem:[%s2337_s17] sm:$0xff]  ;;  %s363_s11 = scalar_lea.vmem %s2703_s2, %s2322_s9  ;;  %s376_s8 = scalar_lea.vmem %s2706_s5, %s2322_s9 }
  0x12   : > { %1902 = vmatpush3.bf16.msra.mxu1 %v2104_v11  ;;  %1863 = vmatprep.subr.bf16.mxu0 %v2105_v12  ;;  %v386_v33 = vld [vmem:[%s2337_s17 + $0x8] sm:$0xff]  ;;  %v1750_v34 = vld [vmem:[%s347_s24 + $0x38] sm:$0xff]  ;;  %v393_v35 = vpack.c.bf16 %v385_v32, %v385_v32  ;;  %vm2364_vm5 = vmand %vm503_vm3, %vm504_vm2 }
  0x13   : > { %1903 = vmatprep.subr.bf16.mxu1 %v2106_v13  ;;  %v394_v36 = vpack.c.bf16 %v386_v33, %v386_v33  ;;  %v404_v37 = vmul.f32 0.0, %v1750_v34  ;;  %v387_v62 = vld [vmem:[%s2337_s17 + $0x10] sm:$0xff]  ;;  %v388_v63 = vld [vmem:[%s2337_s17 + $0x18] sm:$0xff]  ;;  %v2128_v11 = vld [vmem:[%s2704_s3 + $0x180] sm:$0xff]  }
  0x14   : > { %v418_v40 = vshrl.u32 %v393_v35, 16  ;;  %v421_v41 = vshll.u32 %v393_v35, 16  ;;  %v395_v7 = vpack.c.bf16 %v387_v62, %v387_v62  ;;  %v396_v8 = vpack.c.bf16 %v388_v63, %v388_v63  ;;  %v389_v33 = vld [vmem:[%s2337_s17 + $0x20] sm:$0xff] }
  0x15   : > { %1864 = vmatpush3.bf16.msra.mxu0 %v2107_v14  ;;  %v405_v39 = vpack.c.bf16 %v404_v37, %v404_v37  ;;  %v425_v42 = vshrl.u32 %v394_v36, 16  ;;  %v428_v44 = vshll.u32 %v394_v36, 16  ;;  %v2130_v14 = vld [vmem:[%s2704_s3 + $0x1c8] sm:$0xff]   ;;  %v397_v35 = vpack.c.bf16 %v389_v33, %v389_v33 }
  0x16   : > { %1904 = vmatpush3.bf16.msra.mxu1 %v2108_v15  ;;  %1865 = vmatprep.subr.bf16.mxu0 %v2109_v16  ;;  %v420_v47 = vrot.slane %v418_v40, 7  ;;  %v432_v15 = vshrl.u32 %v395_v7, 16  ;;  %v435_v16 = vshll.u32 %v395_v7, 16  ;;  %v390_v36 = vld [vmem:[%s2337_s17 + $0x28] sm:$0xff]  ;;  %v2133_v40 = vld [vmem:[%s2704_s3 + $0x150] sm:$0xff]  }
  0x17   : > { %1905 = vmatprep.subr.bf16.mxu1 %v2110_v17  ;;  %v411_v45 = vshrl.u32 %v405_v39, 16  ;;  %v414_v46 = vshll.u32 %v405_v39, 16  ;;  %v427_v48 = vrot.slane %v425_v42, 7 }
  0x18   : > { %v423_v51 = vor.u32 %v421_v41, %v420_v47  ;;  %v398_v41 = vpack.c.bf16 %v390_v36, %v390_v36 }
  0x19   : > { %1866 = vmatpush3.bf16.msra.mxu0 %v2111_v18  ;;  %v413_v50 = vrot.slane %v411_v45, 7  ;;  %v430_v52 = vor.u32 %v428_v44, %v427_v48  ;;  %v2127_v18 = vld [vmem:[%s2704_s3 + $0x100] sm:$0xff]   ;;  %v2136_v45 = vld [vmem:[%s2704_s3 + $0x190] sm:$0xff]   ;;  %v2138_v48 = vld [vmem:[%s2704_s3 + $0x1d8] sm:$0xff]  }
  0x1a   : > { %1906 = vmatpush3.bf16.msra.mxu1 %v2112_v19  ;;  %1867 = vmatprep.subr.bf16.mxu0 %v2113_v20  ;;  %v494_v55 = vsel %vm2359_vm4, 0, %v423_v51  ;;  %v439_v19 = vshrl.u32 %v396_v8, 16  ;;  %v442_v20 = vshll.u32 %v396_v8, 16  ;;  %v449_v51 = vshll.u32 %v397_v35, 16 }
  0x1b   : > { %1907 = vmatprep.subr.bf16.mxu1 %v2114_v21  ;;  %v416_v54 = vor.u32 %v414_v46, %v413_v50  ;;  %v495_v56 = vsel %vm2359_vm4, 0, %v430_v52  ;;  %v2374_v57 = vsel %vm2364_vm5, %v494_v55, 0  ;;  %v446_v50 = vshrl.u32 %v397_v35, 16  ;;  %v2135_v55 = vld [vmem:[%s2704_s3 + $0x110] sm:$0xff]  }
  0x1c   : > { %v2378_v58 = vsel %vm2364_vm5, %v495_v56, 0  ;;  %v524_v60 = vshrl.u32 %v2374_v57, 16  ;;  %v526_v61 = vshll.u32 %v2374_v57, 16  ;;  %v581_v2 = vrot.slane %v2374_v57, 1 }
  0x1d   : > { %1868 = vmatpush3.bf16.msra.mxu0 %v2115_v22  ;;  %v493_v59 = vsel %vm2359_vm4, 0, %v416_v54  ;;  %v1755_v1 = vcombine.low %v2374_v57, %v2378_v58  ;;  %v533_v12 = vshll.u32 %v2378_v58, 16  ;;  %v2129_v22 = vld [vmem:[%s2704_s3 + $0x148] sm:$0xff]   ;;  %v582_v39 = vrot.slane %v2378_v58, 1 }
  0x1e   : > { %1908 = vmatpush3.bf16.msra.mxu1 %v2116_v23  ;;  %1869 = vmatprep.subr.bf16.mxu0 %v2117_v24  ;;  %v506_v0 = vsel %vm2364_vm5, %v493_v59, 0  ;;  %v528_v5 = vrot.slane %v526_v61, 1  ;;  %v434_v23 = vrot.slane %v432_v15, 7  ;;  %v453_v56 = vshrl.u32 %v398_v41, 16 }
  0x1f   : > { %1909 = vmatprep.subr.bf16.mxu1 %v2118_v25  ;;  %v517_v3 = vshrl.u32 %v506_v0, 16  ;;  %v519_v4 = vshll.u32 %v506_v0, 16  ;;  %1370 = vmatprep.mubr.bf16.mxu1 %v1755_v1  ;;  %v580_v6 = vrot.slane %v506_v0, 1  ;;  %v1752_v21 = vcombine.low %v506_v0, %v2374_v57  ;;  %v2132_v25 = vld [vmem:[%s2704_s3 + $0x188] sm:$0xff]   ;;  %v2140_v1 = vld [vmem:[%s2704_s3 + $0x198] sm:$0xff]  }
  0x20   : > { %v2391_v10 = vor.u32 %v528_v5, %v524_v60  ;;  %v2137_v60 = vld [vmem:[%s2704_s3 + $0x158] sm:$0xff]   ;;  %v448_v61 = vrot.slane %v446_v50, 7  ;;  %v456_v63 = vshll.u32 %v398_v41, 16  ;;  %v2147_v50 = vld [vmem:[%s2704_s3 + $0x128] sm:$0xff]  }
  0x21   : > { %1870 = vmatpush3.bf16.msra.mxu0 %v2119_v26  ;;  %v521_v9 = vrot.slane %v519_v4, 1  ;;  %v1754_v13 = vcombine.low %v580_v6, %v581_v2  ;;  %v441_v26 = vrot.slane %v439_v19, 7  ;;  %v2139_v5 = vld [vmem:[%s2704_s3 + $0x118] sm:$0xff]  }
  0x22   : > { %1910 = vmatpush3.bf16.msra.mxu1 %v2120_v27  ;;  %1871 = vmatprep.subr.bf16.mxu0 %v2121_v28  ;;  %v437_v27 = vor.u32 %v435_v16, %v434_v23  ;;  %v2134_v28 = vld [vmem:[%s2704_s3 + $0x1d0] sm:$0xff]   ;;  %v451_v6 = vor.u32 %v449_v51, %v448_v61  ;;  %v392_v19 = vld [vmem:[%s2337_s17 + $0x38] sm:$0xff]  ;;  %v2144_v23 = vld [vmem:[%s2704_s3 + $0x1a0] sm:$0xff]  }
  0x23   : > { %1911 = vmatprep.subr.bf16.mxu1 %v2122_v29  ;;  %v522_v17 = vor.u32 %v521_v9, %v517_v3  ;;  %v531_v29 = vshrl.u32 %v2378_v58, 16  ;;  %v444_v32 = vor.u32 %v442_v20, %v441_v26  ;;  %v455_v3 = vrot.slane %v453_v56, 7  ;;  %v2146_v26 = vld [vmem:[%s2704_s3 + $0x1e8] sm:$0xff]   ;;  %v2149_v56 = vld [vmem:[%s2704_s3 + $0x170] sm:$0xff]  }
  0x24   : > { %v496_v34 = vsel %vm2359_vm4, 0, %v437_v27 }
  0x25   : > { %1872 = vmatpush3.bf16.msra.mxu0 %v2123_v30  ;;  %v1753_v24 = vcombine.low %v522_v17, %v2391_v10  ;;  %v535_v30 = vrot.slane %v533_v12, 1  ;;  %v2426_v37 = vsel %vm2364_vm5, %v496_v34, 0  ;;  %v458_v9 = vor.u32 %v456_v63, %v455_v3  ;;  %v2141_v17 = vld [vmem:[%s2704_s3 + $0x160] sm:$0xff]  }
  0x26   : > { %1912 = vmatpush3.bf16.msra.mxu1 %v2124_v31  ;;  %1937 = vmatprep.subr.bf16.mxu0 %v2125_v38  ;;  %v2131_v31 = vld [vmem:[%s2704_s3 + $0x108] sm:$0xff]   ;;  %v497_v38 = vsel %vm2359_vm4, 0, %v444_v32  ;;  %v538_v42 = vshrl.u32 %v2426_v37, 16  ;;  %v583_v47 = vrot.slane %v2426_v37, 1  ;;  %v2471_v4 = vcombine.low %v2378_v58, %v2426_v37 }
  0x27   : > { %1977 = vmatprep.subr.bf16.mxu1 %v2126_v43  ;;  %1305 = vmatprep.mubr.bf16.mxu0 %v1753_v24  ;;  %v540_v43 = vshll.u32 %v2426_v37, 16  ;;  %v2438_v44 = vsel %vm2364_vm5, %v497_v38, 0  ;;  %v2449_v52 = vor.u32 %v535_v30, %v531_v29  ;;  %v498_v12 = vsel %vm2359_vm4, 0, %v451_v6  ;;  %v2143_v30 = vld [vmem:[%s2704_s3 + $0x120] sm:$0xff]   ;;  %v2148_v38 = vld [vmem:[%s2704_s3 + $0x1a8] sm:$0xff]  }
  0x28   : > { %1306 = vmatmul.mubr.bf16.vlgmr.msra.gmra.mrb[0].mxu0 %v1752_v21  ;;  %v1761_v46 = vcombine.low %v2426_v37, %v2438_v44  ;;  %v2458_v59 = vcombine.low %v582_v39, %v583_v47  ;;  %v547_v62 = vshll.u32 %v2438_v44, 16  ;;  %v545_v8 = vshrl.u32 %v2438_v44, 16  ;;  %v2158_v58 = vld [vmem:[%s2704_s3 + $0x208] sm:$0xff]   ;;  %v2160_v37 = vld [vmem:[%s2704_s3 + $0x218] sm:$0xff]  }
  0x29   : > { %1371 = vmatmul.mubr.bf16.vlgmr.msra.gmra.mrb[0].mxu1 %v1754_v13  ;;  %1938 = vmatpush3.bf16.msra.mxu0 %v2127_v18  ;;  %v542_v54 = vrot.slane %v540_v43, 1  ;;  %v499_v15 = vsel %vm2359_vm4, 0, %v458_v9  ;;  %v584_v16 = vrot.slane %v2438_v44, 1  ;;  %v391_v18 = vld [vmem:[%s2337_s17 + $0x30] sm:$0xff]  ;;  %v400_v32 = vpack.c.bf16 %v392_v19, %v392_v19  ;;  %v2156_v19 = vld [vmem:[%s2704_s3 + $0x1b8] sm:$0xff]  }
  0x2a   : > { %1978 = vmatpush3.bf16.msra.mxu1 %v2128_v11  ;;  %1939 = vmatprep.subr.bf16.mxu0 %v2129_v22  ;;  %v2142_v11 = vld [vmem:[%s2704_s3 + $0x1e0] sm:$0xff]   ;;  %v549_v13 = vrot.slane %v547_v62, 1  ;;  %v2505_v22 = vsel %vm2364_vm5, %v499_v15, 0  ;;  %v399_v27 = vpack.c.bf16 %v391_v18, %v391_v18  ;;  %v2152_v62 = vld [vmem:[%s2704_s3 + $0x1b0] sm:$0xff]   ;;  %v2155_v18 = vld [vmem:[%s2704_s3 + $0x138] sm:$0xff]   ;;  %v1756_v57 = vcombine.low %v2391_v10, %v2449_v52 }
  0x2b   : > { %1979 = vmatprep.subr.bf16.mxu1 %v2130_v14  ;;  %1378 = vmatprep.mubr.bf16.mxu1 %v1761_v46  ;;  %v2464_v0 = vor.u32 %v542_v54, %v538_v42  ;;  %v2490_v14 = vsel %vm2364_vm5, %v498_v12, 0  ;;  %v467_v41 = vshrl.u32 %v400_v32, 16  ;;  %v470_v42 = vshll.u32 %v400_v32, 16  ;;  %v2150_v46 = vld [vmem:[%s2704_s3 + $0x1f0] sm:$0xff]  }
  0x2c   : > { %v552_v20 = vshrl.u32 %v2490_v14, 16  ;;  %v554_v21 = vshll.u32 %v2490_v14, 16  ;;  %v1767_v24 = vcombine.low %v2490_v14, %v2505_v22  ;;  %v460_v34 = vshrl.u32 %v399_v27, 16 }
  0x2d   : > { %1940 = vmatpush3.bf16.msra.mxu0 %v2131_v31  ;;  %v2479_v7 = vcombine.low %v2449_v52, %v2464_v0  ;;  %v2145_v31 = vld [vmem:[%s2704_s3 + $0x168] sm:$0xff]   ;;  %v463_v35 = vshll.u32 %v399_v27, 16  ;;  %v2538_v43 = vcombine.low %v2438_v44, %v2490_v14  ;;  %v469_v51 = vrot.slane %v467_v41, 7 }
  0x2e   : > { %1980 = vmatpush3.bf16.msra.mxu1 %v2132_v25  ;;  %1941 = vmatprep.subr.bf16.mxu0 %v2133_v40  ;;  %v585_v25 = vrot.slane %v2490_v14, 1  ;;  %v556_v29 = vrot.slane %v554_v21, 1  ;;  %v561_v40 = vshll.u32 %v2505_v22, 16  ;;  %v586_v6 = vrot.slane %v2505_v22, 1 }
  0x2f   : > { %1981 = vmatprep.subr.bf16.mxu1 %v2134_v28  ;;  %1313 = vmatprep.mubr.bf16.mxu0 %v2479_v7  ;;  %v2516_v28 = vor.u32 %v549_v13, %v545_v8  ;;  %v472_v61 = vor.u32 %v470_v42, %v469_v51  ;;  %v2151_v8 = vld [vmem:[%s2704_s3 + $0x130] sm:$0xff]   ;;  %v2153_v13 = vld [vmem:[%s2704_s3 + $0x178] sm:$0xff]  }
  0x30   : > { %1314 = vmatmul.mubr.bf16.gmra.mrb[4].mxu0 %v2471_v4  ;;  %v2528_v33 = vcombine.low %v584_v16, %v585_v25  ;;  %v2530_v36 = vor.u32 %v556_v29, %v552_v20  ;;  %v406_v29 = vld [vmem:[%s363_s11] sm:$0xff]  ;;  %v1769_v53 = vcombine.low %v585_v25, %v586_v6 }
  0x31   : > { %1379 = vmatmul.mubr.bf16.gmra.mrb[4].mxu1 %v2458_v59  ;;  %1942 = vmatpush3.bf16.msra.mxu0 %v2135_v55  ;;  %v559_v55 = vshrl.u32 %v2505_v22, 16  ;;  %v408_v32 = vmul.f32 0.0, %v406_v29  ;;  %v1762_v42 = vcombine.low %v2464_v0, %v2516_v28  ;;  %v2162_v0 = vld [vmem:[%s2704_s3 + $0x228] sm:$0xff]  }
  0x32   : > { %1982 = vmatpush3.bf16.msra.mxu1 %v2136_v45  ;;  %1943 = vmatprep.subr.bf16.mxu0 %v2137_v60  ;;  %v462_v45 = vrot.slane %v460_v34, 7  ;;  %v563_v60 = vrot.slane %v561_v40, 1 }
  0x33   : > { %1983 = vmatprep.subr.bf16.mxu1 %v2138_v48  ;;  %1386 = vmatprep.mubr.bf16.mxu1 %v1767_v24  ;;  %v2546_v48 = vcombine.low %v2516_v28, %v2530_v36  ;;  %v409_v34 = vpack.c.bf16 %v408_v32, %v408_v32 }
  0x34   : > { %v465_v54 = vor.u32 %v463_v35, %v462_v45  ;;  %v2593_v20 = vor.u32 %v563_v60, %v559_v55  ;;  %v2161_v45 = vld [vmem:[%s2704_s3 + $0x220] sm:$0xff]  }
  0x35   : > { %1944 = vmatpush3.bf16.msra.mxu0 %v2139_v5  ;;  %1321 = vmatprep.mubr.bf16.mxu0 %v2546_v48  ;;  %v501_v5 = vsel %vm2359_vm4, 0, %v472_v61  ;;  %v474_v35 = vshrl.u32 %v409_v34, 16 }
  0x36   : > { %1984 = vmatpush3.bf16.msra.mxu1 %v2140_v1  ;;  %1945 = vmatprep.subr.bf16.mxu0 %v2141_v17  ;;  %v500_v63 = vsel %vm2359_vm4, 0, %v465_v54  ;;  %v2154_v1 = vld [vmem:[%s2704_s3 + $0x1f8] sm:$0xff]   ;;  %v2579_v12 = vsel %vm2364_vm5, %v501_v5, 0  ;;  %v1768_v25 = vcombine.low %v2530_v36, %v2593_v20  ;;  %v1751_v5 = vld [vmem:[%s2705_s4] ss:$0 sm:$0xff] }
  0x37   : > { %1985 = vmatprep.subr.bf16.mxu1 %v2142_v11  ;;  %v2567_v3 = vsel %vm2364_vm5, %v500_v63, 0  ;;  %v476_v40 = vrot.slane %v474_v35, 7  ;;  %v591_v10 = vshll.u32 %v2579_v12, 16  ;;  %v589_v44 = vshrl.u32 %v2579_v12, 16  ;;  %v2164_v36 = vld [vmem:[%s2704_s3 + $0x238] sm:$0xff]  }
  0x38   : > { %1322 = vmatmul.mubr.bf16.gmra.mrb[8].mxu0 %v2538_v43  ;;  %v566_v9 = vshrl.u32 %v2567_v3, 16  ;;  %v568_v11 = vshll.u32 %v2567_v3, 16  ;;  %v1773_v15 = vcombine.low %v2567_v3, %v2579_v12  ;;  %v587_v17 = vrot.slane %v2567_v3, 1 }
  0x39   : > { %1387 = vmatmul.mubr.bf16.gmra.mrb[8].mxu1 %v2528_v33  ;;  %1946 = vmatpush3.bf16.msra.mxu0 %v2143_v30  ;;  %v2612_v27 = vcombine.low %v2505_v22, %v2567_v3  ;;  %v593_v49 = vrot.slane %v591_v10, 1  ;;  %v596_v22 = vrot.slane %v2579_v12, 1 }
  0x3a   : > { %1986 = vmatpush3.bf16.msra.mxu1 %v2144_v23  ;;  %1947 = vmatprep.subr.bf16.mxu0 %v2145_v31  ;;  %v570_v21 = vrot.slane %v568_v11, 1  ;;  %v2157_v23 = vld [vmem:[%s2704_s3 + $0x200] sm:$0xff]   ;;  %v2606_v24 = vcombine.low %v586_v6, %v587_v17  ;;  %v1757_v31 = vcombine.low %v581_v2, %v582_v39  ;;  %v1763_v39 = vcombine.low %v583_v47, %v584_v16 }
  0x3b   : > { %1987 = vmatprep.subr.bf16.mxu1 %v2146_v26  ;;  %1394 = vmatprep.mubr.bf16.mxu1 %v1773_v15  ;;  %v1775_v28 = vcombine.low %v587_v17, %v596_v22 }
  0x3c   : > { %v2608_v26 = vor.u32 %v570_v21, %v566_v9 }
  0x3d   : > { %1948 = vmatpush3.bf16.msra.mxu0 %v2147_v50 }
  0x3e   : > { %1988 = vmatpush3.bf16.msra.mxu1 %v2148_v38  ;;  %1949 = vmatprep.subr.bf16.mxu0 %v2149_v56  ;;  %v1771_v30 = vcombine.low %v2593_v20, %v2608_v26  ;;  %v477_v38 = vshll.u32 %v409_v34, 16 }
  0x3f   : > { %1989 = vmatprep.subr.bf16.mxu1 %v2150_v46  ;;  %v594_v46 = vor.u32 %v593_v49, %v589_v44 }
  0x40   : > { %1329 = vmatprep.mubr.bf16.mxu0 %v1771_v30  ;;  %v479_v2 = vor.u32 %v477_v38, %v476_v40 }
  0x41   : > { %1950 = vmatpush3.bf16.msra.mxu0 %v2151_v8  ;;  %1395 = vmatmul.mubr.bf16.gmra.mrb[12].mxu1 %v2606_v24  ;;  %v1774_v54 = vcombine.low %v2608_v26, %v594_v46 }
  0x42   : > { %1990 = vmatpush3.bf16.msra.mxu1 %v2152_v62  ;;  %1951 = vmatprep.subr.bf16.mxu0 %v2153_v13  ;;  %v502_v41 = vsel %vm2359_vm4, 0, %v479_v2 }
  0x43   : > { %1991 = vmatprep.subr.bf16.mxu1 %v2154_v1  ;;  %1500 = vmatprep.mubr.bf16.mxu1 %v2479_v7  ;;  %v2159_v7 = vld [vmem:[%s2704_s3 + $0x210] sm:$0xff]   ;;  %v515_v52 = vsel %vm2364_vm5, %v502_v41, 0 }
  0x44   : > { %1330 = vmatmul.mubr.bf16.gmra.mrb[12].mxu0 %v2612_v27  ;;  %v598_v47 = vshrl.u32 %v515_v52, 16  ;;  %v1776_v50 = vcombine.low %v2579_v12, %v515_v52  ;;  %v605_v51 = vrot.slane %v515_v52, 1 }
  0x45   : > { %1952 = vmatpush3.bf16.msra.mxu0 %v2155_v18  ;;  %1435 = vmatprep.mubr.bf16.mxu0 %v1757_v31 }
  0x46   : > { %1992 = vmatpush3.bf16.msra.mxu1 %v2156_v19  ;;  %2029 = vmatprep.subr.bf16.mxu0 %v2157_v23  ;;  %v1778_v55 = vcombine.low %v596_v22, %v605_v51 }
  0x47   : > { %2053 = vmatprep.subr.bf16.mxu1 %v2157_v23 }
  0x49   : > { %1501 = vmatmul.mubr.bf16.vlgmr.msra.gmra.mrb[16].mxu1 %v2471_v4  ;;  %v600_v4 = vshll.u32 %v515_v52, 16 }
  0x4a   : > { %2061 = vmatpush3.bf16.msra.mxu1 %v2157_v23  ;;  %1508 = vmatprep.mubr.bf16.mxu1 %v2546_v48 }
  0x4b   : > { %2054 = vmatprep.subr.bf16.mxu1 %v2158_v58  ;;  %v602_v16 = vrot.slane %v600_v4, 1 }
  0x4c   : > { %1436 = vmatmul.mubr.bf16.vlgmr.msra.gmra.mrb[16].mxu0 %v1756_v57 }
  0x4d   : > { %2030 = vmatpush3.bf16.msra.mxu0 %v2157_v23  ;;  %1443 = vmatprep.mubr.bf16.mxu0 %v1763_v39  ;;  %v603_v48 = vor.u32 %v602_v16, %v598_v47 }
  0x4e   : > { %2062 = vmatpush3.bf16.msra.mxu1 %v2158_v58  ;;  %2031 = vmatprep.subr.bf16.mxu0 %v2158_v58 }
  0x4f   : > { %2055 = vmatprep.subr.bf16.mxu1 %v2159_v7  ;;  %v1777_v14 = vcombine.low %v594_v46, %v603_v48 }
  0x51   : > { %1509 = vmatmul.mubr.bf16.gmra.mrb[20].mxu1 %v2538_v43  ;;  %2032 = vmatpush3.bf16.msra.mxu0 %v2158_v58  ;;  %v2163_v43 = vld [vmem:[%s2704_s3 + $0x230] sm:$0xff]  }
  0x52   : > { %2063 = vmatpush3.bf16.msra.mxu1 %v2159_v7  ;;  %2033 = vmatprep.subr.bf16.mxu0 %v2159_v7 }
  0x53   : > { %2056 = vmatprep.subr.bf16.mxu1 %v2160_v37  ;;  %1516 = vmatprep.mubr.bf16.mxu1 %v1771_v30 }
  0x54   : > { %1444 = vmatmul.mubr.bf16.gmra.mrb[20].mxu0 %v1762_v42 }
  0x55   : > { %2034 = vmatpush3.bf16.msra.mxu0 %v2159_v7  ;;  %1451 = vmatprep.mubr.bf16.mxu0 %v1769_v53 }
  0x56   : > { %2064 = vmatpush3.bf16.msra.mxu1 %v2160_v37  ;;  %2035 = vmatprep.subr.bf16.mxu0 %v2160_v37 }
  0x57   : > { %2057 = vmatprep.subr.bf16.mxu1 %v2161_v45 }
  0x59   : > { %1517 = vmatmul.mubr.bf16.gmra.mrb[24].mxu1 %v2612_v27  ;;  %2036 = vmatpush3.bf16.msra.mxu0 %v2160_v37 }
  0x5a   : > { %2065 = vmatpush3.bf16.msra.mxu1 %v2161_v45  ;;  %2037 = vmatprep.subr.bf16.mxu0 %v2161_v45 }
  0x5b   : > { %2058 = vmatprep.subr.bf16.mxu1 %v2162_v0  ;;  %1524 = vmatprep.mubr.bf16.mxu1 %v1777_v14 }
  0x5c   : > { %1452 = vmatmul.mubr.bf16.gmra.mrb[24].mxu0 %v1768_v25 }
  0x5d   : > { %2038 = vmatpush3.bf16.msra.mxu0 %v2161_v45  ;;  %1459 = vmatprep.mubr.bf16.mxu0 %v1775_v28 }
  0x5e   : > { %2066 = vmatpush3.bf16.msra.mxu1 %v2162_v0  ;;  %2039 = vmatprep.subr.bf16.mxu0 %v2162_v0 }
  0x5f   : > { %2059 = vmatprep.subr.bf16.mxu1 %v2163_v43 }
  0x61   : > { %1525 = vmatmul.mubr.bf16.gmra.mrb[28].mxu1 %v1776_v50  ;;  %2040 = vmatpush3.bf16.msra.mxu0 %v2162_v0 }
  0x62   : > { %2067 = vmatpush3.bf16.msra.mxu1 %v2163_v43  ;;  %2041 = vmatprep.subr.bf16.mxu0 %v2163_v43 }
  0x63   : > { %2060 = vmatprep.subr.bf16.mxu1 %v2164_v36  ;;  %2049 = vmatprep.mubr.bf16.mxu1 %v2606_v24 }
  0x64   : > { %1460 = vmatmul.mubr.bf16.gmra.mrb[28].mxu0 %v1774_v54 }
  0x65   : > { %2042 = vmatpush3.bf16.msra.mxu0 %v2163_v43  ;;  %2045 = vmatprep.mubr.bf16.mxu0 %v2458_v59 }
  0x66   : > { %2068 = vmatpush3.bf16.msra.mxu1 %v2164_v36  ;;  %2043 = vmatprep.subr.bf16.mxu0 %v2164_v36 }
  0x69   : > { %2050 = vmatmul.mubr.bf16.vlgmr.msra.gmra.mrb[32].mxu1 %v1778_v55  ;;  %2044 = vmatpush3.bf16.msra.mxu0 %v2164_v36 }
  0x6c   : > { %2046 = vmatmul.mubr.bf16.vlgmr.msra.gmra.mrb[32].mxu0 %v2528_v33 }
  0xfb   : > { %v1873_v1 = vpop.f32.mrb[0].mxu0 }
  0xfc   : > { %v1913_v56 = vpop.f32.mrb[0].mxu1  ;;  %v1874_v6 = vpop.f32.mrb[1].mxu0 }
  0xfd   : > { %v1914_v60 = vpop.f32.mrb[1].mxu1  ;;  %v1875_v8 = vadd.f32 %v1874_v6, %v1873_v1  ;;  %v1876_v9 = vpop.f32.mrb[2].mxu0 }
  0xfe   : > { %v1915_v61 = vadd.f32 %v1914_v60, %v1913_v56  ;;  %v1916_v62 = vpop.f32.mrb[2].mxu1  ;;  %v1877_v11 = vpop.f32.mrb[3].mxu0 }
  0xff   : > { %v1917_v63 = vpop.f32.mrb[3].mxu1  ;;  %v1308_v59 = vadd.f32 %v1875_v8, %v1751_v5  ;;  %v1878_v12 = vadd.f32 %v1877_v11, %v1876_v9 }
 0x100   : > { %v1918_v3 = vadd.f32 %v1917_v63, %v1916_v62 }
 0x101   : > { %v1373_v13 = vadd.f32 %v1915_v61, %v1308_v59  ;;  %v1311_v15 = vadd.f32 %v1878_v12, %v1751_v5 }
 0x103   : > { %v2679_v17 = vadd.f32 %v1918_v3, %v1311_v15  ;;  %v1879_v23 = vpop.f32.mrb[4].mxu0 }
 0x104   : > { %v1919_v33 = vpop.f32.mrb[4].mxu1  ;;  %v1880_v26 = vpop.f32.mrb[5].mxu0 }
 0x105   : > { %v1920_v18 = vpop.f32.mrb[5].mxu1  ;;  %v1881_v27 = vadd.f32 %v1880_v26, %v1879_v23  ;;  %v1882_v29 = vpop.f32.mrb[6].mxu0 }
 0x106   : > { %v1921_v19 = vadd.f32 %v1920_v18, %v1919_v33  ;;  %v1922_v20 = vpop.f32.mrb[6].mxu1  ;;  %v1883_v30 = vpop.f32.mrb[7].mxu0 }
 0x107   : > { %v1923_v21 = vpop.f32.mrb[7].mxu1  ;;  %v1316_v31 = vadd.f32 %v1881_v27, %v1751_v5  ;;  %v1884_v32 = vadd.f32 %v1883_v30, %v1882_v29 }
 0x108   : > { %v1924_v24 = vadd.f32 %v1923_v21, %v1922_v20 }
 0x109   : > { %v1381_v35 = vadd.f32 %v1921_v19, %v1316_v31  ;;  %v1319_v38 = vadd.f32 %v1884_v32, %v1751_v5 }
 0x10b   : > { %v1384_v2 = vadd.f32 %v1924_v24, %v1319_v38  ;;  %v1885_v7 = vpop.f32.mrb[8].mxu0 }
 0x10c   : > { %v1925_v34 = vpop.f32.mrb[8].mxu1  ;;  %v1886_v10 = vpop.f32.mrb[9].mxu0 }
 0x10d   : > { %v1926_v58 = vpop.f32.mrb[9].mxu1  ;;  %v1887_v52 = vadd.f32 %v1886_v10, %v1885_v7  ;;  %v1888_v4 = vpop.f32.mrb[10].mxu0 }
 0x10e   : > { %v1927_v40 = vadd.f32 %v1926_v58, %v1925_v34  ;;  %v1928_v57 = vpop.f32.mrb[10].mxu1  ;;  %v1889_v37 = vpop.f32.mrb[11].mxu0 }
 0x10f   : > { %v1929_v39 = vpop.f32.mrb[11].mxu1  ;;  %v1324_v44 = vadd.f32 %v1887_v52, %v1751_v5  ;;  %v1890_v49 = vadd.f32 %v1889_v37, %v1888_v4 }
 0x110   : > { %v1930_v41 = vadd.f32 %v1929_v39, %v1928_v57 }
 0x111   : > { %v1389_v47 = vadd.f32 %v1927_v40, %v1324_v44  ;;  %v1327_v16 = vadd.f32 %v1890_v49, %v1751_v5 }
 0x113   : > { %v2681_v53 = vadd.f32 %v1930_v41, %v1327_v16 }
 0x114   : > { %v1931_v42 = vpop.f32.mrb[12].mxu1 }
 0x115   : > { %v1932_v45 = vpop.f32.mrb[13].mxu1 }
 0x116   : > { %v1933_v46 = vadd.f32 %v1932_v45, %v1931_v42  ;;  %v1934_v48 = vpop.f32.mrb[14].mxu1 }
 0x117   : > { %v1935_v0 = vpop.f32.mrb[15].mxu1  ;;  %v1891_v22 = vpop.f32.mrb[12].mxu0 }
 0x118   : > { %v1936_v14 = vadd.f32 %v1935_v0, %v1934_v48  ;;  %v1892_v25 = vpop.f32.mrb[13].mxu0 }
 0x119   : > { %v1893_v28 = vadd.f32 %v1892_v25, %v1891_v22  ;;  %v1894_v43 = vpop.f32.mrb[14].mxu0 }
 0x11a   : > { %v1895_v50 = vpop.f32.mrb[15].mxu0 }
 0x11b   : > { %v1332_v36 = vadd.f32 %v1893_v28, %v1751_v5  ;;  %v1896_v51 = vadd.f32 %v1895_v50, %v1894_v43 }
 0x11c   : > { %v1993_v54 = vpop.f32.mrb[16].mxu1 }
 0x11d   : > { %v1994_v55 = vpop.f32.mrb[17].mxu1  ;;  %v1397_v56 = vadd.f32 %v1933_v46, %v1332_v36  ;;  %v1335_v60 = vadd.f32 %v1896_v51, %v1751_v5 }
 0x11e   : > { %v1995_v61 = vadd.f32 %v1994_v55, %v1993_v54  ;;  %v1996_v62 = vpop.f32.mrb[18].mxu1 }
 0x11f   : > { %v1997_v63 = vpop.f32.mrb[19].mxu1  ;;  %v1400_v1 = vadd.f32 %v1936_v14, %v1335_v60  ;;  %v1953_v3 = vpop.f32.mrb[16].mxu0 }
 0x120   : > { %v1998_v6 = vadd.f32 %v1997_v63, %v1996_v62  ;;  %v1954_v8 = vpop.f32.mrb[17].mxu0 }
 0x121   : > { %v1955_v9 = vadd.f32 %v1954_v8, %v1953_v3  ;;  %v1956_v11 = vpop.f32.mrb[18].mxu0 }
 0x122   : > { %v1957_v59 = vpop.f32.mrb[19].mxu0 }
 0x123   : > { %v1438_v12 = vadd.f32 %v1955_v9, %v1373_v13  ;;  %v1958_v15 = vadd.f32 %v1957_v59, %v1956_v11 }
 0x124   : > { %v1999_v33 = vpop.f32.mrb[20].mxu1 }
 0x125   : > { %v2000_v18 = vpop.f32.mrb[21].mxu1  ;;  %v1441_v19 = vadd.f32 %v1958_v15, %v2679_v17  ;;  %v1503_v23 = vadd.f32 %v1995_v61, %v1438_v12 }
 0x126   : > { %v2001_v20 = vadd.f32 %v2000_v18, %v1999_v33  ;;  %v2002_v21 = vpop.f32.mrb[22].mxu1 }
 0x127   : > { %v2003_v5 = vpop.f32.mrb[23].mxu1  ;;  %v1959_v24 = vpop.f32.mrb[20].mxu0  ;;  %v2684_v27 = vadd.f32 %v1998_v6, %v1441_v19 }
 0x128   : > { %v2004_v26 = vadd.f32 %v2003_v5, %v2002_v21  ;;  %v1960_v29 = vpop.f32.mrb[21].mxu0 }
 0x129   : > { %v1961_v30 = vadd.f32 %v1960_v29, %v1959_v24  ;;  %v1962_v31 = vpop.f32.mrb[22].mxu0 }
 0x12a   : > { %v1963_v32 = vpop.f32.mrb[23].mxu0 }
 0x12b   : > { %v1446_v34 = vadd.f32 %v1961_v30, %v1381_v35  ;;  %v1964_v38 = vadd.f32 %v1963_v32, %v1962_v31 }
 0x12c   : > { %v2005_v13 = vpop.f32.mrb[24].mxu1 }
 0x12d   : > { %v2006_v58 = vpop.f32.mrb[25].mxu1  ;;  %v1449_v40 = vadd.f32 %v1964_v38, %v1384_v2  ;;  %v1511_v17 = vadd.f32 %v2001_v20, %v1446_v34 }
 0x12e   : > { %v2007_v57 = vadd.f32 %v2006_v58, %v2005_v13  ;;  %v2008_v39 = vpop.f32.mrb[26].mxu1 }
 0x12f   : > { %v2009_v7 = vpop.f32.mrb[27].mxu1  ;;  %v1965_v41 = vpop.f32.mrb[24].mxu0  ;;  %v1514_v52 = vadd.f32 %v2004_v26, %v1449_v40 }
 0x130   : > { %v2010_v10 = vadd.f32 %v2009_v7, %v2008_v39  ;;  %v1966_v4 = vpop.f32.mrb[25].mxu0 }
 0x131   : > { %v1967_v37 = vadd.f32 %v1966_v4, %v1965_v41  ;;  %v1968_v44 = vpop.f32.mrb[26].mxu0 }
 0x132   : > { %v1969_v49 = vpop.f32.mrb[27].mxu0 }
 0x133   : > { %v1454_v16 = vadd.f32 %v1967_v37, %v1389_v47  ;;  %v1970_v42 = vadd.f32 %v1969_v49, %v1968_v44 }
 0x134   : > { %v2011_v45 = vpop.f32.mrb[28].mxu1 }
 0x135   : > { %v2012_v46 = vpop.f32.mrb[29].mxu1  ;;  %v1457_v35 = vadd.f32 %v1970_v42, %v2681_v53  ;;  %v1519_v2 = vadd.f32 %v2007_v57, %v1454_v16 }
 0x136   : > { %v2013_v48 = vadd.f32 %v2012_v46, %v2011_v45  ;;  %v2014_v0 = vpop.f32.mrb[30].mxu1 }
 0x137   : > { %v2015_v22 = vpop.f32.mrb[31].mxu1  ;;  %v1971_v14 = vpop.f32.mrb[28].mxu0  ;;  %v1522_v28 = vadd.f32 %v2010_v10, %v1457_v35 }
 0x138   : > { %v2016_v25 = vadd.f32 %v2015_v22, %v2014_v0  ;;  %v1972_v43 = vpop.f32.mrb[29].mxu0 }
 0x139   : > { %v1973_v50 = vadd.f32 %v1972_v43, %v1971_v14  ;;  %v1974_v36 = vpop.f32.mrb[30].mxu0 }
 0x13a   : > { %v1975_v51 = vpop.f32.mrb[31].mxu0 }
 0x13b   : > { %v1462_v54 = vadd.f32 %v1973_v50, %v1397_v56  ;;  %v1976_v55 = vadd.f32 %v1975_v51, %v1974_v36 }
 0x13c   : > { %v2051_v47 = vpop.f32.mrb[32].mxu1 }
 0x13d   : > { %v1583_v60 = vpop.f32.mrb[33].mxu1  ;;  %v1465_v61 = vadd.f32 %v1976_v55, %v1400_v1  ;;  %v1527_v62 = vadd.f32 %v2013_v48, %v1462_v54 }
 0x13e   : > { %v1584_v63 = vadd.f32 %v1583_v60, %v1519_v2  ;;  %v2052_v53 = vpop.f32.mrb[34].mxu1 }
 0x13f   : > { %v1586_v3 = vpop.f32.mrb[35].mxu1  ;;  %v2047_v6 = vpop.f32.mrb[32].mxu0  ;;  %v1592_v8 = vadd.f32 %v2051_v47, %v1527_v62  ;;  %v1530_v11 = vadd.f32 %v2016_v25, %v1465_v61 }
 0x140   : > { %v1602_v9 = vmax.f32 %v1584_v63, 0.0  ;;  %v1587_v59 = vadd.f32 %v1586_v3, %v1522_v28  ;;  %v1576_v12 = vadd.f32 %v2047_v6, %v1511_v17  ;;  %v1567_v15 = vpop.f32.mrb[33].mxu0 }
 0x141   : > { %v1604_v56 = vmax.f32 %v1592_v8, 0.0  ;;  %v1568_v33 = vadd.f32 %v1567_v15, %v1503_v23  ;;  %v2048_v18 = vpop.f32.mrb[34].mxu0  ;;  %v1595_v1 = vadd.f32 %v2052_v53, %v1530_v11 }
 0x142   : > { %1610 = vst [vmem:[%s376_s8 + $0x20] sm:$0xff] %v1602_v9  ;;  %v1603_v19 = vmax.f32 %v1587_v59, 0.0  ;;  %v1600_v20 = vmax.f32 %v1576_v12, 0.0  ;;  %v1579_v21 = vadd.f32 %v2048_v18, %v1514_v52  ;;  %v1570_v5 = vpop.f32.mrb[35].mxu0 }
 0x143   : > { %1612 = vst [vmem:[%s376_s8 + $0x30] sm:$0xff] %v1604_v56  ;;  %v1598_v24 = vmax.f32 %v1568_v33, 0.0  ;;  %v1605_v26 = vmax.f32 %v1595_v1, 0.0  ;;  %v1571_v29 = vadd.f32 %v1570_v5, %v2684_v27 }
 0x144   : > { %1611 = vst [vmem:[%s376_s8 + $0x28] sm:$0xff] %v1603_v19  ;;  %1608 = vst [vmem:[%s376_s8 + $0x10] sm:$0xff] %v1600_v20  ;;  %v1601_v30 = vmax.f32 %v1579_v21, 0.0 }
 0x145   : > { %1606 = vst [vmem:[%s376_s8] sm:$0xff] %v1598_v24  ;;  %1613 = vst [vmem:[%s376_s8 + $0x38] sm:$0xff] %v1605_v26  ;;  %v1599_v31 = vmax.f32 %v1571_v29, 0.0 }
 0x146   : > { %1609 = vst [vmem:[%s376_s8 + $0x18] sm:$0xff] %v1601_v30 }
 0x147   : > { %1607 = vst [vmem:[%s376_s8 + $0x8] sm:$0xff] %v1599_v31 }
 0x148 PF: > { %s15_s20 = sadd.s32 1, %s2187_s20   ;;  %s2711_s18 = smov %s2183_s19 }
 0x149   : > { %p12_p5 = scmp.ge.s32.totalorder %s15_s20, 6   ;;  %s2712_s19 = smov %s2714_s21 }
 0x14b   :  { %14 = sbr.rel (!%p12_p5) target bundleno = 2 (0x2), region = 77 }

// kernel: vgg_loss.13
= control target key start
LH: loop header
LB: loop body
LE: loop exit
PB: predicated region body
PF: predicated region fallthrough
CT: control target
= control target key end

     0   :  { %s729_s6 = smov 0   ;;  %s731_s7 = smov 0   ;;  %s834_s0 = inlined_call_operand.vmem [shape: f32[4,256,64], index: 0, kind: input, shape index: {}]   ;;  %s835_s1 = inlined_call_operand.vmem [shape: f32[4,64,64], index: 1, kind: output, shape index: {}]  }
   0x1   :  { %s733_s8 = smov 0  }
   0x2 LB: > { %s23_s9 = sadd.s32 1, %s712_s7  ;;  %p484_p0 = scmp.ge.s32.totalorder %s716_s8, 1  ;;  %s716_s8 = sphi %s733_s8, %s11_s8   ;;  %s712_s7 = sphi %s731_s7, %s837_s7   ;;  %s708_s6 = sphi %s729_s6, %s836_s6  }
   0x3   : > { %p25_p1 = scmp.ge.s32.totalorder %s23_s9, 4  ;;  %p106_p2 = scmp.lt.s32.totalorder %s716_s8, 5 }
   0x5   : > { %s839_s9 = smov (%p25_p1, %s23_s9), 0  ;;  %p107_p3 = pnand %p484_p0, %p106_p2 }
   0x6   : > { %p131_p4 = scmp.lt.s32.totalorder (!%p107_p3), %s708_s6, 3  ;;  %vm149_vm0 = vcmask (!%p107_p3), 523264  }
   0x7   : > { %110 = sbr.rel (%p107_p3) target bundleno = 409 (0x199), region = 24 }
   0xe   : > { %s841_s6 = smov (!%p131_p4, %s708_s6), 3 }
   0xf   : > { %s491_s10 = sshll.u32 %s841_s6, 8  ;;  %s492_s14 = sshll.u32 %s841_s6, 6 }
  0x10   : > { %s753_s13 = scalar_lea.vmem %s834_s0, %s491_s10  ;;  %s801_s17 = scalar_lea.vmem %s835_s1, %s492_s14 }
  0x11   : > { %v158_v0 = vld [vmem:[%s753_s13] sm:$0xff]  ;;  %v159_v2 = vld [vmem:[%s753_s13 + $0x8] sm:$0xff]  ;;  %v176_v6 = vld [vmem:[%s753_s13 + $0x90] sm:$0xff] }
  0x12   : > { %v174_v1 = vld [vmem:[%s753_s13 + $0x80] sm:$0xff]  ;;  %v175_v4 = vld [vmem:[%s753_s13 + $0x88] sm:$0xff]  ;;  %v551_v5 = vpack.c.bf16 %v159_v2, %v158_v0  ;;  %v177_v7 = vld [vmem:[%s753_s13 + $0x98] sm:$0xff] }
  0x13   : > { %v622_v3 = vpack.i.bf16 %v158_v0, %v174_v1  ;;  %v549_v8 = vpack.c.bf16 %v175_v4, %v174_v1  ;;  %v624_v9 = vpack.i.bf16 %v159_v2, %v175_v4  ;;  %v553_v10 = vpack.c.bf16 %v177_v7, %v176_v6  ;;  %v160_v11 = vld [vmem:[%s753_s13 + $0x10] sm:$0xff]  ;;  %v161_v12 = vld [vmem:[%s753_s13 + $0x18] sm:$0xff]  ;;  %v178_v14 = vld [vmem:[%s753_s13 + $0xa0] sm:$0xff] }
  0x14   : > { %v555_v13 = vpack.c.bf16 %v161_v12, %v160_v11  ;;  %v179_v15 = vld [vmem:[%s753_s13 + $0xa8] sm:$0xff]  ;;  %v626_v17 = vpack.i.bf16 %v160_v11, %v176_v6  ;;  %v162_v18 = vld [vmem:[%s753_s13 + $0x20] sm:$0xff]  ;;  %v180_v21 = vld [vmem:[%s753_s13 + $0xb0] sm:$0xff]  ;;  %v628_v24 = vpack.i.bf16 %v161_v12, %v177_v7 }
  0x15   : > { %623 = vxpose.xlu0.b32.start [1/16] (narrow) %v622_v3, 64  ;;  %550 = vmatprep.subr.bf16.mxu0 %v549_v8  ;;  %v557_v16 = vpack.c.bf16 %v179_v15, %v178_v14  ;;  %v163_v19 = vld [vmem:[%s753_s13 + $0x28] sm:$0xff]  ;;  %v181_v22 = vld [vmem:[%s753_s13 + $0xb8] sm:$0xff]  ;;  %v164_v25 = vld [vmem:[%s753_s13 + $0x30] sm:$0xff]  ;;  %v630_v31 = vpack.i.bf16 %v162_v18, %v178_v14 }
  0x16   : > { %552 = vmatpush3.bf16.msra.mxu0 %v551_v5  ;;  %581 = vmatprep.subr.bf16.mxu1 %v549_v8  ;;  %v559_v20 = vpack.c.bf16 %v163_v19, %v162_v18  ;;  %v561_v23 = vpack.c.bf16 %v181_v22, %v180_v21  ;;  %v165_v26 = vld [vmem:[%s753_s13 + $0x38] sm:$0xff]  ;;  %v182_v28 = vld [vmem:[%s753_s13 + $0xc0] sm:$0xff]  ;;  %v183_v29 = vld [vmem:[%s753_s13 + $0xc8] sm:$0xff]  ;;  %v632_v38 = vpack.i.bf16 %v163_v19, %v179_v15 }
  0x17   : > { %554 = vmatprep.subr.bf16.mxu0 %v553_v10  ;;  %589 = vmatpush3.bf16.msra.mxu1 %v551_v5  ;;  %v563_v27 = vpack.c.bf16 %v165_v26, %v164_v25  ;;  %v565_v30 = vpack.c.bf16 %v183_v29, %v182_v28  ;;  %v166_v32 = vld [vmem:[%s753_s13 + $0x40] sm:$0xff]  ;;  %v167_v33 = vld [vmem:[%s753_s13 + $0x48] sm:$0xff]  ;;  %v184_v35 = vld [vmem:[%s753_s13 + $0xd0] sm:$0xff]  ;;  %v634_v45 = vpack.i.bf16 %v164_v25, %v180_v21 }
  0x18   : > { %582 = vmatprep.subr.bf16.mxu1 %v553_v10  ;;  %v567_v34 = vpack.c.bf16 %v167_v33, %v166_v32  ;;  %v185_v36 = vld [vmem:[%s753_s13 + $0xd8] sm:$0xff]  ;;  %v168_v39 = vld [vmem:[%s753_s13 + $0x50] sm:$0xff]  ;;  %v186_v42 = vld [vmem:[%s753_s13 + $0xe0] sm:$0xff]  ;;  %v636_v52 = vpack.i.bf16 %v165_v26, %v181_v22  ;;  %v638_v56 = vpack.i.bf16 %v166_v32, %v182_v28  ;;  %v640_v57 = vpack.i.bf16 %v167_v33, %v183_v29 }
  0x19   : > { %625 = vxpose.xlu0.b32.cont [2/16] (narrow) %v624_v9, 64  ;;  %v569_v37 = vpack.c.bf16 %v185_v36, %v184_v35  ;;  %v169_v40 = vld [vmem:[%s753_s13 + $0x58] sm:$0xff]  ;;  %v187_v43 = vld [vmem:[%s753_s13 + $0xe8] sm:$0xff]  ;;  %v170_v46 = vld [vmem:[%s753_s13 + $0x60] sm:$0xff]  ;;  %v642_v58 = vpack.i.bf16 %v168_v39, %v184_v35 }
  0x1a   : > { %556 = vmatpush3.bf16.msra.mxu0 %v555_v13  ;;  %v571_v41 = vpack.c.bf16 %v169_v40, %v168_v39  ;;  %v573_v44 = vpack.c.bf16 %v187_v43, %v186_v42  ;;  %v171_v47 = vld [vmem:[%s753_s13 + $0x68] sm:$0xff]  ;;  %v188_v49 = vld [vmem:[%s753_s13 + $0xf0] sm:$0xff]  ;;  %v189_v50 = vld [vmem:[%s753_s13 + $0xf8] sm:$0xff]  ;;  %v644_v59 = vpack.i.bf16 %v169_v40, %v185_v36  ;;  %v646_v60 = vpack.i.bf16 %v170_v46, %v186_v42 }
  0x1b   : > { %558 = vmatprep.subr.bf16.mxu0 %v557_v16  ;;  %590 = vmatpush3.bf16.msra.mxu1 %v555_v13  ;;  %v575_v48 = vpack.c.bf16 %v171_v47, %v170_v46  ;;  %v577_v51 = vpack.c.bf16 %v189_v50, %v188_v49  ;;  %v172_v53 = vld [vmem:[%s753_s13 + $0x70] sm:$0xff]  ;;  %v173_v54 = vld [vmem:[%s753_s13 + $0x78] sm:$0xff]  ;;  %v648_v61 = vpack.i.bf16 %v171_v47, %v187_v43 }
  0x1c   : > { %583 = vmatprep.subr.bf16.mxu1 %v557_v16  ;;  %v579_v55 = vpack.c.bf16 %v173_v54, %v172_v53  ;;  %v650_v62 = vpack.i.bf16 %v172_v53, %v188_v49  ;;  %v652_v63 = vpack.i.bf16 %v173_v54, %v189_v50 }
  0x1d   : > { %627 = vxpose.xlu0.b32.cont [3/16] (narrow) %v626_v17, 64 }
  0x1e   : > { %560 = vmatpush3.bf16.msra.mxu0 %v559_v20 }
  0x1f   : > { %562 = vmatprep.subr.bf16.mxu0 %v561_v23  ;;  %591 = vmatpush3.bf16.msra.mxu1 %v559_v20 }
  0x20   : > { %584 = vmatprep.subr.bf16.mxu1 %v561_v23 }
  0x21   : > { %629 = vxpose.xlu0.b32.cont [4/16] (narrow) %v628_v24, 64  ;;  %v718_v24 = vmov 0.0  }
  0x22   : > { %564 = vmatpush3.bf16.msra.mxu0 %v563_v27  ;;  %150 = vst.msk [vmem:[#allocation2] sm:$0xff] %vm149_vm0, %v718_v24  ;;  %151 = vst.msk [vmem:[#allocation2 + $0x8] sm:$0xff] %vm149_vm0, %v718_v24 }
  0x23   : > { %566 = vmatprep.subr.bf16.mxu0 %v565_v30  ;;  %592 = vmatpush3.bf16.msra.mxu1 %v563_v27  ;;  %152 = vst.msk [vmem:[#allocation2 + $0x10] sm:$0xff] %vm149_vm0, %v718_v24  ;;  %153 = vst.msk [vmem:[#allocation2 + $0x18] sm:$0xff] %vm149_vm0, %v718_v24 }
  0x24   : > { %585 = vmatprep.subr.bf16.mxu1 %v565_v30  ;;  %154 = vst.msk [vmem:[#allocation2 + $0x20] sm:$0xff] %vm149_vm0, %v718_v24  ;;  %155 = vst.msk [vmem:[#allocation2 + $0x28] sm:$0xff] %vm149_vm0, %v718_v24 }
  0x25   : > { %631 = vxpose.xlu0.b32.cont [5/16] (narrow) %v630_v31, 64  ;;  %156 = vst.msk [vmem:[#allocation2 + $0x30] sm:$0xff] %vm149_vm0, %v718_v24  ;;  %157 = vst.msk [vmem:[#allocation2 + $0x38] sm:$0xff] %vm149_vm0, %v718_v24 }
  0x26   : > { %568 = vmatpush3.bf16.msra.mxu0 %v567_v34 }
  0x27   : > { %570 = vmatprep.subr.bf16.mxu0 %v569_v37  ;;  %593 = vmatpush3.bf16.msra.mxu1 %v567_v34 }
  0x28   : > { %586 = vmatprep.subr.bf16.mxu1 %v569_v37 }
  0x29   : > { %633 = vxpose.xlu0.b32.cont [6/16] (narrow) %v632_v38, 64  ;;  %v190_v26 = vld [vmem:[#allocation2] sm:$0xff]  ;;  %v191_v31 = vld [vmem:[#allocation2 + $0x8] sm:$0xff] }
  0x2a   : > { %572 = vmatpush3.bf16.msra.mxu0 %v571_v41  ;;  %v192_v36 = vld [vmem:[#allocation2 + $0x10] sm:$0xff]  ;;  %v193_v42 = vld [vmem:[#allocation2 + $0x18] sm:$0xff] }
  0x2b   : > { %574 = vmatprep.subr.bf16.mxu0 %v573_v44  ;;  %594 = vmatpush3.bf16.msra.mxu1 %v571_v41  ;;  %v194_v49 = vld [vmem:[#allocation2 + $0x20] sm:$0xff] }
  0x2c   : > { %587 = vmatprep.subr.bf16.mxu1 %v573_v44 }
  0x2d   : > { %635 = vxpose.xlu0.b32.cont [7/16] (narrow) %v634_v45, 64 }
  0x2e   : > { %576 = vmatpush3.bf16.msra.mxu0 %v575_v48 }
  0x2f   : > { %578 = vmatprep.subr.bf16.mxu0 %v577_v51  ;;  %595 = vmatpush3.bf16.msra.mxu1 %v575_v48 }
  0x30   : > { %588 = vmatprep.subr.bf16.mxu1 %v577_v51 }
  0x31   : > { %637 = vxpose.xlu0.b32.cont [8/16] (narrow) %v636_v52, 64 }
  0x32   : > { %580 = vmatpush3.bf16.msra.mxu0 %v579_v55 }
  0x33   : > { %596 = vmatpush3.bf16.msra.mxu1 %v579_v55 }
  0x35   : > { %639 = vxpose.xlu0.b32.cont [9/16] (narrow) %v638_v56, 64  ;;  %v195_v56 = vld [vmem:[#allocation2 + $0x28] sm:$0xff] }
  0x39   : > { %641 = vxpose.xlu0.b32.cont [10/16] (narrow) %v640_v57, 64 }
  0x3d   : > { %643 = vxpose.xlu0.b32.cont [11/16] (narrow) %v642_v58, 64 }
  0x41   : > { %645 = vxpose.xlu0.b32.cont [12/16] (narrow) %v644_v59, 64 }
  0x45   : > { %647 = vxpose.xlu0.b32.cont [13/16] (narrow) %v646_v60, 64 }
  0x49   : > { %649 = vxpose.xlu0.b32.cont [14/16] (narrow) %v648_v61, 64 }
  0x4d   : > { %651 = vxpose.xlu0.b32.cont [15/16] (narrow) %v650_v62, 64 }
  0x51   : > { %653 = vxpose.xlu0.b32.end [16/16] (narrow) %v652_v63, 64  ;;  %v196_v63 = vld [vmem:[#allocation2 + $0x30] sm:$0xff] }
  0x95   : > { %v654_v0 = vpop.trf.xlu0 }
  0x96   : > { %v655_v1 = vunpack.i.l.bf16 %v654_v0  ;;  %v658_v2 = vunpack.i.h.bf16 %v654_v0 }
  0x98   : > { %326 = vmatprep.mubr.f32.mxu0 %v655_v1 }
  0x99   : > { %v659_v3 = vpop.trf.xlu0  ;;  %327 = vmatmul.mubr.f32.vlgmr.msra.gmra.mrb[0].mxu0 %v658_v2 }
  0x9a   : > { %v660_v4 = vunpack.i.l.bf16 %v659_v3  ;;  %v663_v5 = vunpack.i.h.bf16 %v659_v3 }
  0x9c   : > { %331 = vmatprep.mubr.f32.mxu0 %v660_v4 }
  0x9d   : > { %v664_v6 = vpop.trf.xlu0  ;;  %332 = vmatmul.mubr.f32.gmra.mrb[2].mxu0 %v663_v5 }
  0x9e   : > { %v665_v7 = vunpack.i.l.bf16 %v664_v6  ;;  %v668_v8 = vunpack.i.h.bf16 %v664_v6  ;;  %v197_v6 = vld [vmem:[#allocation2 + $0x38] sm:$0xff] }
  0xa0   : > { %336 = vmatprep.mubr.f32.mxu0 %v665_v7 }
  0xa1   : > { %v669_v9 = vpop.trf.xlu0  ;;  %337 = vmatmul.mubr.f32.gmra.mrb[4].mxu0 %v668_v8 }
  0xa2   : > { %v670_v10 = vunpack.i.l.bf16 %v669_v9  ;;  %v673_v11 = vunpack.i.h.bf16 %v669_v9 }
  0xa4   : > { %341 = vmatprep.mubr.f32.mxu0 %v670_v10 }
  0xa5   : > { %v674_v12 = vpop.trf.xlu0  ;;  %342 = vmatmul.mubr.f32.gmra.mrb[6].mxu0 %v673_v11 }
  0xa6   : > { %v675_v13 = vunpack.i.l.bf16 %v674_v12  ;;  %v678_v14 = vunpack.i.h.bf16 %v674_v12 }
  0xa8   : > { %346 = vmatprep.mubr.f32.mxu1 %v675_v13 }
  0xa9   : > { %v679_v15 = vpop.trf.xlu0  ;;  %347 = vmatmul.mubr.f32.vlgmr.msra.gmra.mrb[0].mxu1 %v678_v14 }
  0xaa   : > { %v680_v16 = vunpack.i.l.bf16 %v679_v15  ;;  %v683_v17 = vunpack.i.h.bf16 %v679_v15 }
  0xac   : > { %351 = vmatprep.mubr.f32.mxu1 %v680_v16 }
  0xad   : > { %v684_v18 = vpop.trf.xlu0  ;;  %352 = vmatmul.mubr.f32.gmra.mrb[2].mxu1 %v683_v17 }
  0xae   : > { %v685_v19 = vunpack.i.l.bf16 %v684_v18  ;;  %v688_v20 = vunpack.i.h.bf16 %v684_v18 }
  0xb0   : > { %356 = vmatprep.mubr.f32.mxu1 %v685_v19 }
  0xb1   : > { %v689_v21 = vpop.trf.xlu0  ;;  %357 = vmatmul.mubr.f32.gmra.mrb[4].mxu1 %v688_v20 }
  0xb2   : > { %v693_v22 = vunpack.i.h.bf16 %v689_v21  ;;  %v690_v23 = vunpack.i.l.bf16 %v689_v21 }
  0xb4   : > { %361 = vmatprep.mubr.f32.mxu1 %v690_v23 }
  0xb5   : > { %362 = vmatmul.mubr.f32.gmra.mrb[6].mxu1 %v693_v22 }
 0x16c   : > { %v525_v25 = vpop.f32.mrb[0].mxu0 }
 0x16d   : > { %v526_v27 = vpop.f32.mrb[1].mxu0 }
 0x16e   : > { %v527_v28 = vadd.f32 %v526_v27, %v525_v25 }
 0x170   : > { %v367_v29 = vadd.f32 %v527_v28, %v190_v26  ;;  %v528_v30 = vpop.f32.mrb[2].mxu0 }
 0x171   : > { %v529_v32 = vpop.f32.mrb[3].mxu0 }
 0x172   : > { %376 = vst.msk [vmem:[#allocation2] sm:$0xff] %vm149_vm0, %v367_v29  ;;  %v530_v33 = vadd.f32 %v529_v32, %v528_v30 }
 0x174   : > { %v368_v34 = vadd.f32 %v530_v33, %v191_v31  ;;  %v531_v35 = vpop.f32.mrb[4].mxu0 }
 0x175   : > { %v532_v37 = vpop.f32.mrb[5].mxu0 }
 0x176   : > { %377 = vst.msk [vmem:[#allocation2 + $0x8] sm:$0xff] %vm149_vm0, %v368_v34  ;;  %v533_v38 = vadd.f32 %v532_v37, %v531_v35 }
 0x178   : > { %v369_v39 = vadd.f32 %v533_v38, %v192_v36  ;;  %v534_v40 = vpop.f32.mrb[6].mxu0 }
 0x179   : > { %v387_v41 = vld [vmem:[#allocation2] sm:$0xff]  ;;  %v535_v43 = vpop.f32.mrb[7].mxu0 }
 0x17a   : > { %v395_v44 = vmul.f32 6.1035156e-05, %v387_v41  ;;  %378 = vst.msk [vmem:[#allocation2 + $0x10] sm:$0xff] %vm149_vm0, %v369_v39  ;;  %v536_v45 = vadd.f32 %v535_v43, %v534_v40 }
 0x17c   : > { %403 = vst.msk [vmem:[%s801_s17] sm:$0xff] %vm149_vm0, %v395_v44  ;;  %v370_v46 = vadd.f32 %v536_v45, %v193_v42  ;;  %v537_v47 = vpop.f32.mrb[0].mxu1 }
 0x17d   : > { %v388_v48 = vld [vmem:[#allocation2 + $0x8] sm:$0xff]  ;;  %v538_v50 = vpop.f32.mrb[1].mxu1 }
 0x17e   : > { %v396_v51 = vmul.f32 6.1035156e-05, %v388_v48  ;;  %379 = vst.msk [vmem:[#allocation2 + $0x18] sm:$0xff] %vm149_vm0, %v370_v46  ;;  %v539_v52 = vadd.f32 %v538_v50, %v537_v47 }
 0x180   : > { %404 = vst.msk [vmem:[%s801_s17 + $0x8] sm:$0xff] %vm149_vm0, %v396_v51  ;;  %v371_v53 = vadd.f32 %v539_v52, %v194_v49  ;;  %v540_v54 = vpop.f32.mrb[2].mxu1 }
 0x181   : > { %v389_v55 = vld [vmem:[#allocation2 + $0x10] sm:$0xff]  ;;  %v541_v57 = vpop.f32.mrb[3].mxu1 }
 0x182   : > { %v397_v58 = vmul.f32 6.1035156e-05, %v389_v55  ;;  %380 = vst.msk [vmem:[#allocation2 + $0x20] sm:$0xff] %vm149_vm0, %v371_v53  ;;  %v542_v59 = vadd.f32 %v541_v57, %v540_v54 }
 0x184   : > { %405 = vst.msk [vmem:[%s801_s17 + $0x10] sm:$0xff] %vm149_vm0, %v397_v58  ;;  %v372_v60 = vadd.f32 %v542_v59, %v195_v56  ;;  %v543_v61 = vpop.f32.mrb[4].mxu1 }
 0x185   : > { %v390_v62 = vld [vmem:[#allocation2 + $0x18] sm:$0xff]  ;;  %v544_v0 = vpop.f32.mrb[5].mxu1 }
 0x186   : > { %v398_v1 = vmul.f32 6.1035156e-05, %v390_v62  ;;  %381 = vst.msk [vmem:[#allocation2 + $0x28] sm:$0xff] %vm149_vm0, %v372_v60  ;;  %v545_v2 = vadd.f32 %v544_v0, %v543_v61 }
 0x188   : > { %406 = vst.msk [vmem:[%s801_s17 + $0x18] sm:$0xff] %vm149_vm0, %v398_v1  ;;  %v373_v3 = vadd.f32 %v545_v2, %v196_v63  ;;  %v546_v4 = vpop.f32.mrb[6].mxu1 }
 0x189   : > { %v391_v5 = vld [vmem:[#allocation2 + $0x20] sm:$0xff]  ;;  %v547_v7 = vpop.f32.mrb[7].mxu1 }
 0x18a   : > { %v399_v8 = vmul.f32 6.1035156e-05, %v391_v5  ;;  %382 = vst.msk [vmem:[#allocation2 + $0x30] sm:$0xff] %vm149_vm0, %v373_v3  ;;  %v548_v9 = vadd.f32 %v547_v7, %v546_v4 }
 0x18c   : > { %407 = vst.msk [vmem:[%s801_s17 + $0x20] sm:$0xff] %vm149_vm0, %v399_v8  ;;  %v374_v10 = vadd.f32 %v548_v9, %v197_v6 }
 0x18d   : > { %v392_v11 = vld [vmem:[#allocation2 + $0x28] sm:$0xff] }
 0x18e   : > { %v400_v12 = vmul.f32 6.1035156e-05, %v392_v11  ;;  %383 = vst.msk [vmem:[#allocation2 + $0x38] sm:$0xff] %vm149_vm0, %v374_v10 }
 0x190   : > { %408 = vst.msk [vmem:[%s801_s17 + $0x28] sm:$0xff] %vm149_vm0, %v400_v12 }
 0x191   : > { %v393_v13 = vld [vmem:[#allocation2 + $0x30] sm:$0xff] }
 0x192   : > { %v401_v14 = vmul.f32 6.1035156e-05, %v393_v13 }
 0x194   : > { %409 = vst.msk [vmem:[%s801_s17 + $0x30] sm:$0xff] %vm149_vm0, %v401_v14 }
 0x195   : > { %v394_v15 = vld [vmem:[#allocation2 + $0x38] sm:$0xff] }
 0x196   : > { %v402_v16 = vmul.f32 6.1035156e-05, %v394_v15 }
 0x198   : > { %410 = vst.msk [vmem:[%s801_s17 + $0x38] sm:$0xff] %vm149_vm0, %v402_v16 }
 0x199 PF: > { %s11_s8 = sadd.s32 1, %s716_s8   ;;  %s836_s6 = smov %s712_s7 }
 0x19a   : > { %p8_p5 = scmp.ge.s32.totalorder %s11_s8, 6   ;;  %s837_s7 = smov %s839_s9 }
 0x19c   :  { %10 = sbr.rel (!%p8_p5) target bundleno = 2 (0x2), region = 62 }

// kernel: vgg_loss.16
= control target key start
LH: loop header
LB: loop body
LE: loop exit
PB: predicated region body
PF: predicated region fallthrough
CT: control target
= control target key end

     0   :  { %s320_s0 = inlined_call_operand.vmem [shape: f32[128,64], index: 0, kind: input, shape index: {}]   ;;  %s321_s1 = inlined_call_operand.vmem [shape: f32[128,64], index: 1, kind: input, shape index: {}]   ;;  %s322_s2 = inlined_call_operand.hbm [shape: f32[1,1], index: 2, kind: output, shape index: {}]  }
   0x1   :  { %v18_v0 = vld [vmem:[%s320_s0] sm:$0xff]  ;;  %v19_v1 = vld [vmem:[%s320_s0 + $0x8] sm:$0xff]  ;;  %v20_v2 = vld [vmem:[%s320_s0 + $0x10] sm:$0xff] }
   0x2   :  { %v34_v3 = vld [vmem:[%s321_s1] sm:$0xff]  ;;  %v35_v4 = vld [vmem:[%s321_s1 + $0x8] sm:$0xff]  ;;  %v21_v5 = vld [vmem:[%s320_s0 + $0x18] sm:$0xff] }
   0x3   :  { %v36_v6 = vld [vmem:[%s321_s1 + $0x10] sm:$0xff]  ;;  %v37_v7 = vld [vmem:[%s321_s1 + $0x18] sm:$0xff]  ;;  %v50_v8 = vsub.f32 %v18_v0, %v34_v3  ;;  %v51_v9 = vsub.f32 %v19_v1, %v35_v4  ;;  %v22_v11 = vld [vmem:[%s320_s0 + $0x20] sm:$0xff] }
   0x4   :  { %v52_v10 = vsub.f32 %v20_v2, %v36_v6  ;;  %v38_v12 = vld [vmem:[%s321_s1 + $0x20] sm:$0xff]  ;;  %v53_v13 = vsub.f32 %v21_v5, %v37_v7  ;;  %v23_v14 = vld [vmem:[%s320_s0 + $0x28] sm:$0xff] }
   0x5   :  { %v39_v15 = vld [vmem:[%s321_s1 + $0x28] sm:$0xff]  ;;  %v67_v16 = vmul.f32 %v50_v8, %v50_v8 }
   0x6   :  { %7 = vsyncpa [#allocation4], 0  ;;  %v54_v17 = vsub.f32 %v22_v11, %v38_v12  ;;  %v68_v18 = vmul.f32 %v51_v9, %v51_v9  ;;  %v69_v19 = vmul.f32 %v52_v10, %v52_v10  ;;  %vm83_vm0 = vcmask 523264   ;;  %v24_v20 = vld [vmem:[%s320_s0 + $0x30] sm:$0xff]  ;;  %v25_v24 = vld [vmem:[%s320_s0 + $0x38] sm:$0xff] }
   0x7   :  { %v40_v21 = vld [vmem:[%s321_s1 + $0x30] sm:$0xff]  ;;  %v55_v22 = vsub.f32 %v23_v14, %v39_v15  ;;  %v70_v23 = vmul.f32 %v53_v13, %v53_v13  ;;  %v41_v25 = vld [vmem:[%s321_s1 + $0x38] sm:$0xff]  ;;  %v84_v26 = vsel %vm83_vm0, %v67_v16, 0.0  ;;  %v26_v31 = vld [vmem:[%s320_s0 + $0x40] sm:$0xff]  ;;  %vm16_vm1 = vcmask 0  }
   0x8   :  { %v56_v27 = vsub.f32 %v24_v20, %v40_v21  ;;  %v71_v28 = vmul.f32 %v54_v17, %v54_v17  ;;  %v85_v29 = vsel %vm83_vm0, %v68_v18, 0.0  ;;  %v87_v30 = vsel %vm83_vm0, %v69_v19, 0.0  ;;  %v42_v32 = vld [vmem:[%s321_s1 + $0x40] sm:$0xff]  ;;  %v27_v37 = vld [vmem:[%s320_s0 + $0x48] sm:$0xff]  ;;  %v28_v43 = vld [vmem:[%s320_s0 + $0x50] sm:$0xff] }
   0x9   :  { %v86_v33 = vadd.f32 %v85_v29, %v84_v26  ;;  %v57_v34 = vsub.f32 %v25_v24, %v41_v25  ;;  %v72_v35 = vmul.f32 %v55_v22, %v55_v22  ;;  %v89_v36 = vsel %vm83_vm0, %v70_v23, 0.0  ;;  %v43_v38 = vld [vmem:[%s321_s1 + $0x48] sm:$0xff]  ;;  %v44_v44 = vld [vmem:[%s321_s1 + $0x50] sm:$0xff]  ;;  %v29_v49 = vld [vmem:[%s320_s0 + $0x58] sm:$0xff] }
   0xa   :  { %v58_v40 = vsub.f32 %v26_v31, %v42_v32  ;;  %v73_v41 = vmul.f32 %v56_v27, %v56_v27  ;;  %v91_v42 = vsel %vm83_vm0, %v71_v28, 0.0  ;;  %v59_v46 = vsub.f32 %v27_v37, %v43_v38  ;;  %v45_v50 = vld [vmem:[%s321_s1 + $0x58] sm:$0xff]  ;;  %v30_v55 = vld [vmem:[%s320_s0 + $0x60] sm:$0xff]  ;;  %v31_v61 = vld [vmem:[%s320_s0 + $0x68] sm:$0xff] }
   0xb   :  { %v88_v39 = vadd.f32 %v87_v30, %v86_v33  ;;  %v74_v47 = vmul.f32 %v57_v34, %v57_v34  ;;  %v93_v48 = vsel %vm83_vm0, %v72_v35, 0.0  ;;  %v60_v52 = vsub.f32 %v28_v43, %v44_v44  ;;  %v46_v56 = vld [vmem:[%s321_s1 + $0x60] sm:$0xff]  ;;  %v47_v62 = vld [vmem:[%s321_s1 + $0x68] sm:$0xff]  ;;  %v32_v3 = vld [vmem:[%s320_s0 + $0x70] sm:$0xff] }
   0xc   :  { %v75_v53 = vmul.f32 %v58_v40, %v58_v40  ;;  %v95_v54 = vsel %vm83_vm0, %v73_v41, 0.0  ;;  %v61_v58 = vsub.f32 %v29_v49, %v45_v50  ;;  %v76_v59 = vmul.f32 %v59_v46, %v59_v46  ;;  %v48_v4 = vld [vmem:[%s321_s1 + $0x70] sm:$0xff]  ;;  %v33_v9 = vld [vmem:[%s320_s0 + $0x78] sm:$0xff] }
   0xd   :  { %v90_v45 = vadd.f32 %v89_v36, %v88_v39  ;;  %v97_v60 = vsel %vm83_vm0, %v74_v47, 0.0  ;;  %v62_v0 = vsub.f32 %v30_v55, %v46_v56  ;;  %v77_v1 = vmul.f32 %v60_v52, %v60_v52  ;;  %v49_v10 = vld [vmem:[%s321_s1 + $0x78] sm:$0xff]  ;;  %s177_s1 = smov [#allocation3]  }
   0xe   :  { %v99_v2 = vsel %vm83_vm0, %v75_v53, 0.0  ;;  %v63_v6 = vsub.f32 %v31_v61, %v47_v62  ;;  %v78_v7 = vmul.f32 %v61_v58, %v61_v58  ;;  %v101_v8 = vsel %vm83_vm0, %v76_v59, 0.0  ;;  %s140_s17 = sshll.u32 %s177_s1, 4  ;;  %s141_s17 = int_to_ptr.vmem [resolvable:$true] %s140_s17 }
   0xf   :  { %v92_v51 = vadd.f32 %v91_v42, %v90_v45  ;;  %v64_v12 = vsub.f32 %v32_v3, %v48_v4  ;;  %v79_v13 = vmul.f32 %v62_v0, %v62_v0  ;;  %v103_v14 = vsel %vm83_vm0, %v77_v1, 0.0  ;;  %s152_s18 = scalar_lea.vmem %s141_s17, 16  ;;  %s156_s19 = scalar_lea.vmem %s141_s17, 32 }
  0x10   :  { %v65_v16 = vsub.f32 %v33_v9, %v49_v10  ;;  %v80_v17 = vmul.f32 %v63_v6, %v63_v6  ;;  %v105_v18 = vsel %vm83_vm0, %v78_v7, 0.0  ;;  %v176_v31 = vmov 0.0   ;;  %p153_p0 = scmp.ne.s32.totalorder %s141_s17, %s152_s18  ;;  %p157_p1 = scmp.lt.s32.totalorder %s141_s17, %s141_s17 }
  0x11   :  { %v94_v57 = vadd.f32 %v93_v48, %v92_v51  ;;  %v81_v20 = vmul.f32 %v64_v12, %v64_v12  ;;  %v107_v21 = vsel %vm83_vm0, %v79_v13, 0.0  ;;  %17 = vst.msk [vmem:[#allocation2] sm:$0x1] %vm16_vm1, %v176_v31  ;;  %p158_p2 = scmp.lt.s32.totalorder %s156_s19, %s152_s18 }
  0x12   :  { %v82_v23 = vmul.f32 %v65_v16, %v65_v16  ;;  %v109_v24 = vsel %vm83_vm0, %v80_v17, 0.0 }
  0x13   :  { %v96_v63 = vadd.f32 %v95_v54, %v94_v57  ;;  %v111_v26 = vsel %vm83_vm0, %v81_v20, 0.0  ;;  %p159_p3 = por %p158_p2, %p157_p1 }
  0x14   :  { %v113_v28 = vsel %vm83_vm0, %v82_v23, 0.0 }
  0x15   :  { %v98_v5 = vadd.f32 %v97_v60, %v96_v63  ;;  %p160_p4 = pnand %p159_p3, %p153_p0 }
  0x17   :  { %v100_v11 = vadd.f32 %v99_v2, %v98_v5 }
  0x18   :  { %v66_v39 = vld [vmem:[#allocation2] sm:$0x1] }
  0x19   :  { %v102_v15 = vadd.f32 %v101_v8, %v100_v11 }
  0x1b   :  { %v104_v19 = vadd.f32 %v103_v14, %v102_v15 }
  0x1d   :  { %v106_v22 = vadd.f32 %v105_v18, %v104_v19 }
  0x1f   :  { %v108_v25 = vadd.f32 %v107_v21, %v106_v22 }
  0x21   :  { %v110_v27 = vadd.f32 %v109_v24, %v108_v25 }
  0x23   :  { %v112_v29 = vadd.f32 %v111_v26, %v110_v27 }
  0x25   :  { %v114_v30 = vadd.f32 %v113_v28, %v112_v29 }
  0x27   :  { %115 = vadd.xlane.f32.xlu0 %v114_v30 }
  0xb4   :  { %v116_v32 = vpop.xlane.xlu0 %115 }
  0xb5   :  { %v117_v33 = vrot.slane %v116_v32, 4 }
  0xb7   :  { %v118_v34 = vadd.f32 %v117_v33, %v116_v32 }
  0xb9   :  { %v119_v35 = vrot.slane %v118_v34, 2 }
  0xbb   :  { %v120_v36 = vadd.f32 %v119_v35, %v118_v34 }
  0xbd   :  { %v121_v37 = vrot.slane %v120_v36, 1 }
  0xbf   :  { %v122_v38 = vadd.f32 %v121_v37, %v120_v36 }
  0xc1   :  { %148 = vpush %v122_v38 }
  0xf2   :  { %s149_s0 = spop %148 }
  0xf3   :  { %v124_v40 = vstv %s149_s0 }
  0xf4   :  { %v125_v41 = vadd.f32 %v124_v40, %v66_v39 }
  0xf6   :  { %127 = vst.msk [vmem:[#allocation2] sm:$0x1] %vm16_vm1, %v125_v41 }
  0xfd   :  { %v131_v42 = vld [vmem:[#allocation2] sm:$0x1] }
  0xfe   :  { %v132_v43 = vmul.f32 0.00012207031, %v131_v42 }
 0x100   :  { %133 = vst.msk [vmem:[#allocation3] sm:$0x1] %vm16_vm1, %v132_v43 }
 0x101   :  { %163 = shalt.err (!%p160_p4)
}
 0x102   :  { %s164_s22 = scalar_lea.hbm %s322_s2, 16 }
 0x103   :  { %p165_p5 = scmp.ne.s32.totalorder %s322_s2, %s164_s22  ;;  %p168_p6 = scmp.lt.u32.totalorder %s164_s22, %s322_s2 }
 0x105   :  { %p170_p7 = pnand %p168_p6, %p165_p5 }
 0x107   :  { %173 = shalt.err (!%p170_p7)
}
 0x108   :  { %143 = dma.vmem_to_hbm [thread:$0]  %s141_s17, 16, %s322_s2, [#allocation4]  }
 0x109   :  { %174 = dma.done.wait [#allocation4], 16  }
 0x10a   :  { %175 = vsyncadd [#allocation4], 4294967280 }
 0x10b   :  { %147 = vsyncpa [#allocation4], 1 }

// kernel: vgg_loss.15
= control target key start
LH: loop header
LB: loop body
LE: loop exit
PB: predicated region body
PF: predicated region fallthrough
CT: control target
= control target key end

     0   :  { %7 = vsyncpa [#allocation4], 0  ;;  %vm16_vm0 = vcmask 0   ;;  %v464_v0 = vmov 0.0   ;;  %vm275_vm1 = vcmask 523264   ;;  %s944_s0 = inlined_call_operand.vmem [shape: f32[512,64], index: 0, kind: input, shape index: {}]   ;;  %s945_s1 = inlined_call_operand.vmem [shape: f32[512,64], index: 1, kind: input, shape index: {}]   ;;  %s946_s2 = inlined_call_operand.hbm [shape: f32[1,1], index: 2, kind: output, shape index: {}]  }
   0x1   :  { %17 = vst.msk [vmem:[#allocation2] sm:$0x1] %vm16_vm0, %v464_v0  ;;  %v18_v1 = vld [vmem:[%s944_s0] sm:$0xff]  ;;  %v19_v2 = vld [vmem:[%s944_s0 + $0x8] sm:$0xff]  ;;  %v20_v3 = vld [vmem:[%s944_s0 + $0x10] sm:$0xff] }
   0x2   :  { %v82_v4 = vld [vmem:[%s945_s1] sm:$0xff]  ;;  %v83_v5 = vld [vmem:[%s945_s1 + $0x8] sm:$0xff]  ;;  %v84_v6 = vld [vmem:[%s945_s1 + $0x10] sm:$0xff] }
   0x3   :  { %v21_v7 = vld [vmem:[%s944_s0 + $0x18] sm:$0xff]  ;;  %v146_v9 = vsub.f32 %v18_v1, %v82_v4  ;;  %v147_v10 = vsub.f32 %v19_v2, %v83_v5  ;;  %v148_v11 = vsub.f32 %v20_v3, %v84_v6  ;;  %v22_v12 = vld [vmem:[%s944_s0 + $0x20] sm:$0xff]  ;;  %v23_v15 = vld [vmem:[%s944_s0 + $0x28] sm:$0xff] }
   0x4   :  { %v85_v8 = vld [vmem:[%s945_s1 + $0x18] sm:$0xff]  ;;  %v86_v13 = vld [vmem:[%s945_s1 + $0x20] sm:$0xff]  ;;  %v87_v16 = vld [vmem:[%s945_s1 + $0x28] sm:$0xff] }
   0x5   :  { %v149_v14 = vsub.f32 %v21_v7, %v85_v8  ;;  %v24_v17 = vld [vmem:[%s944_s0 + $0x30] sm:$0xff]  ;;  %v150_v19 = vsub.f32 %v22_v12, %v86_v13  ;;  %v211_v20 = vmul.f32 %v146_v9, %v146_v9  ;;  %v212_v21 = vmul.f32 %v147_v10, %v147_v10  ;;  %v25_v25 = vld [vmem:[%s944_s0 + $0x38] sm:$0xff]  ;;  %v26_v32 = vld [vmem:[%s944_s0 + $0x40] sm:$0xff] }
   0x6   :  { %v88_v18 = vld [vmem:[%s945_s1 + $0x30] sm:$0xff]  ;;  %v213_v22 = vmul.f32 %v148_v11, %v148_v11  ;;  %v151_v23 = vsub.f32 %v23_v15, %v87_v16  ;;  %v89_v26 = vld [vmem:[%s945_s1 + $0x38] sm:$0xff]  ;;  %v90_v33 = vld [vmem:[%s945_s1 + $0x40] sm:$0xff] }
   0x7   :  { %v214_v24 = vmul.f32 %v149_v14, %v149_v14  ;;  %v152_v27 = vsub.f32 %v24_v17, %v88_v18  ;;  %v215_v28 = vmul.f32 %v150_v19, %v150_v19  ;;  %v276_v29 = vsel %vm275_vm1, %v211_v20, 0.0  ;;  %v27_v38 = vld [vmem:[%s944_s0 + $0x48] sm:$0xff]  ;;  %v28_v44 = vld [vmem:[%s944_s0 + $0x50] sm:$0xff]  ;;  %v29_v50 = vld [vmem:[%s944_s0 + $0x58] sm:$0xff] }
   0x8   :  { %v277_v30 = vsel %vm275_vm1, %v212_v21, 0.0  ;;  %v279_v31 = vsel %vm275_vm1, %v213_v22, 0.0  ;;  %v153_v35 = vsub.f32 %v25_v25, %v89_v26  ;;  %v216_v36 = vmul.f32 %v151_v23, %v151_v23  ;;  %v91_v39 = vld [vmem:[%s945_s1 + $0x48] sm:$0xff]  ;;  %v92_v45 = vld [vmem:[%s945_s1 + $0x50] sm:$0xff]  ;;  %v93_v51 = vld [vmem:[%s945_s1 + $0x58] sm:$0xff] }
   0x9   :  { %v278_v34 = vadd.f32 %v277_v30, %v276_v29  ;;  %v281_v37 = vsel %vm275_vm1, %v214_v24, 0.0  ;;  %v154_v41 = vsub.f32 %v26_v32, %v90_v33  ;;  %v217_v42 = vmul.f32 %v152_v27, %v152_v27  ;;  %v30_v56 = vld [vmem:[%s944_s0 + $0x60] sm:$0xff]  ;;  %v31_v62 = vld [vmem:[%s944_s0 + $0x68] sm:$0xff]  ;;  %v32_v4 = vld [vmem:[%s944_s0 + $0x70] sm:$0xff] }
   0xa   :  { %v283_v43 = vsel %vm275_vm1, %v215_v28, 0.0  ;;  %v155_v47 = vsub.f32 %v27_v38, %v91_v39  ;;  %v218_v48 = vmul.f32 %v153_v35, %v153_v35  ;;  %v285_v49 = vsel %vm275_vm1, %v216_v36, 0.0  ;;  %v94_v57 = vld [vmem:[%s945_s1 + $0x60] sm:$0xff]  ;;  %v95_v63 = vld [vmem:[%s945_s1 + $0x68] sm:$0xff]  ;;  %v96_v5 = vld [vmem:[%s945_s1 + $0x70] sm:$0xff] }
   0xb   :  { %v280_v40 = vadd.f32 %v279_v31, %v278_v34  ;;  %v156_v53 = vsub.f32 %v28_v44, %v92_v45  ;;  %v219_v54 = vmul.f32 %v154_v41, %v154_v41  ;;  %v287_v55 = vsel %vm275_vm1, %v217_v42, 0.0  ;;  %v33_v10 = vld [vmem:[%s944_s0 + $0x78] sm:$0xff]  ;;  %v34_v16 = vld [vmem:[%s944_s0 + $0x80] sm:$0xff]  ;;  %v35_v22 = vld [vmem:[%s944_s0 + $0x88] sm:$0xff] }
   0xc   :  { %v157_v59 = vsub.f32 %v29_v50, %v93_v51  ;;  %v220_v60 = vmul.f32 %v155_v47, %v155_v47  ;;  %v289_v61 = vsel %vm275_vm1, %v218_v48, 0.0  ;;  %v158_v1 = vsub.f32 %v30_v56, %v94_v57  ;;  %v97_v11 = vld [vmem:[%s945_s1 + $0x78] sm:$0xff]  ;;  %v98_v17 = vld [vmem:[%s945_s1 + $0x80] sm:$0xff]  ;;  %v99_v23 = vld [vmem:[%s945_s1 + $0x88] sm:$0xff] }
   0xd   :  { %v282_v46 = vadd.f32 %v281_v37, %v280_v40  ;;  %v221_v2 = vmul.f32 %v156_v53, %v156_v53  ;;  %v291_v3 = vsel %vm275_vm1, %v219_v54, 0.0  ;;  %v159_v7 = vsub.f32 %v31_v62, %v95_v63  ;;  %v36_v28 = vld [vmem:[%s944_s0 + $0x90] sm:$0xff]  ;;  %v37_v34 = vld [vmem:[%s944_s0 + $0x98] sm:$0xff]  ;;  %v38_v40 = vld [vmem:[%s944_s0 + $0xa0] sm:$0xff] }
   0xe   :  { %v222_v8 = vmul.f32 %v157_v59, %v157_v59  ;;  %v293_v9 = vsel %vm275_vm1, %v220_v60, 0.0  ;;  %v160_v13 = vsub.f32 %v32_v4, %v96_v5  ;;  %v223_v14 = vmul.f32 %v158_v1, %v158_v1  ;;  %v100_v29 = vld [vmem:[%s945_s1 + $0x90] sm:$0xff]  ;;  %v101_v35 = vld [vmem:[%s945_s1 + $0x98] sm:$0xff]  ;;  %v102_v41 = vld [vmem:[%s945_s1 + $0xa0] sm:$0xff] }
   0xf   :  { %v284_v52 = vadd.f32 %v283_v43, %v282_v46  ;;  %v295_v15 = vsel %vm275_vm1, %v221_v2, 0.0  ;;  %v161_v19 = vsub.f32 %v33_v10, %v97_v11  ;;  %v224_v20 = vmul.f32 %v159_v7, %v159_v7  ;;  %v39_v46 = vld [vmem:[%s944_s0 + $0xa8] sm:$0xff]  ;;  %v104_v53 = vld [vmem:[%s945_s1 + $0xb0] sm:$0xff]  ;;  %v105_v59 = vld [vmem:[%s945_s1 + $0xb8] sm:$0xff] }
  0x10   :  { %v297_v21 = vsel %vm275_vm1, %v222_v8, 0.0  ;;  %v162_v25 = vsub.f32 %v34_v16, %v98_v17  ;;  %v225_v26 = vmul.f32 %v160_v13, %v160_v13  ;;  %v299_v27 = vsel %vm275_vm1, %v223_v14, 0.0  ;;  %v103_v47 = vld [vmem:[%s945_s1 + $0xa8] sm:$0xff]  ;;  %v106_v1 = vld [vmem:[%s945_s1 + $0xc0] sm:$0xff]  ;;  %v108_v13 = vld [vmem:[%s945_s1 + $0xd0] sm:$0xff] }
  0x11   :  { %v286_v58 = vadd.f32 %v285_v49, %v284_v52  ;;  %v163_v31 = vsub.f32 %v35_v22, %v99_v23  ;;  %v226_v32 = vmul.f32 %v161_v19, %v161_v19  ;;  %v301_v33 = vsel %vm275_vm1, %v224_v20, 0.0  ;;  %v40_v52 = vld [vmem:[%s944_s0 + $0xb0] sm:$0xff]  ;;  %v107_v7 = vld [vmem:[%s945_s1 + $0xc8] sm:$0xff]  ;;  %v109_v19 = vld [vmem:[%s945_s1 + $0xd8] sm:$0xff] }
  0x12   :  { %v164_v37 = vsub.f32 %v36_v28, %v100_v29  ;;  %v227_v38 = vmul.f32 %v162_v25, %v162_v25  ;;  %v303_v39 = vsel %vm275_vm1, %v225_v26, 0.0  ;;  %v165_v43 = vsub.f32 %v37_v34, %v101_v35  ;;  %v110_v25 = vld [vmem:[%s945_s1 + $0xe0] sm:$0xff] }
  0x13   :  { %v288_v0 = vadd.f32 %v287_v55, %v286_v58  ;;  %v228_v44 = vmul.f32 %v163_v31, %v163_v31  ;;  %v305_v45 = vsel %vm275_vm1, %v226_v32, 0.0  ;;  %v166_v49 = vsub.f32 %v38_v40, %v102_v41  ;;  %v41_v58 = vld [vmem:[%s944_s0 + $0xb8] sm:$0xff]  ;;  %v111_v31 = vld [vmem:[%s945_s1 + $0xe8] sm:$0xff] }
  0x14   :  { %v229_v50 = vmul.f32 %v164_v37, %v164_v37  ;;  %v307_v51 = vsel %vm275_vm1, %v227_v38, 0.0  ;;  %v167_v55 = vsub.f32 %v39_v46, %v103_v47  ;;  %v230_v56 = vmul.f32 %v165_v43, %v165_v43  ;;  %v112_v37 = vld [vmem:[%s945_s1 + $0xf0] sm:$0xff]  ;;  %v113_v43 = vld [vmem:[%s945_s1 + $0xf8] sm:$0xff] }
  0x15   :  { %v290_v6 = vadd.f32 %v289_v61, %v288_v0  ;;  %v309_v57 = vsel %vm275_vm1, %v228_v44, 0.0  ;;  %v168_v61 = vsub.f32 %v40_v52, %v104_v53  ;;  %v231_v62 = vmul.f32 %v166_v49, %v166_v49  ;;  %v42_v0 = vld [vmem:[%s944_s0 + $0xc0] sm:$0xff] }
  0x16   :  { %v311_v63 = vsel %vm275_vm1, %v229_v50, 0.0  ;;  %v232_v4 = vmul.f32 %v167_v55, %v167_v55  ;;  %v313_v5 = vsel %vm275_vm1, %v230_v56, 0.0  ;;  %v114_v49 = vld [vmem:[%s945_s1 + $0x100] sm:$0xff]  ;;  %v115_v55 = vld [vmem:[%s945_s1 + $0x108] sm:$0xff] }
  0x17   :  { %v292_v12 = vadd.f32 %v291_v3, %v290_v6  ;;  %v169_v3 = vsub.f32 %v41_v58, %v105_v59  ;;  %v43_v6 = vld [vmem:[%s944_s0 + $0xc8] sm:$0xff]  ;;  %v233_v10 = vmul.f32 %v168_v61, %v168_v61  ;;  %v315_v11 = vsel %vm275_vm1, %v231_v62, 0.0  ;;  %v116_v61 = vld [vmem:[%s945_s1 + $0x110] sm:$0xff] }
  0x18   :  { %v317_v17 = vsel %vm275_vm1, %v232_v4, 0.0 }
  0x19   :  { %v294_v18 = vadd.f32 %v293_v9, %v292_v12  ;;  %v170_v9 = vsub.f32 %v42_v0, %v106_v1  ;;  %v44_v12 = vld [vmem:[%s944_s0 + $0xd0] sm:$0xff]  ;;  %v234_v16 = vmul.f32 %v169_v3, %v169_v3  ;;  %v319_v23 = vsel %vm275_vm1, %v233_v10, 0.0  ;;  %v117_v3 = vld [vmem:[%s945_s1 + $0x118] sm:$0xff] }
  0x1b   :  { %v296_v24 = vadd.f32 %v295_v15, %v294_v18  ;;  %v171_v15 = vsub.f32 %v43_v6, %v107_v7  ;;  %v45_v18 = vld [vmem:[%s944_s0 + $0xd8] sm:$0xff]  ;;  %v235_v22 = vmul.f32 %v170_v9, %v170_v9  ;;  %v321_v29 = vsel %vm275_vm1, %v234_v16, 0.0  ;;  %v118_v9 = vld [vmem:[%s945_s1 + $0x120] sm:$0xff] }
  0x1d   :  { %v298_v30 = vadd.f32 %v297_v21, %v296_v24  ;;  %v172_v21 = vsub.f32 %v44_v12, %v108_v13  ;;  %v46_v24 = vld [vmem:[%s944_s0 + $0xe0] sm:$0xff]  ;;  %v236_v28 = vmul.f32 %v171_v15, %v171_v15  ;;  %v323_v35 = vsel %vm275_vm1, %v235_v22, 0.0  ;;  %v119_v15 = vld [vmem:[%s945_s1 + $0x128] sm:$0xff] }
  0x1f   :  { %v300_v36 = vadd.f32 %v299_v27, %v298_v30  ;;  %v173_v27 = vsub.f32 %v45_v18, %v109_v19  ;;  %v47_v30 = vld [vmem:[%s944_s0 + $0xe8] sm:$0xff]  ;;  %v237_v34 = vmul.f32 %v172_v21, %v172_v21  ;;  %v325_v41 = vsel %vm275_vm1, %v236_v28, 0.0  ;;  %v120_v21 = vld [vmem:[%s945_s1 + $0x130] sm:$0xff] }
  0x21   :  { %v302_v42 = vadd.f32 %v301_v33, %v300_v36  ;;  %v174_v33 = vsub.f32 %v46_v24, %v110_v25  ;;  %v48_v36 = vld [vmem:[%s944_s0 + $0xf0] sm:$0xff]  ;;  %v238_v40 = vmul.f32 %v173_v27, %v173_v27  ;;  %v327_v47 = vsel %vm275_vm1, %v237_v34, 0.0  ;;  %v121_v27 = vld [vmem:[%s945_s1 + $0x138] sm:$0xff] }
  0x23   :  { %v304_v48 = vadd.f32 %v303_v39, %v302_v42  ;;  %v175_v39 = vsub.f32 %v47_v30, %v111_v31  ;;  %v49_v42 = vld [vmem:[%s944_s0 + $0xf8] sm:$0xff]  ;;  %v239_v46 = vmul.f32 %v174_v33, %v174_v33  ;;  %v329_v53 = vsel %vm275_vm1, %v238_v40, 0.0  ;;  %v122_v33 = vld [vmem:[%s945_s1 + $0x140] sm:$0xff] }
  0x25   :  { %v306_v54 = vadd.f32 %v305_v45, %v304_v48  ;;  %v176_v45 = vsub.f32 %v48_v36, %v112_v37  ;;  %v50_v48 = vld [vmem:[%s944_s0 + $0x100] sm:$0xff]  ;;  %v240_v52 = vmul.f32 %v175_v39, %v175_v39  ;;  %v331_v59 = vsel %vm275_vm1, %v239_v46, 0.0  ;;  %v123_v39 = vld [vmem:[%s945_s1 + $0x148] sm:$0xff] }
  0x27   :  { %v308_v60 = vadd.f32 %v307_v51, %v306_v54  ;;  %v177_v51 = vsub.f32 %v49_v42, %v113_v43  ;;  %v51_v54 = vld [vmem:[%s944_s0 + $0x108] sm:$0xff]  ;;  %v241_v58 = vmul.f32 %v176_v45, %v176_v45  ;;  %v333_v1 = vsel %vm275_vm1, %v240_v52, 0.0  ;;  %v124_v45 = vld [vmem:[%s945_s1 + $0x150] sm:$0xff] }
  0x29   :  { %v310_v2 = vadd.f32 %v309_v57, %v308_v60  ;;  %v178_v57 = vsub.f32 %v50_v48, %v114_v49  ;;  %v52_v60 = vld [vmem:[%s944_s0 + $0x110] sm:$0xff]  ;;  %v242_v0 = vmul.f32 %v177_v51, %v177_v51  ;;  %v335_v7 = vsel %vm275_vm1, %v241_v58, 0.0  ;;  %v125_v51 = vld [vmem:[%s945_s1 + $0x158] sm:$0xff] }
  0x2b   :  { %v312_v8 = vadd.f32 %v311_v63, %v310_v2  ;;  %v179_v63 = vsub.f32 %v51_v54, %v115_v55  ;;  %v53_v2 = vld [vmem:[%s944_s0 + $0x118] sm:$0xff]  ;;  %v243_v6 = vmul.f32 %v178_v57, %v178_v57  ;;  %v337_v13 = vsel %vm275_vm1, %v242_v0, 0.0  ;;  %v126_v57 = vld [vmem:[%s945_s1 + $0x160] sm:$0xff] }
  0x2d   :  { %v314_v14 = vadd.f32 %v313_v5, %v312_v8  ;;  %v180_v5 = vsub.f32 %v52_v60, %v116_v61  ;;  %v54_v8 = vld [vmem:[%s944_s0 + $0x120] sm:$0xff]  ;;  %v244_v12 = vmul.f32 %v179_v63, %v179_v63  ;;  %v339_v19 = vsel %vm275_vm1, %v243_v6, 0.0  ;;  %v127_v63 = vld [vmem:[%s945_s1 + $0x168] sm:$0xff] }
  0x2f   :  { %v316_v20 = vadd.f32 %v315_v11, %v314_v14  ;;  %v181_v11 = vsub.f32 %v53_v2, %v117_v3  ;;  %v55_v14 = vld [vmem:[%s944_s0 + $0x128] sm:$0xff]  ;;  %v245_v18 = vmul.f32 %v180_v5, %v180_v5  ;;  %v341_v25 = vsel %vm275_vm1, %v244_v12, 0.0  ;;  %v128_v5 = vld [vmem:[%s945_s1 + $0x170] sm:$0xff] }
  0x31   :  { %v318_v26 = vadd.f32 %v317_v17, %v316_v20  ;;  %v182_v17 = vsub.f32 %v54_v8, %v118_v9  ;;  %v56_v20 = vld [vmem:[%s944_s0 + $0x130] sm:$0xff]  ;;  %v246_v24 = vmul.f32 %v181_v11, %v181_v11  ;;  %v343_v31 = vsel %vm275_vm1, %v245_v18, 0.0  ;;  %v129_v11 = vld [vmem:[%s945_s1 + $0x178] sm:$0xff] }
  0x33   :  { %v320_v32 = vadd.f32 %v319_v23, %v318_v26  ;;  %v183_v23 = vsub.f32 %v55_v14, %v119_v15  ;;  %v57_v26 = vld [vmem:[%s944_s0 + $0x138] sm:$0xff]  ;;  %v247_v30 = vmul.f32 %v182_v17, %v182_v17  ;;  %v345_v37 = vsel %vm275_vm1, %v246_v24, 0.0  ;;  %v130_v17 = vld [vmem:[%s945_s1 + $0x180] sm:$0xff] }
  0x35   :  { %v322_v38 = vadd.f32 %v321_v29, %v320_v32  ;;  %v184_v29 = vsub.f32 %v56_v20, %v120_v21  ;;  %v58_v32 = vld [vmem:[%s944_s0 + $0x140] sm:$0xff]  ;;  %v248_v36 = vmul.f32 %v183_v23, %v183_v23  ;;  %v347_v43 = vsel %vm275_vm1, %v247_v30, 0.0  ;;  %v131_v23 = vld [vmem:[%s945_s1 + $0x188] sm:$0xff] }
  0x37   :  { %v324_v44 = vadd.f32 %v323_v35, %v322_v38  ;;  %v185_v35 = vsub.f32 %v57_v26, %v121_v27  ;;  %v59_v38 = vld [vmem:[%s944_s0 + $0x148] sm:$0xff]  ;;  %v249_v42 = vmul.f32 %v184_v29, %v184_v29  ;;  %v349_v49 = vsel %vm275_vm1, %v248_v36, 0.0  ;;  %v132_v29 = vld [vmem:[%s945_s1 + $0x190] sm:$0xff] }
  0x39   :  { %v326_v50 = vadd.f32 %v325_v41, %v324_v44  ;;  %v186_v41 = vsub.f32 %v58_v32, %v122_v33  ;;  %v60_v44 = vld [vmem:[%s944_s0 + $0x150] sm:$0xff]  ;;  %v250_v48 = vmul.f32 %v185_v35, %v185_v35  ;;  %v351_v55 = vsel %vm275_vm1, %v249_v42, 0.0  ;;  %v133_v35 = vld [vmem:[%s945_s1 + $0x198] sm:$0xff] }
  0x3b   :  { %v328_v56 = vadd.f32 %v327_v47, %v326_v50  ;;  %v187_v47 = vsub.f32 %v59_v38, %v123_v39  ;;  %v61_v50 = vld [vmem:[%s944_s0 + $0x158] sm:$0xff]  ;;  %v251_v54 = vmul.f32 %v186_v41, %v186_v41  ;;  %v353_v61 = vsel %vm275_vm1, %v250_v48, 0.0  ;;  %v134_v41 = vld [vmem:[%s945_s1 + $0x1a0] sm:$0xff] }
  0x3d   :  { %v330_v62 = vadd.f32 %v329_v53, %v328_v56  ;;  %v188_v53 = vsub.f32 %v60_v44, %v124_v45  ;;  %v62_v56 = vld [vmem:[%s944_s0 + $0x160] sm:$0xff]  ;;  %v252_v60 = vmul.f32 %v187_v47, %v187_v47  ;;  %v355_v3 = vsel %vm275_vm1, %v251_v54, 0.0  ;;  %v135_v47 = vld [vmem:[%s945_s1 + $0x1a8] sm:$0xff] }
  0x3f   :  { %v332_v4 = vadd.f32 %v331_v59, %v330_v62  ;;  %v189_v59 = vsub.f32 %v61_v50, %v125_v51  ;;  %v63_v62 = vld [vmem:[%s944_s0 + $0x168] sm:$0xff]  ;;  %v253_v2 = vmul.f32 %v188_v53, %v188_v53  ;;  %v357_v9 = vsel %vm275_vm1, %v252_v60, 0.0  ;;  %v136_v53 = vld [vmem:[%s945_s1 + $0x1b0] sm:$0xff] }
  0x41   :  { %v334_v10 = vadd.f32 %v333_v1, %v332_v4  ;;  %v190_v1 = vsub.f32 %v62_v56, %v126_v57  ;;  %v64_v4 = vld [vmem:[%s944_s0 + $0x170] sm:$0xff]  ;;  %v254_v8 = vmul.f32 %v189_v59, %v189_v59  ;;  %v359_v15 = vsel %vm275_vm1, %v253_v2, 0.0  ;;  %v137_v59 = vld [vmem:[%s945_s1 + $0x1b8] sm:$0xff] }
  0x43   :  { %v336_v16 = vadd.f32 %v335_v7, %v334_v10  ;;  %v191_v7 = vsub.f32 %v63_v62, %v127_v63  ;;  %v65_v10 = vld [vmem:[%s944_s0 + $0x178] sm:$0xff]  ;;  %v255_v14 = vmul.f32 %v190_v1, %v190_v1  ;;  %v361_v21 = vsel %vm275_vm1, %v254_v8, 0.0  ;;  %v138_v1 = vld [vmem:[%s945_s1 + $0x1c0] sm:$0xff] }
  0x45   :  { %v338_v22 = vadd.f32 %v337_v13, %v336_v16  ;;  %v192_v13 = vsub.f32 %v64_v4, %v128_v5  ;;  %v66_v16 = vld [vmem:[%s944_s0 + $0x180] sm:$0xff]  ;;  %v256_v20 = vmul.f32 %v191_v7, %v191_v7  ;;  %v363_v27 = vsel %vm275_vm1, %v255_v14, 0.0  ;;  %v139_v7 = vld [vmem:[%s945_s1 + $0x1c8] sm:$0xff] }
  0x47   :  { %v340_v28 = vadd.f32 %v339_v19, %v338_v22  ;;  %v193_v19 = vsub.f32 %v65_v10, %v129_v11  ;;  %v67_v22 = vld [vmem:[%s944_s0 + $0x188] sm:$0xff]  ;;  %v257_v26 = vmul.f32 %v192_v13, %v192_v13  ;;  %v365_v33 = vsel %vm275_vm1, %v256_v20, 0.0  ;;  %v140_v13 = vld [vmem:[%s945_s1 + $0x1d0] sm:$0xff] }
  0x49   :  { %v342_v34 = vadd.f32 %v341_v25, %v340_v28  ;;  %v194_v25 = vsub.f32 %v66_v16, %v130_v17  ;;  %v68_v28 = vld [vmem:[%s944_s0 + $0x190] sm:$0xff]  ;;  %v258_v32 = vmul.f32 %v193_v19, %v193_v19  ;;  %v367_v39 = vsel %vm275_vm1, %v257_v26, 0.0  ;;  %v141_v19 = vld [vmem:[%s945_s1 + $0x1d8] sm:$0xff] }
  0x4b   :  { %v344_v40 = vadd.f32 %v343_v31, %v342_v34  ;;  %v195_v31 = vsub.f32 %v67_v22, %v131_v23  ;;  %v69_v34 = vld [vmem:[%s944_s0 + $0x198] sm:$0xff]  ;;  %v259_v38 = vmul.f32 %v194_v25, %v194_v25  ;;  %v369_v45 = vsel %vm275_vm1, %v258_v32, 0.0  ;;  %v142_v25 = vld [vmem:[%s945_s1 + $0x1e0] sm:$0xff] }
  0x4d   :  { %v346_v46 = vadd.f32 %v345_v37, %v344_v40  ;;  %v196_v37 = vsub.f32 %v68_v28, %v132_v29  ;;  %v70_v40 = vld [vmem:[%s944_s0 + $0x1a0] sm:$0xff]  ;;  %v260_v44 = vmul.f32 %v195_v31, %v195_v31  ;;  %v371_v51 = vsel %vm275_vm1, %v259_v38, 0.0  ;;  %v143_v31 = vld [vmem:[%s945_s1 + $0x1e8] sm:$0xff] }
  0x4f   :  { %v348_v52 = vadd.f32 %v347_v43, %v346_v46  ;;  %v197_v43 = vsub.f32 %v69_v34, %v133_v35  ;;  %v71_v46 = vld [vmem:[%s944_s0 + $0x1a8] sm:$0xff]  ;;  %v261_v50 = vmul.f32 %v196_v37, %v196_v37  ;;  %v373_v57 = vsel %vm275_vm1, %v260_v44, 0.0  ;;  %v144_v37 = vld [vmem:[%s945_s1 + $0x1f0] sm:$0xff] }
  0x51   :  { %v350_v58 = vadd.f32 %v349_v49, %v348_v52  ;;  %v198_v49 = vsub.f32 %v70_v40, %v134_v41  ;;  %v72_v52 = vld [vmem:[%s944_s0 + $0x1b0] sm:$0xff]  ;;  %v262_v56 = vmul.f32 %v197_v43, %v197_v43  ;;  %v375_v63 = vsel %vm275_vm1, %v261_v50, 0.0  ;;  %v145_v43 = vld [vmem:[%s945_s1 + $0x1f8] sm:$0xff]  ;;  %s465_s1 = smov [#allocation3]  }
  0x52   :  { %s428_s13 = sshll.u32 %s465_s1, 4  ;;  %s429_s13 = int_to_ptr.vmem [resolvable:$true] %s428_s13 }
  0x53   :  { %v352_v0 = vadd.f32 %v351_v55, %v350_v58  ;;  %v199_v55 = vsub.f32 %v71_v46, %v135_v47  ;;  %v73_v58 = vld [vmem:[%s944_s0 + $0x1b8] sm:$0xff]  ;;  %v263_v62 = vmul.f32 %v198_v49, %v198_v49  ;;  %v377_v5 = vsel %vm275_vm1, %v262_v56, 0.0  ;;  %s440_s14 = scalar_lea.vmem %s429_s13, 16  ;;  %s444_s15 = scalar_lea.vmem %s429_s13, 32 }
  0x54   :  { %p441_p0 = scmp.ne.s32.totalorder %s429_s13, %s440_s14  ;;  %p445_p1 = scmp.lt.s32.totalorder %s429_s13, %s429_s13 }
  0x55   :  { %v354_v6 = vadd.f32 %v353_v61, %v352_v0  ;;  %v200_v61 = vsub.f32 %v72_v52, %v136_v53  ;;  %v74_v0 = vld [vmem:[%s944_s0 + $0x1c0] sm:$0xff]  ;;  %v264_v4 = vmul.f32 %v199_v55, %v199_v55  ;;  %v379_v11 = vsel %vm275_vm1, %v263_v62, 0.0  ;;  %p446_p2 = scmp.lt.s32.totalorder %s444_s15, %s440_s14 }
  0x57   :  { %v356_v12 = vadd.f32 %v355_v3, %v354_v6  ;;  %v201_v3 = vsub.f32 %v73_v58, %v137_v59  ;;  %v75_v6 = vld [vmem:[%s944_s0 + $0x1c8] sm:$0xff]  ;;  %v265_v10 = vmul.f32 %v200_v61, %v200_v61  ;;  %v381_v17 = vsel %vm275_vm1, %v264_v4, 0.0  ;;  %p447_p3 = por %p446_p2, %p445_p1 }
  0x59   :  { %v358_v18 = vadd.f32 %v357_v9, %v356_v12  ;;  %v202_v9 = vsub.f32 %v74_v0, %v138_v1  ;;  %v76_v12 = vld [vmem:[%s944_s0 + $0x1d0] sm:$0xff]  ;;  %v266_v16 = vmul.f32 %v201_v3, %v201_v3  ;;  %v383_v23 = vsel %vm275_vm1, %v265_v10, 0.0  ;;  %p448_p4 = pnand %p447_p3, %p441_p0 }
  0x5b   :  { %v360_v24 = vadd.f32 %v359_v15, %v358_v18  ;;  %v203_v15 = vsub.f32 %v75_v6, %v139_v7  ;;  %v77_v18 = vld [vmem:[%s944_s0 + $0x1d8] sm:$0xff]  ;;  %v267_v22 = vmul.f32 %v202_v9, %v202_v9  ;;  %v385_v29 = vsel %vm275_vm1, %v266_v16, 0.0  ;;  %v210_v7 = vld [vmem:[#allocation2] sm:$0x1] }
  0x5d   :  { %v362_v30 = vadd.f32 %v361_v21, %v360_v24  ;;  %v204_v21 = vsub.f32 %v76_v12, %v140_v13  ;;  %v78_v24 = vld [vmem:[%s944_s0 + $0x1e0] sm:$0xff]  ;;  %v268_v28 = vmul.f32 %v203_v15, %v203_v15  ;;  %v387_v35 = vsel %vm275_vm1, %v267_v22, 0.0 }
  0x5f   :  { %v364_v36 = vadd.f32 %v363_v27, %v362_v30  ;;  %v205_v27 = vsub.f32 %v77_v18, %v141_v19  ;;  %v79_v30 = vld [vmem:[%s944_s0 + $0x1e8] sm:$0xff]  ;;  %v269_v34 = vmul.f32 %v204_v21, %v204_v21  ;;  %v389_v41 = vsel %vm275_vm1, %v268_v28, 0.0 }
  0x61   :  { %v366_v42 = vadd.f32 %v365_v33, %v364_v36  ;;  %v206_v33 = vsub.f32 %v78_v24, %v142_v25  ;;  %v80_v36 = vld [vmem:[%s944_s0 + $0x1f0] sm:$0xff]  ;;  %v270_v40 = vmul.f32 %v205_v27, %v205_v27  ;;  %v391_v47 = vsel %vm275_vm1, %v269_v34, 0.0 }
  0x63   :  { %v368_v48 = vadd.f32 %v367_v39, %v366_v42  ;;  %v207_v39 = vsub.f32 %v79_v30, %v143_v31  ;;  %v81_v42 = vld [vmem:[%s944_s0 + $0x1f8] sm:$0xff]  ;;  %v271_v46 = vmul.f32 %v206_v33, %v206_v33 }
  0x64   :  { %v209_v49 = vsub.f32 %v81_v42, %v145_v43 }
  0x65   :  { %v370_v54 = vadd.f32 %v369_v45, %v368_v48  ;;  %v208_v45 = vsub.f32 %v80_v36, %v144_v37  ;;  %v272_v50 = vmul.f32 %v207_v39, %v207_v39 }
  0x66   :  { %v274_v56 = vmul.f32 %v209_v49, %v209_v49 }
  0x67   :  { %v372_v60 = vadd.f32 %v371_v51, %v370_v54  ;;  %v393_v51 = vsel %vm275_vm1, %v270_v40, 0.0  ;;  %v273_v53 = vmul.f32 %v208_v45, %v208_v45  ;;  %v395_v54 = vsel %vm275_vm1, %v271_v46, 0.0 }
  0x68   :  { %v401_v61 = vsel %vm275_vm1, %v274_v56, 0.0 }
  0x69   :  { %v374_v2 = vadd.f32 %v373_v57, %v372_v60  ;;  %v397_v57 = vsel %vm275_vm1, %v272_v50, 0.0  ;;  %v399_v59 = vsel %vm275_vm1, %v273_v53, 0.0 }
  0x6b   :  { %v376_v8 = vadd.f32 %v375_v63, %v374_v2 }
  0x6d   :  { %v378_v14 = vadd.f32 %v377_v5, %v376_v8 }
  0x6f   :  { %v380_v20 = vadd.f32 %v379_v11, %v378_v14 }
  0x71   :  { %v382_v26 = vadd.f32 %v381_v17, %v380_v20 }
  0x73   :  { %v384_v32 = vadd.f32 %v383_v23, %v382_v26 }
  0x75   :  { %v386_v38 = vadd.f32 %v385_v29, %v384_v32 }
  0x77   :  { %v388_v44 = vadd.f32 %v387_v35, %v386_v38 }
  0x79   :  { %v390_v48 = vadd.f32 %v389_v41, %v388_v44 }
  0x7b   :  { %v392_v52 = vadd.f32 %v391_v47, %v390_v48 }
  0x7d   :  { %v394_v55 = vadd.f32 %v393_v51, %v392_v52 }
  0x7f   :  { %v396_v58 = vadd.f32 %v395_v54, %v394_v55 }
  0x81   :  { %v398_v60 = vadd.f32 %v397_v57, %v396_v58 }
  0x83   :  { %v400_v62 = vadd.f32 %v399_v59, %v398_v60 }
  0x85   :  { %v402_v63 = vadd.f32 %v401_v61, %v400_v62 }
  0x87   :  { %403 = vadd.xlane.f32.xlu0 %v402_v63 }
 0x114   :  { %v404_v0 = vpop.xlane.xlu0 %403 }
 0x115   :  { %v405_v1 = vrot.slane %v404_v0, 4 }
 0x117   :  { %v406_v2 = vadd.f32 %v405_v1, %v404_v0 }
 0x119   :  { %v407_v3 = vrot.slane %v406_v2, 2 }
 0x11b   :  { %v408_v4 = vadd.f32 %v407_v3, %v406_v2 }
 0x11d   :  { %v409_v5 = vrot.slane %v408_v4, 1 }
 0x11f   :  { %v410_v6 = vadd.f32 %v409_v5, %v408_v4 }
 0x121   :  { %436 = vpush %v410_v6 }
 0x152   :  { %s437_s0 = spop %436 }
 0x153   :  { %v412_v8 = vstv %s437_s0 }
 0x154   :  { %v413_v9 = vadd.f32 %v412_v8, %v210_v7 }
 0x156   :  { %415 = vst.msk [vmem:[#allocation2] sm:$0x1] %vm16_vm0, %v413_v9 }
 0x15d   :  { %v419_v10 = vld [vmem:[#allocation2] sm:$0x1] }
 0x15e   :  { %v420_v11 = vmul.f32 3.0517578e-05, %v419_v10 }
 0x160   :  { %421 = vst.msk [vmem:[#allocation3] sm:$0x1] %vm16_vm0, %v420_v11 }
 0x161   :  { %451 = shalt.err (!%p448_p4)
}
 0x162   :  { %s452_s18 = scalar_lea.hbm %s946_s2, 16 }
 0x163   :  { %p453_p5 = scmp.ne.s32.totalorder %s946_s2, %s452_s18  ;;  %p456_p6 = scmp.lt.u32.totalorder %s452_s18, %s946_s2 }
 0x165   :  { %p458_p7 = pnand %p456_p6, %p453_p5 }
 0x167   :  { %461 = shalt.err (!%p458_p7)
}
 0x168   :  { %431 = dma.vmem_to_hbm [thread:$0]  %s429_s13, 16, %s946_s2, [#allocation4]  }
 0x169   :  { %462 = dma.done.wait [#allocation4], 16  }
 0x16a   :  { %463 = vsyncadd [#allocation4], 4294967280 }
 0x16b   :  { %435 = vsyncpa [#allocation4], 1 }

</bundles_post_ra>
